<compile_context>
chip_gen: v7x
topology: tpu7x:2x2x1
jax: 0.10.0
libtpu: 0.0.40
codegen_flags: <defaults>
</compile_context>

<pallas_src>
import functools

import jax
import jax.numpy as jnp
import numpy as np
from jax.experimental import pallas as pl
from jax.experimental.pallas import tpu as pltpu


def _round_up(x, m):
    return (x + m - 1) // m * m


# -----------------------------------------------------------------------------
# Pallas kernel
# -----------------------------------------------------------------------------
def make_encoder_kernel(num_layers, Tc, Hp, carry_in_regs):
    """LSTM-encoder kernel for static (num_layers, time-chunk Tc, padded hidden Hp)."""

    def _sigmoid(x):
        # sigmoid(x) == 0.5 * (tanh(0.5 x) + 1): a single EUP push per gate.
        return 0.5 * jnp.tanh(0.5 * x) + 0.5

    def kernel(x_ref, last_ref, *rest):
        # rest = [w_ih_0, w_hh_0, b_0, ..., w_ih_{L-1}, w_hh_{L-1}, b_{L-1},
        #         out_ref, h_ref, c_ref, z_ref]
        w_refs = rest[: 3 * num_layers]
        out_ref = rest[3 * num_layers]
        h_ref, c_ref, z_ref = rest[3 * num_layers + 1:]

        t_pid = pl.program_id(1)
        nt = pl.num_programs(1)
        Bc = z_ref.shape[0]

        # Reset persistent state at the start of each batch chunk's time sweep.
        @pl.when(t_pid == 0)
        def _init():
            h_ref[...] = jnp.zeros_like(h_ref)
            c_ref[...] = jnp.zeros_like(c_ref)
            z_ref[...] = jnp.zeros_like(z_ref)

        # Hoist loop-invariant loads (last-step indices, weights, bias broadcast).
        last = last_ref[...]                                          # (Bc, 1) int32
        w_ih = [w_refs[3 * l][...] for l in range(num_layers)]        # (in_lp, 4Hp) bf16
        w_hh = [w_refs[3 * l + 1][...] for l in range(num_layers)]    # (Hp, 4Hp) bf16
        bias = [jnp.broadcast_to(w_refs[3 * l + 2][...], (Bc, 4 * Hp))
                for l in range(num_layers)]                           # (Bc, 4Hp) f32

        # z hoisted out of the time unroll: read once, update locally, store once.
        z = z_ref[...]                                                # (Bc, Hp) f32

        if carry_in_regs:
            hs = [h_ref[l] for l in range(num_layers)]                # bf16
            cs = [c_ref[l] for l in range(num_layers)]                # f32

        for j in range(Tc):                       # static unroll over the time chunk
            t_global = t_pid * Tc + j
            inp = x_ref[j]                        # (Bc, Fp) bf16
            h_top = None
            for l in range(num_layers):           # static unroll over layers
                h_l = hs[l] if carry_in_regs else h_ref[l]
                c_l = cs[l] if carry_in_regs else c_ref[l]
                # Two MXU pushes (K = Fp and K = Hp), both accumulated in f32;
                # avoids materializing a per-step concat copy in VMEM.
                gates = (jnp.dot(inp, w_ih[l], preferred_element_type=jnp.float32)
                         + jnp.dot(h_l, w_hh[l], preferred_element_type=jnp.float32)
                         + bias[l])
                # PyTorch gate order [i, f, g, o]; each gate padded to 128 lanes.
                # (Padded gate columns have zero weights & bias -> i/f/o = 0.5,
                #  g = 0, so padded state columns stay exactly 0 given zero init.)
                i_g = _sigmoid(gates[:, 0 * Hp:1 * Hp])
                f_g = _sigmoid(gates[:, 1 * Hp:2 * Hp])
                g_g = jnp.tanh(gates[:, 2 * Hp:3 * Hp])
                o_g = _sigmoid(gates[:, 3 * Hp:4 * Hp])
                c_new = f_g * c_l + i_g * g_g
                h_new_f32 = o_g * jnp.tanh(c_new)
                h_new = h_new_f32.astype(jnp.bfloat16)    # bf16: MXU operand / state
                if carry_in_regs:
                    hs[l], cs[l] = h_new, c_new
                else:
                    h_ref[l] = h_new
                    c_ref[l] = c_new
                inp = h_new
                h_top = h_new_f32                          # top layer kept f32 for z
            # Select top-layer hidden state at timestep (L - 1) per batch row.
            z = jnp.where(last == t_global, h_top, z)

        if carry_in_regs:
            for l in range(num_layers):
                h_ref[l] = hs[l]
                c_ref[l] = cs[l]
        z_ref[...] = z

        @pl.when(t_pid == nt - 1)
        def _finalize():
            # F.normalize(z, p=2, dim=1): z / max(||z||_2, 1e-12), via EUP rsqrt.
            ssq = jnp.sum(z * z, axis=1, keepdims=True)
            inv = jax.lax.rsqrt(jnp.maximum(ssq, 1e-24))
            out_ref[...] = (z * inv).astype(out_ref.dtype)

    return kernel


# -----------------------------------------------------------------------------
# Wrapper
# -----------------------------------------------------------------------------
def encoder_forward(X, L, params, *, seq_len, fea_num, hidden_dim, num_layers,
                    time_chunk=16, batch_chunks=None):
    """X: (B, T) int32 indices in [0, fea_num); L: (B,) int32 lengths in [1, T]."""
    B, T = X.shape
    assert T == seq_len
    H = hidden_dim
    Hp = _round_up(H, 128)          # pad hidden dim (and each gate block) to 128 lanes
    Fp = _round_up(fea_num, 128)    # pad feature dim to 128 lanes

    # Batch tiling: default nb = 1 — the serial recurrence wants the biggest
    # possible MXU M = Bc.  On v7x pass batch_chunks=2 (megacore) only when each
    # half still has an MXU-filling number of rows (~>=256).
    nb = 1 if batch_chunks is None else max(1, int(batch_chunks))
    Bc = _round_up(pl.cdiv(B, nb), 8)
    Bp = Bc * nb

    Tc = min(time_chunk, T)
    nt = pl.cdiv(T, Tc)
    Tp = nt * Tc

    # ---- glue: embedding gather directly in time-major bf16 layout ----
    emb = jnp.pad(params["embedding"], ((0, 0), (0, Fp - fea_num))).astype(jnp.bfloat16)
    x_tm = jnp.take(emb, jnp.transpose(X), axis=0)                  # (T, B, Fp) bf16
    x_tm = jnp.pad(x_tm, ((0, Tp - T), (0, Bp - B), (0, 0)))        # (Tp, Bp, Fp)

    last_idx = (L - 1).astype(jnp.int32).reshape(B, 1)
    # Padded rows get -1 (never selected; sliced off at the end).
    last_idx = jnp.pad(last_idx, ((0, Bp - B), (0, 0)), constant_values=-1)

    # ---- glue: transpose + pad weights; each gate's columns padded to 128 lanes ----
    def gate_pad_cols(m):
        # m: (rows, 4H) -> (rows, 4Hp); gate g occupies columns [g*Hp, g*Hp + H)
        out = jnp.zeros((m.shape[0], 4 * Hp), m.dtype)
        for g in range(4):
            out = out.at[:, g * Hp:g * Hp + H].set(m[:, g * H:(g + 1) * H])
        return out

    weight_args = []
    w_bytes = 0
    for l in range(num_layers):
        in_l = fea_num if l == 0 else H
        in_lp = Fp if l == 0 else Hp
        w_ih = jnp.transpose(params[f"w_ih_{l}"]).astype(jnp.float32)   # (in_l, 4H)
        w_hh = jnp.transpose(params[f"w_hh_{l}"]).astype(jnp.float32)   # (H, 4H)
        w_ih = jnp.pad(gate_pad_cols(w_ih), ((0, in_lp - in_l), (0, 0))).astype(jnp.bfloat16)
        w_hh = jnp.pad(gate_pad_cols(w_hh), ((0, Hp - H), (0, 0))).astype(jnp.bfloat16)
        b = (params[f"b_ih_{l}"] + params[f"b_hh_{l}"]).astype(jnp.float32).reshape(1, 4 * H)
        b = gate_pad_cols(b)                                            # (1, 4Hp) f32
        weight_args += [w_ih, w_hh, b]
        w_bytes += in_lp * 4 * Hp * 2 + Hp * 4 * Hp * 2 + 4 * Hp * 4

    # Carry h/c in registers across the time-chunk unroll only when they fit in a
    # small number of vregs (otherwise let them live in VMEM scratch).
    state_bytes = num_layers * Bc * Hp * (2 + 4)          # bf16 h + f32 c
    carry_in_regs = state_bytes <= 96 * 1024

    kernel = make_encoder_kernel(num_layers, Tc, Hp, carry_in_regs)

    def resident_spec(a):
        nd = a.ndim
        return pl.BlockSpec(a.shape, lambda b, t, _nd=nd: (0,) * _nd)

    in_specs = (
        [pl.BlockSpec((Tc, Bc, Fp), lambda b, t: (t, b, 0)),   # streamed timesteps
         pl.BlockSpec((Bc, 1), lambda b, t: (b, 0))]           # last-step indices
        + [resident_spec(a) for a in weight_args]              # weights: DMA'd once
    )
    out_spec = pl.BlockSpec((Bc, Hp), lambda b, t: (b, 0))     # lane-dense output

    # VMEM budget: double-buffered streamed/IO blocks + resident weights + scratch.
    x_blk = Tc * Bc * Fp * 2
    io_blk = Bc * 4 + Bc * Hp * 4
    scratch_bytes = state_bytes + Bc * Hp * 4
    footprint = 2 * (w_bytes + x_blk + io_blk) + scratch_bytes
    vmem_limit = int(min(96 << 20, max(32 << 20, int(footprint * 1.5) + (4 << 20))))

    flops = sum(2 * Bp * Tp * ((Fp if l == 0 else Hp) + Hp) * 4 * Hp
                for l in range(num_layers))
    cost = pl.CostEstimate(
        flops=flops,
        transcendentals=Bp * Tp * num_layers * 5 * Hp,
        bytes_accessed=Tp * Bp * Fp * 2 + w_bytes + Bp * Hp * 4 + Bp * 4,
    )

    z_pad = pl.pallas_call(
        kernel,
        grid=(nb, nt),
        in_specs=in_specs,
        out_specs=out_spec,
        out_shape=jax.ShapeDtypeStruct((Bp, Hp), jnp.float32),
        scratch_shapes=[
            pltpu.VMEM((num_layers, Bc, Hp), jnp.bfloat16),  # h per layer (bf16, persistent)
            pltpu.VMEM((num_layers, Bc, Hp), jnp.float32),   # c per layer (persistent)
            pltpu.VMEM((Bc, Hp), jnp.float32),               # selected last-step z
        ],
        compiler_params=pltpu.CompilerParams(
            dimension_semantics=("parallel", "arbitrary"),
            vmem_limit_bytes=vmem_limit,
        ),
        cost_estimate=cost,
    )(x_tm, last_idx, *weight_args)

    return z_pad[:B, :H]


# -----------------------------------------------------------------------------
# Pure-JAX reference (f32, PyTorch semantics) for a sanity check
# -----------------------------------------------------------------------------
def encoder_reference(X, L, params, *, seq_len, fea_num, hidden_dim, num_layers):
    B, T = X.shape
    H = hidden_dim
    x_emb = jnp.take(params["embedding"], X, axis=0).astype(jnp.float32)  # (B, T, F)
    hs = [jnp.zeros((B, H), jnp.float32) for _ in range(num_layers)]
    cs = [jnp.zeros((B, H), jnp.float32) for _ in range(num_layers)]
    outs = []
    for t in range(T):
        inp = x_emb[:, t, :]
        for l in range(num_layers):
            w_ih = params[f"w_ih_{l}"].astype(jnp.float32)
            w_hh = params[f"w_hh_{l}"].astype(jnp.float32)
            b = (params[f"b_ih_{l}"] + params[f"b_hh_{l}"]).astype(jnp.float32)
            gates = inp @ w_ih.T + hs[l] @ w_hh.T + b
            i_g = jax.nn.sigmoid(gates[:, 0:H])
            f_g = jax.nn.sigmoid(gates[:, H:2 * H])
            g_g = jnp.tanh(gates[:, 2 * H:3 * H])
            o_g = jax.nn.sigmoid(gates[:, 3 * H:4 * H])
            cs[l] = f_g * cs[l] + i_g * g_g
            hs[l] = o_g * jnp.tanh(cs[l])
            inp = hs[l]
        outs.append(inp)
    out = jnp.stack(outs, axis=1)  # (B, T, H)
    z = out[jnp.arange(B), L - 1, :]
    norm = jnp.sqrt(jnp.sum(z * z, axis=1, keepdims=True))
    return z / jnp.maximum(norm, 1e-12)


# -----------------------------------------------------------------------------
# Deterministic parameter init (shapes match nn.Embedding + nn.LSTM)
# -----------------------------------------------------------------------------
def init_params(key, *, fea_num, hidden_dim, num_layers):
    params = {}
    key, k_emb = jax.random.split(key)
    params["embedding"] = jax.random.normal(k_emb, (fea_num, fea_num), jnp.float32)
    for l in range(num_layers):
        in_l = fea_num if l == 0 else hidden_dim
        key, k1, k2, k3, k4 = jax.random.split(key, 5)
        # TODO(synk): orthogonal init of the original module replaced by scaled
        # normals (init-only; forward-pass semantics are unaffected).
        params[f"w_ih_{l}"] = 0.3 * jax.random.normal(k1, (4 * hidden_dim, in_l), jnp.float32)
        params[f"w_hh_{l}"] = 0.3 * jax.random.normal(k2, (4 * hidden_dim, hidden_dim), jnp.float32)
        params[f"b_ih_{l}"] = 0.1 * jax.random.normal(k3, (4 * hidden_dim,), jnp.float32)
        params[f"b_hh_{l}"] = 0.1 * jax.random.normal(k4, (4 * hidden_dim,), jnp.float32)
    return params


if __name__ == "__main__":
    seq_len, fea_num, hidden_dim, layers = 8, 4, 32, 2
    batch = 2

    key = jax.random.PRNGKey(0)
    key, k_x, k_l = jax.random.split(key, 3)
    X = jax.random.randint(k_x, (batch, seq_len), 0, fea_num, dtype=jnp.int32)
    L = jnp.array([seq_len, 5], dtype=jnp.int32)  # valid lengths per batch row
    assert int(jnp.min(L)) >= 1  # contract: L in [1, T]

    params = init_params(key, fea_num=fea_num, hidden_dim=hidden_dim, num_layers=layers)

    fwd = jax.jit(functools.partial(
        encoder_forward,
        seq_len=seq_len, fea_num=fea_num, hidden_dim=hidden_dim, num_layers=layers,
        time_chunk=16,
    ))
    z = jax.block_until_ready(fwd(X, L, params))

    z_ref = encoder_reference(
        X, L, params,
        seq_len=seq_len, fea_num=fea_num, hidden_dim=hidden_dim, num_layers=layers,
    )
    # bf16 MXU operands / bf16 inter-layer h (f32 accumulation & gate math)
    # => looser tolerance than the pure-f32 reference.
    np.testing.assert_allclose(np.asarray(z), np.asarray(z_ref), rtol=5e-2, atol=5e-2)

    print("KERNEL_OK")
</pallas_src>

<mosaic_0001>
module attributes {stable_mosaic.version = 11 : i64} {
  func.func @kernel(%arg0: i32, %arg1: i32, %arg2: memref<8x8x128xbf16, #tpu.memory_space<vmem>>, %arg3: memref<8x1xi32, #tpu.memory_space<vmem>>, %arg4: memref<128x512xbf16, #tpu.memory_space<vmem>>, %arg5: memref<128x512xbf16, #tpu.memory_space<vmem>>, %arg6: memref<1x512xf32, #tpu.memory_space<vmem>>, %arg7: memref<128x512xbf16, #tpu.memory_space<vmem>>, %arg8: memref<128x512xbf16, #tpu.memory_space<vmem>>, %arg9: memref<1x512xf32, #tpu.memory_space<vmem>>, %arg10: memref<8x128xf32, #tpu.memory_space<vmem>>, %arg11: memref<2x8x128xbf16, #tpu.memory_space<vmem>>, %arg12: memref<2x8x128xf32, #tpu.memory_space<vmem>>, %arg13: memref<8x128xf32, #tpu.memory_space<vmem>>) attributes {dimension_semantics = [#tpu.dimension_semantics<parallel>, #tpu.dimension_semantics<arbitrary>], iteration_bounds = array<i64: 1, 1>, scalar_prefetch = 0 : i64, scratch_operands = 3 : i64, tpu.core_type = #tpu.core_type<tc>, window_params = [{transform_indices = @transform_0, window_bounds = array<i64: 8, 8, 128>}, {transform_indices = @transform_1, window_bounds = array<i64: 8, 1>}, {pipeline_mode = #tpu.pipeline_mode<synchronous>, transform_indices = @transform_2, window_bounds = array<i64: 128, 512>}, {pipeline_mode = #tpu.pipeline_mode<synchronous>, transform_indices = @transform_3, window_bounds = array<i64: 128, 512>}, {pipeline_mode = #tpu.pipeline_mode<synchronous>, transform_indices = @transform_4, window_bounds = array<i64: 1, 512>}, {pipeline_mode = #tpu.pipeline_mode<synchronous>, transform_indices = @transform_5, window_bounds = array<i64: 128, 512>}, {pipeline_mode = #tpu.pipeline_mode<synchronous>, transform_indices = @transform_6, window_bounds = array<i64: 128, 512>}, {pipeline_mode = #tpu.pipeline_mode<synchronous>, transform_indices = @transform_7, window_bounds = array<i64: 1, 512>}, {transform_indices = @transform_8, window_bounds = array<i64: 8, 128>}]} {
    %c0_i32 = arith.constant 0 : i32
    %0 = arith.cmpi eq, %arg1, %c0_i32 : i32
    %1 = arith.extui %0 : i1 to i32
    %c0_i32_0 = arith.constant 0 : i32
    %2 = arith.cmpi ne, %1, %c0_i32_0 : i32
    scf.if %2 {
      %cst_244 = arith.constant 0.000000e+00 : bf16
      %687 = vector.broadcast %cst_244 : bf16 to vector<2x8x128xbf16>
      %c0_245 = arith.constant 0 : index
      %c0_246 = arith.constant 0 : index
      %c0_247 = arith.constant 0 : index
      %688 = vector.load %arg11[%c0_245, %c0_246, %c0_247] : memref<2x8x128xbf16, #tpu.memory_space<vmem>>, vector<2x8x128xbf16>
      tpu.vector_store %arg11[%c0_245, %c0_246, %c0_247], %687 {strides = array<i32>} : memref<2x8x128xbf16, #tpu.memory_space<vmem>>, vector<2x8x128xbf16>,
      %cst_248 = arith.constant 0.000000e+00 : f32
      %689 = vector.broadcast %cst_248 : f32 to vector<2x8x128xf32>
      %c0_249 = arith.constant 0 : index
      %c0_250 = arith.constant 0 : index
      %c0_251 = arith.constant 0 : index
      %690 = vector.load %arg12[%c0_249, %c0_250, %c0_251] : memref<2x8x128xf32, #tpu.memory_space<vmem>>, vector<2x8x128xf32>
      tpu.vector_store %arg12[%c0_249, %c0_250, %c0_251], %689 {strides = array<i32>} : memref<2x8x128xf32, #tpu.memory_space<vmem>>, vector<2x8x128xf32>,
      %cst_252 = arith.constant 0.000000e+00 : f32
      %691 = vector.broadcast %cst_252 : f32 to vector<8x128xf32>
      %c0_253 = arith.constant 0 : index
      %c0_254 = arith.constant 0 : index
      %692 = vector.load %arg13[%c0_253, %c0_254] : memref<8x128xf32, #tpu.memory_space<vmem>>, vector<8x128xf32>
      tpu.vector_store %arg13[%c0_253, %c0_254], %691 {strides = array<i32>} : memref<8x128xf32, #tpu.memory_space<vmem>>, vector<8x128xf32>,
    } else {
    }
    %c0 = arith.constant 0 : index
    %c0_1 = arith.constant 0 : index
    %3 = vector.load %arg3[%c0, %c0_1] : memref<8x1xi32, #tpu.memory_space<vmem>>, vector<8x1xi32>
    %c0_2 = arith.constant 0 : index
    %c0_3 = arith.constant 0 : index
    %4 = vector.load %arg4[%c0_2, %c0_3] : memref<128x512xbf16, #tpu.memory_space<vmem>>, vector<128x512xbf16>
    %c0_4 = arith.constant 0 : index
    %c0_5 = arith.constant 0 : index
    %5 = vector.load %arg7[%c0_4, %c0_5] : memref<128x512xbf16, #tpu.memory_space<vmem>>, vector<128x512xbf16>
    %c0_6 = arith.constant 0 : index
    %c0_7 = arith.constant 0 : index
    %6 = vector.load %arg5[%c0_6, %c0_7] : memref<128x512xbf16, #tpu.memory_space<vmem>>, vector<128x512xbf16>
    %c0_8 = arith.constant 0 : index
    %c0_9 = arith.constant 0 : index
    %7 = vector.load %arg8[%c0_8, %c0_9] : memref<128x512xbf16, #tpu.memory_space<vmem>>, vector<128x512xbf16>
    %c0_10 = arith.constant 0 : index
    %c0_11 = arith.constant 0 : index
    %8 = vector.load %arg6[%c0_10, %c0_11] : memref<1x512xf32, #tpu.memory_space<vmem>>, vector<1x512xf32>
    %9 = vector.shape_cast %8 : vector<1x512xf32> to vector<1x512xf32>
    %10 = vector.broadcast %9 : vector<1x512xf32> to vector<8x512xf32>
    %c0_12 = arith.constant 0 : index
    %c0_13 = arith.constant 0 : index
    %11 = vector.load %arg9[%c0_12, %c0_13] : memref<1x512xf32, #tpu.memory_space<vmem>>, vector<1x512xf32>
    %12 = vector.shape_cast %11 : vector<1x512xf32> to vector<1x512xf32>
    %13 = vector.broadcast %12 : vector<1x512xf32> to vector<8x512xf32>
    %c0_14 = arith.constant 0 : index
    %c0_15 = arith.constant 0 : index
    %14 = vector.load %arg13[%c0_14, %c0_15] : memref<8x128xf32, #tpu.memory_space<vmem>>, vector<8x128xf32>
    %c0_16 = arith.constant 0 : index
    %c0_17 = arith.constant 0 : index
    %c0_18 = arith.constant 0 : index
    %15 = vector.load %arg11[%c0_16, %c0_17, %c0_18] : memref<2x8x128xbf16, #tpu.memory_space<vmem>>, vector<1x8x128xbf16>
    %16 = vector.shape_cast %15 : vector<1x8x128xbf16> to vector<8x128xbf16>
    %c1 = arith.constant 1 : index
    %c0_19 = arith.constant 0 : index
    %c0_20 = arith.constant 0 : index
    %17 = vector.load %arg11[%c1, %c0_19, %c0_20] : memref<2x8x128xbf16, #tpu.memory_space<vmem>>, vector<1x8x128xbf16>
    %18 = vector.shape_cast %17 : vector<1x8x128xbf16> to vector<8x128xbf16>
    %c0_21 = arith.constant 0 : index
    %c0_22 = arith.constant 0 : index
    %c0_23 = arith.constant 0 : index
    %19 = vector.load %arg12[%c0_21, %c0_22, %c0_23] : memref<2x8x128xf32, #tpu.memory_space<vmem>>, vector<1x8x128xf32>
    %20 = vector.shape_cast %19 : vector<1x8x128xf32> to vector<8x128xf32>
    %c1_24 = arith.constant 1 : index
    %c0_25 = arith.constant 0 : index
    %c0_26 = arith.constant 0 : index
    %21 = vector.load %arg12[%c1_24, %c0_25, %c0_26] : memref<2x8x128xf32, #tpu.memory_space<vmem>>, vector<1x8x128xf32>
    %22 = vector.shape_cast %21 : vector<1x8x128xf32> to vector<8x128xf32>
    %c8_i32 = arith.constant 8 : i32
    %23 = arith.muli %arg1, %c8_i32 : i32
    %c0_i32_27 = arith.constant 0 : i32
    %24 = arith.addi %23, %c0_i32_27 : i32
    %c0_28 = arith.constant 0 : index
    %c0_29 = arith.constant 0 : index
    %c0_30 = arith.constant 0 : index
    %25 = vector.load %arg2[%c0_28, %c0_29, %c0_30] : memref<8x8x128xbf16, #tpu.memory_space<vmem>>, vector<1x8x128xbf16>
    %26 = vector.shape_cast %25 : vector<1x8x128xbf16> to vector<8x128xbf16>
    %cst = arith.constant dense<0.000000e+00> : vector<8x512xf32>
    %27 = tpu.matmul %26, %4, %cst {dimension_numbers = #tpu.dot_dimension_numbers<[1], [0], [0], [1], [0, 0, 1, 1], [], []>} : vector<8x128xbf16>, vector<128x512xbf16>, vector<8x512xf32> -> vector<8x512xf32>
    %cst_31 = arith.constant dense<0.000000e+00> : vector<8x512xf32>
    %28 = tpu.matmul %16, %6, %cst_31 {dimension_numbers = #tpu.dot_dimension_numbers<[1], [0], [0], [1], [0, 0, 1, 1], [], []>} : vector<8x128xbf16>, vector<128x512xbf16>, vector<8x512xf32> -> vector<8x512xf32>
    %29 = arith.addf %27, %28 : vector<8x512xf32>
    %30 = arith.addf %29, %10 : vector<8x512xf32>
    %31 = vector.extract_strided_slice %30 {offsets = [0, 0], sizes = [8, 128], strides = [1, 1]} : vector<8x512xf32> to vector<8x128xf32>
    %cst_32 = arith.constant 5.000000e-01 : f32
    %32 = vector.broadcast %cst_32 : f32 to vector<8x128xf32>
    %33 = arith.mulf %32, %31 : vector<8x128xf32>
    %34 = math.tanh %33 : vector<8x128xf32>
    %cst_33 = arith.constant 5.000000e-01 : f32
    %35 = vector.broadcast %cst_33 : f32 to vector<8x128xf32>
    %36 = arith.mulf %35, %34 : vector<8x128xf32>
    %cst_34 = arith.constant 5.000000e-01 : f32
    %37 = vector.broadcast %cst_34 : f32 to vector<8x128xf32>
    %38 = arith.addf %36, %37 : vector<8x128xf32>
    %39 = vector.extract_strided_slice %30 {offsets = [0, 128], sizes = [8, 128], strides = [1, 1]} : vector<8x512xf32> to vector<8x128xf32>
    %cst_35 = arith.constant 5.000000e-01 : f32
    %40 = vector.broadcast %cst_35 : f32 to vector<8x128xf32>
    %41 = arith.mulf %40, %39 : vector<8x128xf32>
    %42 = math.tanh %41 : vector<8x128xf32>
    %cst_36 = arith.constant 5.000000e-01 : f32
    %43 = vector.broadcast %cst_36 : f32 to vector<8x128xf32>
    %44 = arith.mulf %43, %42 : vector<8x128xf32>
    %cst_37 = arith.constant 5.000000e-01 : f32
    %45 = vector.broadcast %cst_37 : f32 to vector<8x128xf32>
    %46 = arith.addf %44, %45 : vector<8x128xf32>
    %47 = vector.extract_strided_slice %30 {offsets = [0, 256], sizes = [8, 128], strides = [1, 1]} : vector<8x512xf32> to vector<8x128xf32>
    %48 = math.tanh %47 : vector<8x128xf32>
    %49 = vector.extract_strided_slice %30 {offsets = [0, 384], sizes = [8, 128], strides = [1, 1]} : vector<8x512xf32> to vector<8x128xf32>
    %cst_38 = arith.constant 5.000000e-01 : f32
    %50 = vector.broadcast %cst_38 : f32 to vector<8x128xf32>
    %51 = arith.mulf %50, %49 : vector<8x128xf32>
    %52 = math.tanh %51 : vector<8x128xf32>
    %cst_39 = arith.constant 5.000000e-01 : f32
    %53 = vector.broadcast %cst_39 : f32 to vector<8x128xf32>
    %54 = arith.mulf %53, %52 : vector<8x128xf32>
    %cst_40 = arith.constant 5.000000e-01 : f32
    %55 = vector.broadcast %cst_40 : f32 to vector<8x128xf32>
    %56 = arith.addf %54, %55 : vector<8x128xf32>
    %57 = arith.mulf %46, %20 : vector<8x128xf32>
    %58 = arith.mulf %38, %48 : vector<8x128xf32>
    %59 = arith.addf %57, %58 : vector<8x128xf32>
    %60 = math.tanh %59 : vector<8x128xf32>
    %61 = arith.mulf %56, %60 : vector<8x128xf32>
    %62 = arith.truncf %61 : vector<8x128xf32> to vector<8x128xbf16>
    %cst_41 = arith.constant dense<0.000000e+00> : vector<8x512xf32>
    %63 = tpu.matmul %62, %5, %cst_41 {dimension_numbers = #tpu.dot_dimension_numbers<[1], [0], [0], [1], [0, 0, 1, 1], [], []>} : vector<8x128xbf16>, vector<128x512xbf16>, vector<8x512xf32> -> vector<8x512xf32>
    %cst_42 = arith.constant dense<0.000000e+00> : vector<8x512xf32>
    %64 = tpu.matmul %18, %7, %cst_42 {dimension_numbers = #tpu.dot_dimension_numbers<[1], [0], [0], [1], [0, 0, 1, 1], [], []>} : vector<8x128xbf16>, vector<128x512xbf16>, vector<8x512xf32> -> vector<8x512xf32>
    %65 = arith.addf %63, %64 : vector<8x512xf32>
    %66 = arith.addf %65, %13 : vector<8x512xf32>
    %67 = vector.extract_strided_slice %66 {offsets = [0, 0], sizes = [8, 128], strides = [1, 1]} : vector<8x512xf32> to vector<8x128xf32>
    %cst_43 = arith.constant 5.000000e-01 : f32
    %68 = vector.broadcast %cst_43 : f32 to vector<8x128xf32>
    %69 = arith.mulf %68, %67 : vector<8x128xf32>
    %70 = math.tanh %69 : vector<8x128xf32>
    %cst_44 = arith.constant 5.000000e-01 : f32
    %71 = vector.broadcast %cst_44 : f32 to vector<8x128xf32>
    %72 = arith.mulf %71, %70 : vector<8x128xf32>
    %cst_45 = arith.constant 5.000000e-01 : f32
    %73 = vector.broadcast %cst_45 : f32 to vector<8x128xf32>
    %74 = arith.addf %72, %73 : vector<8x128xf32>
    %75 = vector.extract_strided_slice %66 {offsets = [0, 128], sizes = [8, 128], strides = [1, 1]} : vector<8x512xf32> to vector<8x128xf32>
    %cst_46 = arith.constant 5.000000e-01 : f32
    %76 = vector.broadcast %cst_46 : f32 to vector<8x128xf32>
    %77 = arith.mulf %76, %75 : vector<8x128xf32>
    %78 = math.tanh %77 : vector<8x128xf32>
    %cst_47 = arith.constant 5.000000e-01 : f32
    %79 = vector.broadcast %cst_47 : f32 to vector<8x128xf32>
    %80 = arith.mulf %79, %78 : vector<8x128xf32>
    %cst_48 = arith.constant 5.000000e-01 : f32
    %81 = vector.broadcast %cst_48 : f32 to vector<8x128xf32>
    %82 = arith.addf %80, %81 : vector<8x128xf32>
    %83 = vector.extract_strided_slice %66 {offsets = [0, 256], sizes = [8, 128], strides = [1, 1]} : vector<8x512xf32> to vector<8x128xf32>
    %84 = math.tanh %83 : vector<8x128xf32>
    %85 = vector.extract_strided_slice %66 {offsets = [0, 384], sizes = [8, 128], strides = [1, 1]} : vector<8x512xf32> to vector<8x128xf32>
    %cst_49 = arith.constant 5.000000e-01 : f32
    %86 = vector.broadcast %cst_49 : f32 to vector<8x128xf32>
    %87 = arith.mulf %86, %85 : vector<8x128xf32>
    %88 = math.tanh %87 : vector<8x128xf32>
    %cst_50 = arith.constant 5.000000e-01 : f32
    %89 = vector.broadcast %cst_50 : f32 to vector<8x128xf32>
    %90 = arith.mulf %89, %88 : vector<8x128xf32>
    %cst_51 = arith.constant 5.000000e-01 : f32
    %91 = vector.broadcast %cst_51 : f32 to vector<8x128xf32>
    %92 = arith.addf %90, %91 : vector<8x128xf32>
    %93 = arith.mulf %82, %22 : vector<8x128xf32>
    %94 = arith.mulf %74, %84 : vector<8x128xf32>
    %95 = arith.addf %93, %94 : vector<8x128xf32>
    %96 = math.tanh %95 : vector<8x128xf32>
    %97 = arith.mulf %92, %96 : vector<8x128xf32>
    %98 = arith.truncf %97 : vector<8x128xf32> to vector<8x128xbf16>
    %99 = vector.broadcast %24 : i32 to vector<8x1xi32>
    %100 = arith.cmpi eq, %3, %99 : vector<8x1xi32>
    %101 = vector.shape_cast %100 : vector<8x1xi1> to vector<8x1xi1>
    %102 = vector.broadcast %101 : vector<8x1xi1> to vector<8x128xi1>
    %103 = arith.select %102, %97, %14 : vector<8x128xi1>, vector<8x128xf32>
    %c8_i32_52 = arith.constant 8 : i32
    %104 = arith.muli %arg1, %c8_i32_52 : i32
    %c1_i32 = arith.constant 1 : i32
    %105 = arith.addi %104, %c1_i32 : i32
    %c1_53 = arith.constant 1 : index
    %c0_54 = arith.constant 0 : index
    %c0_55 = arith.constant 0 : index
    %106 = vector.load %arg2[%c1_53, %c0_54, %c0_55] : memref<8x8x128xbf16, #tpu.memory_space<vmem>>, vector<1x8x128xbf16>
    %107 = vector.shape_cast %106 : vector<1x8x128xbf16> to vector<8x128xbf16>
    %cst_56 = arith.constant dense<0.000000e+00> : vector<8x512xf32>
    %108 = tpu.matmul %107, %4, %cst_56 {dimension_numbers = #tpu.dot_dimension_numbers<[1], [0], [0], [1], [0, 0, 1, 1], [], []>} : vector<8x128xbf16>, vector<128x512xbf16>, vector<8x512xf32> -> vector<8x512xf32>
    %cst_57 = arith.constant dense<0.000000e+00> : vector<8x512xf32>
    %109 = tpu.matmul %62, %6, %cst_57 {dimension_numbers = #tpu.dot_dimension_numbers<[1], [0], [0], [1], [0, 0, 1, 1], [], []>} : vector<8x128xbf16>, vector<128x512xbf16>, vector<8x512xf32> -> vector<8x512xf32>
    %110 = arith.addf %108, %109 : vector<8x512xf32>
    %111 = arith.addf %110, %10 : vector<8x512xf32>
    %112 = vector.extract_strided_slice %111 {offsets = [0, 0], sizes = [8, 128], strides = [1, 1]} : vector<8x512xf32> to vector<8x128xf32>
    %cst_58 = arith.constant 5.000000e-01 : f32
    %113 = vector.broadcast %cst_58 : f32 to vector<8x128xf32>
    %114 = arith.mulf %113, %112 : vector<8x128xf32>
    %115 = math.tanh %114 : vector<8x128xf32>
    %cst_59 = arith.constant 5.000000e-01 : f32
    %116 = vector.broadcast %cst_59 : f32 to vector<8x128xf32>
    %117 = arith.mulf %116, %115 : vector<8x128xf32>
    %cst_60 = arith.constant 5.000000e-01 : f32
    %118 = vector.broadcast %cst_60 : f32 to vector<8x128xf32>
    %119 = arith.addf %117, %118 : vector<8x128xf32>
    %120 = vector.extract_strided_slice %111 {offsets = [0, 128], sizes = [8, 128], strides = [1, 1]} : vector<8x512xf32> to vector<8x128xf32>
    %cst_61 = arith.constant 5.000000e-01 : f32
    %121 = vector.broadcast %cst_61 : f32 to vector<8x128xf32>
    %122 = arith.mulf %121, %120 : vector<8x128xf32>
    %123 = math.tanh %122 : vector<8x128xf32>
    %cst_62 = arith.constant 5.000000e-01 : f32
    %124 = vector.broadcast %cst_62 : f32 to vector<8x128xf32>
    %125 = arith.mulf %124, %123 : vector<8x128xf32>
    %cst_63 = arith.constant 5.000000e-01 : f32
    %126 = vector.broadcast %cst_63 : f32 to vector<8x128xf32>
    %127 = arith.addf %125, %126 : vector<8x128xf32>
    %128 = vector.extract_strided_slice %111 {offsets = [0, 256], sizes = [8, 128], strides = [1, 1]} : vector<8x512xf32> to vector<8x128xf32>
    %129 = math.tanh %128 : vector<8x128xf32>
    %130 = vector.extract_strided_slice %111 {offsets = [0, 384], sizes = [8, 128], strides = [1, 1]} : vector<8x512xf32> to vector<8x128xf32>
    %cst_64 = arith.constant 5.000000e-01 : f32
    %131 = vector.broadcast %cst_64 : f32 to vector<8x128xf32>
    %132 = arith.mulf %131, %130 : vector<8x128xf32>
    %133 = math.tanh %132 : vector<8x128xf32>
    %cst_65 = arith.constant 5.000000e-01 : f32
    %134 = vector.broadcast %cst_65 : f32 to vector<8x128xf32>
    %135 = arith.mulf %134, %133 : vector<8x128xf32>
    %cst_66 = arith.constant 5.000000e-01 : f32
    %136 = vector.broadcast %cst_66 : f32 to vector<8x128xf32>
    %137 = arith.addf %135, %136 : vector<8x128xf32>
    %138 = arith.mulf %127, %59 : vector<8x128xf32>
    %139 = arith.mulf %119, %129 : vector<8x128xf32>
    %140 = arith.addf %138, %139 : vector<8x128xf32>
    %141 = math.tanh %140 : vector<8x128xf32>
    %142 = arith.mulf %137, %141 : vector<8x128xf32>
    %143 = arith.truncf %142 : vector<8x128xf32> to vector<8x128xbf16>
    %cst_67 = arith.constant dense<0.000000e+00> : vector<8x512xf32>
    %144 = tpu.matmul %143, %5, %cst_67 {dimension_numbers = #tpu.dot_dimension_numbers<[1], [0], [0], [1], [0, 0, 1, 1], [], []>} : vector<8x128xbf16>, vector<128x512xbf16>, vector<8x512xf32> -> vector<8x512xf32>
    %cst_68 = arith.constant dense<0.000000e+00> : vector<8x512xf32>
    %145 = tpu.matmul %98, %7, %cst_68 {dimension_numbers = #tpu.dot_dimension_numbers<[1], [0], [0], [1], [0, 0, 1, 1], [], []>} : vector<8x128xbf16>, vector<128x512xbf16>, vector<8x512xf32> -> vector<8x512xf32>
    %146 = arith.addf %144, %145 : vector<8x512xf32>
    %147 = arith.addf %146, %13 : vector<8x512xf32>
    %148 = vector.extract_strided_slice %147 {offsets = [0, 0], sizes = [8, 128], strides = [1, 1]} : vector<8x512xf32> to vector<8x128xf32>
    %cst_69 = arith.constant 5.000000e-01 : f32
    %149 = vector.broadcast %cst_69 : f32 to vector<8x128xf32>
    %150 = arith.mulf %149, %148 : vector<8x128xf32>
    %151 = math.tanh %150 : vector<8x128xf32>
    %cst_70 = arith.constant 5.000000e-01 : f32
    %152 = vector.broadcast %cst_70 : f32 to vector<8x128xf32>
    %153 = arith.mulf %152, %151 : vector<8x128xf32>
    %cst_71 = arith.constant 5.000000e-01 : f32
    %154 = vector.broadcast %cst_71 : f32 to vector<8x128xf32>
    %155 = arith.addf %153, %154 : vector<8x128xf32>
    %156 = vector.extract_strided_slice %147 {offsets = [0, 128], sizes = [8, 128], strides = [1, 1]} : vector<8x512xf32> to vector<8x128xf32>
    %cst_72 = arith.constant 5.000000e-01 : f32
    %157 = vector.broadcast %cst_72 : f32 to vector<8x128xf32>
    %158 = arith.mulf %157, %156 : vector<8x128xf32>
    %159 = math.tanh %158 : vector<8x128xf32>
    %cst_73 = arith.constant 5.000000e-01 : f32
    %160 = vector.broadcast %cst_73 : f32 to vector<8x128xf32>
    %161 = arith.mulf %160, %159 : vector<8x128xf32>
    %cst_74 = arith.constant 5.000000e-01 : f32
    %162 = vector.broadcast %cst_74 : f32 to vector<8x128xf32>
    %163 = arith.addf %161, %162 : vector<8x128xf32>
    %164 = vector.extract_strided_slice %147 {offsets = [0, 256], sizes = [8, 128], strides = [1, 1]} : vector<8x512xf32> to vector<8x128xf32>
    %165 = math.tanh %164 : vector<8x128xf32>
    %166 = vector.extract_strided_slice %147 {offsets = [0, 384], sizes = [8, 128], strides = [1, 1]} : vector<8x512xf32> to vector<8x128xf32>
    %cst_75 = arith.constant 5.000000e-01 : f32
    %167 = vector.broadcast %cst_75 : f32 to vector<8x128xf32>
    %168 = arith.mulf %167, %166 : vector<8x128xf32>
    %169 = math.tanh %168 : vector<8x128xf32>
    %cst_76 = arith.constant 5.000000e-01 : f32
    %170 = vector.broadcast %cst_76 : f32 to vector<8x128xf32>
    %171 = arith.mulf %170, %169 : vector<8x128xf32>
    %cst_77 = arith.constant 5.000000e-01 : f32
    %172 = vector.broadcast %cst_77 : f32 to vector<8x128xf32>
    %173 = arith.addf %171, %172 : vector<8x128xf32>
    %174 = arith.mulf %163, %95 : vector<8x128xf32>
    %175 = arith.mulf %155, %165 : vector<8x128xf32>
    %176 = arith.addf %174, %175 : vector<8x128xf32>
    %177 = math.tanh %176 : vector<8x128xf32>
    %178 = arith.mulf %173, %177 : vector<8x128xf32>
    %179 = arith.truncf %178 : vector<8x128xf32> to vector<8x128xbf16>
    %180 = vector.broadcast %105 : i32 to vector<8x1xi32>
    %181 = arith.cmpi eq, %3, %180 : vector<8x1xi32>
    %182 = vector.shape_cast %181 : vector<8x1xi1> to vector<8x1xi1>
    %183 = vector.broadcast %182 : vector<8x1xi1> to vector<8x128xi1>
    %184 = arith.select %183, %178, %103 : vector<8x128xi1>, vector<8x128xf32>
    %c8_i32_78 = arith.constant 8 : i32
    %185 = arith.muli %arg1, %c8_i32_78 : i32
    %c2_i32 = arith.constant 2 : i32
    %186 = arith.addi %185, %c2_i32 : i32
    %c2 = arith.constant 2 : index
    %c0_79 = arith.constant 0 : index
    %c0_80 = arith.constant 0 : index
    %187 = vector.load %arg2[%c2, %c0_79, %c0_80] : memref<8x8x128xbf16, #tpu.memory_space<vmem>>, vector<1x8x128xbf16>
    %188 = vector.shape_cast %187 : vector<1x8x128xbf16> to vector<8x128xbf16>
    %cst_81 = arith.constant dense<0.000000e+00> : vector<8x512xf32>
    %189 = tpu.matmul %188, %4, %cst_81 {dimension_numbers = #tpu.dot_dimension_numbers<[1], [0], [0], [1], [0, 0, 1, 1], [], []>} : vector<8x128xbf16>, vector<128x512xbf16>, vector<8x512xf32> -> vector<8x512xf32>
    %cst_82 = arith.constant dense<0.000000e+00> : vector<8x512xf32>
    %190 = tpu.matmul %143, %6, %cst_82 {dimension_numbers = #tpu.dot_dimension_numbers<[1], [0], [0], [1], [0, 0, 1, 1], [], []>} : vector<8x128xbf16>, vector<128x512xbf16>, vector<8x512xf32> -> vector<8x512xf32>
    %191 = arith.addf %189, %190 : vector<8x512xf32>
    %192 = arith.addf %191, %10 : vector<8x512xf32>
    %193 = vector.extract_strided_slice %192 {offsets = [0, 0], sizes = [8, 128], strides = [1, 1]} : vector<8x512xf32> to vector<8x128xf32>
    %cst_83 = arith.constant 5.000000e-01 : f32
    %194 = vector.broadcast %cst_83 : f32 to vector<8x128xf32>
    %195 = arith.mulf %194, %193 : vector<8x128xf32>
    %196 = math.tanh %195 : vector<8x128xf32>
    %cst_84 = arith.constant 5.000000e-01 : f32
    %197 = vector.broadcast %cst_84 : f32 to vector<8x128xf32>
    %198 = arith.mulf %197, %196 : vector<8x128xf32>
    %cst_85 = arith.constant 5.000000e-01 : f32
    %199 = vector.broadcast %cst_85 : f32 to vector<8x128xf32>
    %200 = arith.addf %198, %199 : vector<8x128xf32>
    %201 = vector.extract_strided_slice %192 {offsets = [0, 128], sizes = [8, 128], strides = [1, 1]} : vector<8x512xf32> to vector<8x128xf32>
    %cst_86 = arith.constant 5.000000e-01 : f32
    %202 = vector.broadcast %cst_86 : f32 to vector<8x128xf32>
    %203 = arith.mulf %202, %201 : vector<8x128xf32>
    %204 = math.tanh %203 : vector<8x128xf32>
    %cst_87 = arith.constant 5.000000e-01 : f32
    %205 = vector.broadcast %cst_87 : f32 to vector<8x128xf32>
    %206 = arith.mulf %205, %204 : vector<8x128xf32>
    %cst_88 = arith.constant 5.000000e-01 : f32
    %207 = vector.broadcast %cst_88 : f32 to vector<8x128xf32>
    %208 = arith.addf %206, %207 : vector<8x128xf32>
    %209 = vector.extract_strided_slice %192 {offsets = [0, 256], sizes = [8, 128], strides = [1, 1]} : vector<8x512xf32> to vector<8x128xf32>
    %210 = math.tanh %209 : vector<8x128xf32>
    %211 = vector.extract_strided_slice %192 {offsets = [0, 384], sizes = [8, 128], strides = [1, 1]} : vector<8x512xf32> to vector<8x128xf32>
    %cst_89 = arith.constant 5.000000e-01 : f32
    %212 = vector.broadcast %cst_89 : f32 to vector<8x128xf32>
    %213 = arith.mulf %212, %211 : vector<8x128xf32>
    %214 = math.tanh %213 : vector<8x128xf32>
    %cst_90 = arith.constant 5.000000e-01 : f32
    %215 = vector.broadcast %cst_90 : f32 to vector<8x128xf32>
    %216 = arith.mulf %215, %214 : vector<8x128xf32>
    %cst_91 = arith.constant 5.000000e-01 : f32
    %217 = vector.broadcast %cst_91 : f32 to vector<8x128xf32>
    %218 = arith.addf %216, %217 : vector<8x128xf32>
    %219 = arith.mulf %208, %140 : vector<8x128xf32>
    %220 = arith.mulf %200, %210 : vector<8x128xf32>
    %221 = arith.addf %219, %220 : vector<8x128xf32>
    %222 = math.tanh %221 : vector<8x128xf32>
    %223 = arith.mulf %218, %222 : vector<8x128xf32>
    %224 = arith.truncf %223 : vector<8x128xf32> to vector<8x128xbf16>
    %cst_92 = arith.constant dense<0.000000e+00> : vector<8x512xf32>
    %225 = tpu.matmul %224, %5, %cst_92 {dimension_numbers = #tpu.dot_dimension_numbers<[1], [0], [0], [1], [0, 0, 1, 1], [], []>} : vector<8x128xbf16>, vector<128x512xbf16>, vector<8x512xf32> -> vector<8x512xf32>
    %cst_93 = arith.constant dense<0.000000e+00> : vector<8x512xf32>
    %226 = tpu.matmul %179, %7, %cst_93 {dimension_numbers = #tpu.dot_dimension_numbers<[1], [0], [0], [1], [0, 0, 1, 1], [], []>} : vector<8x128xbf16>, vector<128x512xbf16>, vector<8x512xf32> -> vector<8x512xf32>
    %227 = arith.addf %225, %226 : vector<8x512xf32>
    %228 = arith.addf %227, %13 : vector<8x512xf32>
    %229 = vector.extract_strided_slice %228 {offsets = [0, 0], sizes = [8, 128], strides = [1, 1]} : vector<8x512xf32> to vector<8x128xf32>
    %cst_94 = arith.constant 5.000000e-01 : f32
    %230 = vector.broadcast %cst_94 : f32 to vector<8x128xf32>
    %231 = arith.mulf %230, %229 : vector<8x128xf32>
    %232 = math.tanh %231 : vector<8x128xf32>
    %cst_95 = arith.constant 5.000000e-01 : f32
    %233 = vector.broadcast %cst_95 : f32 to vector<8x128xf32>
    %234 = arith.mulf %233, %232 : vector<8x128xf32>
    %cst_96 = arith.constant 5.000000e-01 : f32
    %235 = vector.broadcast %cst_96 : f32 to vector<8x128xf32>
    %236 = arith.addf %234, %235 : vector<8x128xf32>
    %237 = vector.extract_strided_slice %228 {offsets = [0, 128], sizes = [8, 128], strides = [1, 1]} : vector<8x512xf32> to vector<8x128xf32>
    %cst_97 = arith.constant 5.000000e-01 : f32
    %238 = vector.broadcast %cst_97 : f32 to vector<8x128xf32>
    %239 = arith.mulf %238, %237 : vector<8x128xf32>
    %240 = math.tanh %239 : vector<8x128xf32>
    %cst_98 = arith.constant 5.000000e-01 : f32
    %241 = vector.broadcast %cst_98 : f32 to vector<8x128xf32>
    %242 = arith.mulf %241, %240 : vector<8x128xf32>
    %cst_99 = arith.constant 5.000000e-01 : f32
    %243 = vector.broadcast %cst_99 : f32 to vector<8x128xf32>
    %244 = arith.addf %242, %243 : vector<8x128xf32>
    %245 = vector.extract_strided_slice %228 {offsets = [0, 256], sizes = [8, 128], strides = [1, 1]} : vector<8x512xf32> to vector<8x128xf32>
    %246 = math.tanh %245 : vector<8x128xf32>
    %247 = vector.extract_strided_slice %228 {offsets = [0, 384], sizes = [8, 128], strides = [1, 1]} : vector<8x512xf32> to vector<8x128xf32>
    %cst_100 = arith.constant 5.000000e-01 : f32
    %248 = vector.broadcast %cst_100 : f32 to vector<8x128xf32>
    %249 = arith.mulf %248, %247 : vector<8x128xf32>
    %250 = math.tanh %249 : vector<8x128xf32>
    %cst_101 = arith.constant 5.000000e-01 : f32
    %251 = vector.broadcast %cst_101 : f32 to vector<8x128xf32>
    %252 = arith.mulf %251, %250 : vector<8x128xf32>
    %cst_102 = arith.constant 5.000000e-01 : f32
    %253 = vector.broadcast %cst_102 : f32 to vector<8x128xf32>
    %254 = arith.addf %252, %253 : vector<8x128xf32>
    %255 = arith.mulf %244, %176 : vector<8x128xf32>
    %256 = arith.mulf %236, %246 : vector<8x128xf32>
    %257 = arith.addf %255, %256 : vector<8x128xf32>
    %258 = math.tanh %257 : vector<8x128xf32>
    %259 = arith.mulf %254, %258 : vector<8x128xf32>
    %260 = arith.truncf %259 : vector<8x128xf32> to vector<8x128xbf16>
    %261 = vector.broadcast %186 : i32 to vector<8x1xi32>
    %262 = arith.cmpi eq, %3, %261 : vector<8x1xi32>
    %263 = vector.shape_cast %262 : vector<8x1xi1> to vector<8x1xi1>
    %264 = vector.broadcast %263 : vector<8x1xi1> to vector<8x128xi1>
    %265 = arith.select %264, %259, %184 : vector<8x128xi1>, vector<8x128xf32>
    %c8_i32_103 = arith.constant 8 : i32
    %266 = arith.muli %arg1, %c8_i32_103 : i32
    %c3_i32 = arith.constant 3 : i32
    %267 = arith.addi %266, %c3_i32 : i32
    %c3 = arith.constant 3 : index
    %c0_104 = arith.constant 0 : index
    %c0_105 = arith.constant 0 : index
    %268 = vector.load %arg2[%c3, %c0_104, %c0_105] : memref<8x8x128xbf16, #tpu.memory_space<vmem>>, vector<1x8x128xbf16>
    %269 = vector.shape_cast %268 : vector<1x8x128xbf16> to vector<8x128xbf16>
    %cst_106 = arith.constant dense<0.000000e+00> : vector<8x512xf32>
    %270 = tpu.matmul %269, %4, %cst_106 {dimension_numbers = #tpu.dot_dimension_numbers<[1], [0], [0], [1], [0, 0, 1, 1], [], []>} : vector<8x128xbf16>, vector<128x512xbf16>, vector<8x512xf32> -> vector<8x512xf32>
    %cst_107 = arith.constant dense<0.000000e+00> : vector<8x512xf32>
    %271 = tpu.matmul %224, %6, %cst_107 {dimension_numbers = #tpu.dot_dimension_numbers<[1], [0], [0], [1], [0, 0, 1, 1], [], []>} : vector<8x128xbf16>, vector<128x512xbf16>, vector<8x512xf32> -> vector<8x512xf32>
    %272 = arith.addf %270, %271 : vector<8x512xf32>
    %273 = arith.addf %272, %10 : vector<8x512xf32>
    %274 = vector.extract_strided_slice %273 {offsets = [0, 0], sizes = [8, 128], strides = [1, 1]} : vector<8x512xf32> to vector<8x128xf32>
    %cst_108 = arith.constant 5.000000e-01 : f32
    %275 = vector.broadcast %cst_108 : f32 to vector<8x128xf32>
    %276 = arith.mulf %275, %274 : vector<8x128xf32>
    %277 = math.tanh %276 : vector<8x128xf32>
    %cst_109 = arith.constant 5.000000e-01 : f32
    %278 = vector.broadcast %cst_109 : f32 to vector<8x128xf32>
    %279 = arith.mulf %278, %277 : vector<8x128xf32>
    %cst_110 = arith.constant 5.000000e-01 : f32
    %280 = vector.broadcast %cst_110 : f32 to vector<8x128xf32>
    %281 = arith.addf %279, %280 : vector<8x128xf32>
    %282 = vector.extract_strided_slice %273 {offsets = [0, 128], sizes = [8, 128], strides = [1, 1]} : vector<8x512xf32> to vector<8x128xf32>
    %cst_111 = arith.constant 5.000000e-01 : f32
    %283 = vector.broadcast %cst_111 : f32 to vector<8x128xf32>
    %284 = arith.mulf %283, %282 : vector<8x128xf32>
    %285 = math.tanh %284 : vector<8x128xf32>
    %cst_112 = arith.constant 5.000000e-01 : f32
    %286 = vector.broadcast %cst_112 : f32 to vector<8x128xf32>
    %287 = arith.mulf %286, %285 : vector<8x128xf32>
    %cst_113 = arith.constant 5.000000e-01 : f32
    %288 = vector.broadcast %cst_113 : f32 to vector<8x128xf32>
    %289 = arith.addf %287, %288 : vector<8x128xf32>
    %290 = vector.extract_strided_slice %273 {offsets = [0, 256], sizes = [8, 128], strides = [1, 1]} : vector<8x512xf32> to vector<8x128xf32>
    %291 = math.tanh %290 : vector<8x128xf32>
    %292 = vector.extract_strided_slice %273 {offsets = [0, 384], sizes = [8, 128], strides = [1, 1]} : vector<8x512xf32> to vector<8x128xf32>
    %cst_114 = arith.constant 5.000000e-01 : f32
    %293 = vector.broadcast %cst_114 : f32 to vector<8x128xf32>
    %294 = arith.mulf %293, %292 : vector<8x128xf32>
    %295 = math.tanh %294 : vector<8x128xf32>
    %cst_115 = arith.constant 5.000000e-01 : f32
    %296 = vector.broadcast %cst_115 : f32 to vector<8x128xf32>
    %297 = arith.mulf %296, %295 : vector<8x128xf32>
    %cst_116 = arith.constant 5.000000e-01 : f32
    %298 = vector.broadcast %cst_116 : f32 to vector<8x128xf32>
    %299 = arith.addf %297, %298 : vector<8x128xf32>
    %300 = arith.mulf %289, %221 : vector<8x128xf32>
    %301 = arith.mulf %281, %291 : vector<8x128xf32>
    %302 = arith.addf %300, %301 : vector<8x128xf32>
    %303 = math.tanh %302 : vector<8x128xf32>
    %304 = arith.mulf %299, %303 : vector<8x128xf32>
    %305 = arith.truncf %304 : vector<8x128xf32> to vector<8x128xbf16>
    %cst_117 = arith.constant dense<0.000000e+00> : vector<8x512xf32>
    %306 = tpu.matmul %305, %5, %cst_117 {dimension_numbers = #tpu.dot_dimension_numbers<[1], [0], [0], [1], [0, 0, 1, 1], [], []>} : vector<8x128xbf16>, vector<128x512xbf16>, vector<8x512xf32> -> vector<8x512xf32>
    %cst_118 = arith.constant dense<0.000000e+00> : vector<8x512xf32>
    %307 = tpu.matmul %260, %7, %cst_118 {dimension_numbers = #tpu.dot_dimension_numbers<[1], [0], [0], [1], [0, 0, 1, 1], [], []>} : vector<8x128xbf16>, vector<128x512xbf16>, vector<8x512xf32> -> vector<8x512xf32>
    %308 = arith.addf %306, %307 : vector<8x512xf32>
    %309 = arith.addf %308, %13 : vector<8x512xf32>
    %310 = vector.extract_strided_slice %309 {offsets = [0, 0], sizes = [8, 128], strides = [1, 1]} : vector<8x512xf32> to vector<8x128xf32>
    %cst_119 = arith.constant 5.000000e-01 : f32
    %311 = vector.broadcast %cst_119 : f32 to vector<8x128xf32>
    %312 = arith.mulf %311, %310 : vector<8x128xf32>
    %313 = math.tanh %312 : vector<8x128xf32>
    %cst_120 = arith.constant 5.000000e-01 : f32
    %314 = vector.broadcast %cst_120 : f32 to vector<8x128xf32>
    %315 = arith.mulf %314, %313 : vector<8x128xf32>
    %cst_121 = arith.constant 5.000000e-01 : f32
    %316 = vector.broadcast %cst_121 : f32 to vector<8x128xf32>
    %317 = arith.addf %315, %316 : vector<8x128xf32>
    %318 = vector.extract_strided_slice %309 {offsets = [0, 128], sizes = [8, 128], strides = [1, 1]} : vector<8x512xf32> to vector<8x128xf32>
    %cst_122 = arith.constant 5.000000e-01 : f32
    %319 = vector.broadcast %cst_122 : f32 to vector<8x128xf32>
    %320 = arith.mulf %319, %318 : vector<8x128xf32>
    %321 = math.tanh %320 : vector<8x128xf32>
    %cst_123 = arith.constant 5.000000e-01 : f32
    %322 = vector.broadcast %cst_123 : f32 to vector<8x128xf32>
    %323 = arith.mulf %322, %321 : vector<8x128xf32>
    %cst_124 = arith.constant 5.000000e-01 : f32
    %324 = vector.broadcast %cst_124 : f32 to vector<8x128xf32>
    %325 = arith.addf %323, %324 : vector<8x128xf32>
    %326 = vector.extract_strided_slice %309 {offsets = [0, 256], sizes = [8, 128], strides = [1, 1]} : vector<8x512xf32> to vector<8x128xf32>
    %327 = math.tanh %326 : vector<8x128xf32>
    %328 = vector.extract_strided_slice %309 {offsets = [0, 384], sizes = [8, 128], strides = [1, 1]} : vector<8x512xf32> to vector<8x128xf32>
    %cst_125 = arith.constant 5.000000e-01 : f32
    %329 = vector.broadcast %cst_125 : f32 to vector<8x128xf32>
    %330 = arith.mulf %329, %328 : vector<8x128xf32>
    %331 = math.tanh %330 : vector<8x128xf32>
    %cst_126 = arith.constant 5.000000e-01 : f32
    %332 = vector.broadcast %cst_126 : f32 to vector<8x128xf32>
    %333 = arith.mulf %332, %331 : vector<8x128xf32>
    %cst_127 = arith.constant 5.000000e-01 : f32
    %334 = vector.broadcast %cst_127 : f32 to vector<8x128xf32>
    %335 = arith.addf %333, %334 : vector<8x128xf32>
    %336 = arith.mulf %325, %257 : vector<8x128xf32>
    %337 = arith.mulf %317, %327 : vector<8x128xf32>
    %338 = arith.addf %336, %337 : vector<8x128xf32>
    %339 = math.tanh %338 : vector<8x128xf32>
    %340 = arith.mulf %335, %339 : vector<8x128xf32>
    %341 = arith.truncf %340 : vector<8x128xf32> to vector<8x128xbf16>
    %342 = vector.broadcast %267 : i32 to vector<8x1xi32>
    %343 = arith.cmpi eq, %3, %342 : vector<8x1xi32>
    %344 = vector.shape_cast %343 : vector<8x1xi1> to vector<8x1xi1>
    %345 = vector.broadcast %344 : vector<8x1xi1> to vector<8x128xi1>
    %346 = arith.select %345, %340, %265 : vector<8x128xi1>, vector<8x128xf32>
    %c8_i32_128 = arith.constant 8 : i32
    %347 = arith.muli %arg1, %c8_i32_128 : i32
    %c4_i32 = arith.constant 4 : i32
    %348 = arith.addi %347, %c4_i32 : i32
    %c4 = arith.constant 4 : index
    %c0_129 = arith.constant 0 : index
    %c0_130 = arith.constant 0 : index
    %349 = vector.load %arg2[%c4, %c0_129, %c0_130] : memref<8x8x128xbf16, #tpu.memory_space<vmem>>, vector<1x8x128xbf16>
    %350 = vector.shape_cast %349 : vector<1x8x128xbf16> to vector<8x128xbf16>
    %cst_131 = arith.constant dense<0.000000e+00> : vector<8x512xf32>
    %351 = tpu.matmul %350, %4, %cst_131 {dimension_numbers = #tpu.dot_dimension_numbers<[1], [0], [0], [1], [0, 0, 1, 1], [], []>} : vector<8x128xbf16>, vector<128x512xbf16>, vector<8x512xf32> -> vector<8x512xf32>
    %cst_132 = arith.constant dense<0.000000e+00> : vector<8x512xf32>
    %352 = tpu.matmul %305, %6, %cst_132 {dimension_numbers = #tpu.dot_dimension_numbers<[1], [0], [0], [1], [0, 0, 1, 1], [], []>} : vector<8x128xbf16>, vector<128x512xbf16>, vector<8x512xf32> -> vector<8x512xf32>
    %353 = arith.addf %351, %352 : vector<8x512xf32>
    %354 = arith.addf %353, %10 : vector<8x512xf32>
    %355 = vector.extract_strided_slice %354 {offsets = [0, 0], sizes = [8, 128], strides = [1, 1]} : vector<8x512xf32> to vector<8x128xf32>
    %cst_133 = arith.constant 5.000000e-01 : f32
    %356 = vector.broadcast %cst_133 : f32 to vector<8x128xf32>
    %357 = arith.mulf %356, %355 : vector<8x128xf32>
    %358 = math.tanh %357 : vector<8x128xf32>
    %cst_134 = arith.constant 5.000000e-01 : f32
    %359 = vector.broadcast %cst_134 : f32 to vector<8x128xf32>
    %360 = arith.mulf %359, %358 : vector<8x128xf32>
    %cst_135 = arith.constant 5.000000e-01 : f32
    %361 = vector.broadcast %cst_135 : f32 to vector<8x128xf32>
    %362 = arith.addf %360, %361 : vector<8x128xf32>
    %363 = vector.extract_strided_slice %354 {offsets = [0, 128], sizes = [8, 128], strides = [1, 1]} : vector<8x512xf32> to vector<8x128xf32>
    %cst_136 = arith.constant 5.000000e-01 : f32
    %364 = vector.broadcast %cst_136 : f32 to vector<8x128xf32>
    %365 = arith.mulf %364, %363 : vector<8x128xf32>
    %366 = math.tanh %365 : vector<8x128xf32>
    %cst_137 = arith.constant 5.000000e-01 : f32
    %367 = vector.broadcast %cst_137 : f32 to vector<8x128xf32>
    %368 = arith.mulf %367, %366 : vector<8x128xf32>
    %cst_138 = arith.constant 5.000000e-01 : f32
    %369 = vector.broadcast %cst_138 : f32 to vector<8x128xf32>
    %370 = arith.addf %368, %369 : vector<8x128xf32>
    %371 = vector.extract_strided_slice %354 {offsets = [0, 256], sizes = [8, 128], strides = [1, 1]} : vector<8x512xf32> to vector<8x128xf32>
    %372 = math.tanh %371 : vector<8x128xf32>
    %373 = vector.extract_strided_slice %354 {offsets = [0, 384], sizes = [8, 128], strides = [1, 1]} : vector<8x512xf32> to vector<8x128xf32>
    %cst_139 = arith.constant 5.000000e-01 : f32
    %374 = vector.broadcast %cst_139 : f32 to vector<8x128xf32>
    %375 = arith.mulf %374, %373 : vector<8x128xf32>
    %376 = math.tanh %375 : vector<8x128xf32>
    %cst_140 = arith.constant 5.000000e-01 : f32
    %377 = vector.broadcast %cst_140 : f32 to vector<8x128xf32>
    %378 = arith.mulf %377, %376 : vector<8x128xf32>
    %cst_141 = arith.constant 5.000000e-01 : f32
    %379 = vector.broadcast %cst_141 : f32 to vector<8x128xf32>
    %380 = arith.addf %378, %379 : vector<8x128xf32>
    %381 = arith.mulf %370, %302 : vector<8x128xf32>
    %382 = arith.mulf %362, %372 : vector<8x128xf32>
    %383 = arith.addf %381, %382 : vector<8x128xf32>
    %384 = math.tanh %383 : vector<8x128xf32>
    %385 = arith.mulf %380, %384 : vector<8x128xf32>
    %386 = arith.truncf %385 : vector<8x128xf32> to vector<8x128xbf16>
    %cst_142 = arith.constant dense<0.000000e+00> : vector<8x512xf32>
    %387 = tpu.matmul %386, %5, %cst_142 {dimension_numbers = #tpu.dot_dimension_numbers<[1], [0], [0], [1], [0, 0, 1, 1], [], []>} : vector<8x128xbf16>, vector<128x512xbf16>, vector<8x512xf32> -> vector<8x512xf32>
    %cst_143 = arith.constant dense<0.000000e+00> : vector<8x512xf32>
    %388 = tpu.matmul %341, %7, %cst_143 {dimension_numbers = #tpu.dot_dimension_numbers<[1], [0], [0], [1], [0, 0, 1, 1], [], []>} : vector<8x128xbf16>, vector<128x512xbf16>, vector<8x512xf32> -> vector<8x512xf32>
    %389 = arith.addf %387, %388 : vector<8x512xf32>
    %390 = arith.addf %389, %13 : vector<8x512xf32>
    %391 = vector.extract_strided_slice %390 {offsets = [0, 0], sizes = [8, 128], strides = [1, 1]} : vector<8x512xf32> to vector<8x128xf32>
    %cst_144 = arith.constant 5.000000e-01 : f32
    %392 = vector.broadcast %cst_144 : f32 to vector<8x128xf32>
    %393 = arith.mulf %392, %391 : vector<8x128xf32>
    %394 = math.tanh %393 : vector<8x128xf32>
    %cst_145 = arith.constant 5.000000e-01 : f32
    %395 = vector.broadcast %cst_145 : f32 to vector<8x128xf32>
    %396 = arith.mulf %395, %394 : vector<8x128xf32>
    %cst_146 = arith.constant 5.000000e-01 : f32
    %397 = vector.broadcast %cst_146 : f32 to vector<8x128xf32>
    %398 = arith.addf %396, %397 : vector<8x128xf32>
    %399 = vector.extract_strided_slice %390 {offsets = [0, 128], sizes = [8, 128], strides = [1, 1]} : vector<8x512xf32> to vector<8x128xf32>
    %cst_147 = arith.constant 5.000000e-01 : f32
    %400 = vector.broadcast %cst_147 : f32 to vector<8x128xf32>
    %401 = arith.mulf %400, %399 : vector<8x128xf32>
    %402 = math.tanh %401 : vector<8x128xf32>
    %cst_148 = arith.constant 5.000000e-01 : f32
    %403 = vector.broadcast %cst_148 : f32 to vector<8x128xf32>
    %404 = arith.mulf %403, %402 : vector<8x128xf32>
    %cst_149 = arith.constant 5.000000e-01 : f32
    %405 = vector.broadcast %cst_149 : f32 to vector<8x128xf32>
    %406 = arith.addf %404, %405 : vector<8x128xf32>
    %407 = vector.extract_strided_slice %390 {offsets = [0, 256], sizes = [8, 128], strides = [1, 1]} : vector<8x512xf32> to vector<8x128xf32>
    %408 = math.tanh %407 : vector<8x128xf32>
    %409 = vector.extract_strided_slice %390 {offsets = [0, 384], sizes = [8, 128], strides = [1, 1]} : vector<8x512xf32> to vector<8x128xf32>
    %cst_150 = arith.constant 5.000000e-01 : f32
    %410 = vector.broadcast %cst_150 : f32 to vector<8x128xf32>
    %411 = arith.mulf %410, %409 : vector<8x128xf32>
    %412 = math.tanh %411 : vector<8x128xf32>
    %cst_151 = arith.constant 5.000000e-01 : f32
    %413 = vector.broadcast %cst_151 : f32 to vector<8x128xf32>
    %414 = arith.mulf %413, %412 : vector<8x128xf32>
    %cst_152 = arith.constant 5.000000e-01 : f32
    %415 = vector.broadcast %cst_152 : f32 to vector<8x128xf32>
    %416 = arith.addf %414, %415 : vector<8x128xf32>
    %417 = arith.mulf %406, %338 : vector<8x128xf32>
    %418 = arith.mulf %398, %408 : vector<8x128xf32>
    %419 = arith.addf %417, %418 : vector<8x128xf32>
    %420 = math.tanh %419 : vector<8x128xf32>
    %421 = arith.mulf %416, %420 : vector<8x128xf32>
    %422 = arith.truncf %421 : vector<8x128xf32> to vector<8x128xbf16>
    %423 = vector.broadcast %348 : i32 to vector<8x1xi32>
    %424 = arith.cmpi eq, %3, %423 : vector<8x1xi32>
    %425 = vector.shape_cast %424 : vector<8x1xi1> to vector<8x1xi1>
    %426 = vector.broadcast %425 : vector<8x1xi1> to vector<8x128xi1>
    %427 = arith.select %426, %421, %346 : vector<8x128xi1>, vector<8x128xf32>
    %c8_i32_153 = arith.constant 8 : i32
    %428 = arith.muli %arg1, %c8_i32_153 : i32
    %c5_i32 = arith.constant 5 : i32
    %429 = arith.addi %428, %c5_i32 : i32
    %c5 = arith.constant 5 : index
    %c0_154 = arith.constant 0 : index
    %c0_155 = arith.constant 0 : index
    %430 = vector.load %arg2[%c5, %c0_154, %c0_155] : memref<8x8x128xbf16, #tpu.memory_space<vmem>>, vector<1x8x128xbf16>
    %431 = vector.shape_cast %430 : vector<1x8x128xbf16> to vector<8x128xbf16>
    %cst_156 = arith.constant dense<0.000000e+00> : vector<8x512xf32>
    %432 = tpu.matmul %431, %4, %cst_156 {dimension_numbers = #tpu.dot_dimension_numbers<[1], [0], [0], [1], [0, 0, 1, 1], [], []>} : vector<8x128xbf16>, vector<128x512xbf16>, vector<8x512xf32> -> vector<8x512xf32>
    %cst_157 = arith.constant dense<0.000000e+00> : vector<8x512xf32>
    %433 = tpu.matmul %386, %6, %cst_157 {dimension_numbers = #tpu.dot_dimension_numbers<[1], [0], [0], [1], [0, 0, 1, 1], [], []>} : vector<8x128xbf16>, vector<128x512xbf16>, vector<8x512xf32> -> vector<8x512xf32>
    %434 = arith.addf %432, %433 : vector<8x512xf32>
    %435 = arith.addf %434, %10 : vector<8x512xf32>
    %436 = vector.extract_strided_slice %435 {offsets = [0, 0], sizes = [8, 128], strides = [1, 1]} : vector<8x512xf32> to vector<8x128xf32>
    %cst_158 = arith.constant 5.000000e-01 : f32
    %437 = vector.broadcast %cst_158 : f32 to vector<8x128xf32>
    %438 = arith.mulf %437, %436 : vector<8x128xf32>
    %439 = math.tanh %438 : vector<8x128xf32>
    %cst_159 = arith.constant 5.000000e-01 : f32
    %440 = vector.broadcast %cst_159 : f32 to vector<8x128xf32>
    %441 = arith.mulf %440, %439 : vector<8x128xf32>
    %cst_160 = arith.constant 5.000000e-01 : f32
    %442 = vector.broadcast %cst_160 : f32 to vector<8x128xf32>
    %443 = arith.addf %441, %442 : vector<8x128xf32>
    %444 = vector.extract_strided_slice %435 {offsets = [0, 128], sizes = [8, 128], strides = [1, 1]} : vector<8x512xf32> to vector<8x128xf32>
    %cst_161 = arith.constant 5.000000e-01 : f32
    %445 = vector.broadcast %cst_161 : f32 to vector<8x128xf32>
    %446 = arith.mulf %445, %444 : vector<8x128xf32>
    %447 = math.tanh %446 : vector<8x128xf32>
    %cst_162 = arith.constant 5.000000e-01 : f32
    %448 = vector.broadcast %cst_162 : f32 to vector<8x128xf32>
    %449 = arith.mulf %448, %447 : vector<8x128xf32>
    %cst_163 = arith.constant 5.000000e-01 : f32
    %450 = vector.broadcast %cst_163 : f32 to vector<8x128xf32>
    %451 = arith.addf %449, %450 : vector<8x128xf32>
    %452 = vector.extract_strided_slice %435 {offsets = [0, 256], sizes = [8, 128], strides = [1, 1]} : vector<8x512xf32> to vector<8x128xf32>
    %453 = math.tanh %452 : vector<8x128xf32>
    %454 = vector.extract_strided_slice %435 {offsets = [0, 384], sizes = [8, 128], strides = [1, 1]} : vector<8x512xf32> to vector<8x128xf32>
    %cst_164 = arith.constant 5.000000e-01 : f32
    %455 = vector.broadcast %cst_164 : f32 to vector<8x128xf32>
    %456 = arith.mulf %455, %454 : vector<8x128xf32>
    %457 = math.tanh %456 : vector<8x128xf32>
    %cst_165 = arith.constant 5.000000e-01 : f32
    %458 = vector.broadcast %cst_165 : f32 to vector<8x128xf32>
    %459 = arith.mulf %458, %457 : vector<8x128xf32>
    %cst_166 = arith.constant 5.000000e-01 : f32
    %460 = vector.broadcast %cst_166 : f32 to vector<8x128xf32>
    %461 = arith.addf %459, %460 : vector<8x128xf32>
    %462 = arith.mulf %451, %383 : vector<8x128xf32>
    %463 = arith.mulf %443, %453 : vector<8x128xf32>
    %464 = arith.addf %462, %463 : vector<8x128xf32>
    %465 = math.tanh %464 : vector<8x128xf32>
    %466 = arith.mulf %461, %465 : vector<8x128xf32>
    %467 = arith.truncf %466 : vector<8x128xf32> to vector<8x128xbf16>
    %cst_167 = arith.constant dense<0.000000e+00> : vector<8x512xf32>
    %468 = tpu.matmul %467, %5, %cst_167 {dimension_numbers = #tpu.dot_dimension_numbers<[1], [0], [0], [1], [0, 0, 1, 1], [], []>} : vector<8x128xbf16>, vector<128x512xbf16>, vector<8x512xf32> -> vector<8x512xf32>
    %cst_168 = arith.constant dense<0.000000e+00> : vector<8x512xf32>
    %469 = tpu.matmul %422, %7, %cst_168 {dimension_numbers = #tpu.dot_dimension_numbers<[1], [0], [0], [1], [0, 0, 1, 1], [], []>} : vector<8x128xbf16>, vector<128x512xbf16>, vector<8x512xf32> -> vector<8x512xf32>
    %470 = arith.addf %468, %469 : vector<8x512xf32>
    %471 = arith.addf %470, %13 : vector<8x512xf32>
    %472 = vector.extract_strided_slice %471 {offsets = [0, 0], sizes = [8, 128], strides = [1, 1]} : vector<8x512xf32> to vector<8x128xf32>
    %cst_169 = arith.constant 5.000000e-01 : f32
    %473 = vector.broadcast %cst_169 : f32 to vector<8x128xf32>
    %474 = arith.mulf %473, %472 : vector<8x128xf32>
    %475 = math.tanh %474 : vector<8x128xf32>
    %cst_170 = arith.constant 5.000000e-01 : f32
    %476 = vector.broadcast %cst_170 : f32 to vector<8x128xf32>
    %477 = arith.mulf %476, %475 : vector<8x128xf32>
    %cst_171 = arith.constant 5.000000e-01 : f32
    %478 = vector.broadcast %cst_171 : f32 to vector<8x128xf32>
    %479 = arith.addf %477, %478 : vector<8x128xf32>
    %480 = vector.extract_strided_slice %471 {offsets = [0, 128], sizes = [8, 128], strides = [1, 1]} : vector<8x512xf32> to vector<8x128xf32>
    %cst_172 = arith.constant 5.000000e-01 : f32
    %481 = vector.broadcast %cst_172 : f32 to vector<8x128xf32>
    %482 = arith.mulf %481, %480 : vector<8x128xf32>
    %483 = math.tanh %482 : vector<8x128xf32>
    %cst_173 = arith.constant 5.000000e-01 : f32
    %484 = vector.broadcast %cst_173 : f32 to vector<8x128xf32>
    %485 = arith.mulf %484, %483 : vector<8x128xf32>
    %cst_174 = arith.constant 5.000000e-01 : f32
    %486 = vector.broadcast %cst_174 : f32 to vector<8x128xf32>
    %487 = arith.addf %485, %486 : vector<8x128xf32>
    %488 = vector.extract_strided_slice %471 {offsets = [0, 256], sizes = [8, 128], strides = [1, 1]} : vector<8x512xf32> to vector<8x128xf32>
    %489 = math.tanh %488 : vector<8x128xf32>
    %490 = vector.extract_strided_slice %471 {offsets = [0, 384], sizes = [8, 128], strides = [1, 1]} : vector<8x512xf32> to vector<8x128xf32>
    %cst_175 = arith.constant 5.000000e-01 : f32
    %491 = vector.broadcast %cst_175 : f32 to vector<8x128xf32>
    %492 = arith.mulf %491, %490 : vector<8x128xf32>
    %493 = math.tanh %492 : vector<8x128xf32>
    %cst_176 = arith.constant 5.000000e-01 : f32
    %494 = vector.broadcast %cst_176 : f32 to vector<8x128xf32>
    %495 = arith.mulf %494, %493 : vector<8x128xf32>
    %cst_177 = arith.constant 5.000000e-01 : f32
    %496 = vector.broadcast %cst_177 : f32 to vector<8x128xf32>
    %497 = arith.addf %495, %496 : vector<8x128xf32>
    %498 = arith.mulf %487, %419 : vector<8x128xf32>
    %499 = arith.mulf %479, %489 : vector<8x128xf32>
    %500 = arith.addf %498, %499 : vector<8x128xf32>
    %501 = math.tanh %500 : vector<8x128xf32>
    %502 = arith.mulf %497, %501 : vector<8x128xf32>
    %503 = arith.truncf %502 : vector<8x128xf32> to vector<8x128xbf16>
    %504 = vector.broadcast %429 : i32 to vector<8x1xi32>
    %505 = arith.cmpi eq, %3, %504 : vector<8x1xi32>
    %506 = vector.shape_cast %505 : vector<8x1xi1> to vector<8x1xi1>
    %507 = vector.broadcast %506 : vector<8x1xi1> to vector<8x128xi1>
    %508 = arith.select %507, %502, %427 : vector<8x128xi1>, vector<8x128xf32>
    %c8_i32_178 = arith.constant 8 : i32
    %509 = arith.muli %arg1, %c8_i32_178 : i32
    %c6_i32 = arith.constant 6 : i32
    %510 = arith.addi %509, %c6_i32 : i32
    %c6 = arith.constant 6 : index
    %c0_179 = arith.constant 0 : index
    %c0_180 = arith.constant 0 : index
    %511 = vector.load %arg2[%c6, %c0_179, %c0_180] : memref<8x8x128xbf16, #tpu.memory_space<vmem>>, vector<1x8x128xbf16>
    %512 = vector.shape_cast %511 : vector<1x8x128xbf16> to vector<8x128xbf16>
    %cst_181 = arith.constant dense<0.000000e+00> : vector<8x512xf32>
    %513 = tpu.matmul %512, %4, %cst_181 {dimension_numbers = #tpu.dot_dimension_numbers<[1], [0], [0], [1], [0, 0, 1, 1], [], []>} : vector<8x128xbf16>, vector<128x512xbf16>, vector<8x512xf32> -> vector<8x512xf32>
    %cst_182 = arith.constant dense<0.000000e+00> : vector<8x512xf32>
    %514 = tpu.matmul %467, %6, %cst_182 {dimension_numbers = #tpu.dot_dimension_numbers<[1], [0], [0], [1], [0, 0, 1, 1], [], []>} : vector<8x128xbf16>, vector<128x512xbf16>, vector<8x512xf32> -> vector<8x512xf32>
    %515 = arith.addf %513, %514 : vector<8x512xf32>
    %516 = arith.addf %515, %10 : vector<8x512xf32>
    %517 = vector.extract_strided_slice %516 {offsets = [0, 0], sizes = [8, 128], strides = [1, 1]} : vector<8x512xf32> to vector<8x128xf32>
    %cst_183 = arith.constant 5.000000e-01 : f32
    %518 = vector.broadcast %cst_183 : f32 to vector<8x128xf32>
    %519 = arith.mulf %518, %517 : vector<8x128xf32>
    %520 = math.tanh %519 : vector<8x128xf32>
    %cst_184 = arith.constant 5.000000e-01 : f32
    %521 = vector.broadcast %cst_184 : f32 to vector<8x128xf32>
    %522 = arith.mulf %521, %520 : vector<8x128xf32>
    %cst_185 = arith.constant 5.000000e-01 : f32
    %523 = vector.broadcast %cst_185 : f32 to vector<8x128xf32>
    %524 = arith.addf %522, %523 : vector<8x128xf32>
    %525 = vector.extract_strided_slice %516 {offsets = [0, 128], sizes = [8, 128], strides = [1, 1]} : vector<8x512xf32> to vector<8x128xf32>
    %cst_186 = arith.constant 5.000000e-01 : f32
    %526 = vector.broadcast %cst_186 : f32 to vector<8x128xf32>
    %527 = arith.mulf %526, %525 : vector<8x128xf32>
    %528 = math.tanh %527 : vector<8x128xf32>
    %cst_187 = arith.constant 5.000000e-01 : f32
    %529 = vector.broadcast %cst_187 : f32 to vector<8x128xf32>
    %530 = arith.mulf %529, %528 : vector<8x128xf32>
    %cst_188 = arith.constant 5.000000e-01 : f32
    %531 = vector.broadcast %cst_188 : f32 to vector<8x128xf32>
    %532 = arith.addf %530, %531 : vector<8x128xf32>
    %533 = vector.extract_strided_slice %516 {offsets = [0, 256], sizes = [8, 128], strides = [1, 1]} : vector<8x512xf32> to vector<8x128xf32>
    %534 = math.tanh %533 : vector<8x128xf32>
    %535 = vector.extract_strided_slice %516 {offsets = [0, 384], sizes = [8, 128], strides = [1, 1]} : vector<8x512xf32> to vector<8x128xf32>
    %cst_189 = arith.constant 5.000000e-01 : f32
    %536 = vector.broadcast %cst_189 : f32 to vector<8x128xf32>
    %537 = arith.mulf %536, %535 : vector<8x128xf32>
    %538 = math.tanh %537 : vector<8x128xf32>
    %cst_190 = arith.constant 5.000000e-01 : f32
    %539 = vector.broadcast %cst_190 : f32 to vector<8x128xf32>
    %540 = arith.mulf %539, %538 : vector<8x128xf32>
    %cst_191 = arith.constant 5.000000e-01 : f32
    %541 = vector.broadcast %cst_191 : f32 to vector<8x128xf32>
    %542 = arith.addf %540, %541 : vector<8x128xf32>
    %543 = arith.mulf %532, %464 : vector<8x128xf32>
    %544 = arith.mulf %524, %534 : vector<8x128xf32>
    %545 = arith.addf %543, %544 : vector<8x128xf32>
    %546 = math.tanh %545 : vector<8x128xf32>
    %547 = arith.mulf %542, %546 : vector<8x128xf32>
    %548 = arith.truncf %547 : vector<8x128xf32> to vector<8x128xbf16>
    %cst_192 = arith.constant dense<0.000000e+00> : vector<8x512xf32>
    %549 = tpu.matmul %548, %5, %cst_192 {dimension_numbers = #tpu.dot_dimension_numbers<[1], [0], [0], [1], [0, 0, 1, 1], [], []>} : vector<8x128xbf16>, vector<128x512xbf16>, vector<8x512xf32> -> vector<8x512xf32>
    %cst_193 = arith.constant dense<0.000000e+00> : vector<8x512xf32>
    %550 = tpu.matmul %503, %7, %cst_193 {dimension_numbers = #tpu.dot_dimension_numbers<[1], [0], [0], [1], [0, 0, 1, 1], [], []>} : vector<8x128xbf16>, vector<128x512xbf16>, vector<8x512xf32> -> vector<8x512xf32>
    %551 = arith.addf %549, %550 : vector<8x512xf32>
    %552 = arith.addf %551, %13 : vector<8x512xf32>
    %553 = vector.extract_strided_slice %552 {offsets = [0, 0], sizes = [8, 128], strides = [1, 1]} : vector<8x512xf32> to vector<8x128xf32>
    %cst_194 = arith.constant 5.000000e-01 : f32
    %554 = vector.broadcast %cst_194 : f32 to vector<8x128xf32>
    %555 = arith.mulf %554, %553 : vector<8x128xf32>
    %556 = math.tanh %555 : vector<8x128xf32>
    %cst_195 = arith.constant 5.000000e-01 : f32
    %557 = vector.broadcast %cst_195 : f32 to vector<8x128xf32>
    %558 = arith.mulf %557, %556 : vector<8x128xf32>
    %cst_196 = arith.constant 5.000000e-01 : f32
    %559 = vector.broadcast %cst_196 : f32 to vector<8x128xf32>
    %560 = arith.addf %558, %559 : vector<8x128xf32>
    %561 = vector.extract_strided_slice %552 {offsets = [0, 128], sizes = [8, 128], strides = [1, 1]} : vector<8x512xf32> to vector<8x128xf32>
    %cst_197 = arith.constant 5.000000e-01 : f32
    %562 = vector.broadcast %cst_197 : f32 to vector<8x128xf32>
    %563 = arith.mulf %562, %561 : vector<8x128xf32>
    %564 = math.tanh %563 : vector<8x128xf32>
    %cst_198 = arith.constant 5.000000e-01 : f32
    %565 = vector.broadcast %cst_198 : f32 to vector<8x128xf32>
    %566 = arith.mulf %565, %564 : vector<8x128xf32>
    %cst_199 = arith.constant 5.000000e-01 : f32
    %567 = vector.broadcast %cst_199 : f32 to vector<8x128xf32>
    %568 = arith.addf %566, %567 : vector<8x128xf32>
    %569 = vector.extract_strided_slice %552 {offsets = [0, 256], sizes = [8, 128], strides = [1, 1]} : vector<8x512xf32> to vector<8x128xf32>
    %570 = math.tanh %569 : vector<8x128xf32>
    %571 = vector.extract_strided_slice %552 {offsets = [0, 384], sizes = [8, 128], strides = [1, 1]} : vector<8x512xf32> to vector<8x128xf32>
    %cst_200 = arith.constant 5.000000e-01 : f32
    %572 = vector.broadcast %cst_200 : f32 to vector<8x128xf32>
    %573 = arith.mulf %572, %571 : vector<8x128xf32>
    %574 = math.tanh %573 : vector<8x128xf32>
    %cst_201 = arith.constant 5.000000e-01 : f32
    %575 = vector.broadcast %cst_201 : f32 to vector<8x128xf32>
    %576 = arith.mulf %575, %574 : vector<8x128xf32>
    %cst_202 = arith.constant 5.000000e-01 : f32
    %577 = vector.broadcast %cst_202 : f32 to vector<8x128xf32>
    %578 = arith.addf %576, %577 : vector<8x128xf32>
    %579 = arith.mulf %568, %500 : vector<8x128xf32>
    %580 = arith.mulf %560, %570 : vector<8x128xf32>
    %581 = arith.addf %579, %580 : vector<8x128xf32>
    %582 = math.tanh %581 : vector<8x128xf32>
    %583 = arith.mulf %578, %582 : vector<8x128xf32>
    %584 = arith.truncf %583 : vector<8x128xf32> to vector<8x128xbf16>
    %585 = vector.broadcast %510 : i32 to vector<8x1xi32>
    %586 = arith.cmpi eq, %3, %585 : vector<8x1xi32>
    %587 = vector.shape_cast %586 : vector<8x1xi1> to vector<8x1xi1>
    %588 = vector.broadcast %587 : vector<8x1xi1> to vector<8x128xi1>
    %589 = arith.select %588, %583, %508 : vector<8x128xi1>, vector<8x128xf32>
    %c8_i32_203 = arith.constant 8 : i32
    %590 = arith.muli %arg1, %c8_i32_203 : i32
    %c7_i32 = arith.constant 7 : i32
    %591 = arith.addi %590, %c7_i32 : i32
    %c7 = arith.constant 7 : index
    %c0_204 = arith.constant 0 : index
    %c0_205 = arith.constant 0 : index
    %592 = vector.load %arg2[%c7, %c0_204, %c0_205] : memref<8x8x128xbf16, #tpu.memory_space<vmem>>, vector<1x8x128xbf16>
    %593 = vector.shape_cast %592 : vector<1x8x128xbf16> to vector<8x128xbf16>
    %cst_206 = arith.constant dense<0.000000e+00> : vector<8x512xf32>
    %594 = tpu.matmul %593, %4, %cst_206 {dimension_numbers = #tpu.dot_dimension_numbers<[1], [0], [0], [1], [0, 0, 1, 1], [], []>} : vector<8x128xbf16>, vector<128x512xbf16>, vector<8x512xf32> -> vector<8x512xf32>
    %cst_207 = arith.constant dense<0.000000e+00> : vector<8x512xf32>
    %595 = tpu.matmul %548, %6, %cst_207 {dimension_numbers = #tpu.dot_dimension_numbers<[1], [0], [0], [1], [0, 0, 1, 1], [], []>} : vector<8x128xbf16>, vector<128x512xbf16>, vector<8x512xf32> -> vector<8x512xf32>
    %596 = arith.addf %594, %595 : vector<8x512xf32>
    %597 = arith.addf %596, %10 : vector<8x512xf32>
    %598 = vector.extract_strided_slice %597 {offsets = [0, 0], sizes = [8, 128], strides = [1, 1]} : vector<8x512xf32> to vector<8x128xf32>
    %cst_208 = arith.constant 5.000000e-01 : f32
    %599 = vector.broadcast %cst_208 : f32 to vector<8x128xf32>
    %600 = arith.mulf %599, %598 : vector<8x128xf32>
    %601 = math.tanh %600 : vector<8x128xf32>
    %cst_209 = arith.constant 5.000000e-01 : f32
    %602 = vector.broadcast %cst_209 : f32 to vector<8x128xf32>
    %603 = arith.mulf %602, %601 : vector<8x128xf32>
    %cst_210 = arith.constant 5.000000e-01 : f32
    %604 = vector.broadcast %cst_210 : f32 to vector<8x128xf32>
    %605 = arith.addf %603, %604 : vector<8x128xf32>
    %606 = vector.extract_strided_slice %597 {offsets = [0, 128], sizes = [8, 128], strides = [1, 1]} : vector<8x512xf32> to vector<8x128xf32>
    %cst_211 = arith.constant 5.000000e-01 : f32
    %607 = vector.broadcast %cst_211 : f32 to vector<8x128xf32>
    %608 = arith.mulf %607, %606 : vector<8x128xf32>
    %609 = math.tanh %608 : vector<8x128xf32>
    %cst_212 = arith.constant 5.000000e-01 : f32
    %610 = vector.broadcast %cst_212 : f32 to vector<8x128xf32>
    %611 = arith.mulf %610, %609 : vector<8x128xf32>
    %cst_213 = arith.constant 5.000000e-01 : f32
    %612 = vector.broadcast %cst_213 : f32 to vector<8x128xf32>
    %613 = arith.addf %611, %612 : vector<8x128xf32>
    %614 = vector.extract_strided_slice %597 {offsets = [0, 256], sizes = [8, 128], strides = [1, 1]} : vector<8x512xf32> to vector<8x128xf32>
    %615 = math.tanh %614 : vector<8x128xf32>
    %616 = vector.extract_strided_slice %597 {offsets = [0, 384], sizes = [8, 128], strides = [1, 1]} : vector<8x512xf32> to vector<8x128xf32>
    %cst_214 = arith.constant 5.000000e-01 : f32
    %617 = vector.broadcast %cst_214 : f32 to vector<8x128xf32>
    %618 = arith.mulf %617, %616 : vector<8x128xf32>
    %619 = math.tanh %618 : vector<8x128xf32>
    %cst_215 = arith.constant 5.000000e-01 : f32
    %620 = vector.broadcast %cst_215 : f32 to vector<8x128xf32>
    %621 = arith.mulf %620, %619 : vector<8x128xf32>
    %cst_216 = arith.constant 5.000000e-01 : f32
    %622 = vector.broadcast %cst_216 : f32 to vector<8x128xf32>
    %623 = arith.addf %621, %622 : vector<8x128xf32>
    %624 = arith.mulf %613, %545 : vector<8x128xf32>
    %625 = arith.mulf %605, %615 : vector<8x128xf32>
    %626 = arith.addf %624, %625 : vector<8x128xf32>
    %627 = math.tanh %626 : vector<8x128xf32>
    %628 = arith.mulf %623, %627 : vector<8x128xf32>
    %629 = arith.truncf %628 : vector<8x128xf32> to vector<8x128xbf16>
    %cst_217 = arith.constant dense<0.000000e+00> : vector<8x512xf32>
    %630 = tpu.matmul %629, %5, %cst_217 {dimension_numbers = #tpu.dot_dimension_numbers<[1], [0], [0], [1], [0, 0, 1, 1], [], []>} : vector<8x128xbf16>, vector<128x512xbf16>, vector<8x512xf32> -> vector<8x512xf32>
    %cst_218 = arith.constant dense<0.000000e+00> : vector<8x512xf32>
    %631 = tpu.matmul %584, %7, %cst_218 {dimension_numbers = #tpu.dot_dimension_numbers<[1], [0], [0], [1], [0, 0, 1, 1], [], []>} : vector<8x128xbf16>, vector<128x512xbf16>, vector<8x512xf32> -> vector<8x512xf32>
    %632 = arith.addf %630, %631 : vector<8x512xf32>
    %633 = arith.addf %632, %13 : vector<8x512xf32>
    %634 = vector.extract_strided_slice %633 {offsets = [0, 0], sizes = [8, 128], strides = [1, 1]} : vector<8x512xf32> to vector<8x128xf32>
    %cst_219 = arith.constant 5.000000e-01 : f32
    %635 = vector.broadcast %cst_219 : f32 to vector<8x128xf32>
    %636 = arith.mulf %635, %634 : vector<8x128xf32>
    %637 = math.tanh %636 : vector<8x128xf32>
    %cst_220 = arith.constant 5.000000e-01 : f32
    %638 = vector.broadcast %cst_220 : f32 to vector<8x128xf32>
    %639 = arith.mulf %638, %637 : vector<8x128xf32>
    %cst_221 = arith.constant 5.000000e-01 : f32
    %640 = vector.broadcast %cst_221 : f32 to vector<8x128xf32>
    %641 = arith.addf %639, %640 : vector<8x128xf32>
    %642 = vector.extract_strided_slice %633 {offsets = [0, 128], sizes = [8, 128], strides = [1, 1]} : vector<8x512xf32> to vector<8x128xf32>
    %cst_222 = arith.constant 5.000000e-01 : f32
    %643 = vector.broadcast %cst_222 : f32 to vector<8x128xf32>
    %644 = arith.mulf %643, %642 : vector<8x128xf32>
    %645 = math.tanh %644 : vector<8x128xf32>
    %cst_223 = arith.constant 5.000000e-01 : f32
    %646 = vector.broadcast %cst_223 : f32 to vector<8x128xf32>
    %647 = arith.mulf %646, %645 : vector<8x128xf32>
    %cst_224 = arith.constant 5.000000e-01 : f32
    %648 = vector.broadcast %cst_224 : f32 to vector<8x128xf32>
    %649 = arith.addf %647, %648 : vector<8x128xf32>
    %650 = vector.extract_strided_slice %633 {offsets = [0, 256], sizes = [8, 128], strides = [1, 1]} : vector<8x512xf32> to vector<8x128xf32>
    %651 = math.tanh %650 : vector<8x128xf32>
    %652 = vector.extract_strided_slice %633 {offsets = [0, 384], sizes = [8, 128], strides = [1, 1]} : vector<8x512xf32> to vector<8x128xf32>
    %cst_225 = arith.constant 5.000000e-01 : f32
    %653 = vector.broadcast %cst_225 : f32 to vector<8x128xf32>
    %654 = arith.mulf %653, %652 : vector<8x128xf32>
    %655 = math.tanh %654 : vector<8x128xf32>
    %cst_226 = arith.constant 5.000000e-01 : f32
    %656 = vector.broadcast %cst_226 : f32 to vector<8x128xf32>
    %657 = arith.mulf %656, %655 : vector<8x128xf32>
    %cst_227 = arith.constant 5.000000e-01 : f32
    %658 = vector.broadcast %cst_227 : f32 to vector<8x128xf32>
    %659 = arith.addf %657, %658 : vector<8x128xf32>
    %660 = arith.mulf %649, %581 : vector<8x128xf32>
    %661 = arith.mulf %641, %651 : vector<8x128xf32>
    %662 = arith.addf %660, %661 : vector<8x128xf32>
    %663 = math.tanh %662 : vector<8x128xf32>
    %664 = arith.mulf %659, %663 : vector<8x128xf32>
    %665 = arith.truncf %664 : vector<8x128xf32> to vector<8x128xbf16>
    %666 = vector.broadcast %591 : i32 to vector<8x1xi32>
    %667 = arith.cmpi eq, %3, %666 : vector<8x1xi32>
    %668 = vector.shape_cast %667 : vector<8x1xi1> to vector<8x1xi1>
    %669 = vector.broadcast %668 : vector<8x1xi1> to vector<8x128xi1>
    %670 = arith.select %669, %664, %589 : vector<8x128xi1>, vector<8x128xf32>
    %c0_228 = arith.constant 0 : index
    %c0_229 = arith.constant 0 : index
    %c0_230 = arith.constant 0 : index
    %671 = vector.load %arg11[%c0_228, %c0_229, %c0_230] : memref<2x8x128xbf16, #tpu.memory_space<vmem>>, vector<1x8x128xbf16>
    %672 = vector.shape_cast %671 : vector<1x8x128xbf16> to vector<8x128xbf16>
    %673 = vector.shape_cast %629 : vector<8x128xbf16> to vector<1x8x128xbf16>
    tpu.vector_store %arg11[%c0_228, %c0_229, %c0_230], %673 {strides = array<i32>} : memref<2x8x128xbf16, #tpu.memory_space<vmem>>, vector<1x8x128xbf16>,
    %c0_231 = arith.constant 0 : index
    %c0_232 = arith.constant 0 : index
    %c0_233 = arith.constant 0 : index
    %674 = vector.load %arg12[%c0_231, %c0_232, %c0_233] : memref<2x8x128xf32, #tpu.memory_space<vmem>>, vector<1x8x128xf32>
    %675 = vector.shape_cast %674 : vector<1x8x128xf32> to vector<8x128xf32>
    %676 = vector.shape_cast %626 : vector<8x128xf32> to vector<1x8x128xf32>
    tpu.vector_store %arg12[%c0_231, %c0_232, %c0_233], %676 {strides = array<i32>} : memref<2x8x128xf32, #tpu.memory_space<vmem>>, vector<1x8x128xf32>,
    %c1_234 = arith.constant 1 : index
    %c0_235 = arith.constant 0 : index
    %c0_236 = arith.constant 0 : index
    %677 = vector.load %arg11[%c1_234, %c0_235, %c0_236] : memref<2x8x128xbf16, #tpu.memory_space<vmem>>, vector<1x8x128xbf16>
    %678 = vector.shape_cast %677 : vector<1x8x128xbf16> to vector<8x128xbf16>
    %679 = vector.shape_cast %665 : vector<8x128xbf16> to vector<1x8x128xbf16>
    tpu.vector_store %arg11[%c1_234, %c0_235, %c0_236], %679 {strides = array<i32>} : memref<2x8x128xbf16, #tpu.memory_space<vmem>>, vector<1x8x128xbf16>,
    %c1_237 = arith.constant 1 : index
    %c0_238 = arith.constant 0 : index
    %c0_239 = arith.constant 0 : index
    %680 = vector.load %arg12[%c1_237, %c0_238, %c0_239] : memref<2x8x128xf32, #tpu.memory_space<vmem>>, vector<1x8x128xf32>
    %681 = vector.shape_cast %680 : vector<1x8x128xf32> to vector<8x128xf32>
    %682 = vector.shape_cast %662 : vector<8x128xf32> to vector<1x8x128xf32>
    tpu.vector_store %arg12[%c1_237, %c0_238, %c0_239], %682 {strides = array<i32>} : memref<2x8x128xf32, #tpu.memory_space<vmem>>, vector<1x8x128xf32>,
    %c0_240 = arith.constant 0 : index
    %c0_241 = arith.constant 0 : index
    %683 = vector.load %arg13[%c0_240, %c0_241] : memref<8x128xf32, #tpu.memory_space<vmem>>, vector<8x128xf32>
    tpu.vector_store %arg13[%c0_240, %c0_241], %670 {strides = array<i32>} : memref<8x128xf32, #tpu.memory_space<vmem>>, vector<8x128xf32>,
    %c0_i32_242 = arith.constant 0 : i32
    %684 = arith.cmpi eq, %arg1, %c0_i32_242 : i32
    %685 = arith.extui %684 : i1 to i32
    %c0_i32_243 = arith.constant 0 : i32
    %686 = arith.cmpi ne, %685, %c0_i32_243 : i32
    scf.if %686 {
      %687 = arith.mulf %670, %670 : vector<8x128xf32>
      %cst_244 = arith.constant dense<0.000000e+00> : vector<8xf32>
      %688 = vector.multi_reduction <add>, %687, %cst_244 [1] : vector<8x128xf32> to vector<8xf32>
      %689 = vector.shape_cast %688 : vector<8xf32> to vector<8x1xf32>
      %cst_245 = arith.constant 1.000000e-24 : f32
      %690 = vector.broadcast %cst_245 : f32 to vector<8x1xf32>
      %691 = arith.maximumf %689, %690 : vector<8x1xf32>
      %692 = math.rsqrt %691 : vector<8x1xf32>
      %693 = vector.broadcast %692 : vector<8x1xf32> to vector<8x128xf32>
      %694 = arith.mulf %670, %693 : vector<8x128xf32>
      %c0_246 = arith.constant 0 : index
      %c0_247 = arith.constant 0 : index
      %695 = vector.load %arg10[%c0_246, %c0_247] : memref<8x128xf32, #tpu.memory_space<vmem>>, vector<8x128xf32>
      tpu.vector_store %arg10[%c0_246, %c0_247], %694 {strides = array<i32>} : memref<8x128xf32, #tpu.memory_space<vmem>>, vector<8x128xf32>,
    } else {
    }
    return
  }
  func.func @transform_0(%arg0: i32, %arg1: i32) -> (i32, i32, i32) {
    %c0_i32 = arith.constant 0 : i32
    %c0_i32_0 = arith.constant 0 : i32
    return %arg1, %arg0, %c0_i32 : i32, i32, i32
  }
  func.func @transform_1(%arg0: i32, %arg1: i32) -> (i32, i32) {
    %c0_i32 = arith.constant 0 : i32
    %c0_i32_0 = arith.constant 0 : i32
    return %arg0, %c0_i32 : i32, i32
  }
  func.func @transform_2(%arg0: i32, %arg1: i32) -> (i32, i32) {
    %c0_i32 = arith.constant 0 : i32
    %c0_i32_0 = arith.constant 0 : i32
    %c0_i32_1 = arith.constant 0 : i32
    return %c0_i32, %c0_i32_0 : i32, i32
  }
  func.func @transform_3(%arg0: i32, %arg1: i32) -> (i32, i32) {
    %c0_i32 = arith.constant 0 : i32
    %c0_i32_0 = arith.constant 0 : i32
    %c0_i32_1 = arith.constant 0 : i32
    return %c0_i32, %c0_i32_0 : i32, i32
  }
  func.func @transform_4(%arg0: i32, %arg1: i32) -> (i32, i32) {
    %c0_i32 = arith.constant 0 : i32
    %c0_i32_0 = arith.constant 0 : i32
    %c0_i32_1 = arith.constant 0 : i32
    return %c0_i32, %c0_i32_0 : i32, i32
  }
  func.func @transform_5(%arg0: i32, %arg1: i32) -> (i32, i32) {
    %c0_i32 = arith.constant 0 : i32
    %c0_i32_0 = arith.constant 0 : i32
    %c0_i32_1 = arith.constant 0 : i32
    return %c0_i32, %c0_i32_0 : i32, i32
  }
  func.func @transform_6(%arg0: i32, %arg1: i32) -> (i32, i32) {
    %c0_i32 = arith.constant 0 : i32
    %c0_i32_0 = arith.constant 0 : i32
    %c0_i32_1 = arith.constant 0 : i32
    return %c0_i32, %c0_i32_0 : i32, i32
  }
  func.func @transform_7(%arg0: i32, %arg1: i32) -> (i32, i32) {
    %c0_i32 = arith.constant 0 : i32
    %c0_i32_0 = arith.constant 0 : i32
    %c0_i32_1 = arith.constant 0 : i32
    return %c0_i32, %c0_i32_0 : i32, i32
  }
  func.func @transform_8(%arg0: i32, %arg1: i32) -> (i32, i32) {
    %c0_i32 = arith.constant 0 : i32
    %c0_i32_0 = arith.constant 0 : i32
    return %arg0, %c0_i32 : i32, i32
  }
}

</mosaic_0001>

<bundles_post_ra>
// kernel: encoder_forward.1
= control target key start
LH: loop header
LB: loop body
LE: loop exit
PB: predicated region body
PF: predicated region fallthrough
CT: control target
= control target key end

     0   :  { %v8069_v1 = vmov 0   ;;  %s8060_s3 = inlined_call_operand.vmem [shape: bf16[128,512], index: 3, kind: input, shape index: {}]   ;;  %s8061_s2 = inlined_call_operand.vmem [shape: bf16[128,512], index: 2, kind: input, shape index: {}]   ;;  %s8062_s0 = inlined_call_operand.vmem [shape: bf16[8,8,128], index: 0, kind: input, shape index: {}]   ;;  %s8063_s6 = inlined_call_operand.vmem [shape: bf16[128,512], index: 6, kind: input, shape index: {}]   ;;  %s8064_s5 = inlined_call_operand.vmem [shape: bf16[128,512], index: 5, kind: input, shape index: {}]   ;;  %s8065_s1 = inlined_call_operand.vmem [shape: s32[8,1], index: 1, kind: input, shape index: {}]   ;;  %s8066_s4 = inlined_call_operand.vmem [shape: f32[1,512], index: 4, kind: input, shape index: {}]   ;;  %s8067_s7 = inlined_call_operand.vmem [shape: f32[1,512], index: 7, kind: input, shape index: {}]   ;;  %s8068_s8 = inlined_call_operand.vmem [shape: f32[8,128], index: 8, kind: output, shape index: {}]  }
   0x1   :  { %v4761_v0 = vld [vmem:[%s8060_s3 + $0x4] ss:$16 sps:$4 sm:$0xff]   ;;  %413 = vmatprep.mubr.bf16.mxu0 %v8069_v1  ;;  %34 = vst [vmem:[#allocation2] sm:$0xf] %v8069_v1  ;;  %35 = vst [vmem:[#allocation2 + $0x4] sm:$0xf] %v8069_v1  ;;  %454 = vmatprep.mubr.bf16.mxu1 %v8069_v1 }
   0x2   :  { %v4770_v2 = vld [vmem:[%s8060_s3 + $0xc] ss:$16 sps:$4 sm:$0xff]   ;;  %4098 = vset.pattern.permute.xlu0 %v8069_v1  ;;  %4099 = vset.pattern.permute.xlu1 %v8069_v1  ;;  %v4778_v3 = vld [vmem:[%s8060_s3] ss:$16 sps:$4 sm:$0xff]   ;;  %v4783_v4 = vld [vmem:[%s8060_s3 + $0x8] ss:$16 sps:$4 sm:$0xff]  }
   0x3   :  { %381 = vmatprep.subr.bf16.mxu0 %v4761_v0  ;;  %422 = vmatprep.subr.bf16.mxu1 %v4770_v2  ;;  %v4789_v5 = vld [vmem:[%s8060_s3 + $0x24] ss:$16 sps:$4 sm:$0xff]   ;;  %v4796_v6 = vld [vmem:[%s8060_s3 + $0x2c] ss:$16 sps:$4 sm:$0xff]   ;;  %v4801_v7 = vld [vmem:[%s8060_s3 + $0x20] ss:$16 sps:$4 sm:$0xff]  }
   0x4   :  { %382 = vmatpush1.bf16.msra.mxu0 %v4778_v3  ;;  %423 = vmatpush1.bf16.msra.mxu1 %v4783_v4  ;;  %v4807_v8 = vld [vmem:[%s8060_s3 + $0x28] ss:$16 sps:$4 sm:$0xff]   ;;  %v4813_v9 = vld [vmem:[%s8060_s3 + $0x44] ss:$16 sps:$4 sm:$0xff]   ;;  %v4818_v10 = vld [vmem:[%s8060_s3 + $0x4c] ss:$16 sps:$4 sm:$0xff]  }
   0x5   :  { %383 = vmatprep.subr.bf16.mxu0 %v4789_v5  ;;  %424 = vmatprep.subr.bf16.mxu1 %v4796_v6  ;;  %v4823_v11 = vld [vmem:[%s8060_s3 + $0x40] ss:$16 sps:$4 sm:$0xff]   ;;  %v4828_v12 = vld [vmem:[%s8060_s3 + $0x48] ss:$16 sps:$4 sm:$0xff]   ;;  %v4835_v13 = vld [vmem:[%s8060_s3 + $0x64] ss:$16 sps:$4 sm:$0xff]  }
   0x6   :  { %v4842_v14 = vld [vmem:[%s8060_s3 + $0x6c] ss:$16 sps:$4 sm:$0xff]   ;;  %v4847_v15 = vld [vmem:[%s8060_s3 + $0x60] ss:$16 sps:$4 sm:$0xff]   ;;  %v4854_v16 = vld [vmem:[%s8060_s3 + $0x68] ss:$16 sps:$4 sm:$0xff]  }
   0x7   :  { %v4859_v17 = vld [vmem:[%s8060_s3 + $0x84] ss:$16 sps:$4 sm:$0xff]   ;;  %v4866_v18 = vld [vmem:[%s8060_s3 + $0x8c] ss:$16 sps:$4 sm:$0xff]   ;;  %v4871_v19 = vld [vmem:[%s8060_s3 + $0x80] ss:$16 sps:$4 sm:$0xff]  }
   0x8   :  { %384 = vmatpush1.bf16.msra.mxu0 %v4801_v7  ;;  %425 = vmatpush1.bf16.msra.mxu1 %v4807_v8  ;;  %v4876_v20 = vld [vmem:[%s8060_s3 + $0x88] ss:$16 sps:$4 sm:$0xff]   ;;  %v4883_v21 = vld [vmem:[%s8060_s3 + $0xa4] ss:$16 sps:$4 sm:$0xff]   ;;  %v4890_v22 = vld [vmem:[%s8060_s3 + $0xac] ss:$16 sps:$4 sm:$0xff]  }
   0x9   :  { %385 = vmatprep.subr.bf16.mxu0 %v4813_v9  ;;  %426 = vmatprep.subr.bf16.mxu1 %v4818_v10  ;;  %v4897_v23 = vld [vmem:[%s8060_s3 + $0xa0] ss:$16 sps:$4 sm:$0xff]   ;;  %v4902_v24 = vld [vmem:[%s8060_s3 + $0xa8] ss:$16 sps:$4 sm:$0xff]   ;;  %v4909_v25 = vld [vmem:[%s8060_s3 + $0xc4] ss:$16 sps:$4 sm:$0xff]  }
   0xa   :  { %v4914_v26 = vld [vmem:[%s8060_s3 + $0xcc] ss:$16 sps:$4 sm:$0xff]   ;;  %v4919_v27 = vld [vmem:[%s8060_s3 + $0xc0] ss:$16 sps:$4 sm:$0xff]   ;;  %v4924_v28 = vld [vmem:[%s8060_s3 + $0xc8] ss:$16 sps:$4 sm:$0xff]  }
   0xb   :  { %v4931_v29 = vld [vmem:[%s8060_s3 + $0xe4] ss:$16 sps:$4 sm:$0xff]   ;;  %v4938_v30 = vld [vmem:[%s8060_s3 + $0xec] ss:$16 sps:$4 sm:$0xff]   ;;  %v4943_v31 = vld [vmem:[%s8060_s3 + $0xe0] ss:$16 sps:$4 sm:$0xff]  }
   0xc   :  { %386 = vmatpush1.bf16.msra.mxu0 %v4823_v11  ;;  %427 = vmatpush1.bf16.msra.mxu1 %v4828_v12  ;;  %v4950_v32 = vld [vmem:[%s8060_s3 + $0xe8] ss:$16 sps:$4 sm:$0xff]   ;;  %v4957_v33 = vld [vmem:[%s8061_s2 + $0x4] ss:$16 sps:$4 sm:$0xff]   ;;  %v4962_v34 = vld [vmem:[%s8061_s2 + $0xc] ss:$16 sps:$4 sm:$0xff]  }
   0xd   :  { %387 = vmatprep.subr.bf16.mxu0 %v4835_v13  ;;  %428 = vmatprep.subr.bf16.mxu1 %v4842_v14  ;;  %v213_v35 = vld [vmem:[#allocation2] sm:$0xf]  ;;  %v4972_v37 = vld [vmem:[%s8061_s2 + $0x8] ss:$16 sps:$4 sm:$0xff]   ;;  %v4979_v38 = vld [vmem:[%s8061_s2 + $0x24] ss:$16 sps:$4 sm:$0xff]  }
   0xe   :  { %v4967_v36 = vld [vmem:[%s8061_s2] ss:$16 sps:$4 sm:$0xff]   ;;  %v4986_v39 = vld [vmem:[%s8061_s2 + $0x2c] ss:$16 sps:$4 sm:$0xff]   ;;  %v4998_v41 = vld [vmem:[%s8061_s2 + $0x28] ss:$16 sps:$4 sm:$0xff]  }
   0xf   :  { %v4991_v40 = vld [vmem:[%s8061_s2 + $0x20] ss:$16 sps:$4 sm:$0xff]   ;;  %v5005_v42 = vld [vmem:[%s8061_s2 + $0x44] ss:$16 sps:$4 sm:$0xff]   ;;  %v5010_v43 = vld [vmem:[%s8061_s2 + $0x4c] ss:$16 sps:$4 sm:$0xff]  }
  0x10   :  { %388 = vmatpush1.bf16.msra.mxu0 %v4847_v15  ;;  %429 = vmatpush1.bf16.msra.mxu1 %v4854_v16  ;;  %8540 = vst [vmem:[#allocation5_spill] sm:$0xff] %v5005_v42  ;;  %8541 = vst [vmem:[#allocation6_spill] sm:$0xff] %v5010_v43  ;;  %v5017_v44 = vld [vmem:[%s8061_s2 + $0x40] ss:$16 sps:$4 sm:$0xff]   ;;  %v5022_v45 = vld [vmem:[%s8061_s2 + $0x48] ss:$16 sps:$4 sm:$0xff]  }
  0x11   :  { %389 = vmatprep.subr.bf16.mxu0 %v4859_v17  ;;  %430 = vmatprep.subr.bf16.mxu1 %v4866_v18  ;;  %8542 = vst [vmem:[#allocation7_spill] sm:$0xff] %v5017_v44  ;;  %8543 = vst [vmem:[#allocation8_spill] sm:$0xff] %v5022_v45  ;;  %v5029_v46 = vld [vmem:[%s8061_s2 + $0x64] ss:$16 sps:$4 sm:$0xff]   ;;  %v5036_v47 = vld [vmem:[%s8061_s2 + $0x6c] ss:$16 sps:$4 sm:$0xff]  }
  0x12   :  { %8544 = vst [vmem:[#allocation9_spill] sm:$0xff] %v5029_v46  ;;  %8545 = vst [vmem:[#allocation10_spill] sm:$0xff] %v5036_v47  ;;  %v5043_v48 = vld [vmem:[%s8061_s2 + $0x60] ss:$16 sps:$4 sm:$0xff]   ;;  %v5048_v49 = vld [vmem:[%s8061_s2 + $0x68] ss:$16 sps:$4 sm:$0xff]  }
  0x13   :  { %8546 = vst [vmem:[#allocation11_spill] sm:$0xff] %v5043_v48  ;;  %8547 = vst [vmem:[#allocation12_spill] sm:$0xff] %v5048_v49  ;;  %v5055_v50 = vld [vmem:[%s8061_s2 + $0x84] ss:$16 sps:$4 sm:$0xff]   ;;  %v5060_v51 = vld [vmem:[%s8061_s2 + $0x8c] ss:$16 sps:$4 sm:$0xff]  }
  0x14   :  { %390 = vmatpush1.bf16.msra.mxu0 %v4871_v19  ;;  %431 = vmatpush1.bf16.msra.mxu1 %v4876_v20  ;;  %8548 = vst [vmem:[#allocation13_spill] sm:$0xff] %v5055_v50  ;;  %8549 = vst [vmem:[#allocation14_spill] sm:$0xff] %v5060_v51  ;;  %v5067_v52 = vld [vmem:[%s8061_s2 + $0x80] ss:$16 sps:$4 sm:$0xff]   ;;  %v5072_v53 = vld [vmem:[%s8061_s2 + $0x88] ss:$16 sps:$4 sm:$0xff]  }
  0x15   :  { %391 = vmatprep.subr.bf16.mxu0 %v4883_v21  ;;  %432 = vmatprep.subr.bf16.mxu1 %v4890_v22  ;;  %8550 = vst [vmem:[#allocation15_spill] sm:$0xff] %v5067_v52  ;;  %8551 = vst [vmem:[#allocation16_spill] sm:$0xff] %v5072_v53  ;;  %v5079_v54 = vld [vmem:[%s8061_s2 + $0xa4] ss:$16 sps:$4 sm:$0xff]   ;;  %v5084_v55 = vld [vmem:[%s8061_s2 + $0xac] ss:$16 sps:$4 sm:$0xff]  }
  0x16   :  { %8552 = vst [vmem:[#allocation17_spill] sm:$0xff] %v5079_v54  ;;  %8553 = vst [vmem:[#allocation18_spill] sm:$0xff] %v5084_v55  ;;  %v5091_v56 = vld [vmem:[%s8061_s2 + $0xa0] ss:$16 sps:$4 sm:$0xff]   ;;  %v5096_v57 = vld [vmem:[%s8061_s2 + $0xa8] ss:$16 sps:$4 sm:$0xff]  }
  0x17   :  { %8554 = vst [vmem:[#allocation19_spill] sm:$0xff] %v5091_v56  ;;  %8555 = vst [vmem:[#allocation20_spill] sm:$0xff] %v5096_v57  ;;  %v5103_v58 = vld [vmem:[%s8061_s2 + $0xc4] ss:$16 sps:$4 sm:$0xff]   ;;  %v5108_v59 = vld [vmem:[%s8061_s2 + $0xcc] ss:$16 sps:$4 sm:$0xff]  }
  0x18   :  { %392 = vmatpush1.bf16.msra.mxu0 %v4897_v23  ;;  %433 = vmatpush1.bf16.msra.mxu1 %v4902_v24  ;;  %8556 = vst [vmem:[#allocation21_spill] sm:$0xff] %v5103_v58  ;;  %8557 = vst [vmem:[#allocation22_spill] sm:$0xff] %v5108_v59  ;;  %v5115_v60 = vld [vmem:[%s8061_s2 + $0xc0] ss:$16 sps:$4 sm:$0xff]   ;;  %v5120_v61 = vld [vmem:[%s8061_s2 + $0xc8] ss:$16 sps:$4 sm:$0xff]  }
  0x19   :  { %393 = vmatprep.subr.bf16.mxu0 %v4909_v25  ;;  %434 = vmatprep.subr.bf16.mxu1 %v4914_v26  ;;  %8558 = vst [vmem:[#allocation23_spill] sm:$0xff] %v5115_v60  ;;  %8559 = vst [vmem:[#allocation24_spill] sm:$0xff] %v5120_v61  ;;  %v5127_v62 = vld [vmem:[%s8061_s2 + $0xe4] ss:$16 sps:$4 sm:$0xff]   ;;  %v5132_v63 = vld [vmem:[%s8061_s2 + $0xec] ss:$16 sps:$4 sm:$0xff]  }
  0x1a   :  { %8560 = vst [vmem:[#allocation25_spill] sm:$0xff] %v5127_v62  ;;  %8561 = vst [vmem:[#allocation26_spill] sm:$0xff] %v5132_v63 }
  0x1c   :  { %394 = vmatpush1.bf16.msra.mxu0 %v4919_v27  ;;  %435 = vmatpush1.bf16.msra.mxu1 %v4924_v28 }
  0x1d   :  { %395 = vmatprep.subr.bf16.mxu0 %v4931_v29  ;;  %436 = vmatprep.subr.bf16.mxu1 %v4938_v30 }
  0x20   :  { %396 = vmatpush1.bf16.msra.mxu0 %v4943_v31  ;;  %437 = vmatpush1.bf16.msra.mxu1 %v4950_v32 }
  0x21   :  { %623 = vmatprep.subr.bf16.mxu0 %v4957_v33  ;;  %664 = vmatprep.subr.bf16.mxu1 %v4962_v34 }
  0x23   :  { %414 = vmatmul.mubr.bf16.vlgmr.msra.gmra.mrb[0].mxu0 %v213_v35  ;;  %455 = vmatmul.mubr.bf16.vlgmr.msra.gmra.mrb[0].mxu1 %v213_v35  ;;  %v5139_v35 = vld [vmem:[%s8061_s2 + $0xe0] ss:$16 sps:$4 sm:$0xff]  }
  0x24   :  { %624 = vmatpush1.bf16.msra.mxu0 %v4967_v36  ;;  %665 = vmatpush1.bf16.msra.mxu1 %v4972_v37  ;;  %8562 = vst [vmem:[#allocation27_spill] sm:$0xff] %v5139_v35 }
  0x25   :  { %625 = vmatprep.subr.bf16.mxu0 %v4979_v38  ;;  %666 = vmatprep.subr.bf16.mxu1 %v4986_v39 }
  0x26   :  { %655 = vmatprep.mubr.bf16.mxu0 %v8069_v1  ;;  %696 = vmatprep.mubr.bf16.mxu1 %v8069_v1  ;;  %v5144_v1 = vld [vmem:[%s8061_s2 + $0xe8] ss:$16 sps:$4 sm:$0xff]  }
  0x27   :  { %8563 = vst [vmem:[#allocation28_spill] sm:$0xff] %v5144_v1 }
  0x28   :  { %626 = vmatpush1.bf16.msra.mxu0 %v4991_v40  ;;  %667 = vmatpush1.bf16.msra.mxu1 %v4998_v41 }
  0x29   :  { %627 = vmatprep.subr.bf16.mxu0 %v5005_v42  ;;  %668 = vmatprep.subr.bf16.mxu1 %v5010_v43 }
  0x2c   :  { %628 = vmatpush1.bf16.msra.mxu0 %v5017_v44  ;;  %669 = vmatpush1.bf16.msra.mxu1 %v5022_v45 }
  0x2d   :  { %629 = vmatprep.subr.bf16.mxu0 %v5029_v46  ;;  %670 = vmatprep.subr.bf16.mxu1 %v5036_v47 }
  0x30   :  { %630 = vmatpush1.bf16.msra.mxu0 %v5043_v48  ;;  %671 = vmatpush1.bf16.msra.mxu1 %v5048_v49 }
  0x31   :  { %631 = vmatprep.subr.bf16.mxu0 %v5055_v50  ;;  %672 = vmatprep.subr.bf16.mxu1 %v5060_v51 }
  0x34   :  { %632 = vmatpush1.bf16.msra.mxu0 %v5067_v52  ;;  %673 = vmatpush1.bf16.msra.mxu1 %v5072_v53 }
  0x35   :  { %633 = vmatprep.subr.bf16.mxu0 %v5079_v54  ;;  %674 = vmatprep.subr.bf16.mxu1 %v5084_v55 }
  0x38   :  { %634 = vmatpush1.bf16.msra.mxu0 %v5091_v56  ;;  %675 = vmatpush1.bf16.msra.mxu1 %v5096_v57 }
  0x39   :  { %635 = vmatprep.subr.bf16.mxu0 %v5103_v58  ;;  %676 = vmatprep.subr.bf16.mxu1 %v5108_v59  ;;  %v5191_v59 = vld [vmem:[%s8063_s6 + $0x2c] ss:$16 sps:$4 sm:$0xff]  }
  0x3a   :  { %8571 = vst [vmem:[#allocation35_spill] sm:$0xff] %v5191_v59  ;;  %v5233_v58 = vld [vmem:[%s8063_s6 + $0x6c] ss:$16 sps:$4 sm:$0xff]  }
  0x3b   :  { %8578 = vst [vmem:[#allocation42_spill] sm:$0xff] %v5233_v58 }
  0x3c   :  { %636 = vmatpush1.bf16.msra.mxu0 %v5115_v60  ;;  %677 = vmatpush1.bf16.msra.mxu1 %v5120_v61  ;;  %v220_v61 = vld [vmem:[%s8062_s0] sm:$0xf]  ;;  %v8564_v60 = vmov 0  }
  0x3d   :  { %637 = vmatprep.subr.bf16.mxu0 %v5127_v62  ;;  %678 = vmatprep.subr.bf16.mxu1 %v5132_v63  ;;  %v5158_v62 = vld [vmem:[%s8063_s6 + $0x4] ss:$16 sps:$4 sm:$0xff]  }
  0x3e   :  { %8565 = vst [vmem:[#allocation29_spill] sm:$0xff] %v5158_v62  ;;  %v5180_v63 = vld [vmem:[%s8063_s6 + $0x24] ss:$16 sps:$4 sm:$0xff]  }
  0x3f   :  { %8569 = vst [vmem:[#allocation33_spill] sm:$0xff] %v5180_v63 }
  0x40   :  { %638 = vmatpush1.bf16.msra.mxu0 %v5139_v35  ;;  %679 = vmatpush1.bf16.msra.mxu1 %v5144_v1  ;;  %v5163_v35 = vld [vmem:[%s8063_s6] ss:$16 sps:$4 sm:$0xff]   ;;  %v5174_v1 = vld [vmem:[%s8063_s6 + $0x8] ss:$16 sps:$4 sm:$0xff]  }
  0x41   :  { %8566 = vst [vmem:[#allocation30_spill] sm:$0xff] %v5163_v35  ;;  %888 = vmatprep.subr.bf16.mxu0 %v5158_v62  ;;  %8568 = vst [vmem:[#allocation32_spill] sm:$0xff] %v5174_v1  ;;  %v5185_v62 = vld [vmem:[%s8063_s6 + $0x20] ss:$16 sps:$4 sm:$0xff]  }
  0x42   :  { %8570 = vst [vmem:[#allocation34_spill] sm:$0xff] %v5185_v62 }
  0x43   :  { %656 = vmatmul.mubr.bf16.vlgmr.msra.gmra.mrb[4].mxu0 %v220_v61  ;;  %697 = vmatmul.mubr.bf16.vlgmr.msra.gmra.mrb[4].mxu1 %v220_v61  ;;  %v5169_v61 = vld [vmem:[%s8063_s6 + $0xc] ss:$16 sps:$4 sm:$0xff]  }
  0x44   :  { %920 = vmatprep.mubr.bf16.mxu0 %v8564_v60  ;;  %961 = vmatprep.mubr.bf16.mxu1 %v8564_v60  ;;  %8567 = vst [vmem:[#allocation31_spill] sm:$0xff] %v5169_v61 }
  0x45   :  { %889 = vmatpush1.bf16.msra.mxu0 %v5163_v35  ;;  %929 = vmatprep.subr.bf16.mxu1 %v5169_v61  ;;  %v5198_v35 = vld [vmem:[%s8063_s6 + $0x28] ss:$16 sps:$4 sm:$0xff]   ;;  %v5204_v61 = vld [vmem:[%s8063_s6 + $0x44] ss:$16 sps:$4 sm:$0xff]  }
  0x46   :  { %930 = vmatpush1.bf16.msra.mxu1 %v5174_v1  ;;  %890 = vmatprep.subr.bf16.mxu0 %v5180_v63  ;;  %8572 = vst [vmem:[#allocation36_spill] sm:$0xff] %v5198_v35  ;;  %8573 = vst [vmem:[#allocation37_spill] sm:$0xff] %v5204_v61  ;;  %v5210_v1 = vld [vmem:[%s8063_s6 + $0x40] ss:$16 sps:$4 sm:$0xff]   ;;  %v5215_v63 = vld [vmem:[%s8063_s6 + $0x4c] ss:$16 sps:$4 sm:$0xff]  }
  0x47   :  { %931 = vmatprep.subr.bf16.mxu1 %v5191_v59  ;;  %8574 = vst [vmem:[#allocation38_spill] sm:$0xff] %v5210_v1  ;;  %8575 = vst [vmem:[#allocation39_spill] sm:$0xff] %v5215_v63  ;;  %v5221_v59 = vld [vmem:[%s8063_s6 + $0x64] ss:$16 sps:$4 sm:$0xff]  }
  0x48   :  { %8576 = vst [vmem:[#allocation40_spill] sm:$0xff] %v5221_v59 }
  0x49   :  { %891 = vmatpush1.bf16.msra.mxu0 %v5185_v62  ;;  %v5227_v62 = vld [vmem:[%s8063_s6 + $0x48] ss:$16 sps:$4 sm:$0xff]  }
  0x4a   :  { %892 = vmatprep.subr.bf16.mxu0 %v5204_v61  ;;  %932 = vmatpush1.bf16.msra.mxu1 %v5198_v35  ;;  %8577 = vst [vmem:[#allocation41_spill] sm:$0xff] %v5227_v62  ;;  %v5239_v61 = vld [vmem:[%s8063_s6 + $0x60] ss:$16 sps:$4 sm:$0xff]   ;;  %v5245_v35 = vld [vmem:[%s8063_s6 + $0x84] ss:$16 sps:$4 sm:$0xff]  }
  0x4b   :  { %933 = vmatprep.subr.bf16.mxu1 %v5215_v63  ;;  %8579 = vst [vmem:[#allocation43_spill] sm:$0xff] %v5239_v61  ;;  %8580 = vst [vmem:[#allocation44_spill] sm:$0xff] %v5245_v35  ;;  %v5251_v63 = vld [vmem:[%s8063_s6 + $0x68] ss:$16 sps:$4 sm:$0xff]  }
  0x4c   :  { %8581 = vst [vmem:[#allocation45_spill] sm:$0xff] %v5251_v63 }
  0x4d   :  { %893 = vmatpush1.bf16.msra.mxu0 %v5210_v1  ;;  %v5257_v1 = vld [vmem:[%s8063_s6 + $0x8c] ss:$16 sps:$4 sm:$0xff]  }
  0x4e   :  { %894 = vmatprep.subr.bf16.mxu0 %v5221_v59  ;;  %934 = vmatpush1.bf16.msra.mxu1 %v5227_v62  ;;  %8582 = vst [vmem:[#allocation46_spill] sm:$0xff] %v5257_v1  ;;  %v5263_v59 = vld [vmem:[%s8063_s6 + $0x80] ss:$16 sps:$4 sm:$0xff]   ;;  %v5268_v62 = vld [vmem:[%s8063_s6 + $0x88] ss:$16 sps:$4 sm:$0xff]  }
  0x4f   :  { %935 = vmatprep.subr.bf16.mxu1 %v5233_v58  ;;  %8583 = vst [vmem:[#allocation47_spill] sm:$0xff] %v5263_v59  ;;  %8584 = vst [vmem:[#allocation48_spill] sm:$0xff] %v5268_v62  ;;  %v5274_v58 = vld [vmem:[%s8063_s6 + $0xa4] ss:$16 sps:$4 sm:$0xff]  }
  0x50   :  { %8585 = vst [vmem:[#allocation49_spill] sm:$0xff] %v5274_v58 }
  0x51   :  { %895 = vmatpush1.bf16.msra.mxu0 %v5239_v61  ;;  %v5280_v61 = vld [vmem:[%s8063_s6 + $0xac] ss:$16 sps:$4 sm:$0xff]  }
  0x52   :  { %896 = vmatprep.subr.bf16.mxu0 %v5245_v35  ;;  %936 = vmatpush1.bf16.msra.mxu1 %v5251_v63  ;;  %8586 = vst [vmem:[#allocation50_spill] sm:$0xff] %v5280_v61  ;;  %v5287_v35 = vld [vmem:[%s8063_s6 + $0xa0] ss:$16 sps:$4 sm:$0xff]   ;;  %v5293_v63 = vld [vmem:[%s8063_s6 + $0xc4] ss:$16 sps:$4 sm:$0xff]  }
  0x53   :  { %937 = vmatprep.subr.bf16.mxu1 %v5257_v1  ;;  %8587 = vst [vmem:[#allocation51_spill] sm:$0xff] %v5287_v35  ;;  %8588 = vst [vmem:[#allocation52_spill] sm:$0xff] %v5293_v63  ;;  %v5299_v1 = vld [vmem:[%s8063_s6 + $0xa8] ss:$16 sps:$4 sm:$0xff]  }
  0x54   :  { %8589 = vst [vmem:[#allocation53_spill] sm:$0xff] %v5299_v1 }
  0x55   :  { %897 = vmatpush1.bf16.msra.mxu0 %v5263_v59 }
  0x56   :  { %898 = vmatprep.subr.bf16.mxu0 %v5274_v58  ;;  %938 = vmatpush1.bf16.msra.mxu1 %v5268_v62  ;;  %v5308_v58 = vld [vmem:[%s8063_s6 + $0xc0] ss:$16 sps:$4 sm:$0xff]   ;;  %v5314_v62 = vld [vmem:[%s8063_s6 + $0xcc] ss:$16 sps:$4 sm:$0xff]  }
  0x57   :  { %939 = vmatprep.subr.bf16.mxu1 %v5280_v61  ;;  %8590 = vst [vmem:[#allocation54_spill] sm:$0xff] %v5308_v58  ;;  %8591 = vst [vmem:[#allocation55_spill] sm:$0xff] %v5314_v62  ;;  %v5405_v61 = vld [vmem:[%s8064_s5 + $0x4c] ss:$16 sps:$4 sm:$0xff]  }
  0x58   :  { %8606 = vst [vmem:[#allocation70_spill] sm:$0xff] %v5405_v61 }
  0x59   :  { %899 = vmatpush1.bf16.msra.mxu0 %v5287_v35  ;;  %v5319_v35 = vld [vmem:[%s8063_s6 + $0xc8] ss:$16 sps:$4 sm:$0xff]  }
  0x5a   :  { %900 = vmatprep.subr.bf16.mxu0 %v5293_v63  ;;  %940 = vmatpush1.bf16.msra.mxu1 %v5299_v1  ;;  %8592 = vst [vmem:[#allocation56_spill] sm:$0xff] %v5319_v35  ;;  %v5325_v63 = vld [vmem:[%s8063_s6 + $0xe4] ss:$16 sps:$4 sm:$0xff]   ;;  %v5337_v1 = vld [vmem:[%s8063_s6 + $0xec] ss:$16 sps:$4 sm:$0xff]  }
  0x5b   :  { %941 = vmatprep.subr.bf16.mxu1 %v5314_v62  ;;  %8593 = vst [vmem:[#allocation57_spill] sm:$0xff] %v5325_v63  ;;  %8595 = vst [vmem:[#allocation59_spill] sm:$0xff] %v5337_v1  ;;  %v5343_v62 = vld [vmem:[%s8063_s6 + $0xe8] ss:$16 sps:$4 sm:$0xff]  }
  0x5c   :  { %8596 = vst [vmem:[#allocation60_spill] sm:$0xff] %v5343_v62 }
  0x5d   :  { %901 = vmatpush1.bf16.msra.mxu0 %v5308_v58  ;;  %v5331_v58 = vld [vmem:[%s8063_s6 + $0xe0] ss:$16 sps:$4 sm:$0xff]  }
  0x5e   :  { %942 = vmatpush1.bf16.msra.mxu1 %v5319_v35  ;;  %8594 = vst [vmem:[#allocation58_spill] sm:$0xff] %v5331_v58  ;;  %902 = vmatprep.subr.bf16.mxu0 %v5325_v63  ;;  %v215_v35 = vld [vmem:[#allocation2 + $0x4] sm:$0xf] }
  0x5f   :  { %943 = vmatprep.subr.bf16.mxu1 %v5337_v1  ;;  %v5350_v63 = vld [vmem:[%s8064_s5 + $0x4] ss:$16 sps:$4 sm:$0xff]   ;;  %v5367_v1 = vld [vmem:[%s8064_s5 + $0x8] ss:$16 sps:$4 sm:$0xff]  }
  0x60   :  { %8597 = vst [vmem:[#allocation61_spill] sm:$0xff] %v5350_v63  ;;  %8600 = vst [vmem:[#allocation64_spill] sm:$0xff] %v5367_v1 }
  0x61   :  { %903 = vmatpush1.bf16.msra.mxu0 %v5331_v58  ;;  %v5355_v58 = vld [vmem:[%s8064_s5 + $0xc] ss:$16 sps:$4 sm:$0xff]  }
  0x62   :  { %944 = vmatpush1.bf16.msra.mxu1 %v5343_v62  ;;  %8598 = vst [vmem:[#allocation62_spill] sm:$0xff] %v5355_v58  ;;  %1130 = vmatprep.subr.bf16.mxu0 %v5350_v63  ;;  %v5362_v62 = vld [vmem:[%s8064_s5] ss:$16 sps:$4 sm:$0xff]   ;;  %v5381_v63 = vld [vmem:[%s8064_s5 + $0x2c] ss:$16 sps:$4 sm:$0xff]  }
  0x63   :  { %8599 = vst [vmem:[#allocation63_spill] sm:$0xff] %v5362_v62  ;;  %1171 = vmatprep.subr.bf16.mxu1 %v5355_v58  ;;  %8602 = vst [vmem:[#allocation66_spill] sm:$0xff] %v5381_v63  ;;  %v5386_v58 = vld [vmem:[%s8064_s5 + $0x20] ss:$16 sps:$4 sm:$0xff]  }
  0x64   :  { %921 = vmatmul.mubr.bf16.vlgmr.msra.gmra.mrb[8].mxu0 %v215_v35  ;;  %8603 = vst [vmem:[#allocation67_spill] sm:$0xff] %v5386_v58 }
  0x65   :  { %1162 = vmatprep.mubr.bf16.mxu0 %v8564_v60  ;;  %962 = vmatmul.mubr.bf16.vlgmr.msra.gmra.mrb[8].mxu1 %v215_v35  ;;  %v5376_v35 = vld [vmem:[%s8064_s5 + $0x24] ss:$16 sps:$4 sm:$0xff]  }
  0x66   :  { %1203 = vmatprep.mubr.bf16.mxu1 %v8564_v60  ;;  %1131 = vmatpush1.bf16.msra.mxu0 %v5362_v62  ;;  %8601 = vst [vmem:[#allocation65_spill] sm:$0xff] %v5376_v35  ;;  %v5391_v62 = vld [vmem:[%s8064_s5 + $0x28] ss:$16 sps:$4 sm:$0xff]  }
  0x67   :  { %1172 = vmatpush1.bf16.msra.mxu1 %v5367_v1  ;;  %8604 = vst [vmem:[#allocation68_spill] sm:$0xff] %v5391_v62  ;;  %1132 = vmatprep.subr.bf16.mxu0 %v5376_v35  ;;  %v5400_v1 = vld [vmem:[%s8064_s5 + $0x44] ss:$16 sps:$4 sm:$0xff]   ;;  %v5410_v35 = vld [vmem:[%s8064_s5 + $0x40] ss:$16 sps:$4 sm:$0xff]  }
  0x68   :  { %1173 = vmatprep.subr.bf16.mxu1 %v5381_v63  ;;  %8605 = vst [vmem:[#allocation69_spill] sm:$0xff] %v5400_v1  ;;  %8607 = vst [vmem:[#allocation71_spill] sm:$0xff] %v5410_v35  ;;  %v5429_v63 = vld [vmem:[%s8064_s5 + $0x6c] ss:$16 sps:$4 sm:$0xff]  }
  0x69   :  { %8610 = vst [vmem:[#allocation74_spill] sm:$0xff] %v5429_v63 }
  0x6a   :  { %1133 = vmatpush1.bf16.msra.mxu0 %v5386_v58  ;;  %v5415_v58 = vld [vmem:[%s8064_s5 + $0x48] ss:$16 sps:$4 sm:$0xff]  }
  0x6b   :  { %1174 = vmatpush1.bf16.msra.mxu1 %v5391_v62  ;;  %8608 = vst [vmem:[#allocation72_spill] sm:$0xff] %v5415_v58  ;;  %1134 = vmatprep.subr.bf16.mxu0 %v5400_v1  ;;  %v5424_v62 = vld [vmem:[%s8064_s5 + $0x64] ss:$16 sps:$4 sm:$0xff]   ;;  %v5434_v1 = vld [vmem:[%s8064_s5 + $0x60] ss:$16 sps:$4 sm:$0xff]  }
  0x6c   :  { %1175 = vmatprep.subr.bf16.mxu1 %v5405_v61  ;;  %8609 = vst [vmem:[#allocation73_spill] sm:$0xff] %v5424_v62  ;;  %8611 = vst [vmem:[#allocation75_spill] sm:$0xff] %v5434_v1  ;;  %v5453_v61 = vld [vmem:[%s8064_s5 + $0x8c] ss:$16 sps:$4 sm:$0xff]  }
  0x6d   :  { %8614 = vst [vmem:[#allocation78_spill] sm:$0xff] %v5453_v61 }
  0x6e   :  { %1135 = vmatpush1.bf16.msra.mxu0 %v5410_v35  ;;  %v5439_v35 = vld [vmem:[%s8064_s5 + $0x68] ss:$16 sps:$4 sm:$0xff]  }
  0x6f   :  { %1176 = vmatpush1.bf16.msra.mxu1 %v5415_v58  ;;  %8612 = vst [vmem:[#allocation76_spill] sm:$0xff] %v5439_v35  ;;  %1136 = vmatprep.subr.bf16.mxu0 %v5424_v62  ;;  %v5448_v58 = vld [vmem:[%s8064_s5 + $0x84] ss:$16 sps:$4 sm:$0xff]   ;;  %v5458_v62 = vld [vmem:[%s8064_s5 + $0x80] ss:$16 sps:$4 sm:$0xff]  }
  0x70   :  { %1177 = vmatprep.subr.bf16.mxu1 %v5429_v63  ;;  %8613 = vst [vmem:[#allocation77_spill] sm:$0xff] %v5448_v58  ;;  %8615 = vst [vmem:[#allocation79_spill] sm:$0xff] %v5458_v62  ;;  %v5475_v63 = vld [vmem:[%s8064_s5 + $0xac] ss:$16 sps:$4 sm:$0xff]  }
  0x71   :  { %8618 = vst [vmem:[#allocation82_spill] sm:$0xff] %v5475_v63 }
  0x72   :  { %1137 = vmatpush1.bf16.msra.mxu0 %v5434_v1  ;;  %v5463_v1 = vld [vmem:[%s8064_s5 + $0x88] ss:$16 sps:$4 sm:$0xff]  }
  0x73   :  { %1178 = vmatpush1.bf16.msra.mxu1 %v5439_v35  ;;  %8616 = vst [vmem:[#allocation80_spill] sm:$0xff] %v5463_v1  ;;  %1138 = vmatprep.subr.bf16.mxu0 %v5448_v58  ;;  %v5470_v35 = vld [vmem:[%s8064_s5 + $0xa4] ss:$16 sps:$4 sm:$0xff]   ;;  %v5482_v58 = vld [vmem:[%s8064_s5 + $0xa0] ss:$16 sps:$4 sm:$0xff]  }
  0x74   :  { %1179 = vmatprep.subr.bf16.mxu1 %v5453_v61  ;;  %8617 = vst [vmem:[#allocation81_spill] sm:$0xff] %v5470_v35  ;;  %8619 = vst [vmem:[#allocation83_spill] sm:$0xff] %v5482_v58  ;;  %v5487_v61 = vld [vmem:[%s8064_s5 + $0xa8] ss:$16 sps:$4 sm:$0xff]  }
  0x75   :  { %8620 = vst [vmem:[#allocation84_spill] sm:$0xff] %v5487_v61 }
  0x76   :  { %1139 = vmatpush1.bf16.msra.mxu0 %v5458_v62  ;;  %v5494_v62 = vld [vmem:[%s8064_s5 + $0xc4] ss:$16 sps:$4 sm:$0xff]  }
  0x77   :  { %1180 = vmatpush1.bf16.msra.mxu1 %v5463_v1  ;;  %1140 = vmatprep.subr.bf16.mxu0 %v5470_v35  ;;  %8621 = vst [vmem:[#allocation85_spill] sm:$0xff] %v5494_v62  ;;  %v5499_v1 = vld [vmem:[%s8064_s5 + $0xcc] ss:$16 sps:$4 sm:$0xff]   ;;  %v5506_v35 = vld [vmem:[%s8064_s5 + $0xc0] ss:$16 sps:$4 sm:$0xff]  }
  0x78   :  { %1181 = vmatprep.subr.bf16.mxu1 %v5475_v63  ;;  %8622 = vst [vmem:[#allocation86_spill] sm:$0xff] %v5499_v1  ;;  %8623 = vst [vmem:[#allocation87_spill] sm:$0xff] %v5506_v35  ;;  %v5511_v63 = vld [vmem:[%s8064_s5 + $0xc8] ss:$16 sps:$4 sm:$0xff]  }
  0x79   :  { %8624 = vst [vmem:[#allocation88_spill] sm:$0xff] %v5511_v63 }
  0x7a   :  { %1141 = vmatpush1.bf16.msra.mxu0 %v5482_v58  ;;  %v5518_v58 = vld [vmem:[%s8064_s5 + $0xe4] ss:$16 sps:$4 sm:$0xff]  }
  0x7b   :  { %1182 = vmatpush1.bf16.msra.mxu1 %v5487_v61  ;;  %1142 = vmatprep.subr.bf16.mxu0 %v5494_v62  ;;  %8625 = vst [vmem:[#allocation89_spill] sm:$0xff] %v5518_v58  ;;  %v5523_v61 = vld [vmem:[%s8064_s5 + $0xec] ss:$16 sps:$4 sm:$0xff]   ;;  %v5530_v62 = vld [vmem:[%s8064_s5 + $0xe0] ss:$16 sps:$4 sm:$0xff]  }
  0x7c   :  { %1183 = vmatprep.subr.bf16.mxu1 %v5499_v1  ;;  %8626 = vst [vmem:[#allocation90_spill] sm:$0xff] %v5523_v61  ;;  %8627 = vst [vmem:[#allocation91_spill] sm:$0xff] %v5530_v62  ;;  %v5535_v1 = vld [vmem:[%s8064_s5 + $0xe8] ss:$16 sps:$4 sm:$0xff]  }
  0x7d   :  { %8628 = vst [vmem:[#allocation92_spill] sm:$0xff] %v5535_v1 }
  0x7e   :  { %1143 = vmatpush1.bf16.msra.mxu0 %v5506_v35 }
  0x7f   :  { %1184 = vmatpush1.bf16.msra.mxu1 %v5511_v63  ;;  %1144 = vmatprep.subr.bf16.mxu0 %v5518_v58 }
  0x80   :  { %1185 = vmatprep.subr.bf16.mxu1 %v5523_v61  ;;  %v5546_v61 = vld [vmem:[%s8065_s1] sm:$0xff] }
  0x81   :  { %8629 = vst [vmem:[#allocation93_spill] sm:$0xff] %v5546_v61  ;;  %vm1236_vm0 = vcmp.eq.s32.totalorder %v5546_v61, 0 }
  0x82   :  { %1145 = vmatpush1.bf16.msra.mxu0 %v5530_v62 }
  0x83   :  { %1186 = vmatpush1.bf16.msra.mxu1 %v5535_v1  ;;  %1246 = vmatprep.subr.bf16.mxu0 %v4761_v0  ;;  %v1237_v1 = vsel %vm1236_vm0, 1, %v8564_v60  ;;  %v170_v0 = vlaneseq }
  0x84   :  { %1287 = vmatprep.subr.bf16.mxu1 %v4770_v2  ;;  %1239 = vperm.xlu0 %4098, %v1237_v1  }
  0x85   :  { %v5550_v2 = vshrl.u32 %v170_v0, 7 }
  0x87   :  { %v8158_v62 = vsub.s32 0, %v5550_v2  ;;  %v184_v44 = vsub.s32 3, %v5550_v2 }
  0xf6   :  { %v415_v63 = vpop.f32.mrb[0].mxu0  ;;  %v456_v35 = vpop.f32.mrb[0].mxu1 }
  0xf7   :  { %v417_v59 = vpop.f32.mrb[1].mxu0  ;;  %v458_v57 = vpop.f32.mrb[1].mxu1 }
  0xf8   :  { %v419_v56 = vpop.f32.mrb[2].mxu0  ;;  %v460_v55 = vpop.f32.mrb[2].mxu1 }
  0xf9   :  { %v420_v54 = vpop.f32.mrb[3].mxu0  ;;  %v461_v53 = vpop.f32.mrb[3].mxu1  ;;  %v180_v56 = vsub.s32 2, %v5550_v2 }
  0xfa   :  { %v168_v54 = vld [vmem:[%s8066_s4] sm:$0xf]  ;;  %v8162_v53 = vsub.s32 1, %v5550_v2 }
  0xfb   :  { %v5559_v55 = vrot.slane %v168_v54, %v8158_v62  ;;  %v5569_v62 = vrot.slane %v168_v54, %v180_v56 }
  0xfc   :  { %v5564_v1 = vrot.slane %v168_v54, %v8162_v53 }
 0x116   :  { %v657_v58 = vpop.f32.mrb[4].mxu0  ;;  %v698_v61 = vpop.f32.mrb[4].mxu1 }
 0x117   :  { %v658_v0 = vadd.f32 %v657_v58, %v415_v63  ;;  %v699_v52 = vadd.f32 %v698_v61, %v456_v35  ;;  %v659_v51 = vpop.f32.mrb[5].mxu0  ;;  %v700_v50 = vpop.f32.mrb[5].mxu1 }
 0x118   :  { %v660_v49 = vadd.f32 %v659_v51, %v417_v59  ;;  %v701_v48 = vadd.f32 %v700_v50, %v458_v57  ;;  %v661_v47 = vpop.f32.mrb[6].mxu0  ;;  %v702_v46 = vpop.f32.mrb[6].mxu1 }
 0x119   :  { %v705_v45 = vadd.f32 %v658_v0, %v5559_v55  ;;  %v662_v43 = vpop.f32.mrb[7].mxu0  ;;  %v703_v42 = vpop.f32.mrb[7].mxu1  ;;  %v707_v51 = vadd.f32 %v699_v52, %v5569_v62  ;;  %v5576_v46 = vrot.slane %v168_v54, %v184_v44 }
 0x11a   :  { %v706_v53 = vadd.f32 %v660_v49, %v5564_v1 }
 0x11b   :  { %v709_v58 = vmul.f32 0.5, %v705_v45  ;;  %8630 = vst [vmem:[#allocation94_spill] sm:$0xff] %v5576_v46  ;;  %v708_v47 = vadd.f32 %v701_v48, %v5576_v46 }
 0x11c   :  { %v713_v63 = vmul.f32 0.5, %v706_v53 }
 0x11d   :  { %4292 = vtanh.f32 %v709_v58  ;;  %v718_v50 = vmul.f32 0.5, %v708_v47  ;;  %v8660_v47 = vld [vmem:[#allocation35_spill] sm:$0xff] }
 0x11e   :  { %4294 = vtanh.f32 %v713_v63 }
 0x11f   :  { %4296 = vtanh.f32 %v707_v51 }
 0x120   :  { %4298 = vtanh.f32 %v718_v50  ;;  %v8661_v50 = vld [vmem:[#allocation34_spill] sm:$0xff] }
 0x127   :  { %v4293_v57 = vpop.eup %4292 }
 0x128   :  { %v4295_v59 = vpop.eup %4294  ;;  %v711_v43 = vmul.f32 0.5, %v4293_v57  ;;  %v8662_v57 = vld [vmem:[#allocation36_spill] sm:$0xff] }
 0x129   :  { %v715_v42 = vmul.f32 0.5, %v4295_v59  ;;  %v4297_v45 = vpop.eup %4296  ;;  %v8663_v59 = vld [vmem:[#allocation37_spill] sm:$0xff] }
 0x12a   :  { %v712_v49 = vadd.f32 0.5, %v711_v43  ;;  %v4299_v54 = vpop.eup %4298  ;;  %v8664_v43 = vld [vmem:[#allocation39_spill] sm:$0xff] }
 0x12b   :  { %v716_v61 = vadd.f32 0.5, %v715_v42  ;;  %v720_v0 = vmul.f32 0.5, %v4299_v54  ;;  %v8665_v42 = vld [vmem:[#allocation38_spill] sm:$0xff]  ;;  %v8671_v54 = vld [vmem:[#allocation44_spill] sm:$0xff] }
 0x12c   :  { %v723_v35 = vmul.f32 %v4297_v45, %v712_v49  ;;  %v8666_v49 = vld [vmem:[#allocation41_spill] sm:$0xff]  ;;  %v8667_v45 = vld [vmem:[#allocation40_spill] sm:$0xff] }
 0x12d   :  { %v722_v53 = vmul.f32 0.0, %v716_v61  ;;  %v721_v58 = vadd.f32 0.5, %v720_v0  ;;  %v8668_v61 = vld [vmem:[#allocation42_spill] sm:$0xff] }
 0x12e   :  { %v8672_v0 = vld [vmem:[#allocation46_spill] sm:$0xff] }
 0x12f   :  { %v5579_v52 = vadd.f32 %v723_v35, %v722_v53  ;;  %v8669_v35 = vld [vmem:[#allocation43_spill] sm:$0xff]  ;;  %v8670_v53 = vld [vmem:[#allocation45_spill] sm:$0xff] }
 0x131   :  { %4300 = vtanh.f32 %v5579_v52 }
 0x13b   :  { %v4301_v63 = vpop.eup %4300 }
 0x13c   :  { %v726_v48 = vmul.f32 %v4301_v63, %v721_v58  ;;  %v8673_v58 = vld [vmem:[#allocation47_spill] sm:$0xff]  ;;  %v8674_v63 = vld [vmem:[#allocation48_spill] sm:$0xff] }
 0x13e   :  { %v727_v51 = vpack.c.bf16 %v726_v48, %v726_v48  ;;  %v8675_v48 = vld [vmem:[#allocation49_spill] sm:$0xff] }
 0x140   :  { %1163 = vmatmul.mubr.bf16.vlgmr.msra.gmra.mrb[12].mxu0 %v727_v51  ;;  %1204 = vmatmul.mubr.bf16.vlgmr.msra.gmra.mrb[12].mxu1 %v727_v51 }
 0x141   :  { %1247 = vmatpush1.bf16.msra.mxu0 %v4778_v3  ;;  %1288 = vmatpush1.bf16.msra.mxu1 %v4783_v4  ;;  %v8631_v3 = vld [vmem:[#allocation5_spill] sm:$0xff]  ;;  %v8632_v4 = vld [vmem:[#allocation6_spill] sm:$0xff] }
 0x142   :  { %1248 = vmatprep.subr.bf16.mxu0 %v4789_v5  ;;  %1289 = vmatprep.subr.bf16.mxu1 %v4796_v6  ;;  %v8633_v5 = vld [vmem:[#allocation7_spill] sm:$0xff]  ;;  %v8634_v6 = vld [vmem:[#allocation8_spill] sm:$0xff] }
 0x143   :  { %1278 = vmatprep.mubr.bf16.mxu0 %v8564_v60  ;;  %1319 = vmatprep.mubr.bf16.mxu1 %v8564_v60 }
 0x145   :  { %1249 = vmatpush1.bf16.msra.mxu0 %v4801_v7  ;;  %1290 = vmatpush1.bf16.msra.mxu1 %v4807_v8  ;;  %v8635_v7 = vld [vmem:[#allocation9_spill] sm:$0xff]  ;;  %v8636_v8 = vld [vmem:[#allocation10_spill] sm:$0xff] }
 0x146   :  { %1250 = vmatprep.subr.bf16.mxu0 %v4813_v9  ;;  %1291 = vmatprep.subr.bf16.mxu1 %v4818_v10  ;;  %v8637_v9 = vld [vmem:[#allocation11_spill] sm:$0xff]  ;;  %v8638_v10 = vld [vmem:[#allocation12_spill] sm:$0xff] }
 0x149   :  { %1251 = vmatpush1.bf16.msra.mxu0 %v4823_v11  ;;  %1292 = vmatpush1.bf16.msra.mxu1 %v4828_v12  ;;  %v8639_v11 = vld [vmem:[#allocation13_spill] sm:$0xff]  ;;  %v8640_v12 = vld [vmem:[#allocation14_spill] sm:$0xff] }
 0x14a   :  { %1252 = vmatprep.subr.bf16.mxu0 %v4835_v13  ;;  %1293 = vmatprep.subr.bf16.mxu1 %v4842_v14  ;;  %v8641_v13 = vld [vmem:[#allocation15_spill] sm:$0xff]  ;;  %v8642_v14 = vld [vmem:[#allocation16_spill] sm:$0xff] }
 0x14d   :  { %1253 = vmatpush1.bf16.msra.mxu0 %v4847_v15  ;;  %1294 = vmatpush1.bf16.msra.mxu1 %v4854_v16  ;;  %v5636_v15 = vpop.f32.mrb[8].mxu0  ;;  %v8643_v16 = vld [vmem:[#allocation17_spill] sm:$0xff] }
 0x14e   :  { %1254 = vmatprep.subr.bf16.mxu0 %v4859_v17  ;;  %1295 = vmatprep.subr.bf16.mxu1 %v4866_v18  ;;  %v8644_v17 = vld [vmem:[#allocation18_spill] sm:$0xff]  ;;  %v5640_v18 = vpop.f32.mrb[9].mxu0 }
 0x151   :  { %1255 = vmatpush1.bf16.msra.mxu0 %v4871_v19  ;;  %1296 = vmatpush1.bf16.msra.mxu1 %v4876_v20  ;;  %v926_v19 = vpop.f32.mrb[10].mxu0  ;;  %v963_v20 = vpop.f32.mrb[8].mxu1 }
 0x152   :  { %1256 = vmatprep.subr.bf16.mxu0 %v4883_v21  ;;  %1297 = vmatprep.subr.bf16.mxu1 %v4890_v22  ;;  %v927_v21 = vpop.f32.mrb[11].mxu0  ;;  %v5642_v22 = vpop.f32.mrb[9].mxu1 }
 0x155   :  { %1257 = vmatpush1.bf16.msra.mxu0 %v4897_v23  ;;  %1298 = vmatpush1.bf16.msra.mxu1 %v4902_v24  ;;  %v8645_v23 = vld [vmem:[#allocation19_spill] sm:$0xff]  ;;  %v8646_v24 = vld [vmem:[#allocation20_spill] sm:$0xff] }
 0x156   :  { %1258 = vmatprep.subr.bf16.mxu0 %v4909_v25  ;;  %1299 = vmatprep.subr.bf16.mxu1 %v4914_v26  ;;  %v967_v25 = vpop.f32.mrb[10].mxu1  ;;  %v8647_v26 = vld [vmem:[#allocation21_spill] sm:$0xff] }
 0x159   :  { %1259 = vmatpush1.bf16.msra.mxu0 %v4919_v27  ;;  %1300 = vmatpush1.bf16.msra.mxu1 %v4924_v28  ;;  %v8648_v27 = vld [vmem:[#allocation22_spill] sm:$0xff]  ;;  %v968_v28 = vpop.f32.mrb[11].mxu1 }
 0x15a   :  { %1260 = vmatprep.subr.bf16.mxu0 %v4931_v29  ;;  %1301 = vmatprep.subr.bf16.mxu1 %v4938_v30  ;;  %v8649_v29 = vld [vmem:[#allocation23_spill] sm:$0xff]  ;;  %v8650_v30 = vld [vmem:[#allocation24_spill] sm:$0xff] }
 0x15d   :  { %1261 = vmatpush1.bf16.msra.mxu0 %v4943_v31  ;;  %1302 = vmatpush1.bf16.msra.mxu1 %v4950_v32  ;;  %v8651_v31 = vld [vmem:[#allocation25_spill] sm:$0xff]  ;;  %v8652_v32 = vld [vmem:[#allocation26_spill] sm:$0xff] }
 0x15e   :  { %1328 = vmatprep.subr.bf16.mxu0 %v4957_v33  ;;  %1369 = vmatprep.subr.bf16.mxu1 %v4962_v34  ;;  %v8653_v33 = vld [vmem:[#allocation27_spill] sm:$0xff]  ;;  %v8654_v34 = vld [vmem:[#allocation28_spill] sm:$0xff] }
 0x160   :  { %1279 = vmatmul.mubr.bf16.vlgmr.msra.gmra.mrb[16].mxu0 %v727_v51  ;;  %1320 = vmatmul.mubr.bf16.vlgmr.msra.gmra.mrb[16].mxu1 %v727_v51  ;;  %v8676_v51 = vld [vmem:[#allocation50_spill] sm:$0xff] }
 0x161   :  { %1329 = vmatpush1.bf16.msra.mxu0 %v4967_v36  ;;  %1370 = vmatpush1.bf16.msra.mxu1 %v4972_v37  ;;  %v4085_v36 = vld [vmem:[%s8062_s0 + $0x4] sm:$0xf]  ;;  %v8655_v37 = vld [vmem:[#allocation29_spill] sm:$0xff] }
 0x162   :  { %1330 = vmatprep.subr.bf16.mxu0 %v4979_v38  ;;  %1371 = vmatprep.subr.bf16.mxu1 %v4986_v39  ;;  %v8656_v38 = vld [vmem:[#allocation31_spill] sm:$0xff]  ;;  %v8657_v39 = vld [vmem:[#allocation30_spill] sm:$0xff] }
 0x163   :  { %1360 = vmatprep.mubr.bf16.mxu0 %v8564_v60  ;;  %1401 = vmatprep.mubr.bf16.mxu1 %v8564_v60 }
 0x165   :  { %1331 = vmatpush1.bf16.msra.mxu0 %v4991_v40  ;;  %1372 = vmatpush1.bf16.msra.mxu1 %v4998_v41  ;;  %v8658_v40 = vld [vmem:[#allocation32_spill] sm:$0xff]  ;;  %v8659_v41 = vld [vmem:[#allocation33_spill] sm:$0xff] }
 0x166   :  { %1332 = vmatprep.subr.bf16.mxu0 %v8631_v3  ;;  %1373 = vmatprep.subr.bf16.mxu1 %v8632_v4  ;;  %v8677_v3 = vld [vmem:[#allocation51_spill] sm:$0xff]  ;;  %v8678_v4 = vld [vmem:[#allocation53_spill] sm:$0xff] }
 0x169   :  { %1333 = vmatpush1.bf16.msra.mxu0 %v8633_v5  ;;  %1374 = vmatpush1.bf16.msra.mxu1 %v8634_v6  ;;  %v8679_v5 = vld [vmem:[#allocation52_spill] sm:$0xff]  ;;  %v8680_v6 = vld [vmem:[#allocation55_spill] sm:$0xff] }
 0x16a   :  { %1334 = vmatprep.subr.bf16.mxu0 %v8635_v7  ;;  %1375 = vmatprep.subr.bf16.mxu1 %v8636_v8  ;;  %v8681_v7 = vld [vmem:[#allocation54_spill] sm:$0xff]  ;;  %v8682_v8 = vld [vmem:[#allocation56_spill] sm:$0xff] }
 0x16d   :  { %1335 = vmatpush1.bf16.msra.mxu0 %v8637_v9  ;;  %1376 = vmatpush1.bf16.msra.mxu1 %v8638_v10  ;;  %v8683_v9 = vld [vmem:[#allocation57_spill] sm:$0xff]  ;;  %v8684_v10 = vld [vmem:[#allocation59_spill] sm:$0xff] }
 0x16e   :  { %1336 = vmatprep.subr.bf16.mxu0 %v8639_v11  ;;  %1377 = vmatprep.subr.bf16.mxu1 %v8640_v12  ;;  %v8685_v11 = vld [vmem:[#allocation58_spill] sm:$0xff]  ;;  %v8686_v12 = vld [vmem:[#allocation60_spill] sm:$0xff] }
 0x171   :  { %1337 = vmatpush1.bf16.msra.mxu0 %v8641_v13  ;;  %1378 = vmatpush1.bf16.msra.mxu1 %v8642_v14  ;;  %v8687_v13 = vld [vmem:[#allocation61_spill] sm:$0xff]  ;;  %v8688_v14 = vld [vmem:[#allocation62_spill] sm:$0xff] }
 0x172   :  { %1338 = vmatprep.subr.bf16.mxu0 %v8643_v16  ;;  %1379 = vmatprep.subr.bf16.mxu1 %v8644_v17  ;;  %v190_v16 = vld [vmem:[%s8067_s7] sm:$0xf]  ;;  %v8689_v17 = vsub.s32 0, %v5550_v2 }
 0x174   :  { %v5698_v19 = vrot.slane %v190_v16, %v8689_v17  ;;  %v8699_v17 = vld [vmem:[#allocation70_spill] sm:$0xff] }
 0x175   :  { %1339 = vmatpush1.bf16.msra.mxu0 %v8645_v23  ;;  %1380 = vmatpush1.bf16.msra.mxu1 %v8646_v24  ;;  %v8690_v24 = vsub.s32 1, %v5550_v2 }
 0x176   :  { %1340 = vmatprep.subr.bf16.mxu0 %v8647_v26  ;;  %1381 = vmatprep.subr.bf16.mxu1 %v8648_v27 }
 0x177   :  { %v5702_v25 = vrot.slane %v190_v16, %v8690_v24  ;;  %v8702_v24 = vld [vmem:[#allocation73_spill] sm:$0xff] }
 0x179   :  { %1341 = vmatpush1.bf16.msra.mxu0 %v8649_v29  ;;  %1382 = vmatpush1.bf16.msra.mxu1 %v8650_v30 }
 0x17a   :  { %1342 = vmatprep.subr.bf16.mxu0 %v8651_v31  ;;  %1383 = vmatprep.subr.bf16.mxu1 %v8652_v32 }
 0x17d   :  { %1343 = vmatpush1.bf16.msra.mxu0 %v8653_v33  ;;  %1384 = vmatpush1.bf16.msra.mxu1 %v8654_v34 }
 0x17e   :  { %1433 = vmatprep.subr.bf16.mxu0 %v8655_v37  ;;  %1474 = vmatprep.subr.bf16.mxu1 %v8656_v38 }
 0x180   :  { %1361 = vmatmul.mubr.bf16.vlgmr.msra.gmra.mrb[20].mxu0 %v4085_v36  ;;  %1402 = vmatmul.mubr.bf16.vlgmr.msra.gmra.mrb[20].mxu1 %v4085_v36  ;;  %v5710_v36 = vrot.slane %v190_v16, %v180_v56 }
 0x181   :  { %1434 = vmatpush1.bf16.msra.mxu0 %v8657_v39  ;;  %1475 = vmatpush1.bf16.msra.mxu1 %v8658_v40 }
 0x182   :  { %1435 = vmatprep.subr.bf16.mxu0 %v8659_v41  ;;  %1476 = vmatprep.subr.bf16.mxu1 %v8660_v47 }
 0x183   :  { %1465 = vmatprep.mubr.bf16.mxu0 %v8564_v60  ;;  %1506 = vmatprep.mubr.bf16.mxu1 %v8564_v60 }
 0x185   :  { %1436 = vmatpush1.bf16.msra.mxu0 %v8661_v50  ;;  %1477 = vmatpush1.bf16.msra.mxu1 %v8662_v57 }
 0x186   :  { %1437 = vmatprep.subr.bf16.mxu0 %v8663_v59  ;;  %1478 = vmatprep.subr.bf16.mxu1 %v8664_v43 }
 0x189   :  { %1438 = vmatpush1.bf16.msra.mxu0 %v8665_v42  ;;  %1479 = vmatpush1.bf16.msra.mxu1 %v8666_v49 }
 0x18a   :  { %1439 = vmatprep.subr.bf16.mxu0 %v8667_v45  ;;  %1480 = vmatprep.subr.bf16.mxu1 %v8668_v61 }
 0x18d   :  { %1440 = vmatpush1.bf16.msra.mxu0 %v8669_v35  ;;  %1481 = vmatpush1.bf16.msra.mxu1 %v8670_v53 }
 0x18e   :  { %1441 = vmatprep.subr.bf16.mxu0 %v8671_v54  ;;  %1482 = vmatprep.subr.bf16.mxu1 %v8672_v0 }
 0x191   :  { %1442 = vmatpush1.bf16.msra.mxu0 %v8673_v58  ;;  %1483 = vmatpush1.bf16.msra.mxu1 %v8674_v63 }
 0x192   :  { %1443 = vmatprep.subr.bf16.mxu0 %v8675_v48  ;;  %1484 = vmatprep.subr.bf16.mxu1 %v8676_v51 }
 0x195   :  { %1444 = vmatpush1.bf16.msra.mxu0 %v8677_v3  ;;  %1485 = vmatpush1.bf16.msra.mxu1 %v8678_v4 }
 0x196   :  { %1445 = vmatprep.subr.bf16.mxu0 %v8679_v5  ;;  %1486 = vmatprep.subr.bf16.mxu1 %v8680_v6 }
 0x199   :  { %1446 = vmatpush1.bf16.msra.mxu0 %v8681_v7  ;;  %1487 = vmatpush1.bf16.msra.mxu1 %v8682_v8  ;;  %v8691_v7 = vld [vmem:[#allocation93_spill] sm:$0xff]  ;;  %v8692_v8 = vld [vmem:[#allocation63_spill] sm:$0xff] }
 0x19a   :  { %1447 = vmatprep.subr.bf16.mxu0 %v8683_v9  ;;  %1488 = vmatprep.subr.bf16.mxu1 %v8684_v10  ;;  %vm1621_vm1 = vcmp.eq.s32.totalorder %v8691_v7, 1  ;;  %v8693_v9 = vld [vmem:[#allocation64_spill] sm:$0xff]  ;;  %vm2006_vm4 = vcmp.eq.s32.totalorder %v8691_v7, 2 }
 0x19b   :  { %v1622_v10 = vsel %vm1621_vm1, 1, %v8564_v60  ;;  %v6407_v7 = vld [vmem:[%s8064_s5 + $0x24] ss:$16 sps:$4 sm:$0xff]  }
 0x19c   :  { %1624 = vperm.xlu0 %4098, %v1622_v10  }
 0x19d   :  { %1448 = vmatpush1.bf16.msra.mxu0 %v8685_v11  ;;  %1489 = vmatpush1.bf16.msra.mxu1 %v8686_v12  ;;  %v8694_v11 = vld [vmem:[#allocation65_spill] sm:$0xff]  ;;  %v8695_v12 = vld [vmem:[#allocation66_spill] sm:$0xff] }
 0x19e   :  { %1515 = vmatprep.subr.bf16.mxu0 %v8687_v13  ;;  %1556 = vmatprep.subr.bf16.mxu1 %v8688_v14  ;;  %v8696_v13 = vld [vmem:[#allocation67_spill] sm:$0xff]  ;;  %v8697_v14 = vld [vmem:[#allocation68_spill] sm:$0xff] }
 0x213   :  { %v1164_v21 = vpop.f32.mrb[12].mxu0  ;;  %v1205_v23 = vpop.f32.mrb[12].mxu1 }
 0x214   :  { %v1165_v26 = vadd.f32 %v1164_v21, %v5636_v15  ;;  %v1206_v27 = vadd.f32 %v1205_v23, %v963_v20  ;;  %v1166_v28 = vpop.f32.mrb[13].mxu0  ;;  %v1207_v29 = vpop.f32.mrb[13].mxu1  ;;  %v8700_v21 = vld [vmem:[#allocation71_spill] sm:$0xff]  ;;  %v8701_v23 = vld [vmem:[#allocation72_spill] sm:$0xff] }
 0x215   :  { %v1167_v30 = vadd.f32 %v1166_v28, %v5640_v18  ;;  %v1208_v31 = vadd.f32 %v1207_v29, %v5642_v22  ;;  %v1168_v32 = vpop.f32.mrb[14].mxu0  ;;  %v1209_v33 = vpop.f32.mrb[14].mxu1  ;;  %v5716_v18 = vrot.slane %v190_v16, %v184_v44  ;;  %v8698_v16 = vld [vmem:[#allocation69_spill] sm:$0xff]  ;;  %v8705_v28 = vld [vmem:[#allocation76_spill] sm:$0xff] }
 0x216   :  { %v1212_v34 = vadd.f32 %v1165_v26, %v5698_v19  ;;  %v1169_v37 = vpop.f32.mrb[15].mxu0  ;;  %v1210_v38 = vpop.f32.mrb[15].mxu1  ;;  %v1214_v40 = vadd.f32 %v1206_v27, %v5710_v36  ;;  %v8703_v26 = vld [vmem:[#allocation74_spill] sm:$0xff]  ;;  %v8704_v27 = vld [vmem:[#allocation75_spill] sm:$0xff]  ;;  %v8706_v29 = vld [vmem:[#allocation77_spill] sm:$0xff] }
 0x217   :  { %v1213_v39 = vadd.f32 %v1167_v30, %v5702_v25  ;;  %v1215_v22 = vadd.f32 %v1208_v31, %v5716_v18  ;;  %v8707_v30 = vld [vmem:[#allocation78_spill] sm:$0xff]  ;;  %v8708_v31 = vld [vmem:[#allocation79_spill] sm:$0xff]  ;;  %v8709_v32 = vld [vmem:[#allocation80_spill] sm:$0xff] }
 0x218   :  { %v1216_v15 = vmul.f32 0.5, %v1212_v34  ;;  %v8710_v33 = vld [vmem:[#allocation81_spill] sm:$0xff]  ;;  %v8711_v34 = vld [vmem:[#allocation82_spill] sm:$0xff]  ;;  %v8712_v37 = vld [vmem:[#allocation83_spill] sm:$0xff] }
 0x219   :  { %v1220_v20 = vmul.f32 0.5, %v1213_v39  ;;  %v1225_v41 = vmul.f32 0.5, %v1215_v22  ;;  %v8713_v38 = vld [vmem:[#allocation84_spill] sm:$0xff] }
 0x21a   :  { %4302 = vtanh.f32 %v1216_v15 }
 0x21b   :  { %4304 = vtanh.f32 %v1220_v20  ;;  %v8714_v20 = vld [vmem:[#allocation85_spill] sm:$0xff] }
 0x21c   :  { %4306 = vtanh.f32 %v1214_v40  ;;  %v8715_v40 = vld [vmem:[#allocation86_spill] sm:$0xff] }
 0x21d   :  { %4308 = vtanh.f32 %v1225_v41 }
 0x224   :  { %v4303_v56 = vpop.eup %4302 }
 0x225   :  { %v4305_v47 = vpop.eup %4304  ;;  %v1218_v50 = vmul.f32 0.5, %v4303_v56 }
 0x226   :  { %v1222_v57 = vmul.f32 0.5, %v4305_v47  ;;  %v4307_v43 = vpop.eup %4306 }
 0x227   :  { %v1219_v59 = vadd.f32 0.5, %v1218_v50  ;;  %v4309_v44 = vpop.eup %4308 }
 0x228   :  { %v1223_v42 = vadd.f32 0.5, %v1222_v57  ;;  %v1227_v53 = vmul.f32 0.5, %v4309_v44  ;;  %v8716_v44 = vld [vmem:[#allocation87_spill] sm:$0xff] }
 0x229   :  { %v1230_v49 = vmul.f32 %v4307_v43, %v1219_v59 }
 0x22a   :  { %v1229_v45 = vmul.f32 0.0, %v1223_v42  ;;  %v1228_v3 = vadd.f32 0.5, %v1227_v53  ;;  %v8717_v53 = vld [vmem:[#allocation88_spill] sm:$0xff] }
 0x22c   :  { %v5719_v61 = vadd.f32 %v1230_v49, %v1229_v45 }
 0x22e   :  { %4310 = vtanh.f32 %v5719_v61 }
 0x233   :  { %v1280_v2 = vpop.f32.mrb[16].mxu0  ;;  %v1321_v35 = vpop.f32.mrb[16].mxu1 }
 0x234   :  { %v1282_v54 = vpop.f32.mrb[17].mxu0  ;;  %v1323_v0 = vpop.f32.mrb[17].mxu1 }
 0x235   :  { %v1284_v58 = vpop.f32.mrb[18].mxu0  ;;  %v1325_v63 = vpop.f32.mrb[18].mxu1 }
 0x236   :  { %v1285_v48 = vpop.f32.mrb[19].mxu0  ;;  %v1326_v51 = vpop.f32.mrb[19].mxu1  ;;  %v8718_v63 = vld [vmem:[#allocation89_spill] sm:$0xff] }
 0x237   :  { %v8721_v51 = vld [vmem:[#allocation92_spill] sm:$0xff] }
 0x238   :  { %v4311_v4 = vpop.eup %4310 }
 0x239   :  { %v5722_v5 = vmul.f32 %v4311_v4, %v1228_v3  ;;  %v5766_v3 = vld [vmem:[%s8060_s3 + $0x4] ss:$16 sps:$4 sm:$0xff]   ;;  %v5772_v4 = vld [vmem:[%s8060_s3 + $0xc] ss:$16 sps:$4 sm:$0xff]  }
 0x23a   :  { %8722 = vst [vmem:[#allocation5_spill] sm:$0xff] %v5766_v3  ;;  %8723 = vst [vmem:[#allocation6_spill] sm:$0xff] %v5772_v4 }
 0x23b   :  { %v1234_v6 = vpack.c.bf16 %v5722_v5, %v5722_v5 }
 0x23d   :  { %1466 = vmatmul.mubr.bf16.vlgmr.msra.gmra.mrb[24].mxu0 %v1234_v6  ;;  %1507 = vmatmul.mubr.bf16.vlgmr.msra.gmra.mrb[24].mxu1 %v1234_v6 }
 0x23e   :  { %1516 = vmatpush1.bf16.msra.mxu0 %v8692_v8  ;;  %1557 = vmatpush1.bf16.msra.mxu1 %v8693_v9 }
 0x23f   :  { %1517 = vmatprep.subr.bf16.mxu0 %v8694_v11  ;;  %1558 = vmatprep.subr.bf16.mxu1 %v8695_v12 }
 0x240   :  { %1547 = vmatprep.mubr.bf16.mxu0 %v8564_v60  ;;  %1588 = vmatprep.mubr.bf16.mxu1 %v8564_v60 }
 0x242   :  { %1518 = vmatpush1.bf16.msra.mxu0 %v8696_v13  ;;  %1559 = vmatpush1.bf16.msra.mxu1 %v8697_v14 }
 0x243   :  { %1519 = vmatprep.subr.bf16.mxu0 %v8698_v16  ;;  %1560 = vmatprep.subr.bf16.mxu1 %v8699_v17 }
 0x246   :  { %1520 = vmatpush1.bf16.msra.mxu0 %v8700_v21  ;;  %1561 = vmatpush1.bf16.msra.mxu1 %v8701_v23 }
 0x247   :  { %1521 = vmatprep.subr.bf16.mxu0 %v8702_v24  ;;  %1562 = vmatprep.subr.bf16.mxu1 %v8703_v26 }
 0x24a   :  { %1522 = vmatpush1.bf16.msra.mxu0 %v8704_v27  ;;  %1563 = vmatpush1.bf16.msra.mxu1 %v8705_v28 }
 0x24b   :  { %1523 = vmatprep.subr.bf16.mxu0 %v8706_v29  ;;  %1564 = vmatprep.subr.bf16.mxu1 %v8707_v30 }
 0x24e   :  { %1524 = vmatpush1.bf16.msra.mxu0 %v8708_v31  ;;  %1565 = vmatpush1.bf16.msra.mxu1 %v8709_v32  ;;  %v5787_v31 = vld [vmem:[%s8060_s3] ss:$16 sps:$4 sm:$0xff]   ;;  %v5799_v32 = vld [vmem:[%s8060_s3 + $0x24] ss:$16 sps:$4 sm:$0xff]  }
 0x24f   :  { %1525 = vmatprep.subr.bf16.mxu0 %v8710_v33  ;;  %1566 = vmatprep.subr.bf16.mxu1 %v8711_v34  ;;  %v5805_v33 = vld [vmem:[%s8060_s3 + $0x2c] ss:$16 sps:$4 sm:$0xff]   ;;  %v5813_v34 = vld [vmem:[%s8060_s3 + $0x20] ss:$16 sps:$4 sm:$0xff]  }
 0x252   :  { %1526 = vmatpush1.bf16.msra.mxu0 %v8712_v37  ;;  %1567 = vmatpush1.bf16.msra.mxu1 %v8713_v38  ;;  %v5819_v37 = vld [vmem:[%s8060_s3 + $0x28] ss:$16 sps:$4 sm:$0xff]   ;;  %v5825_v38 = vld [vmem:[%s8060_s3 + $0x44] ss:$16 sps:$4 sm:$0xff]  }
 0x253   :  { %v1362_v39 = vpop.f32.mrb[20].mxu0  ;;  %v1403_v15 = vpop.f32.mrb[20].mxu1  ;;  %1527 = vmatprep.subr.bf16.mxu0 %v8714_v20  ;;  %1568 = vmatprep.subr.bf16.mxu1 %v8715_v40  ;;  %v5843_v20 = vld [vmem:[%s8060_s3 + $0x48] ss:$16 sps:$4 sm:$0xff]   ;;  %v5849_v40 = vld [vmem:[%s8060_s3 + $0x64] ss:$16 sps:$4 sm:$0xff]  }
 0x254   :  { %v1363_v22 = vadd.f32 %v1362_v39, %v1280_v2  ;;  %v1404_v41 = vadd.f32 %v1403_v15, %v1321_v35  ;;  %v1364_v56 = vpop.f32.mrb[21].mxu0  ;;  %v1405_v47 = vpop.f32.mrb[21].mxu1  ;;  %v8719_v2 = vld [vmem:[#allocation90_spill] sm:$0xff]  ;;  %v5831_v39 = vld [vmem:[%s8060_s3 + $0x4c] ss:$16 sps:$4 sm:$0xff]  }
 0x255   :  { %v1365_v50 = vadd.f32 %v1364_v56, %v1282_v54  ;;  %v1406_v57 = vadd.f32 %v1405_v47, %v1323_v0  ;;  %v1366_v59 = vpop.f32.mrb[22].mxu0  ;;  %v1407_v43 = vpop.f32.mrb[22].mxu1  ;;  %v8720_v0 = vld [vmem:[#allocation91_spill] sm:$0xff]  ;;  %v5837_v15 = vld [vmem:[%s8060_s3 + $0x40] ss:$16 sps:$4 sm:$0xff]  }
 0x256   :  { %v1410_v42 = vadd.f32 %v1363_v22, %v5559_v55  ;;  %v1367_v49 = vpop.f32.mrb[23].mxu0  ;;  %v1408_v45 = vpop.f32.mrb[23].mxu1  ;;  %1528 = vmatpush1.bf16.msra.mxu0 %v8716_v44  ;;  %1569 = vmatpush1.bf16.msra.mxu1 %v8717_v53  ;;  %v1412_v54 = vadd.f32 %v1404_v41, %v5569_v62  ;;  %v5855_v22 = vld [vmem:[%s8060_s3 + $0x6c] ss:$16 sps:$4 sm:$0xff]   ;;  %v5861_v41 = vld [vmem:[%s8060_s3 + $0x60] ss:$16 sps:$4 sm:$0xff]  }
 0x257   :  { %v1411_v58 = vadd.f32 %v1365_v50, %v5564_v1  ;;  %1529 = vmatprep.subr.bf16.mxu0 %v8718_v63  ;;  %1570 = vmatprep.subr.bf16.mxu1 %v8719_v2  ;;  %v1413_v6 = vadd.f32 %v1406_v57, %v5576_v46  ;;  %v5867_v56 = vld [vmem:[%s8060_s3 + $0x68] ss:$16 sps:$4 sm:$0xff]   ;;  %v5873_v47 = vld [vmem:[%s8060_s3 + $0x84] ss:$16 sps:$4 sm:$0xff]   ;;  %v5879_v50 = vld [vmem:[%s8060_s3 + $0x8c] ss:$16 sps:$4 sm:$0xff]  }
 0x258   :  { %v1414_v35 = vmul.f32 0.5, %v1410_v42  ;;  %v5885_v57 = vld [vmem:[%s8060_s3 + $0x80] ss:$16 sps:$4 sm:$0xff]   ;;  %v5891_v59 = vld [vmem:[%s8060_s3 + $0x88] ss:$16 sps:$4 sm:$0xff]  }
 0x259   :  { %v1418_v48 = vmul.f32 0.5, %v1411_v58  ;;  %v1423_v8 = vmul.f32 0.5, %v1413_v6  ;;  %v5897_v43 = vld [vmem:[%s8060_s3 + $0xa4] ss:$16 sps:$4 sm:$0xff]   ;;  %v5903_v42 = vld [vmem:[%s8060_s3 + $0xac] ss:$16 sps:$4 sm:$0xff]  }
 0x25a   :  { %4312 = vtanh.f32 %v1414_v35  ;;  %1530 = vmatpush1.bf16.msra.mxu0 %v8720_v0  ;;  %1571 = vmatpush1.bf16.msra.mxu1 %v8721_v51  ;;  %v5909_v49 = vld [vmem:[%s8060_s3 + $0xa0] ss:$16 sps:$4 sm:$0xff]   ;;  %v5915_v45 = vld [vmem:[%s8060_s3 + $0xa8] ss:$16 sps:$4 sm:$0xff]   ;;  %v5921_v44 = vld [vmem:[%s8060_s3 + $0xc4] ss:$16 sps:$4 sm:$0xff]  }
 0x25b   :  { %4314 = vtanh.f32 %v1418_v48  ;;  %1631 = vmatprep.subr.bf16.mxu0 %v5766_v3  ;;  %1672 = vmatprep.subr.bf16.mxu1 %v5772_v4  ;;  %8724 = vst [vmem:[#allocation7_spill] sm:$0xff] %v5921_v44  ;;  %v5927_v53 = vld [vmem:[%s8060_s3 + $0xcc] ss:$16 sps:$4 sm:$0xff]   ;;  %v5933_v58 = vld [vmem:[%s8060_s3 + $0xc0] ss:$16 sps:$4 sm:$0xff]  }
 0x25c   :  { %4316 = vtanh.f32 %v1412_v54  ;;  %8725 = vst [vmem:[#allocation8_spill] sm:$0xff] %v5927_v53  ;;  %8726 = vst [vmem:[#allocation9_spill] sm:$0xff] %v5933_v58  ;;  %v5939_v63 = vld [vmem:[%s8060_s3 + $0xc8] ss:$16 sps:$4 sm:$0xff]   ;;  %v5945_v2 = vld [vmem:[%s8060_s3 + $0xe4] ss:$16 sps:$4 sm:$0xff]  }
 0x25d   :  { %4318 = vtanh.f32 %v1423_v8  ;;  %8727 = vst [vmem:[#allocation10_spill] sm:$0xff] %v5939_v63  ;;  %8728 = vst [vmem:[#allocation11_spill] sm:$0xff] %v5945_v2  ;;  %v5951_v35 = vld [vmem:[%s8060_s3 + $0xec] ss:$16 sps:$4 sm:$0xff]   ;;  %v5957_v48 = vld [vmem:[%s8060_s3 + $0xe0] ss:$16 sps:$4 sm:$0xff]  }
 0x25e   :  { %8729 = vst [vmem:[#allocation12_spill] sm:$0xff] %v5951_v35  ;;  %8730 = vst [vmem:[#allocation13_spill] sm:$0xff] %v5957_v48  ;;  %v5963_v54 = vld [vmem:[%s8060_s3 + $0xe8] ss:$16 sps:$4 sm:$0xff]   ;;  %v5969_v0 = vld [vmem:[%s8061_s2 + $0x4] ss:$16 sps:$4 sm:$0xff]  }
 0x25f   :  { %8731 = vst [vmem:[#allocation14_spill] sm:$0xff] %v5963_v54  ;;  %8732 = vst [vmem:[#allocation15_spill] sm:$0xff] %v5969_v0  ;;  %v5975_v51 = vld [vmem:[%s8061_s2 + $0xc] ss:$16 sps:$4 sm:$0xff]   ;;  %v5983_v6 = vld [vmem:[%s8061_s2] ss:$16 sps:$4 sm:$0xff]  }
 0x260   :  { %8733 = vst [vmem:[#allocation16_spill] sm:$0xff] %v5975_v51  ;;  %8734 = vst [vmem:[#allocation17_spill] sm:$0xff] %v5983_v6  ;;  %v5989_v8 = vld [vmem:[%s8061_s2 + $0x8] ss:$16 sps:$4 sm:$0xff]  }
 0x261   :  { %8735 = vst [vmem:[#allocation18_spill] sm:$0xff] %v5989_v8 }
 0x264   :  { %v4313_v9 = vpop.eup %4312 }
 0x265   :  { %v4315_v10 = vpop.eup %4314  ;;  %v1416_v11 = vmul.f32 0.5, %v4313_v9  ;;  %v5995_v9 = vld [vmem:[%s8061_s2 + $0x24] ss:$16 sps:$4 sm:$0xff]  }
 0x266   :  { %v1420_v12 = vmul.f32 0.5, %v4315_v10  ;;  %v4317_v14 = vpop.eup %4316  ;;  %8736 = vst [vmem:[#allocation19_spill] sm:$0xff] %v5995_v9  ;;  %v6001_v10 = vld [vmem:[%s8061_s2 + $0x2c] ss:$16 sps:$4 sm:$0xff]  }
 0x267   :  { %v1417_v13 = vadd.f32 0.5, %v1416_v11  ;;  %v4319_v24 = vpop.eup %4318  ;;  %8737 = vst [vmem:[#allocation20_spill] sm:$0xff] %v6001_v10  ;;  %v6009_v11 = vld [vmem:[%s8061_s2 + $0x20] ss:$16 sps:$4 sm:$0xff]  }
 0x268   :  { %v1421_v16 = vadd.f32 0.5, %v1420_v12  ;;  %v1425_v26 = vmul.f32 0.5, %v4319_v24  ;;  %8738 = vst [vmem:[#allocation21_spill] sm:$0xff] %v6009_v11  ;;  %v6015_v12 = vld [vmem:[%s8061_s2 + $0x28] ss:$16 sps:$4 sm:$0xff]  }
 0x269   :  { %v1428_v17 = vmul.f32 %v4317_v14, %v1417_v13  ;;  %8739 = vst [vmem:[#allocation22_spill] sm:$0xff] %v6015_v12  ;;  %v6021_v13 = vld [vmem:[%s8061_s2 + $0x44] ss:$16 sps:$4 sm:$0xff]   ;;  %v6027_v14 = vld [vmem:[%s8061_s2 + $0x4c] ss:$16 sps:$4 sm:$0xff]  }
 0x26a   :  { %v1427_v21 = vmul.f32 %v1421_v16, %v5579_v52  ;;  %v1426_v27 = vadd.f32 0.5, %v1425_v26  ;;  %v5793_v52 = vld [vmem:[%s8060_s3 + $0x8] ss:$16 sps:$4 sm:$0xff]   ;;  %8740 = vst [vmem:[#allocation23_spill] sm:$0xff] %v6021_v13  ;;  %8741 = vst [vmem:[#allocation24_spill] sm:$0xff] %v6027_v14 }
 0x26b   :  { %v6033_v16 = vld [vmem:[%s8061_s2 + $0x40] ss:$16 sps:$4 sm:$0xff]   ;;  %v6051_v24 = vld [vmem:[%s8061_s2 + $0x6c] ss:$16 sps:$4 sm:$0xff]  }
 0x26c   :  { %v5777_v23 = vadd.f32 %v1428_v17, %v1427_v21  ;;  %8742 = vst [vmem:[#allocation25_spill] sm:$0xff] %v6033_v16  ;;  %v6039_v17 = vld [vmem:[%s8061_s2 + $0x48] ss:$16 sps:$4 sm:$0xff]   ;;  %v6045_v21 = vld [vmem:[%s8061_s2 + $0x64] ss:$16 sps:$4 sm:$0xff]   ;;  %8745 = vst [vmem:[#allocation28_spill] sm:$0xff] %v6051_v24 }
 0x26d   :  { %8743 = vst [vmem:[#allocation26_spill] sm:$0xff] %v6039_v17  ;;  %8744 = vst [vmem:[#allocation27_spill] sm:$0xff] %v6045_v21  ;;  %v6057_v26 = vld [vmem:[%s8061_s2 + $0x60] ss:$16 sps:$4 sm:$0xff]  }
 0x26e   :  { %4320 = vtanh.f32 %v5777_v23  ;;  %8746 = vst [vmem:[#allocation29_spill] sm:$0xff] %v6057_v26 }
 0x278   :  { %v4321_v28 = vpop.eup %4320 }
 0x279   :  { %v1431_v29 = vmul.f32 %v4321_v28, %v1426_v27  ;;  %v6063_v27 = vld [vmem:[%s8061_s2 + $0x68] ss:$16 sps:$4 sm:$0xff]   ;;  %v6069_v28 = vld [vmem:[%s8061_s2 + $0x84] ss:$16 sps:$4 sm:$0xff]  }
 0x27a   :  { %8747 = vst [vmem:[#allocation31_spill] sm:$0xff] %v6063_v27  ;;  %8748 = vst [vmem:[#allocation30_spill] sm:$0xff] %v6069_v28 }
 0x27b   :  { %v5780_v30 = vpack.c.bf16 %v1431_v29, %v1431_v29  ;;  %v6075_v29 = vld [vmem:[%s8061_s2 + $0x8c] ss:$16 sps:$4 sm:$0xff]  }
 0x27c   :  { %8749 = vst [vmem:[#allocation32_spill] sm:$0xff] %v6075_v29 }
 0x27d   :  { %1548 = vmatmul.mubr.bf16.vlgmr.msra.gmra.mrb[28].mxu0 %v5780_v30  ;;  %1589 = vmatmul.mubr.bf16.vlgmr.msra.gmra.mrb[28].mxu1 %v5780_v30 }
 0x27e   :  { %1632 = vmatpush1.bf16.msra.mxu0 %v5787_v31  ;;  %1673 = vmatpush1.bf16.msra.mxu1 %v5793_v52 }
 0x27f   :  { %1633 = vmatprep.subr.bf16.mxu0 %v5799_v32  ;;  %1674 = vmatprep.subr.bf16.mxu1 %v5805_v33 }
 0x280   :  { %1663 = vmatprep.mubr.bf16.mxu0 %v8564_v60  ;;  %1704 = vmatprep.mubr.bf16.mxu1 %v8564_v60 }
 0x282   :  { %1634 = vmatpush1.bf16.msra.mxu0 %v5813_v34  ;;  %1675 = vmatpush1.bf16.msra.mxu1 %v5819_v37 }
 0x283   :  { %1635 = vmatprep.subr.bf16.mxu0 %v5825_v38  ;;  %1676 = vmatprep.subr.bf16.mxu1 %v5831_v39 }
 0x286   :  { %1636 = vmatpush1.bf16.msra.mxu0 %v5837_v15  ;;  %1677 = vmatpush1.bf16.msra.mxu1 %v5843_v20 }
 0x287   :  { %1637 = vmatprep.subr.bf16.mxu0 %v5849_v40  ;;  %1678 = vmatprep.subr.bf16.mxu1 %v5855_v22 }
 0x28a   :  { %1638 = vmatpush1.bf16.msra.mxu0 %v5861_v41  ;;  %1679 = vmatpush1.bf16.msra.mxu1 %v5867_v56 }
 0x28b   :  { %1639 = vmatprep.subr.bf16.mxu0 %v5873_v47  ;;  %1680 = vmatprep.subr.bf16.mxu1 %v5879_v50 }
 0x28e   :  { %1640 = vmatpush1.bf16.msra.mxu0 %v5885_v57  ;;  %1681 = vmatpush1.bf16.msra.mxu1 %v5891_v59 }
 0x28f   :  { %1641 = vmatprep.subr.bf16.mxu0 %v5897_v43  ;;  %1682 = vmatprep.subr.bf16.mxu1 %v5903_v42 }
 0x292   :  { %1642 = vmatpush1.bf16.msra.mxu0 %v5909_v49  ;;  %1683 = vmatpush1.bf16.msra.mxu1 %v5915_v45 }
 0x293   :  { %1643 = vmatprep.subr.bf16.mxu0 %v5921_v44  ;;  %1684 = vmatprep.subr.bf16.mxu1 %v5927_v53 }
 0x296   :  { %1644 = vmatpush1.bf16.msra.mxu0 %v5933_v58  ;;  %1685 = vmatpush1.bf16.msra.mxu1 %v5939_v63 }
 0x297   :  { %1645 = vmatprep.subr.bf16.mxu0 %v5945_v2  ;;  %1686 = vmatprep.subr.bf16.mxu1 %v5951_v35 }
 0x29a   :  { %1646 = vmatpush1.bf16.msra.mxu0 %v5957_v48  ;;  %1687 = vmatpush1.bf16.msra.mxu1 %v5963_v54 }
 0x29b   :  { %1713 = vmatprep.subr.bf16.mxu0 %v5969_v0  ;;  %1754 = vmatprep.subr.bf16.mxu1 %v5975_v51 }
 0x29d   :  { %1664 = vmatmul.mubr.bf16.vlgmr.msra.gmra.mrb[32].mxu0 %v5780_v30  ;;  %1705 = vmatmul.mubr.bf16.vlgmr.msra.gmra.mrb[32].mxu1 %v5780_v30  ;;  %v6081_v30 = vld [vmem:[%s8061_s2 + $0x80] ss:$16 sps:$4 sm:$0xff]  }
 0x29e   :  { %1714 = vmatpush1.bf16.msra.mxu0 %v5983_v6  ;;  %1755 = vmatpush1.bf16.msra.mxu1 %v5989_v8  ;;  %8750 = vst [vmem:[#allocation33_spill] sm:$0xff] %v6081_v30 }
 0x29f   :  { %1715 = vmatprep.subr.bf16.mxu0 %v5995_v9  ;;  %1756 = vmatprep.subr.bf16.mxu1 %v6001_v10 }
 0x2a0   :  { %1745 = vmatprep.mubr.bf16.mxu0 %v8564_v60  ;;  %1786 = vmatprep.mubr.bf16.mxu1 %v8564_v60 }
 0x2a2   :  { %1716 = vmatpush1.bf16.msra.mxu0 %v6009_v11  ;;  %1757 = vmatpush1.bf16.msra.mxu1 %v6015_v12 }
 0x2a3   :  { %1717 = vmatprep.subr.bf16.mxu0 %v6021_v13  ;;  %1758 = vmatprep.subr.bf16.mxu1 %v6027_v14 }
 0x2a6   :  { %1718 = vmatpush1.bf16.msra.mxu0 %v6033_v16  ;;  %1759 = vmatpush1.bf16.msra.mxu1 %v6039_v17 }
 0x2a7   :  { %1719 = vmatprep.subr.bf16.mxu0 %v6045_v21  ;;  %1760 = vmatprep.subr.bf16.mxu1 %v6051_v24 }
 0x2aa   :  { %1720 = vmatpush1.bf16.msra.mxu0 %v6057_v26  ;;  %1761 = vmatpush1.bf16.msra.mxu1 %v6063_v27  ;;  %v6087_v27 = vld [vmem:[%s8061_s2 + $0x88] ss:$16 sps:$4 sm:$0xff]  }
 0x2ab   :  { %1721 = vmatprep.subr.bf16.mxu0 %v6069_v28  ;;  %1762 = vmatprep.subr.bf16.mxu1 %v6075_v29  ;;  %8751 = vst [vmem:[#allocation35_spill] sm:$0xff] %v6087_v27  ;;  %v6093_v28 = vld [vmem:[%s8061_s2 + $0xa4] ss:$16 sps:$4 sm:$0xff]   ;;  %v6099_v29 = vld [vmem:[%s8061_s2 + $0xac] ss:$16 sps:$4 sm:$0xff]  }
 0x2ac   :  { %8752 = vst [vmem:[#allocation34_spill] sm:$0xff] %v6093_v28  ;;  %8753 = vst [vmem:[#allocation36_spill] sm:$0xff] %v6099_v29 }
 0x2ae   :  { %1722 = vmatpush1.bf16.msra.mxu0 %v6081_v30  ;;  %1763 = vmatpush1.bf16.msra.mxu1 %v6087_v27  ;;  %v6105_v30 = vld [vmem:[%s8061_s2 + $0xa0] ss:$16 sps:$4 sm:$0xff]   ;;  %v6111_v27 = vld [vmem:[%s8061_s2 + $0xa8] ss:$16 sps:$4 sm:$0xff]  }
 0x2af   :  { %1723 = vmatprep.subr.bf16.mxu0 %v6093_v28  ;;  %1764 = vmatprep.subr.bf16.mxu1 %v6099_v29  ;;  %8754 = vst [vmem:[#allocation37_spill] sm:$0xff] %v6105_v30  ;;  %8755 = vst [vmem:[#allocation39_spill] sm:$0xff] %v6111_v27  ;;  %v6117_v28 = vld [vmem:[%s8061_s2 + $0xc4] ss:$16 sps:$4 sm:$0xff]   ;;  %v6123_v29 = vld [vmem:[%s8061_s2 + $0xcc] ss:$16 sps:$4 sm:$0xff]  }
 0x2b0   :  { %8756 = vst [vmem:[#allocation38_spill] sm:$0xff] %v6117_v28  ;;  %8757 = vst [vmem:[#allocation41_spill] sm:$0xff] %v6123_v29 }
 0x2b2   :  { %1724 = vmatpush1.bf16.msra.mxu0 %v6105_v30  ;;  %1765 = vmatpush1.bf16.msra.mxu1 %v6111_v27  ;;  %v6129_v30 = vld [vmem:[%s8061_s2 + $0xc0] ss:$16 sps:$4 sm:$0xff]   ;;  %v6135_v27 = vld [vmem:[%s8061_s2 + $0xc8] ss:$16 sps:$4 sm:$0xff]  }
 0x2b3   :  { %1725 = vmatprep.subr.bf16.mxu0 %v6117_v28  ;;  %1766 = vmatprep.subr.bf16.mxu1 %v6123_v29  ;;  %8758 = vst [vmem:[#allocation40_spill] sm:$0xff] %v6129_v30  ;;  %8759 = vst [vmem:[#allocation42_spill] sm:$0xff] %v6135_v27  ;;  %v6141_v28 = vld [vmem:[%s8061_s2 + $0xe4] ss:$16 sps:$4 sm:$0xff]   ;;  %v6147_v29 = vld [vmem:[%s8061_s2 + $0xec] ss:$16 sps:$4 sm:$0xff]  }
 0x2b4   :  { %8760 = vst [vmem:[#allocation43_spill] sm:$0xff] %v6141_v28  ;;  %8761 = vst [vmem:[#allocation45_spill] sm:$0xff] %v6147_v29 }
 0x2b6   :  { %1726 = vmatpush1.bf16.msra.mxu0 %v6129_v30  ;;  %1767 = vmatpush1.bf16.msra.mxu1 %v6135_v27  ;;  %v6153_v30 = vld [vmem:[%s8061_s2 + $0xe0] ss:$16 sps:$4 sm:$0xff]   ;;  %v6159_v27 = vld [vmem:[%s8061_s2 + $0xe8] ss:$16 sps:$4 sm:$0xff]  }
 0x2b7   :  { %1727 = vmatprep.subr.bf16.mxu0 %v6141_v28  ;;  %1768 = vmatprep.subr.bf16.mxu1 %v6147_v29  ;;  %8762 = vst [vmem:[#allocation44_spill] sm:$0xff] %v6153_v30  ;;  %8763 = vst [vmem:[#allocation46_spill] sm:$0xff] %v6159_v27  ;;  %v4086_v28 = vld [vmem:[%s8062_s0 + $0x8] sm:$0xf]  ;;  %v6168_v29 = vld [vmem:[%s8063_s6 + $0x4] ss:$16 sps:$4 sm:$0xff]  }
 0x2b8   :  { %8764 = vst [vmem:[#allocation47_spill] sm:$0xff] %v6168_v29 }
 0x2ba   :  { %1728 = vmatpush1.bf16.msra.mxu0 %v6153_v30  ;;  %1769 = vmatpush1.bf16.msra.mxu1 %v6159_v27  ;;  %v6174_v30 = vld [vmem:[%s8063_s6 + $0xc] ss:$16 sps:$4 sm:$0xff]   ;;  %v6180_v27 = vld [vmem:[%s8063_s6] ss:$16 sps:$4 sm:$0xff]  }
 0x2bb   :  { %1818 = vmatprep.subr.bf16.mxu0 %v6168_v29  ;;  %8765 = vst [vmem:[#allocation48_spill] sm:$0xff] %v6174_v30  ;;  %1859 = vmatprep.subr.bf16.mxu1 %v6174_v30  ;;  %8766 = vst [vmem:[#allocation49_spill] sm:$0xff] %v6180_v27  ;;  %v6186_v29 = vld [vmem:[%s8063_s6 + $0x8] ss:$16 sps:$4 sm:$0xff]   ;;  %v6192_v30 = vld [vmem:[%s8063_s6 + $0x24] ss:$16 sps:$4 sm:$0xff]  }
 0x2bc   :  { %8767 = vst [vmem:[#allocation50_spill] sm:$0xff] %v6186_v29  ;;  %8768 = vst [vmem:[#allocation51_spill] sm:$0xff] %v6192_v30 }
 0x2bd   :  { %1746 = vmatmul.mubr.bf16.vlgmr.msra.gmra.mrb[36].mxu0 %v4086_v28  ;;  %1787 = vmatmul.mubr.bf16.vlgmr.msra.gmra.mrb[36].mxu1 %v4086_v28  ;;  %v6198_v28 = vld [vmem:[%s8063_s6 + $0x2c] ss:$16 sps:$4 sm:$0xff]  }
 0x2be   :  { %1819 = vmatpush1.bf16.msra.mxu0 %v6180_v27  ;;  %1860 = vmatpush1.bf16.msra.mxu1 %v6186_v29  ;;  %8769 = vst [vmem:[#allocation53_spill] sm:$0xff] %v6198_v28  ;;  %v6206_v29 = vld [vmem:[%s8063_s6 + $0x20] ss:$16 sps:$4 sm:$0xff]   ;;  %v6224_v27 = vld [vmem:[%s8063_s6 + $0x4c] ss:$16 sps:$4 sm:$0xff]  }
 0x2bf   :  { %1820 = vmatprep.subr.bf16.mxu0 %v6192_v30  ;;  %1861 = vmatprep.subr.bf16.mxu1 %v6198_v28  ;;  %8770 = vst [vmem:[#allocation52_spill] sm:$0xff] %v6206_v29  ;;  %v6212_v30 = vld [vmem:[%s8063_s6 + $0x28] ss:$16 sps:$4 sm:$0xff]   ;;  %v6218_v28 = vld [vmem:[%s8063_s6 + $0x44] ss:$16 sps:$4 sm:$0xff]   ;;  %8773 = vst [vmem:[#allocation56_spill] sm:$0xff] %v6224_v27 }
 0x2c0   :  { %1850 = vmatprep.mubr.bf16.mxu0 %v8564_v60  ;;  %1891 = vmatprep.mubr.bf16.mxu1 %v8564_v60  ;;  %8771 = vst [vmem:[#allocation55_spill] sm:$0xff] %v6212_v30  ;;  %8772 = vst [vmem:[#allocation54_spill] sm:$0xff] %v6218_v28 }
 0x2c2   :  { %1821 = vmatpush1.bf16.msra.mxu0 %v6206_v29  ;;  %1862 = vmatpush1.bf16.msra.mxu1 %v6212_v30  ;;  %v6230_v29 = vld [vmem:[%s8063_s6 + $0x40] ss:$16 sps:$4 sm:$0xff]   ;;  %v6236_v30 = vld [vmem:[%s8063_s6 + $0x48] ss:$16 sps:$4 sm:$0xff]  }
 0x2c3   :  { %1822 = vmatprep.subr.bf16.mxu0 %v6218_v28  ;;  %1863 = vmatprep.subr.bf16.mxu1 %v6224_v27  ;;  %8774 = vst [vmem:[#allocation57_spill] sm:$0xff] %v6230_v29  ;;  %8775 = vst [vmem:[#allocation59_spill] sm:$0xff] %v6236_v30  ;;  %v6242_v28 = vld [vmem:[%s8063_s6 + $0x64] ss:$16 sps:$4 sm:$0xff]   ;;  %v6248_v27 = vld [vmem:[%s8063_s6 + $0x6c] ss:$16 sps:$4 sm:$0xff]  }
 0x2c4   :  { %8776 = vst [vmem:[#allocation58_spill] sm:$0xff] %v6242_v28  ;;  %8777 = vst [vmem:[#allocation60_spill] sm:$0xff] %v6248_v27 }
 0x2c6   :  { %1823 = vmatpush1.bf16.msra.mxu0 %v6230_v29  ;;  %1864 = vmatpush1.bf16.msra.mxu1 %v6236_v30  ;;  %v6254_v29 = vld [vmem:[%s8063_s6 + $0x60] ss:$16 sps:$4 sm:$0xff]   ;;  %v6260_v30 = vld [vmem:[%s8063_s6 + $0x68] ss:$16 sps:$4 sm:$0xff]  }
 0x2c7   :  { %1824 = vmatprep.subr.bf16.mxu0 %v6242_v28  ;;  %1865 = vmatprep.subr.bf16.mxu1 %v6248_v27  ;;  %8778 = vst [vmem:[#allocation61_spill] sm:$0xff] %v6254_v29  ;;  %8779 = vst [vmem:[#allocation62_spill] sm:$0xff] %v6260_v30  ;;  %v6266_v28 = vld [vmem:[%s8063_s6 + $0x84] ss:$16 sps:$4 sm:$0xff]   ;;  %v6272_v27 = vld [vmem:[%s8063_s6 + $0x8c] ss:$16 sps:$4 sm:$0xff]  }
 0x2c8   :  { %8780 = vst [vmem:[#allocation93_spill] sm:$0xff] %v6266_v28  ;;  %8781 = vst [vmem:[#allocation63_spill] sm:$0xff] %v6272_v27 }
 0x2ca   :  { %1825 = vmatpush1.bf16.msra.mxu0 %v6254_v29  ;;  %1866 = vmatpush1.bf16.msra.mxu1 %v6260_v30  ;;  %v6278_v29 = vld [vmem:[%s8063_s6 + $0x80] ss:$16 sps:$4 sm:$0xff]   ;;  %v6284_v30 = vld [vmem:[%s8063_s6 + $0x88] ss:$16 sps:$4 sm:$0xff]  }
 0x2cb   :  { %1826 = vmatprep.subr.bf16.mxu0 %v6266_v28  ;;  %1867 = vmatprep.subr.bf16.mxu1 %v6272_v27  ;;  %8782 = vst [vmem:[#allocation64_spill] sm:$0xff] %v6278_v29  ;;  %8783 = vst [vmem:[#allocation65_spill] sm:$0xff] %v6284_v30  ;;  %v6290_v28 = vld [vmem:[%s8063_s6 + $0xa4] ss:$16 sps:$4 sm:$0xff]   ;;  %v6296_v27 = vld [vmem:[%s8063_s6 + $0xac] ss:$16 sps:$4 sm:$0xff]  }
 0x2cc   :  { %8784 = vst [vmem:[#allocation66_spill] sm:$0xff] %v6290_v28  ;;  %8785 = vst [vmem:[#allocation67_spill] sm:$0xff] %v6296_v27 }
 0x2ce   :  { %1827 = vmatpush1.bf16.msra.mxu0 %v6278_v29  ;;  %1868 = vmatpush1.bf16.msra.mxu1 %v6284_v30  ;;  %v6302_v29 = vld [vmem:[%s8063_s6 + $0xa0] ss:$16 sps:$4 sm:$0xff]   ;;  %v6308_v30 = vld [vmem:[%s8063_s6 + $0xa8] ss:$16 sps:$4 sm:$0xff]  }
 0x2cf   :  { %1828 = vmatprep.subr.bf16.mxu0 %v6290_v28  ;;  %1869 = vmatprep.subr.bf16.mxu1 %v6296_v27  ;;  %8786 = vst [vmem:[#allocation68_spill] sm:$0xff] %v6302_v29  ;;  %8787 = vst [vmem:[#allocation69_spill] sm:$0xff] %v6308_v30  ;;  %v6314_v28 = vld [vmem:[%s8063_s6 + $0xc4] ss:$16 sps:$4 sm:$0xff]   ;;  %v6320_v27 = vld [vmem:[%s8063_s6 + $0xcc] ss:$16 sps:$4 sm:$0xff]  }
 0x2d0   :  { %8788 = vst [vmem:[#allocation70_spill] sm:$0xff] %v6314_v28  ;;  %8789 = vst [vmem:[#allocation71_spill] sm:$0xff] %v6320_v27 }
 0x2d2   :  { %1829 = vmatpush1.bf16.msra.mxu0 %v6302_v29  ;;  %1870 = vmatpush1.bf16.msra.mxu1 %v6308_v30  ;;  %v6326_v29 = vld [vmem:[%s8063_s6 + $0xc0] ss:$16 sps:$4 sm:$0xff]   ;;  %v6332_v30 = vld [vmem:[%s8063_s6 + $0xc8] ss:$16 sps:$4 sm:$0xff]  }
 0x2d3   :  { %1830 = vmatprep.subr.bf16.mxu0 %v6314_v28  ;;  %1871 = vmatprep.subr.bf16.mxu1 %v6320_v27  ;;  %8790 = vst [vmem:[#allocation72_spill] sm:$0xff] %v6326_v29  ;;  %8791 = vst [vmem:[#allocation73_spill] sm:$0xff] %v6332_v30  ;;  %v6338_v28 = vld [vmem:[%s8063_s6 + $0xe4] ss:$16 sps:$4 sm:$0xff]   ;;  %v6344_v27 = vld [vmem:[%s8063_s6 + $0xec] ss:$16 sps:$4 sm:$0xff]  }
 0x2d4   :  { %8792 = vst [vmem:[#allocation74_spill] sm:$0xff] %v6338_v28  ;;  %8793 = vst [vmem:[#allocation75_spill] sm:$0xff] %v6344_v27 }
 0x2d6   :  { %1831 = vmatpush1.bf16.msra.mxu0 %v6326_v29  ;;  %1872 = vmatpush1.bf16.msra.mxu1 %v6332_v30  ;;  %v6350_v29 = vld [vmem:[%s8063_s6 + $0xe0] ss:$16 sps:$4 sm:$0xff]   ;;  %v6356_v30 = vld [vmem:[%s8063_s6 + $0xe8] ss:$16 sps:$4 sm:$0xff]  }
 0x2d7   :  { %1832 = vmatprep.subr.bf16.mxu0 %v6338_v28  ;;  %1873 = vmatprep.subr.bf16.mxu1 %v6344_v27  ;;  %8794 = vst [vmem:[#allocation76_spill] sm:$0xff] %v6350_v29  ;;  %8795 = vst [vmem:[#allocation77_spill] sm:$0xff] %v6356_v30  ;;  %v6362_v28 = vld [vmem:[%s8064_s5 + $0x4] ss:$16 sps:$4 sm:$0xff]   ;;  %v6368_v27 = vld [vmem:[%s8064_s5 + $0xc] ss:$16 sps:$4 sm:$0xff]  }
 0x2d8   :  { %8796 = vst [vmem:[#allocation78_spill] sm:$0xff] %v6362_v28  ;;  %8797 = vst [vmem:[#allocation79_spill] sm:$0xff] %v6368_v27 }
 0x2da   :  { %1833 = vmatpush1.bf16.msra.mxu0 %v6350_v29  ;;  %1874 = vmatpush1.bf16.msra.mxu1 %v6356_v30 }
 0x2db   :  { %1900 = vmatprep.subr.bf16.mxu0 %v6362_v28  ;;  %1941 = vmatprep.subr.bf16.mxu1 %v6368_v27 }
 0x310   :  { %v1467_v29 = vpop.f32.mrb[24].mxu0  ;;  %v1508_v26 = vpop.f32.mrb[24].mxu1 }
 0x311   :  { %v1469_v24 = vpop.f32.mrb[25].mxu0  ;;  %v1510_v21 = vpop.f32.mrb[25].mxu1 }
 0x312   :  { %v1471_v17 = vpop.f32.mrb[26].mxu0  ;;  %v1512_v30 = vpop.f32.mrb[26].mxu1 }
 0x313   :  { %v1472_v16 = vpop.f32.mrb[27].mxu0  ;;  %v1513_v14 = vpop.f32.mrb[27].mxu1 }
 0x350   :  { %v1549_v13 = vpop.f32.mrb[28].mxu0  ;;  %v1590_v12 = vpop.f32.mrb[28].mxu1 }
 0x351   :  { %v1550_v11 = vadd.f32 %v1549_v13, %v1467_v29  ;;  %v1591_v10 = vadd.f32 %v1590_v12, %v1508_v26  ;;  %v1551_v28 = vpop.f32.mrb[29].mxu0  ;;  %v1592_v9 = vpop.f32.mrb[29].mxu1 }
 0x352   :  { %v1552_v8 = vadd.f32 %v1551_v28, %v1469_v24  ;;  %v1593_v6 = vadd.f32 %v1592_v9, %v1510_v21  ;;  %v1553_v51 = vpop.f32.mrb[30].mxu0  ;;  %v1594_v0 = vpop.f32.mrb[30].mxu1 }
 0x353   :  { %v1597_v27 = vadd.f32 %v1550_v11, %v5698_v19  ;;  %v1554_v54 = vpop.f32.mrb[31].mxu0  ;;  %v1595_v48 = vpop.f32.mrb[31].mxu1  ;;  %v1599_v14 = vadd.f32 %v1591_v10, %v5710_v36 }
 0x354   :  { %v1598_v35 = vadd.f32 %v1552_v8, %v5702_v25  ;;  %v1600_v12 = vadd.f32 %v1593_v6, %v5716_v18  ;;  %v1240_v24 = vpop.permute.xlu0 %1239 }
 0x355   :  { %v1601_v17 = vmul.f32 0.5, %v1597_v27  ;;  %vm1241_vm2 = vcmp.eq.s32.totalorder %v1240_v24, 1  ;;  %v6427_v24 = vld [vmem:[%s8064_s5 + $0x28] ss:$16 sps:$4 sm:$0xff]  }
 0x356   :  { %v1605_v30 = vmul.f32 0.5, %v1598_v35  ;;  %v1610_v13 = vmul.f32 0.5, %v1600_v12  ;;  %8798 = vst [vmem:[#allocation80_spill] sm:$0xff] %v6427_v24 }
 0x357   :  { %4322 = vtanh.f32 %v1601_v17 }
 0x358   :  { %4324 = vtanh.f32 %v1605_v30  ;;  %v1625_v26 = vpop.permute.xlu0 %1624 }
 0x359   :  { %4326 = vtanh.f32 %v1599_v14  ;;  %vm1626_vm3 = vcmp.eq.s32.totalorder %v1625_v26, 1  ;;  %v6439_v26 = vld [vmem:[%s8064_s5 + $0x4c] ss:$16 sps:$4 sm:$0xff]  }
 0x35a   :  { %4328 = vtanh.f32 %v1610_v13  ;;  %8800 = vst [vmem:[#allocation82_spill] sm:$0xff] %v6439_v26 }
 0x361   :  { %v4323_v16 = vpop.eup %4322 }
 0x362   :  { %v4325_v9 = vpop.eup %4324  ;;  %v1603_v51 = vmul.f32 0.5, %v4323_v16 }
 0x363   :  { %v1607_v0 = vmul.f32 0.5, %v4325_v9  ;;  %v4327_v54 = vpop.eup %4326 }
 0x364   :  { %v1604_v11 = vadd.f32 0.5, %v1603_v51  ;;  %v4329_v10 = vpop.eup %4328  ;;  %v1242_v51 = vsel %vm1241_vm2, %v5722_v5, 0.0  ;;  %v2007_v5 = vsel %vm2006_vm4, 1, %v8564_v60 }
 0x365   :  { %v1608_v48 = vadd.f32 0.5, %v1607_v0  ;;  %v1612_v6 = vmul.f32 0.5, %v4329_v10  ;;  %2009 = vperm.xlu1 %4099, %v2007_v5   ;;  %v6433_v10 = vld [vmem:[%s8064_s5 + $0x44] ss:$16 sps:$4 sm:$0xff]  }
 0x366   :  { %v1615_v21 = vmul.f32 %v4327_v54, %v1604_v11  ;;  %v6394_v54 = vld [vmem:[%s8064_s5] ss:$16 sps:$4 sm:$0xff]   ;;  %8799 = vst [vmem:[#allocation81_spill] sm:$0xff] %v6433_v10  ;;  %v6505_v5 = vld [vmem:[%s8064_s5 + $0xa4] ss:$16 sps:$4 sm:$0xff]  }
 0x367   :  { %v1614_v8 = vmul.f32 %v1608_v48, %v5719_v61  ;;  %v1613_v13 = vadd.f32 0.5, %v1612_v6  ;;  %v6400_v48 = vld [vmem:[%s8064_s5 + $0x8] ss:$16 sps:$4 sm:$0xff]   ;;  %v6445_v6 = vld [vmem:[%s8064_s5 + $0x40] ss:$16 sps:$4 sm:$0xff]   ;;  %8811 = vst [vmem:[#allocation95_spill] sm:$0xff] %v6505_v5 }
 0x368   :  { %8801 = vst [vmem:[#allocation83_spill] sm:$0xff] %v6445_v6 }
 0x369   :  { %v6376_v35 = vadd.f32 %v1615_v21, %v1614_v8  ;;  %v6413_v21 = vld [vmem:[%s8064_s5 + $0x2c] ss:$16 sps:$4 sm:$0xff]   ;;  %v6421_v8 = vld [vmem:[%s8064_s5 + $0x20] ss:$16 sps:$4 sm:$0xff]  }
 0x36b   :  { %4330 = vtanh.f32 %v6376_v35 }
 0x370   :  { %v6379_v27 = vpop.f32.mrb[32].mxu0  ;;  %v6381_v29 = vpop.f32.mrb[32].mxu1 }
 0x371   :  { %v6383_v28 = vpop.f32.mrb[33].mxu0  ;;  %v6385_v17 = vpop.f32.mrb[33].mxu1 }
 0x372   :  { %v1669_v30 = vpop.f32.mrb[34].mxu0  ;;  %v1710_v14 = vpop.f32.mrb[34].mxu1 }
 0x373   :  { %v1670_v12 = vpop.f32.mrb[35].mxu0  ;;  %v1711_v61 = vpop.f32.mrb[35].mxu1  ;;  %v6451_v30 = vld [vmem:[%s8064_s5 + $0x48] ss:$16 sps:$4 sm:$0xff]   ;;  %v6457_v14 = vld [vmem:[%s8064_s5 + $0x64] ss:$16 sps:$4 sm:$0xff]  }
 0x374   :  { %8802 = vst [vmem:[#allocation84_spill] sm:$0xff] %v6451_v30  ;;  %8803 = vst [vmem:[#allocation85_spill] sm:$0xff] %v6457_v14  ;;  %v6463_v12 = vld [vmem:[%s8064_s5 + $0x6c] ss:$16 sps:$4 sm:$0xff]   ;;  %v6469_v61 = vld [vmem:[%s8064_s5 + $0x60] ss:$16 sps:$4 sm:$0xff]  }
 0x375   :  { %v4331_v16 = vpop.eup %4330  ;;  %8804 = vst [vmem:[#allocation86_spill] sm:$0xff] %v6463_v12  ;;  %8805 = vst [vmem:[#allocation87_spill] sm:$0xff] %v6469_v61 }
 0x376   :  { %v1618_v9 = vmul.f32 %v4331_v16, %v1613_v13  ;;  %v6475_v13 = vld [vmem:[%s8064_s5 + $0x68] ss:$16 sps:$4 sm:$0xff]   ;;  %v6481_v16 = vld [vmem:[%s8064_s5 + $0x84] ss:$16 sps:$4 sm:$0xff]  }
 0x377   :  { %8806 = vst [vmem:[#allocation88_spill] sm:$0xff] %v6475_v13  ;;  %8807 = vst [vmem:[#allocation89_spill] sm:$0xff] %v6481_v16 }
 0x378   :  { %v6388_v0 = vsel %vm1626_vm3, %v1618_v9, %v1242_v51  ;;  %v1619_v11 = vpack.c.bf16 %v1618_v9, %v1618_v9  ;;  %v6487_v9 = vld [vmem:[%s8064_s5 + $0x8c] ss:$16 sps:$4 sm:$0xff]   ;;  %v6493_v51 = vld [vmem:[%s8064_s5 + $0x80] ss:$16 sps:$4 sm:$0xff]  }
 0x379   :  { %8808 = vst [vmem:[#allocation90_spill] sm:$0xff] %v6487_v9  ;;  %8809 = vst [vmem:[#allocation91_spill] sm:$0xff] %v6493_v51 }
 0x37a   :  { %1851 = vmatmul.mubr.bf16.vlgmr.msra.gmra.mrb[40].mxu0 %v1619_v11  ;;  %1892 = vmatmul.mubr.bf16.vlgmr.msra.gmra.mrb[40].mxu1 %v1619_v11  ;;  %v6499_v11 = vld [vmem:[%s8064_s5 + $0x88] ss:$16 sps:$4 sm:$0xff]  }
 0x37b   :  { %1901 = vmatpush1.bf16.msra.mxu0 %v6394_v54  ;;  %1942 = vmatpush1.bf16.msra.mxu1 %v6400_v48  ;;  %8810 = vst [vmem:[#allocation92_spill] sm:$0xff] %v6499_v11 }
 0x37c   :  { %1902 = vmatprep.subr.bf16.mxu0 %v6407_v7  ;;  %1943 = vmatprep.subr.bf16.mxu1 %v6413_v21 }
 0x37d   :  { %1932 = vmatprep.mubr.bf16.mxu0 %v8564_v60  ;;  %1973 = vmatprep.mubr.bf16.mxu1 %v8564_v60 }
 0x37f   :  { %1903 = vmatpush1.bf16.msra.mxu0 %v6421_v8  ;;  %1944 = vmatpush1.bf16.msra.mxu1 %v6427_v24 }
 0x380   :  { %1904 = vmatprep.subr.bf16.mxu0 %v6433_v10  ;;  %1945 = vmatprep.subr.bf16.mxu1 %v6439_v26 }
 0x383   :  { %1905 = vmatpush1.bf16.msra.mxu0 %v6445_v6  ;;  %1946 = vmatpush1.bf16.msra.mxu1 %v6451_v30 }
 0x384   :  { %1906 = vmatprep.subr.bf16.mxu0 %v6457_v14  ;;  %1947 = vmatprep.subr.bf16.mxu1 %v6463_v12 }
 0x387   :  { %1907 = vmatpush1.bf16.msra.mxu0 %v6469_v61  ;;  %1948 = vmatpush1.bf16.msra.mxu1 %v6475_v13 }
 0x388   :  { %1908 = vmatprep.subr.bf16.mxu0 %v6481_v16  ;;  %1949 = vmatprep.subr.bf16.mxu1 %v6487_v9  ;;  %v6511_v9 = vld [vmem:[%s8064_s5 + $0xac] ss:$16 sps:$4 sm:$0xff]  }
 0x389   :  { %8812 = vst [vmem:[#allocation96_spill] sm:$0xff] %v6511_v9 }
 0x38b   :  { %1909 = vmatpush1.bf16.msra.mxu0 %v6493_v51  ;;  %1950 = vmatpush1.bf16.msra.mxu1 %v6499_v11  ;;  %v6517_v51 = vld [vmem:[%s8064_s5 + $0xa0] ss:$16 sps:$4 sm:$0xff]   ;;  %v6523_v11 = vld [vmem:[%s8064_s5 + $0xa8] ss:$16 sps:$4 sm:$0xff]  }
 0x38c   :  { %1910 = vmatprep.subr.bf16.mxu0 %v6505_v5  ;;  %1951 = vmatprep.subr.bf16.mxu1 %v6511_v9  ;;  %8813 = vst [vmem:[#allocation97_spill] sm:$0xff] %v6517_v51  ;;  %8814 = vst [vmem:[#allocation98_spill] sm:$0xff] %v6523_v11  ;;  %v6529_v9 = vld [vmem:[%s8064_s5 + $0xc4] ss:$16 sps:$4 sm:$0xff]  }
 0x38d   :  { %8815 = vst [vmem:[#allocation99_spill] sm:$0xff] %v6529_v9 }
 0x38f   :  { %1911 = vmatpush1.bf16.msra.mxu0 %v6517_v51  ;;  %1952 = vmatpush1.bf16.msra.mxu1 %v6523_v11  ;;  %v6535_v51 = vld [vmem:[%s8064_s5 + $0xcc] ss:$16 sps:$4 sm:$0xff]  }
 0x390   :  { %v1747_v5 = vpop.f32.mrb[36].mxu0  ;;  %v1788_v16 = vpop.f32.mrb[36].mxu1  ;;  %1912 = vmatprep.subr.bf16.mxu0 %v6529_v9  ;;  %8816 = vst [vmem:[#allocation100_spill] sm:$0xff] %v6535_v51  ;;  %1953 = vmatprep.subr.bf16.mxu1 %v6535_v51  ;;  %v6546_v51 = vld [vmem:[%s8064_s5 + $0xc0] ss:$16 sps:$4 sm:$0xff]  }
 0x391   :  { %v1748_v13 = vadd.f32 %v1747_v5, %v6379_v27  ;;  %v1789_v11 = vadd.f32 %v1788_v16, %v6381_v29  ;;  %v1749_v61 = vpop.f32.mrb[37].mxu0  ;;  %v1790_v12 = vpop.f32.mrb[37].mxu1  ;;  %v6552_v27 = vld [vmem:[%s8064_s5 + $0xc8] ss:$16 sps:$4 sm:$0xff]  }
 0x392   :  { %v1750_v14 = vadd.f32 %v1749_v61, %v6383_v28  ;;  %v1791_v30 = vadd.f32 %v1790_v12, %v6385_v17  ;;  %v1751_v6 = vpop.f32.mrb[38].mxu0  ;;  %v1792_v26 = vpop.f32.mrb[38].mxu1  ;;  %v6559_v28 = vld [vmem:[%s8064_s5 + $0xe4] ss:$16 sps:$4 sm:$0xff]   ;;  %v6565_v17 = vld [vmem:[%s8064_s5 + $0xec] ss:$16 sps:$4 sm:$0xff]  }
 0x393   :  { %v1795_v9 = vadd.f32 %v1748_v13, %v5559_v55  ;;  %v1752_v10 = vpop.f32.mrb[39].mxu0  ;;  %v1793_v24 = vpop.f32.mrb[39].mxu1  ;;  %1913 = vmatpush1.bf16.msra.mxu0 %v6546_v51  ;;  %1954 = vmatpush1.bf16.msra.mxu1 %v6552_v27  ;;  %v1797_v26 = vadd.f32 %v1789_v11, %v5569_v62  ;;  %v6572_v6 = vld [vmem:[%s8064_s5 + $0xe0] ss:$16 sps:$4 sm:$0xff]  }
 0x394   :  { %v1796_v29 = vadd.f32 %v1750_v14, %v5564_v1  ;;  %1914 = vmatprep.subr.bf16.mxu0 %v6559_v28  ;;  %1955 = vmatprep.subr.bf16.mxu1 %v6565_v17  ;;  %8817 = vst [vmem:[#allocation101_spill] sm:$0xff] %v6572_v6  ;;  %v6578_v14 = vld [vmem:[%s8064_s5 + $0xe8] ss:$16 sps:$4 sm:$0xff]   ;;  %v1798_v12 = vadd.f32 %v1791_v30, %v5576_v46 }
 0x395   :  { %v1799_v24 = vmul.f32 0.5, %v1795_v9  ;;  %8818 = vst [vmem:[#allocation102_spill] sm:$0xff] %v6578_v14 }
 0x396   :  { %v1803_v10 = vmul.f32 0.5, %v1796_v29  ;;  %v1808_v61 = vmul.f32 0.5, %v1798_v12 }
 0x397   :  { %4332 = vtanh.f32 %v1799_v24  ;;  %1915 = vmatpush1.bf16.msra.mxu0 %v6572_v6  ;;  %1956 = vmatpush1.bf16.msra.mxu1 %v6578_v14 }
 0x398   :  { %4334 = vtanh.f32 %v1803_v10  ;;  %2016 = vmatprep.subr.bf16.mxu0 %v5766_v3  ;;  %2057 = vmatprep.subr.bf16.mxu1 %v5772_v4 }
 0x399   :  { %4336 = vtanh.f32 %v1797_v26 }
 0x39a   :  { %4338 = vtanh.f32 %v1808_v61  ;;  %v8824_v61 = vld [vmem:[#allocation17_spill] sm:$0xff] }
 0x3a1   :  { %v4333_v13 = vpop.eup %4332 }
 0x3a2   :  { %v4335_v16 = vpop.eup %4334  ;;  %v1801_v9 = vmul.f32 0.5, %v4333_v13  ;;  %v8825_v13 = vld [vmem:[#allocation18_spill] sm:$0xff] }
 0x3a3   :  { %v1805_v11 = vmul.f32 0.5, %v4335_v16  ;;  %v4337_v29 = vpop.eup %4336  ;;  %v8826_v16 = vld [vmem:[#allocation19_spill] sm:$0xff] }
 0x3a4   :  { %v1802_v5 = vadd.f32 0.5, %v1801_v9  ;;  %v4339_v4 = vpop.eup %4338  ;;  %v8827_v9 = vld [vmem:[#allocation20_spill] sm:$0xff] }
 0x3a5   :  { %v1806_v24 = vadd.f32 0.5, %v1805_v11  ;;  %v1810_v26 = vmul.f32 0.5, %v4339_v4  ;;  %v8820_v4 = vld [vmem:[#allocation13_spill] sm:$0xff] }
 0x3a6   :  { %v1813_v6 = vmul.f32 %v4337_v29, %v1802_v5  ;;  %v8828_v11 = vld [vmem:[#allocation21_spill] sm:$0xff]  ;;  %v8829_v5 = vld [vmem:[#allocation22_spill] sm:$0xff]  ;;  %v8830_v29 = vld [vmem:[#allocation23_spill] sm:$0xff] }
 0x3a7   :  { %v1812_v14 = vmul.f32 %v1806_v24, %v5777_v23  ;;  %v1811_v3 = vadd.f32 0.5, %v1810_v26  ;;  %v8821_v23 = vld [vmem:[#allocation14_spill] sm:$0xff]  ;;  %v8831_v24 = vld [vmem:[#allocation24_spill] sm:$0xff] }
 0x3a8   :  { %v8833_v26 = vld [vmem:[#allocation26_spill] sm:$0xff] }
 0x3a9   :  { %v6585_v10 = vadd.f32 %v1813_v6, %v1812_v14  ;;  %v8822_v6 = vld [vmem:[#allocation15_spill] sm:$0xff]  ;;  %v8823_v14 = vld [vmem:[#allocation16_spill] sm:$0xff] }
 0x3ab   :  { %4340 = vtanh.f32 %v6585_v10 }
 0x3b5   :  { %v4341_v30 = vpop.eup %4340 }
 0x3b6   :  { %v1816_v12 = vmul.f32 %v4341_v30, %v1811_v3  ;;  %v8819_v3 = vld [vmem:[#allocation12_spill] sm:$0xff]  ;;  %v8834_v30 = vld [vmem:[#allocation27_spill] sm:$0xff] }
 0x3b8   :  { %v1817_v46 = vpack.c.bf16 %v1816_v12, %v1816_v12  ;;  %v8835_v12 = vld [vmem:[#allocation28_spill] sm:$0xff] }
 0x3ba   :  { %1933 = vmatmul.mubr.bf16.vlgmr.msra.gmra.mrb[44].mxu0 %v1817_v46  ;;  %1974 = vmatmul.mubr.bf16.vlgmr.msra.gmra.mrb[44].mxu1 %v1817_v46 }
 0x3bb   :  { %2017 = vmatpush1.bf16.msra.mxu0 %v5787_v31  ;;  %2058 = vmatpush1.bf16.msra.mxu1 %v5793_v52 }
 0x3bc   :  { %2018 = vmatprep.subr.bf16.mxu0 %v5799_v32  ;;  %2059 = vmatprep.subr.bf16.mxu1 %v5805_v33 }
 0x3bd   :  { %2048 = vmatprep.mubr.bf16.mxu0 %v8564_v60  ;;  %2089 = vmatprep.mubr.bf16.mxu1 %v8564_v60 }
 0x3bf   :  { %2019 = vmatpush1.bf16.msra.mxu0 %v5813_v34  ;;  %2060 = vmatpush1.bf16.msra.mxu1 %v5819_v37 }
 0x3c0   :  { %2020 = vmatprep.subr.bf16.mxu0 %v5825_v38  ;;  %2061 = vmatprep.subr.bf16.mxu1 %v5831_v39 }
 0x3c3   :  { %2021 = vmatpush1.bf16.msra.mxu0 %v5837_v15  ;;  %2062 = vmatpush1.bf16.msra.mxu1 %v5843_v20 }
 0x3c4   :  { %2022 = vmatprep.subr.bf16.mxu0 %v5849_v40  ;;  %2063 = vmatprep.subr.bf16.mxu1 %v5855_v22 }
 0x3c7   :  { %2023 = vmatpush1.bf16.msra.mxu0 %v5861_v41  ;;  %2064 = vmatpush1.bf16.msra.mxu1 %v5867_v56 }
 0x3c8   :  { %2024 = vmatprep.subr.bf16.mxu0 %v5873_v47  ;;  %2065 = vmatprep.subr.bf16.mxu1 %v5879_v50 }
 0x3cb   :  { %2025 = vmatpush1.bf16.msra.mxu0 %v5885_v57  ;;  %2066 = vmatpush1.bf16.msra.mxu1 %v5891_v59 }
 0x3cc   :  { %2026 = vmatprep.subr.bf16.mxu0 %v5897_v43  ;;  %2067 = vmatprep.subr.bf16.mxu1 %v5903_v42 }
 0x3cf   :  { %2027 = vmatpush1.bf16.msra.mxu0 %v5909_v49  ;;  %2068 = vmatpush1.bf16.msra.mxu1 %v5915_v45 }
 0x3d0   :  { %2028 = vmatprep.subr.bf16.mxu0 %v5921_v44  ;;  %2069 = vmatprep.subr.bf16.mxu1 %v5927_v53 }
 0x3d3   :  { %2029 = vmatpush1.bf16.msra.mxu0 %v5933_v58  ;;  %2070 = vmatpush1.bf16.msra.mxu1 %v5939_v63 }
 0x3d4   :  { %2030 = vmatprep.subr.bf16.mxu0 %v5945_v2  ;;  %2071 = vmatprep.subr.bf16.mxu1 %v8819_v3 }
 0x3d7   :  { %2031 = vmatpush1.bf16.msra.mxu0 %v8820_v4  ;;  %2072 = vmatpush1.bf16.msra.mxu1 %v8821_v23 }
 0x3d8   :  { %2098 = vmatprep.subr.bf16.mxu0 %v8822_v6  ;;  %2139 = vmatprep.subr.bf16.mxu1 %v8823_v14 }
 0x3da   :  { %2049 = vmatmul.mubr.bf16.vlgmr.msra.gmra.mrb[48].mxu0 %v1817_v46  ;;  %2090 = vmatmul.mubr.bf16.vlgmr.msra.gmra.mrb[48].mxu1 %v1817_v46  ;;  %v8832_v46 = vld [vmem:[#allocation25_spill] sm:$0xff] }
 0x3db   :  { %2099 = vmatpush1.bf16.msra.mxu0 %v8824_v61  ;;  %2140 = vmatpush1.bf16.msra.mxu1 %v8825_v13  ;;  %v8838_v13 = vld [vmem:[#allocation30_spill] sm:$0xff] }
 0x3dc   :  { %2100 = vmatprep.subr.bf16.mxu0 %v8826_v16  ;;  %2141 = vmatprep.subr.bf16.mxu1 %v8827_v9  ;;  %v8836_v9 = vld [vmem:[#allocation29_spill] sm:$0xff]  ;;  %v8837_v16 = vld [vmem:[#allocation31_spill] sm:$0xff] }
 0x3dd   :  { %2130 = vmatprep.mubr.bf16.mxu0 %v8564_v60  ;;  %2171 = vmatprep.mubr.bf16.mxu1 %v8564_v60 }
 0x3df   :  { %2101 = vmatpush1.bf16.msra.mxu0 %v8828_v11  ;;  %2142 = vmatpush1.bf16.msra.mxu1 %v8829_v5  ;;  %v8839_v11 = vld [vmem:[#allocation32_spill] sm:$0xff]  ;;  %v8840_v5 = vld [vmem:[#allocation33_spill] sm:$0xff] }
 0x3e0   :  { %2102 = vmatprep.subr.bf16.mxu0 %v8830_v29  ;;  %2143 = vmatprep.subr.bf16.mxu1 %v8831_v24  ;;  %v8841_v29 = vld [vmem:[#allocation35_spill] sm:$0xff]  ;;  %v8842_v24 = vld [vmem:[#allocation34_spill] sm:$0xff] }
 0x3e3   :  { %2103 = vmatpush1.bf16.msra.mxu0 %v8832_v46  ;;  %2144 = vmatpush1.bf16.msra.mxu1 %v8833_v26  ;;  %v8843_v46 = vld [vmem:[#allocation36_spill] sm:$0xff]  ;;  %v8844_v26 = vld [vmem:[#allocation37_spill] sm:$0xff] }
 0x3e4   :  { %2104 = vmatprep.subr.bf16.mxu0 %v8834_v30  ;;  %2145 = vmatprep.subr.bf16.mxu1 %v8835_v12  ;;  %v8845_v30 = vld [vmem:[#allocation39_spill] sm:$0xff]  ;;  %v8846_v12 = vld [vmem:[#allocation38_spill] sm:$0xff] }
 0x3e7   :  { %2105 = vmatpush1.bf16.msra.mxu0 %v8836_v9  ;;  %2146 = vmatpush1.bf16.msra.mxu1 %v8837_v16  ;;  %v8847_v9 = vld [vmem:[#allocation41_spill] sm:$0xff]  ;;  %v8848_v16 = vld [vmem:[#allocation40_spill] sm:$0xff] }
 0x3e8   :  { %2106 = vmatprep.subr.bf16.mxu0 %v8838_v13  ;;  %2147 = vmatprep.subr.bf16.mxu1 %v8839_v11  ;;  %v8849_v13 = vld [vmem:[#allocation42_spill] sm:$0xff]  ;;  %v8850_v11 = vld [vmem:[#allocation43_spill] sm:$0xff] }
 0x3eb   :  { %2107 = vmatpush1.bf16.msra.mxu0 %v8840_v5  ;;  %2148 = vmatpush1.bf16.msra.mxu1 %v8841_v29  ;;  %v8851_v5 = vld [vmem:[#allocation45_spill] sm:$0xff]  ;;  %v8852_v29 = vld [vmem:[#allocation44_spill] sm:$0xff] }
 0x3ec   :  { %2108 = vmatprep.subr.bf16.mxu0 %v8842_v24  ;;  %2149 = vmatprep.subr.bf16.mxu1 %v8843_v46  ;;  %v8853_v24 = vld [vmem:[#allocation46_spill] sm:$0xff]  ;;  %v8870_v46 = vld [vmem:[#allocation93_spill] sm:$0xff] }
 0x3ef   :  { %2109 = vmatpush1.bf16.msra.mxu0 %v8844_v26  ;;  %2150 = vmatpush1.bf16.msra.mxu1 %v8845_v30  ;;  %v4087_v30 = vld [vmem:[%s8062_s0 + $0xc] sm:$0xf]  ;;  %v8854_v26 = vld [vmem:[#allocation47_spill] sm:$0xff] }
 0x3f0   :  { %2110 = vmatprep.subr.bf16.mxu0 %v8846_v12  ;;  %2151 = vmatprep.subr.bf16.mxu1 %v8847_v9  ;;  %v8855_v12 = vld [vmem:[#allocation48_spill] sm:$0xff]  ;;  %v8869_v9 = vld [vmem:[#allocation62_spill] sm:$0xff] }
 0x3f3   :  { %2111 = vmatpush1.bf16.msra.mxu0 %v8848_v16  ;;  %2152 = vmatpush1.bf16.msra.mxu1 %v8849_v13  ;;  %v8856_v16 = vld [vmem:[#allocation49_spill] sm:$0xff]  ;;  %v8857_v13 = vld [vmem:[#allocation50_spill] sm:$0xff] }
 0x3f4   :  { %2112 = vmatprep.subr.bf16.mxu0 %v8850_v11  ;;  %2153 = vmatprep.subr.bf16.mxu1 %v8851_v5  ;;  %v8858_v11 = vld [vmem:[#allocation51_spill] sm:$0xff]  ;;  %v8859_v5 = vld [vmem:[#allocation53_spill] sm:$0xff] }
 0x3f7   :  { %2113 = vmatpush1.bf16.msra.mxu0 %v8852_v29  ;;  %2154 = vmatpush1.bf16.msra.mxu1 %v8853_v24  ;;  %v8860_v24 = vld [vmem:[#allocation52_spill] sm:$0xff]  ;;  %v8861_v29 = vld [vmem:[#allocation55_spill] sm:$0xff] }
 0x3f8   :  { %2203 = vmatprep.subr.bf16.mxu0 %v8854_v26  ;;  %2244 = vmatprep.subr.bf16.mxu1 %v8855_v12  ;;  %v8862_v26 = vld [vmem:[#allocation54_spill] sm:$0xff]  ;;  %v8863_v12 = vld [vmem:[#allocation56_spill] sm:$0xff] }
 0x3fa   :  { %2131 = vmatmul.mubr.bf16.vlgmr.msra.gmra.mrb[52].mxu0 %v4087_v30  ;;  %2172 = vmatmul.mubr.bf16.vlgmr.msra.gmra.mrb[52].mxu1 %v4087_v30  ;;  %v8864_v30 = vld [vmem:[#allocation57_spill] sm:$0xff] }
 0x3fb   :  { %2204 = vmatpush1.bf16.msra.mxu0 %v8856_v16  ;;  %2245 = vmatpush1.bf16.msra.mxu1 %v8857_v13  ;;  %v8865_v16 = vld [vmem:[#allocation59_spill] sm:$0xff]  ;;  %v8866_v13 = vld [vmem:[#allocation58_spill] sm:$0xff] }
 0x3fc   :  { %2205 = vmatprep.subr.bf16.mxu0 %v8858_v11  ;;  %2246 = vmatprep.subr.bf16.mxu1 %v8859_v5  ;;  %v8867_v11 = vld [vmem:[#allocation60_spill] sm:$0xff]  ;;  %v8868_v5 = vld [vmem:[#allocation61_spill] sm:$0xff] }
 0x3fd   :  { %2235 = vmatprep.mubr.bf16.mxu0 %v8564_v60  ;;  %2276 = vmatprep.mubr.bf16.mxu1 %v8564_v60 }
 0x3ff   :  { %2206 = vmatpush1.bf16.msra.mxu0 %v8860_v24  ;;  %2247 = vmatpush1.bf16.msra.mxu1 %v8861_v29  ;;  %v8871_v24 = vld [vmem:[#allocation63_spill] sm:$0xff]  ;;  %v8872_v29 = vld [vmem:[#allocation64_spill] sm:$0xff] }
 0x400   :  { %2207 = vmatprep.subr.bf16.mxu0 %v8862_v26  ;;  %2248 = vmatprep.subr.bf16.mxu1 %v8863_v12  ;;  %v8873_v26 = vld [vmem:[#allocation65_spill] sm:$0xff]  ;;  %v8874_v12 = vld [vmem:[#allocation66_spill] sm:$0xff] }
 0x403   :  { %2208 = vmatpush1.bf16.msra.mxu0 %v8864_v30  ;;  %2249 = vmatpush1.bf16.msra.mxu1 %v8865_v16  ;;  %v8875_v30 = vld [vmem:[#allocation67_spill] sm:$0xff]  ;;  %v8876_v16 = vld [vmem:[#allocation68_spill] sm:$0xff] }
 0x404   :  { %2209 = vmatprep.subr.bf16.mxu0 %v8866_v13  ;;  %2250 = vmatprep.subr.bf16.mxu1 %v8867_v11  ;;  %v8877_v13 = vld [vmem:[#allocation69_spill] sm:$0xff]  ;;  %v8878_v11 = vld [vmem:[#allocation70_spill] sm:$0xff] }
 0x407   :  { %2210 = vmatpush1.bf16.msra.mxu0 %v8868_v5  ;;  %2251 = vmatpush1.bf16.msra.mxu1 %v8869_v9  ;;  %v8879_v5 = vld [vmem:[#allocation71_spill] sm:$0xff]  ;;  %v8880_v9 = vld [vmem:[#allocation72_spill] sm:$0xff] }
 0x408   :  { %2211 = vmatprep.subr.bf16.mxu0 %v8870_v46  ;;  %2252 = vmatprep.subr.bf16.mxu1 %v8871_v24  ;;  %v8881_v46 = vld [vmem:[#allocation73_spill] sm:$0xff]  ;;  %v8882_v24 = vld [vmem:[#allocation74_spill] sm:$0xff] }
 0x40b   :  { %2212 = vmatpush1.bf16.msra.mxu0 %v8872_v29  ;;  %2253 = vmatpush1.bf16.msra.mxu1 %v8873_v26  ;;  %v8883_v29 = vld [vmem:[#allocation75_spill] sm:$0xff]  ;;  %v8884_v26 = vld [vmem:[#allocation76_spill] sm:$0xff] }
 0x40c   :  { %2213 = vmatprep.subr.bf16.mxu0 %v8874_v12  ;;  %2254 = vmatprep.subr.bf16.mxu1 %v8875_v30  ;;  %v8885_v12 = vld [vmem:[#allocation77_spill] sm:$0xff]  ;;  %v8886_v30 = vld [vmem:[#allocation78_spill] sm:$0xff] }
 0x40f   :  { %2214 = vmatpush1.bf16.msra.mxu0 %v8876_v16  ;;  %2255 = vmatpush1.bf16.msra.mxu1 %v8877_v13  ;;  %v8887_v16 = vld [vmem:[#allocation79_spill] sm:$0xff] }
 0x410   :  { %2215 = vmatprep.subr.bf16.mxu0 %v8878_v11  ;;  %2256 = vmatprep.subr.bf16.mxu1 %v8879_v5 }
 0x413   :  { %2216 = vmatpush1.bf16.msra.mxu0 %v8880_v9  ;;  %2257 = vmatpush1.bf16.msra.mxu1 %v8881_v46 }
 0x414   :  { %2217 = vmatprep.subr.bf16.mxu0 %v8882_v24  ;;  %2258 = vmatprep.subr.bf16.mxu1 %v8883_v29 }
 0x417   :  { %2218 = vmatpush1.bf16.msra.mxu0 %v8884_v26  ;;  %2259 = vmatpush1.bf16.msra.mxu1 %v8885_v12 }
 0x418   :  { %2285 = vmatprep.subr.bf16.mxu0 %v8886_v30  ;;  %2326 = vmatprep.subr.bf16.mxu1 %v8887_v16 }
 0x44d   :  { %v1852_v13 = vpop.f32.mrb[40].mxu0  ;;  %v1893_v11 = vpop.f32.mrb[40].mxu1 }
 0x44e   :  { %v1854_v61 = vpop.f32.mrb[41].mxu0  ;;  %v1895_v5 = vpop.f32.mrb[41].mxu1 }
 0x44f   :  { %v1856_v14 = vpop.f32.mrb[42].mxu0  ;;  %v1897_v9 = vpop.f32.mrb[42].mxu1 }
 0x450   :  { %v1857_v6 = vpop.f32.mrb[43].mxu0  ;;  %v1898_v46 = vpop.f32.mrb[43].mxu1 }
 0x48d   :  { %v1934_v23 = vpop.f32.mrb[44].mxu0  ;;  %v1975_v24 = vpop.f32.mrb[44].mxu1 }
 0x48e   :  { %v1935_v4 = vadd.f32 %v1934_v23, %v1852_v13  ;;  %v1976_v29 = vadd.f32 %v1975_v24, %v1893_v11  ;;  %v1936_v3 = vpop.f32.mrb[45].mxu0  ;;  %v1977_v26 = vpop.f32.mrb[45].mxu1 }
 0x48f   :  { %v1937_v2 = vadd.f32 %v1936_v3, %v1854_v61  ;;  %v1978_v12 = vadd.f32 %v1977_v26, %v1895_v5  ;;  %v1938_v63 = vpop.f32.mrb[46].mxu0  ;;  %v1979_v30 = vpop.f32.mrb[46].mxu1 }
 0x490   :  { %v1982_v16 = vadd.f32 %v1935_v4, %v5698_v19  ;;  %v1939_v58 = vpop.f32.mrb[47].mxu0  ;;  %v1980_v53 = vpop.f32.mrb[47].mxu1  ;;  %v1984_v6 = vadd.f32 %v1976_v29, %v5710_v36 }
 0x491   :  { %v1983_v44 = vadd.f32 %v1937_v2, %v5702_v25  ;;  %v1985_v23 = vadd.f32 %v1978_v12, %v5716_v18  ;;  %v2010_v29 = vpop.permute.xlu1 %2009 }
 0x492   :  { %v1986_v14 = vmul.f32 0.5, %v1982_v16  ;;  %vm2011_vm5 = vcmp.eq.s32.totalorder %v2010_v29, 1  ;;  %v8894_v29 = vld [vmem:[#allocation86_spill] sm:$0xff] }
 0x493   :  { %v1990_v9 = vmul.f32 0.5, %v1983_v44  ;;  %v1995_v13 = vmul.f32 0.5, %v1985_v23 }
 0x494   :  { %4342 = vtanh.f32 %v1986_v14 }
 0x495   :  { %4344 = vtanh.f32 %v1990_v9 }
 0x496   :  { %4346 = vtanh.f32 %v1984_v6 }
 0x497   :  { %4348 = vtanh.f32 %v1995_v13 }
 0x49e   :  { %v4343_v3 = vpop.eup %4342 }
 0x49f   :  { %v4345_v61 = vpop.eup %4344  ;;  %v1988_v63 = vmul.f32 0.5, %v4343_v3 }
 0x4a0   :  { %v1992_v11 = vmul.f32 0.5, %v4345_v61  ;;  %v4347_v58 = vpop.eup %4346 }
 0x4a1   :  { %v1989_v4 = vadd.f32 0.5, %v1988_v63  ;;  %v4349_v16 = vpop.eup %4348 }
 0x4a2   :  { %v1993_v53 = vadd.f32 0.5, %v1992_v11  ;;  %v1997_v24 = vmul.f32 0.5, %v4349_v16  ;;  %v6707_v11 = vld [vmem:[%s8065_s1] sm:$0xff]  ;;  %v8893_v16 = vld [vmem:[#allocation85_spill] sm:$0xff] }
 0x4a3   :  { %v2000_v5 = vmul.f32 %v4347_v58, %v1989_v4  ;;  %vm2391_vm6 = vcmp.eq.s32.totalorder %v6707_v11, 3  ;;  %v8889_v58 = vld [vmem:[#allocation81_spill] sm:$0xff]  ;;  %vm2776_vm8 = vcmp.eq.s32.totalorder %v6707_v11, 4  ;;  %vm3161_vm10 = vcmp.eq.s32.totalorder %v6707_v11, 5  ;;  %v7550_v11 = vld [vmem:[%s8064_s5 + $0x24] ss:$16 sps:$4 sm:$0xff]  }
 0x4a4   :  { %v1999_v2 = vmul.f32 %v1993_v53, %v6376_v35  ;;  %v1998_v13 = vadd.f32 0.5, %v1997_v24  ;;  %v2392_v4 = vsel %vm2391_vm6, 1, %v8564_v60  ;;  %v8890_v53 = vld [vmem:[#allocation82_spill] sm:$0xff]  ;;  %v8895_v24 = vld [vmem:[#allocation87_spill] sm:$0xff] }
 0x4a5   :  { %2394 = vperm.xlu1 %4099, %v2392_v4   ;;  %v8904_v4 = vld [vmem:[#allocation98_spill] sm:$0xff] }
 0x4a6   :  { %v6698_v44 = vadd.f32 %v2000_v5, %v1999_v2  ;;  %v8891_v5 = vld [vmem:[#allocation83_spill] sm:$0xff]  ;;  %v8892_v2 = vld [vmem:[#allocation84_spill] sm:$0xff] }
 0x4a8   :  { %4350 = vtanh.f32 %v6698_v44 }
 0x4ad   :  { %v2050_v46 = vpop.f32.mrb[48].mxu0  ;;  %v2091_v26 = vpop.f32.mrb[48].mxu1 }
 0x4ae   :  { %v2052_v12 = vpop.f32.mrb[49].mxu0  ;;  %v2093_v30 = vpop.f32.mrb[49].mxu1 }
 0x4af   :  { %v2054_v14 = vpop.f32.mrb[50].mxu0  ;;  %v2095_v9 = vpop.f32.mrb[50].mxu1 }
 0x4b0   :  { %v2055_v6 = vpop.f32.mrb[51].mxu0  ;;  %v2096_v23 = vpop.f32.mrb[51].mxu1  ;;  %v8896_v14 = vld [vmem:[#allocation88_spill] sm:$0xff]  ;;  %v8897_v9 = vld [vmem:[#allocation89_spill] sm:$0xff] }
 0x4b1   :  { %v8898_v6 = vld [vmem:[#allocation90_spill] sm:$0xff]  ;;  %v8899_v23 = vld [vmem:[#allocation91_spill] sm:$0xff] }
 0x4b2   :  { %v4351_v3 = vpop.eup %4350 }
 0x4b3   :  { %v2003_v61 = vmul.f32 %v4351_v3, %v1998_v13  ;;  %v8900_v13 = vld [vmem:[#allocation92_spill] sm:$0xff]  ;;  %v8901_v3 = vld [vmem:[#allocation95_spill] sm:$0xff] }
 0x4b5   :  { %v6702_v35 = vsel %vm2011_vm5, %v2003_v61, %v6388_v0  ;;  %v2004_v63 = vpack.c.bf16 %v2003_v61, %v2003_v61  ;;  %v8888_v0 = vld [vmem:[#allocation80_spill] sm:$0xff] }
 0x4b6   :  { %v8902_v61 = vld [vmem:[#allocation96_spill] sm:$0xff] }
 0x4b7   :  { %2236 = vmatmul.mubr.bf16.vlgmr.msra.gmra.mrb[56].mxu0 %v2004_v63  ;;  %2277 = vmatmul.mubr.bf16.vlgmr.msra.gmra.mrb[56].mxu1 %v2004_v63  ;;  %v8903_v63 = vld [vmem:[#allocation97_spill] sm:$0xff] }
 0x4b8   :  { %2286 = vmatpush1.bf16.msra.mxu0 %v6394_v54  ;;  %2327 = vmatpush1.bf16.msra.mxu1 %v6400_v48 }
 0x4b9   :  { %2287 = vmatprep.subr.bf16.mxu0 %v6407_v7  ;;  %2328 = vmatprep.subr.bf16.mxu1 %v6413_v21 }
 0x4ba   :  { %2317 = vmatprep.mubr.bf16.mxu0 %v8564_v60  ;;  %2358 = vmatprep.mubr.bf16.mxu1 %v8564_v60 }
 0x4bc   :  { %2288 = vmatpush1.bf16.msra.mxu0 %v6421_v8  ;;  %2329 = vmatpush1.bf16.msra.mxu1 %v8888_v0 }
 0x4bd   :  { %2289 = vmatprep.subr.bf16.mxu0 %v8889_v58  ;;  %2330 = vmatprep.subr.bf16.mxu1 %v8890_v53 }
 0x4c0   :  { %2290 = vmatpush1.bf16.msra.mxu0 %v8891_v5  ;;  %2331 = vmatpush1.bf16.msra.mxu1 %v8892_v2 }
 0x4c1   :  { %2291 = vmatprep.subr.bf16.mxu0 %v8893_v16  ;;  %2332 = vmatprep.subr.bf16.mxu1 %v8894_v29  ;;  %v8905_v16 = vld [vmem:[#allocation99_spill] sm:$0xff] }
 0x4c4   :  { %2292 = vmatpush1.bf16.msra.mxu0 %v8895_v24  ;;  %2333 = vmatpush1.bf16.msra.mxu1 %v8896_v14  ;;  %v8906_v14 = vld [vmem:[#allocation100_spill] sm:$0xff] }
 0x4c5   :  { %2293 = vmatprep.subr.bf16.mxu0 %v8897_v9  ;;  %2334 = vmatprep.subr.bf16.mxu1 %v8898_v6 }
 0x4c8   :  { %2294 = vmatpush1.bf16.msra.mxu0 %v8899_v23  ;;  %2335 = vmatpush1.bf16.msra.mxu1 %v8900_v13 }
 0x4c9   :  { %2295 = vmatprep.subr.bf16.mxu0 %v8901_v3  ;;  %2336 = vmatprep.subr.bf16.mxu1 %v8902_v61 }
 0x4cc   :  { %2296 = vmatpush1.bf16.msra.mxu0 %v8903_v63  ;;  %2337 = vmatpush1.bf16.msra.mxu1 %v8904_v4 }
 0x4cd   :  { %v2132_v29 = vpop.f32.mrb[52].mxu0  ;;  %v2173_v24 = vpop.f32.mrb[52].mxu1  ;;  %2297 = vmatprep.subr.bf16.mxu0 %v8905_v16  ;;  %2338 = vmatprep.subr.bf16.mxu1 %v8906_v14 }
 0x4ce   :  { %v2133_v9 = vadd.f32 %v2132_v29, %v2050_v46  ;;  %v2174_v6 = vadd.f32 %v2173_v24, %v2091_v26  ;;  %v2134_v2 = vpop.f32.mrb[53].mxu0  ;;  %v2175_v23 = vpop.f32.mrb[53].mxu1 }
 0x4cf   :  { %v2135_v5 = vadd.f32 %v2134_v2, %v2052_v12  ;;  %v2176_v13 = vadd.f32 %v2175_v23, %v2093_v30  ;;  %v2136_v53 = vpop.f32.mrb[54].mxu0  ;;  %v2177_v3 = vpop.f32.mrb[54].mxu1  ;;  %v8907_v30 = vld [vmem:[#allocation101_spill] sm:$0xff]  ;;  %v8910_v2 = vld [vmem:[#allocation6_spill] sm:$0xff] }
 0x4d0   :  { %v2180_v61 = vadd.f32 %v2133_v9, %v5559_v55  ;;  %v2137_v58 = vpop.f32.mrb[55].mxu0  ;;  %v2178_v63 = vpop.f32.mrb[55].mxu1  ;;  %2298 = vmatpush1.bf16.msra.mxu0 %v6546_v51  ;;  %2339 = vmatpush1.bf16.msra.mxu1 %v6552_v27  ;;  %v2182_v12 = vadd.f32 %v2174_v6, %v5569_v62  ;;  %v8908_v53 = vld [vmem:[#allocation102_spill] sm:$0xff] }
 0x4d1   :  { %v2181_v16 = vadd.f32 %v2135_v5, %v5564_v1  ;;  %2299 = vmatprep.subr.bf16.mxu0 %v6559_v28  ;;  %2340 = vmatprep.subr.bf16.mxu1 %v6565_v17  ;;  %v8909_v58 = vld [vmem:[#allocation5_spill] sm:$0xff]  ;;  %v8911_v5 = vld [vmem:[#allocation94_spill] sm:$0xff] }
 0x4d2   :  { %v2184_v46 = vmul.f32 0.5, %v2180_v61  ;;  %v2183_v29 = vadd.f32 %v2176_v13, %v8911_v5 }
 0x4d3   :  { %v2188_v26 = vmul.f32 0.5, %v2181_v16 }
 0x4d4   :  { %4352 = vtanh.f32 %v2184_v46  ;;  %2300 = vmatpush1.bf16.msra.mxu0 %v8907_v30  ;;  %2341 = vmatpush1.bf16.msra.mxu1 %v8908_v53  ;;  %v2193_v24 = vmul.f32 0.5, %v2183_v29 }
 0x4d5   :  { %4354 = vtanh.f32 %v2188_v26  ;;  %2401 = vmatprep.subr.bf16.mxu0 %v8909_v58  ;;  %2442 = vmatprep.subr.bf16.mxu1 %v8910_v2 }
 0x4d6   :  { %4356 = vtanh.f32 %v2182_v12 }
 0x4d7   :  { %4358 = vtanh.f32 %v2193_v24  ;;  %v8937_v24 = vld [vmem:[#allocation32_spill] sm:$0xff] }
 0x4de   :  { %v4353_v9 = vpop.eup %4352 }
 0x4df   :  { %v4355_v23 = vpop.eup %4354  ;;  %v2186_v3 = vmul.f32 0.5, %v4353_v9  ;;  %v8938_v9 = vld [vmem:[#allocation33_spill] sm:$0xff] }
 0x4e0   :  { %v2190_v16 = vmul.f32 0.5, %v4355_v23  ;;  %v4357_v6 = vpop.eup %4356  ;;  %v8939_v23 = vld [vmem:[#allocation35_spill] sm:$0xff] }
 0x4e1   :  { %v2187_v61 = vadd.f32 0.5, %v2186_v3  ;;  %v4359_v58 = vpop.eup %4358  ;;  %v8940_v3 = vld [vmem:[#allocation34_spill] sm:$0xff] }
 0x4e2   :  { %v2191_v63 = vadd.f32 0.5, %v2190_v16  ;;  %v2195_v12 = vmul.f32 0.5, %v4359_v58  ;;  %v8941_v16 = vld [vmem:[#allocation36_spill] sm:$0xff] }
 0x4e3   :  { %v2198_v46 = vmul.f32 %v4357_v6, %v2187_v61  ;;  %v8942_v61 = vld [vmem:[#allocation37_spill] sm:$0xff]  ;;  %v8943_v6 = vld [vmem:[#allocation39_spill] sm:$0xff]  ;;  %v8946_v58 = vld [vmem:[#allocation40_spill] sm:$0xff] }
 0x4e4   :  { %v2197_v53 = vmul.f32 %v2191_v63, %v6585_v10  ;;  %v2196_v2 = vadd.f32 0.5, %v2195_v12  ;;  %v8934_v10 = vld [vmem:[#allocation29_spill] sm:$0xff]  ;;  %v8944_v63 = vld [vmem:[#allocation38_spill] sm:$0xff] }
 0x4e5   :  { %v8947_v12 = vld [vmem:[#allocation42_spill] sm:$0xff] }
 0x4e6   :  { %v6750_v26 = vadd.f32 %v2198_v46, %v2197_v53  ;;  %v8935_v53 = vld [vmem:[#allocation31_spill] sm:$0xff]  ;;  %v8945_v46 = vld [vmem:[#allocation41_spill] sm:$0xff] }
 0x4e8   :  { %4360 = vtanh.f32 %v6750_v26 }
 0x4f2   :  { %v4361_v13 = vpop.eup %4360 }
 0x4f3   :  { %v2201_v29 = vmul.f32 %v4361_v13, %v2196_v2  ;;  %v8948_v2 = vld [vmem:[#allocation43_spill] sm:$0xff]  ;;  %v8949_v13 = vld [vmem:[#allocation45_spill] sm:$0xff] }
 0x4f5   :  { %v2202_v5 = vpack.c.bf16 %v2201_v29, %v2201_v29  ;;  %v8950_v29 = vld [vmem:[#allocation44_spill] sm:$0xff] }
 0x4f7   :  { %2318 = vmatmul.mubr.bf16.vlgmr.msra.gmra.mrb[60].mxu0 %v2202_v5  ;;  %2359 = vmatmul.mubr.bf16.vlgmr.msra.gmra.mrb[60].mxu1 %v2202_v5 }
 0x4f8   :  { %2402 = vmatpush1.bf16.msra.mxu0 %v5787_v31  ;;  %2443 = vmatpush1.bf16.msra.mxu1 %v5793_v52  ;;  %v8912_v31 = vld [vmem:[#allocation7_spill] sm:$0xff]  ;;  %v8913_v52 = vld [vmem:[#allocation8_spill] sm:$0xff] }
 0x4f9   :  { %2403 = vmatprep.subr.bf16.mxu0 %v5799_v32  ;;  %2444 = vmatprep.subr.bf16.mxu1 %v5805_v33  ;;  %v8914_v32 = vld [vmem:[#allocation9_spill] sm:$0xff]  ;;  %v8915_v33 = vld [vmem:[#allocation10_spill] sm:$0xff] }
 0x4fa   :  { %2433 = vmatprep.mubr.bf16.mxu0 %v8564_v60  ;;  %2474 = vmatprep.mubr.bf16.mxu1 %v8564_v60 }
 0x4fc   :  { %2404 = vmatpush1.bf16.msra.mxu0 %v5813_v34  ;;  %2445 = vmatpush1.bf16.msra.mxu1 %v5819_v37  ;;  %v8916_v34 = vld [vmem:[#allocation11_spill] sm:$0xff]  ;;  %v8917_v37 = vld [vmem:[#allocation12_spill] sm:$0xff] }
 0x4fd   :  { %2405 = vmatprep.subr.bf16.mxu0 %v5825_v38  ;;  %2446 = vmatprep.subr.bf16.mxu1 %v5831_v39  ;;  %v8918_v38 = vld [vmem:[#allocation13_spill] sm:$0xff]  ;;  %v8919_v39 = vld [vmem:[#allocation14_spill] sm:$0xff] }
 0x500   :  { %2406 = vmatpush1.bf16.msra.mxu0 %v5837_v15  ;;  %2447 = vmatpush1.bf16.msra.mxu1 %v5843_v20  ;;  %v8920_v15 = vld [vmem:[#allocation15_spill] sm:$0xff]  ;;  %v8921_v20 = vld [vmem:[#allocation16_spill] sm:$0xff] }
 0x501   :  { %2407 = vmatprep.subr.bf16.mxu0 %v5849_v40  ;;  %2448 = vmatprep.subr.bf16.mxu1 %v5855_v22  ;;  %v8922_v40 = vld [vmem:[#allocation17_spill] sm:$0xff]  ;;  %v8923_v22 = vld [vmem:[#allocation18_spill] sm:$0xff] }
 0x504   :  { %2408 = vmatpush1.bf16.msra.mxu0 %v5861_v41  ;;  %2449 = vmatpush1.bf16.msra.mxu1 %v5867_v56  ;;  %v8924_v41 = vld [vmem:[#allocation19_spill] sm:$0xff]  ;;  %v8925_v56 = vld [vmem:[#allocation20_spill] sm:$0xff] }
 0x505   :  { %2409 = vmatprep.subr.bf16.mxu0 %v5873_v47  ;;  %2450 = vmatprep.subr.bf16.mxu1 %v5879_v50  ;;  %v8926_v47 = vld [vmem:[#allocation21_spill] sm:$0xff]  ;;  %v8927_v50 = vld [vmem:[#allocation22_spill] sm:$0xff] }
 0x508   :  { %2410 = vmatpush1.bf16.msra.mxu0 %v5885_v57  ;;  %2451 = vmatpush1.bf16.msra.mxu1 %v5891_v59  ;;  %v8928_v57 = vld [vmem:[#allocation23_spill] sm:$0xff]  ;;  %v8929_v59 = vld [vmem:[#allocation24_spill] sm:$0xff] }
 0x509   :  { %2411 = vmatprep.subr.bf16.mxu0 %v5897_v43  ;;  %2452 = vmatprep.subr.bf16.mxu1 %v5903_v42  ;;  %v8930_v43 = vld [vmem:[#allocation25_spill] sm:$0xff]  ;;  %v8931_v42 = vld [vmem:[#allocation26_spill] sm:$0xff] }
 0x50c   :  { %2412 = vmatpush1.bf16.msra.mxu0 %v5909_v49  ;;  %2453 = vmatpush1.bf16.msra.mxu1 %v5915_v45  ;;  %v8932_v49 = vld [vmem:[#allocation27_spill] sm:$0xff]  ;;  %v8933_v45 = vld [vmem:[#allocation28_spill] sm:$0xff] }
 0x50d   :  { %2413 = vmatprep.subr.bf16.mxu0 %v8912_v31  ;;  %2454 = vmatprep.subr.bf16.mxu1 %v8913_v52  ;;  %v8951_v31 = vld [vmem:[#allocation46_spill] sm:$0xff] }
 0x50e   :  { %v4088_v52 = vld [vmem:[%s8062_s0 + $0x10] sm:$0xf] }
 0x510   :  { %2414 = vmatpush1.bf16.msra.mxu0 %v8914_v32  ;;  %2455 = vmatpush1.bf16.msra.mxu1 %v8915_v33  ;;  %v8952_v32 = vld [vmem:[#allocation47_spill] sm:$0xff]  ;;  %v8953_v33 = vld [vmem:[#allocation48_spill] sm:$0xff] }
 0x511   :  { %2415 = vmatprep.subr.bf16.mxu0 %v8916_v34  ;;  %2456 = vmatprep.subr.bf16.mxu1 %v8917_v37  ;;  %v8954_v34 = vld [vmem:[#allocation49_spill] sm:$0xff]  ;;  %v8955_v37 = vld [vmem:[#allocation50_spill] sm:$0xff] }
 0x514   :  { %2416 = vmatpush1.bf16.msra.mxu0 %v8918_v38  ;;  %2457 = vmatpush1.bf16.msra.mxu1 %v8919_v39  ;;  %v8956_v38 = vld [vmem:[#allocation51_spill] sm:$0xff]  ;;  %v8957_v39 = vld [vmem:[#allocation53_spill] sm:$0xff] }
 0x515   :  { %2483 = vmatprep.subr.bf16.mxu0 %v8920_v15  ;;  %2524 = vmatprep.subr.bf16.mxu1 %v8921_v20  ;;  %v8958_v15 = vld [vmem:[#allocation52_spill] sm:$0xff]  ;;  %v8959_v20 = vld [vmem:[#allocation55_spill] sm:$0xff] }
 0x517   :  { %2434 = vmatmul.mubr.bf16.vlgmr.msra.gmra.mrb[64].mxu0 %v2202_v5  ;;  %2475 = vmatmul.mubr.bf16.vlgmr.msra.gmra.mrb[64].mxu1 %v2202_v5  ;;  %v8936_v5 = vld [vmem:[#allocation30_spill] sm:$0xff] }
 0x518   :  { %2484 = vmatpush1.bf16.msra.mxu0 %v8922_v40  ;;  %2525 = vmatpush1.bf16.msra.mxu1 %v8923_v22  ;;  %v8960_v40 = vld [vmem:[#allocation54_spill] sm:$0xff]  ;;  %v8961_v22 = vld [vmem:[#allocation56_spill] sm:$0xff] }
 0x519   :  { %2485 = vmatprep.subr.bf16.mxu0 %v8924_v41  ;;  %2526 = vmatprep.subr.bf16.mxu1 %v8925_v56  ;;  %v8962_v41 = vld [vmem:[#allocation57_spill] sm:$0xff]  ;;  %v8963_v56 = vld [vmem:[#allocation59_spill] sm:$0xff] }
 0x51a   :  { %2515 = vmatprep.mubr.bf16.mxu0 %v8564_v60  ;;  %2556 = vmatprep.mubr.bf16.mxu1 %v8564_v60 }
 0x51c   :  { %2486 = vmatpush1.bf16.msra.mxu0 %v8926_v47  ;;  %2527 = vmatpush1.bf16.msra.mxu1 %v8927_v50  ;;  %v8964_v47 = vld [vmem:[#allocation58_spill] sm:$0xff]  ;;  %v8965_v50 = vld [vmem:[#allocation60_spill] sm:$0xff] }
 0x51d   :  { %2487 = vmatprep.subr.bf16.mxu0 %v8928_v57  ;;  %2528 = vmatprep.subr.bf16.mxu1 %v8929_v59  ;;  %v8966_v57 = vld [vmem:[#allocation61_spill] sm:$0xff]  ;;  %v8967_v59 = vld [vmem:[#allocation62_spill] sm:$0xff] }
 0x520   :  { %2488 = vmatpush1.bf16.msra.mxu0 %v8930_v43  ;;  %2529 = vmatpush1.bf16.msra.mxu1 %v8931_v42  ;;  %v8968_v43 = vld [vmem:[#allocation93_spill] sm:$0xff]  ;;  %v8969_v42 = vld [vmem:[#allocation63_spill] sm:$0xff] }
 0x521   :  { %2489 = vmatprep.subr.bf16.mxu0 %v8932_v49  ;;  %2530 = vmatprep.subr.bf16.mxu1 %v8933_v45  ;;  %v8970_v49 = vld [vmem:[#allocation64_spill] sm:$0xff]  ;;  %v8971_v45 = vld [vmem:[#allocation65_spill] sm:$0xff] }
 0x524   :  { %2490 = vmatpush1.bf16.msra.mxu0 %v8934_v10  ;;  %2531 = vmatpush1.bf16.msra.mxu1 %v8935_v53  ;;  %v8972_v10 = vld [vmem:[#allocation66_spill] sm:$0xff]  ;;  %v8973_v53 = vld [vmem:[#allocation67_spill] sm:$0xff] }
 0x525   :  { %2491 = vmatprep.subr.bf16.mxu0 %v8936_v5  ;;  %2532 = vmatprep.subr.bf16.mxu1 %v8937_v24  ;;  %v8974_v5 = vld [vmem:[#allocation68_spill] sm:$0xff]  ;;  %v8975_v24 = vld [vmem:[#allocation69_spill] sm:$0xff] }
 0x528   :  { %2492 = vmatpush1.bf16.msra.mxu0 %v8938_v9  ;;  %2533 = vmatpush1.bf16.msra.mxu1 %v8939_v23  ;;  %v8976_v9 = vld [vmem:[#allocation70_spill] sm:$0xff]  ;;  %v8977_v23 = vld [vmem:[#allocation71_spill] sm:$0xff] }
 0x529   :  { %2493 = vmatprep.subr.bf16.mxu0 %v8940_v3  ;;  %2534 = vmatprep.subr.bf16.mxu1 %v8941_v16  ;;  %v8978_v3 = vld [vmem:[#allocation72_spill] sm:$0xff]  ;;  %v8979_v16 = vld [vmem:[#allocation73_spill] sm:$0xff] }
 0x52c   :  { %2494 = vmatpush1.bf16.msra.mxu0 %v8942_v61  ;;  %2535 = vmatpush1.bf16.msra.mxu1 %v8943_v6  ;;  %v8980_v61 = vld [vmem:[#allocation74_spill] sm:$0xff]  ;;  %v8981_v6 = vld [vmem:[#allocation75_spill] sm:$0xff] }
 0x52d   :  { %2495 = vmatprep.subr.bf16.mxu0 %v8944_v63  ;;  %2536 = vmatprep.subr.bf16.mxu1 %v8945_v46  ;;  %v8982_v63 = vld [vmem:[#allocation76_spill] sm:$0xff]  ;;  %v8983_v46 = vld [vmem:[#allocation77_spill] sm:$0xff] }
 0x530   :  { %2496 = vmatpush1.bf16.msra.mxu0 %v8946_v58  ;;  %2537 = vmatpush1.bf16.msra.mxu1 %v8947_v12  ;;  %v8984_v58 = vld [vmem:[#allocation78_spill] sm:$0xff]  ;;  %v8985_v12 = vld [vmem:[#allocation79_spill] sm:$0xff] }
 0x531   :  { %2497 = vmatprep.subr.bf16.mxu0 %v8948_v2  ;;  %2538 = vmatprep.subr.bf16.mxu1 %v8949_v13 }
 0x534   :  { %2498 = vmatpush1.bf16.msra.mxu0 %v8950_v29  ;;  %2539 = vmatpush1.bf16.msra.mxu1 %v8951_v31 }
 0x535   :  { %2588 = vmatprep.subr.bf16.mxu0 %v8952_v32  ;;  %2629 = vmatprep.subr.bf16.mxu1 %v8953_v33 }
 0x537   :  { %2516 = vmatmul.mubr.bf16.vlgmr.msra.gmra.mrb[68].mxu0 %v4088_v52  ;;  %2557 = vmatmul.mubr.bf16.vlgmr.msra.gmra.mrb[68].mxu1 %v4088_v52 }
 0x538   :  { %2589 = vmatpush1.bf16.msra.mxu0 %v8954_v34  ;;  %2630 = vmatpush1.bf16.msra.mxu1 %v8955_v37 }
 0x539   :  { %2590 = vmatprep.subr.bf16.mxu0 %v8956_v38  ;;  %2631 = vmatprep.subr.bf16.mxu1 %v8957_v39 }
 0x53a   :  { %2620 = vmatprep.mubr.bf16.mxu0 %v8564_v60  ;;  %2661 = vmatprep.mubr.bf16.mxu1 %v8564_v60 }
 0x53c   :  { %2591 = vmatpush1.bf16.msra.mxu0 %v8958_v15  ;;  %2632 = vmatpush1.bf16.msra.mxu1 %v8959_v20 }
 0x53d   :  { %2592 = vmatprep.subr.bf16.mxu0 %v8960_v40  ;;  %2633 = vmatprep.subr.bf16.mxu1 %v8961_v22 }
 0x540   :  { %2593 = vmatpush1.bf16.msra.mxu0 %v8962_v41  ;;  %2634 = vmatpush1.bf16.msra.mxu1 %v8963_v56 }
 0x541   :  { %2594 = vmatprep.subr.bf16.mxu0 %v8964_v47  ;;  %2635 = vmatprep.subr.bf16.mxu1 %v8965_v50 }
 0x544   :  { %2595 = vmatpush1.bf16.msra.mxu0 %v8966_v57  ;;  %2636 = vmatpush1.bf16.msra.mxu1 %v8967_v59 }
 0x545   :  { %2596 = vmatprep.subr.bf16.mxu0 %v8968_v43  ;;  %2637 = vmatprep.subr.bf16.mxu1 %v8969_v42 }
 0x548   :  { %2597 = vmatpush1.bf16.msra.mxu0 %v8970_v49  ;;  %2638 = vmatpush1.bf16.msra.mxu1 %v8971_v45 }
 0x549   :  { %2598 = vmatprep.subr.bf16.mxu0 %v8972_v10  ;;  %2639 = vmatprep.subr.bf16.mxu1 %v8973_v53 }
 0x54c   :  { %2599 = vmatpush1.bf16.msra.mxu0 %v8974_v5  ;;  %2640 = vmatpush1.bf16.msra.mxu1 %v8975_v24 }
 0x54d   :  { %2600 = vmatprep.subr.bf16.mxu0 %v8976_v9  ;;  %2641 = vmatprep.subr.bf16.mxu1 %v8977_v23 }
 0x550   :  { %2601 = vmatpush1.bf16.msra.mxu0 %v8978_v3  ;;  %2642 = vmatpush1.bf16.msra.mxu1 %v8979_v16 }
 0x551   :  { %2602 = vmatprep.subr.bf16.mxu0 %v8980_v61  ;;  %2643 = vmatprep.subr.bf16.mxu1 %v8981_v6 }
 0x554   :  { %2603 = vmatpush1.bf16.msra.mxu0 %v8982_v63  ;;  %2644 = vmatpush1.bf16.msra.mxu1 %v8983_v46 }
 0x555   :  { %2670 = vmatprep.subr.bf16.mxu0 %v8984_v58  ;;  %2711 = vmatprep.subr.bf16.mxu1 %v8985_v12  ;;  %v2395_v12 = vpop.permute.xlu1 %2394 }
 0x556   :  { %vm2396_vm7 = vcmp.eq.s32.totalorder %v2395_v12, 1 }
 0x58a   :  { %v2237_v2 = vpop.f32.mrb[56].mxu0  ;;  %v2278_v13 = vpop.f32.mrb[56].mxu1 }
 0x58b   :  { %v2239_v29 = vpop.f32.mrb[57].mxu0  ;;  %v2280_v31 = vpop.f32.mrb[57].mxu1 }
 0x58c   :  { %v2241_v52 = vpop.f32.mrb[58].mxu0  ;;  %v2282_v32 = vpop.f32.mrb[58].mxu1 }
 0x58d   :  { %v2242_v33 = vpop.f32.mrb[59].mxu0  ;;  %v2283_v34 = vpop.f32.mrb[59].mxu1 }
 0x5ca   :  { %v2319_v37 = vpop.f32.mrb[60].mxu0  ;;  %v2360_v38 = vpop.f32.mrb[60].mxu1 }
 0x5cb   :  { %v2320_v39 = vadd.f32 %v2319_v37, %v2237_v2  ;;  %v2361_v15 = vadd.f32 %v2360_v38, %v2278_v13  ;;  %v2321_v20 = vpop.f32.mrb[61].mxu0  ;;  %v2362_v40 = vpop.f32.mrb[61].mxu1 }
 0x5cc   :  { %v2322_v22 = vadd.f32 %v2321_v20, %v2239_v29  ;;  %v2363_v41 = vadd.f32 %v2362_v40, %v2280_v31  ;;  %v2323_v56 = vpop.f32.mrb[62].mxu0  ;;  %v2364_v47 = vpop.f32.mrb[62].mxu1  ;;  %v2777_v40 = vsel %vm2776_vm8, 1, %v8564_v60 }
 0x5cd   :  { %v2367_v50 = vadd.f32 %v2320_v39, %v5698_v19  ;;  %v2324_v57 = vpop.f32.mrb[63].mxu0  ;;  %v2365_v59 = vpop.f32.mrb[63].mxu1  ;;  %v2369_v45 = vadd.f32 %v2361_v15, %v5710_v36  ;;  %2779 = vperm.xlu0 %4098, %v2777_v40   ;;  %v8993_v56 = vld [vmem:[#allocation88_spill] sm:$0xff]  ;;  %v8994_v47 = vld [vmem:[#allocation89_spill] sm:$0xff] }
 0x5ce   :  { %v2368_v43 = vadd.f32 %v2322_v22, %v5702_v25  ;;  %v2370_v10 = vadd.f32 %v2363_v41, %v5716_v18  ;;  %v8989_v22 = vld [vmem:[#allocation84_spill] sm:$0xff]  ;;  %v8992_v41 = vld [vmem:[#allocation87_spill] sm:$0xff] }
 0x5cf   :  { %v2371_v42 = vmul.f32 0.5, %v2367_v50  ;;  %v8997_v50 = vld [vmem:[#allocation92_spill] sm:$0xff]  ;;  %v8998_v57 = vld [vmem:[#allocation95_spill] sm:$0xff] }
 0x5d0   :  { %v2375_v49 = vmul.f32 0.5, %v2368_v43  ;;  %v2380_v53 = vmul.f32 0.5, %v2370_v10  ;;  %v8999_v59 = vld [vmem:[#allocation96_spill] sm:$0xff]  ;;  %v9000_v43 = vld [vmem:[#allocation97_spill] sm:$0xff] }
 0x5d1   :  { %4362 = vtanh.f32 %v2371_v42 }
 0x5d2   :  { %4364 = vtanh.f32 %v2375_v49 }
 0x5d3   :  { %4366 = vtanh.f32 %v2369_v45  ;;  %v9001_v45 = vld [vmem:[#allocation99_spill] sm:$0xff] }
 0x5d4   :  { %4368 = vtanh.f32 %v2380_v53 }
 0x5db   :  { %v4363_v5 = vpop.eup %4362 }
 0x5dc   :  { %v4365_v24 = vpop.eup %4364  ;;  %v2373_v9 = vmul.f32 0.5, %v4363_v5 }
 0x5dd   :  { %v2377_v23 = vmul.f32 0.5, %v4365_v24  ;;  %v4367_v16 = vpop.eup %4366 }
 0x5de   :  { %v2374_v3 = vadd.f32 0.5, %v2373_v9  ;;  %v4369_v58 = vpop.eup %4368 }
 0x5df   :  { %v2378_v61 = vadd.f32 0.5, %v2377_v23  ;;  %v2382_v2 = vmul.f32 0.5, %v4369_v58 }
 0x5e0   :  { %v2385_v6 = vmul.f32 %v4367_v16, %v2374_v3 }
 0x5e1   :  { %v2384_v63 = vmul.f32 %v2378_v61, %v6698_v44  ;;  %v2383_v38 = vadd.f32 0.5, %v2382_v2  ;;  %v9002_v2 = vld [vmem:[#allocation102_spill] sm:$0xff] }
 0x5e3   :  { %v6863_v46 = vadd.f32 %v2385_v6, %v2384_v63 }
 0x5e5   :  { %4370 = vtanh.f32 %v6863_v46 }
 0x5ea   :  { %v2435_v13 = vpop.f32.mrb[64].mxu0  ;;  %v2476_v29 = vpop.f32.mrb[64].mxu1 }
 0x5eb   :  { %v2437_v31 = vpop.f32.mrb[65].mxu0  ;;  %v2478_v52 = vpop.f32.mrb[65].mxu1 }
 0x5ec   :  { %v2439_v32 = vpop.f32.mrb[66].mxu0  ;;  %v2480_v33 = vpop.f32.mrb[66].mxu1 }
 0x5ed   :  { %v2440_v34 = vpop.f32.mrb[67].mxu0  ;;  %v2481_v37 = vpop.f32.mrb[67].mxu1 }
 0x5ef   :  { %v4371_v39 = vpop.eup %4370 }
 0x5f0   :  { %v2388_v15 = vmul.f32 %v4371_v39, %v2383_v38 }
 0x5f2   :  { %v6867_v44 = vsel %vm2396_vm7, %v2388_v15, %v6702_v35  ;;  %v2389_v20 = vpack.c.bf16 %v2388_v15, %v2388_v15  ;;  %v8986_v35 = vld [vmem:[#allocation81_spill] sm:$0xff] }
 0x5f4   :  { %2621 = vmatmul.mubr.bf16.vlgmr.msra.gmra.mrb[72].mxu0 %v2389_v20  ;;  %2662 = vmatmul.mubr.bf16.vlgmr.msra.gmra.mrb[72].mxu1 %v2389_v20 }
 0x5f5   :  { %2671 = vmatpush1.bf16.msra.mxu0 %v6394_v54  ;;  %2712 = vmatpush1.bf16.msra.mxu1 %v6400_v48  ;;  %v8987_v54 = vld [vmem:[#allocation82_spill] sm:$0xff]  ;;  %v8988_v48 = vld [vmem:[#allocation83_spill] sm:$0xff] }
 0x5f6   :  { %2672 = vmatprep.subr.bf16.mxu0 %v6407_v7  ;;  %2713 = vmatprep.subr.bf16.mxu1 %v6413_v21  ;;  %v8990_v7 = vld [vmem:[#allocation85_spill] sm:$0xff]  ;;  %v8991_v21 = vld [vmem:[#allocation86_spill] sm:$0xff] }
 0x5f7   :  { %2702 = vmatprep.mubr.bf16.mxu0 %v8564_v60  ;;  %2743 = vmatprep.mubr.bf16.mxu1 %v8564_v60 }
 0x5f9   :  { %2673 = vmatpush1.bf16.msra.mxu0 %v6421_v8  ;;  %2714 = vmatpush1.bf16.msra.mxu1 %v8888_v0  ;;  %v8995_v8 = vld [vmem:[#allocation90_spill] sm:$0xff]  ;;  %v8996_v0 = vld [vmem:[#allocation91_spill] sm:$0xff] }
 0x5fa   :  { %2674 = vmatprep.subr.bf16.mxu0 %v8986_v35  ;;  %2715 = vmatprep.subr.bf16.mxu1 %v8987_v54 }
 0x5fd   :  { %2675 = vmatpush1.bf16.msra.mxu0 %v8988_v48  ;;  %2716 = vmatpush1.bf16.msra.mxu1 %v8989_v22  ;;  %v6930_v22 = vld [vmem:[%s8060_s3] ss:$16 sps:$4 sm:$0xff]  }
 0x5fe   :  { %2676 = vmatprep.subr.bf16.mxu0 %v8990_v7  ;;  %2717 = vmatprep.subr.bf16.mxu1 %v8991_v21  ;;  %v6942_v7 = vld [vmem:[%s8060_s3 + $0x24] ss:$16 sps:$4 sm:$0xff]   ;;  %v6948_v21 = vld [vmem:[%s8060_s3 + $0x2c] ss:$16 sps:$4 sm:$0xff]  }
 0x601   :  { %2677 = vmatpush1.bf16.msra.mxu0 %v8992_v41  ;;  %2718 = vmatpush1.bf16.msra.mxu1 %v8993_v56  ;;  %v6956_v41 = vld [vmem:[%s8060_s3 + $0x20] ss:$16 sps:$4 sm:$0xff]   ;;  %v6962_v56 = vld [vmem:[%s8060_s3 + $0x28] ss:$16 sps:$4 sm:$0xff]  }
 0x602   :  { %2678 = vmatprep.subr.bf16.mxu0 %v8994_v47  ;;  %2719 = vmatprep.subr.bf16.mxu1 %v8995_v8  ;;  %v6968_v47 = vld [vmem:[%s8060_s3 + $0x44] ss:$16 sps:$4 sm:$0xff]   ;;  %v6974_v8 = vld [vmem:[%s8060_s3 + $0x4c] ss:$16 sps:$4 sm:$0xff]  }
 0x605   :  { %2679 = vmatpush1.bf16.msra.mxu0 %v8996_v0  ;;  %2720 = vmatpush1.bf16.msra.mxu1 %v8997_v50  ;;  %v6980_v0 = vld [vmem:[%s8060_s3 + $0x40] ss:$16 sps:$4 sm:$0xff]   ;;  %v6986_v50 = vld [vmem:[%s8060_s3 + $0x48] ss:$16 sps:$4 sm:$0xff]  }
 0x606   :  { %2680 = vmatprep.subr.bf16.mxu0 %v8998_v57  ;;  %2721 = vmatprep.subr.bf16.mxu1 %v8999_v59  ;;  %v6992_v57 = vld [vmem:[%s8060_s3 + $0x64] ss:$16 sps:$4 sm:$0xff]   ;;  %v6998_v59 = vld [vmem:[%s8060_s3 + $0x6c] ss:$16 sps:$4 sm:$0xff]  }
 0x609   :  { %2681 = vmatpush1.bf16.msra.mxu0 %v9000_v43  ;;  %2722 = vmatpush1.bf16.msra.mxu1 %v8904_v4  ;;  %v7004_v43 = vld [vmem:[%s8060_s3 + $0x60] ss:$16 sps:$4 sm:$0xff]  }
 0x60a   :  { %v2517_v42 = vpop.f32.mrb[68].mxu0  ;;  %v2558_v49 = vpop.f32.mrb[68].mxu1  ;;  %2682 = vmatprep.subr.bf16.mxu0 %v9001_v45  ;;  %2723 = vmatprep.subr.bf16.mxu1 %v8906_v14  ;;  %v7022_v45 = vld [vmem:[%s8060_s3 + $0x8c] ss:$16 sps:$4 sm:$0xff]  }
 0x60b   :  { %v2518_v10 = vadd.f32 %v2517_v42, %v2435_v13  ;;  %v2559_v53 = vadd.f32 %v2558_v49, %v2476_v29  ;;  %v2519_v5 = vpop.f32.mrb[69].mxu0  ;;  %v2560_v24 = vpop.f32.mrb[69].mxu1  ;;  %v7010_v42 = vld [vmem:[%s8060_s3 + $0x68] ss:$16 sps:$4 sm:$0xff]   ;;  %v7016_v49 = vld [vmem:[%s8060_s3 + $0x84] ss:$16 sps:$4 sm:$0xff]  }
 0x60c   :  { %v2520_v9 = vadd.f32 %v2519_v5, %v2437_v31  ;;  %v2561_v23 = vadd.f32 %v2560_v24, %v2478_v52  ;;  %v2521_v3 = vpop.f32.mrb[70].mxu0  ;;  %v2562_v16 = vpop.f32.mrb[70].mxu1  ;;  %v7040_v5 = vld [vmem:[%s8060_s3 + $0xa4] ss:$16 sps:$4 sm:$0xff]   ;;  %v7046_v24 = vld [vmem:[%s8060_s3 + $0xac] ss:$16 sps:$4 sm:$0xff]  }
 0x60d   :  { %v2565_v61 = vadd.f32 %v2518_v10, %v5559_v55  ;;  %v2522_v6 = vpop.f32.mrb[71].mxu0  ;;  %v2563_v63 = vpop.f32.mrb[71].mxu1  ;;  %2683 = vmatpush1.bf16.msra.mxu0 %v6546_v51  ;;  %2724 = vmatpush1.bf16.msra.mxu1 %v6552_v27  ;;  %v2567_v12 = vadd.f32 %v2559_v53, %v5569_v62  ;;  %v6909_v51 = vld [vmem:[%s8060_s3 + $0x4] ss:$16 sps:$4 sm:$0xff]   ;;  %v6915_v27 = vld [vmem:[%s8060_s3 + $0xc] ss:$16 sps:$4 sm:$0xff]  }
 0x60e   :  { %v2566_v4 = vadd.f32 %v2520_v9, %v5564_v1  ;;  %2684 = vmatprep.subr.bf16.mxu0 %v6559_v28  ;;  %2725 = vmatprep.subr.bf16.mxu1 %v6565_v17  ;;  %9003 = vst [vmem:[#allocation80_spill] sm:$0xff] %v6909_v51  ;;  %9004 = vst [vmem:[#allocation98_spill] sm:$0xff] %v6915_v27  ;;  %v9005_v28 = vld [vmem:[#allocation94_spill] sm:$0xff]  ;;  %v7034_v53 = vld [vmem:[%s8060_s3 + $0x88] ss:$16 sps:$4 sm:$0xff]  }
 0x60f   :  { %v2569_v14 = vmul.f32 0.5, %v2565_v61  ;;  %v2568_v17 = vadd.f32 %v2561_v23, %v9005_v28  ;;  %v7028_v10 = vld [vmem:[%s8060_s3 + $0x80] ss:$16 sps:$4 sm:$0xff]   ;;  %v7058_v23 = vld [vmem:[%s8060_s3 + $0xa8] ss:$16 sps:$4 sm:$0xff]  }
 0x610   :  { %v2573_v58 = vmul.f32 0.5, %v2566_v4  ;;  %v7052_v9 = vld [vmem:[%s8060_s3 + $0xa0] ss:$16 sps:$4 sm:$0xff]   ;;  %v7064_v3 = vld [vmem:[%s8060_s3 + $0xc4] ss:$16 sps:$4 sm:$0xff]  }
 0x611   :  { %4372 = vtanh.f32 %v2569_v14  ;;  %2685 = vmatpush1.bf16.msra.mxu0 %v8907_v30  ;;  %2726 = vmatpush1.bf16.msra.mxu1 %v9002_v2  ;;  %v2578_v30 = vmul.f32 0.5, %v2568_v17  ;;  %9006 = vst [vmem:[#allocation100_spill] sm:$0xff] %v7064_v3  ;;  %v7070_v16 = vld [vmem:[%s8060_s3 + $0xcc] ss:$16 sps:$4 sm:$0xff]   ;;  %v7076_v61 = vld [vmem:[%s8060_s3 + $0xc0] ss:$16 sps:$4 sm:$0xff]  }
 0x612   :  { %4374 = vtanh.f32 %v2573_v58  ;;  %2786 = vmatprep.subr.bf16.mxu0 %v6909_v51  ;;  %2827 = vmatprep.subr.bf16.mxu1 %v6915_v27  ;;  %9007 = vst [vmem:[#allocation101_spill] sm:$0xff] %v7070_v16  ;;  %9008 = vst [vmem:[#allocation5_spill] sm:$0xff] %v7076_v61  ;;  %v7082_v6 = vld [vmem:[%s8060_s3 + $0xc8] ss:$16 sps:$4 sm:$0xff]   ;;  %v7088_v63 = vld [vmem:[%s8060_s3 + $0xe4] ss:$16 sps:$4 sm:$0xff]  }
 0x613   :  { %4376 = vtanh.f32 %v2567_v12  ;;  %9009 = vst [vmem:[#allocation6_spill] sm:$0xff] %v7082_v6  ;;  %9010 = vst [vmem:[#allocation7_spill] sm:$0xff] %v7088_v63  ;;  %v7094_v4 = vld [vmem:[%s8060_s3 + $0xec] ss:$16 sps:$4 sm:$0xff]   ;;  %v7100_v14 = vld [vmem:[%s8060_s3 + $0xe0] ss:$16 sps:$4 sm:$0xff]  }
 0x614   :  { %4378 = vtanh.f32 %v2578_v30  ;;  %9011 = vst [vmem:[#allocation8_spill] sm:$0xff] %v7094_v4  ;;  %9012 = vst [vmem:[#allocation9_spill] sm:$0xff] %v7100_v14  ;;  %v7106_v58 = vld [vmem:[%s8060_s3 + $0xe8] ss:$16 sps:$4 sm:$0xff]   ;;  %v7112_v12 = vld [vmem:[%s8061_s2 + $0x4] ss:$16 sps:$4 sm:$0xff]  }
 0x615   :  { %9013 = vst [vmem:[#allocation10_spill] sm:$0xff] %v7106_v58  ;;  %9014 = vst [vmem:[#allocation11_spill] sm:$0xff] %v7112_v12  ;;  %v7118_v2 = vld [vmem:[%s8061_s2 + $0xc] ss:$16 sps:$4 sm:$0xff]   ;;  %v7126_v17 = vld [vmem:[%s8061_s2] ss:$16 sps:$4 sm:$0xff]  }
 0x616   :  { %9015 = vst [vmem:[#allocation12_spill] sm:$0xff] %v7118_v2  ;;  %9016 = vst [vmem:[#allocation13_spill] sm:$0xff] %v7126_v17  ;;  %v7132_v30 = vld [vmem:[%s8061_s2 + $0x8] ss:$16 sps:$4 sm:$0xff]  }
 0x617   :  { %9017 = vst [vmem:[#allocation14_spill] sm:$0xff] %v7132_v30 }
 0x61b   :  { %v4373_v13 = vpop.eup %4372 }
 0x61c   :  { %v4375_v29 = vpop.eup %4374  ;;  %v2571_v31 = vmul.f32 0.5, %v4373_v13  ;;  %v7138_v13 = vld [vmem:[%s8061_s2 + $0x24] ss:$16 sps:$4 sm:$0xff]  }
 0x61d   :  { %v2575_v52 = vmul.f32 0.5, %v4375_v29  ;;  %v4377_v33 = vpop.eup %4376  ;;  %9018 = vst [vmem:[#allocation15_spill] sm:$0xff] %v7138_v13  ;;  %v7144_v29 = vld [vmem:[%s8061_s2 + $0x2c] ss:$16 sps:$4 sm:$0xff]  }
 0x61e   :  { %v2572_v32 = vadd.f32 0.5, %v2571_v31  ;;  %v4379_v15 = vpop.eup %4378  ;;  %9019 = vst [vmem:[#allocation16_spill] sm:$0xff] %v7144_v29  ;;  %v7152_v31 = vld [vmem:[%s8061_s2 + $0x20] ss:$16 sps:$4 sm:$0xff]  }
 0x61f   :  { %v2576_v34 = vadd.f32 0.5, %v2575_v52  ;;  %v2580_v20 = vmul.f32 0.5, %v4379_v15  ;;  %9020 = vst [vmem:[#allocation17_spill] sm:$0xff] %v7152_v31  ;;  %v7158_v52 = vld [vmem:[%s8061_s2 + $0x28] ss:$16 sps:$4 sm:$0xff]  }
 0x620   :  { %v2583_v37 = vmul.f32 %v4377_v33, %v2572_v32  ;;  %9021 = vst [vmem:[#allocation18_spill] sm:$0xff] %v7158_v52  ;;  %v7164_v32 = vld [vmem:[%s8061_s2 + $0x44] ss:$16 sps:$4 sm:$0xff]   ;;  %v7170_v33 = vld [vmem:[%s8061_s2 + $0x4c] ss:$16 sps:$4 sm:$0xff]  }
 0x621   :  { %v2582_v38 = vmul.f32 %v2576_v34, %v6750_v26  ;;  %v2581_v40 = vadd.f32 0.5, %v2580_v20  ;;  %v6936_v26 = vld [vmem:[%s8060_s3 + $0x8] ss:$16 sps:$4 sm:$0xff]   ;;  %9022 = vst [vmem:[#allocation19_spill] sm:$0xff] %v7164_v32  ;;  %9023 = vst [vmem:[#allocation20_spill] sm:$0xff] %v7170_v33 }
 0x622   :  { %v7176_v34 = vld [vmem:[%s8061_s2 + $0x40] ss:$16 sps:$4 sm:$0xff]   ;;  %v7194_v15 = vld [vmem:[%s8061_s2 + $0x6c] ss:$16 sps:$4 sm:$0xff]  }
 0x623   :  { %v6920_v39 = vadd.f32 %v2583_v37, %v2582_v38  ;;  %9024 = vst [vmem:[#allocation21_spill] sm:$0xff] %v7176_v34  ;;  %v7182_v37 = vld [vmem:[%s8061_s2 + $0x48] ss:$16 sps:$4 sm:$0xff]   ;;  %v7188_v38 = vld [vmem:[%s8061_s2 + $0x64] ss:$16 sps:$4 sm:$0xff]   ;;  %9027 = vst [vmem:[#allocation24_spill] sm:$0xff] %v7194_v15 }
 0x624   :  { %9025 = vst [vmem:[#allocation22_spill] sm:$0xff] %v7182_v37  ;;  %9026 = vst [vmem:[#allocation23_spill] sm:$0xff] %v7188_v38  ;;  %v7200_v20 = vld [vmem:[%s8061_s2 + $0x60] ss:$16 sps:$4 sm:$0xff]  }
 0x625   :  { %4380 = vtanh.f32 %v6920_v39  ;;  %9028 = vst [vmem:[#allocation25_spill] sm:$0xff] %v7200_v20 }
 0x62f   :  { %v4381_v35 = vpop.eup %4380 }
 0x630   :  { %v2586_v54 = vmul.f32 %v4381_v35, %v2581_v40  ;;  %v7206_v40 = vld [vmem:[%s8061_s2 + $0x68] ss:$16 sps:$4 sm:$0xff]   ;;  %v7212_v35 = vld [vmem:[%s8061_s2 + $0x84] ss:$16 sps:$4 sm:$0xff]  }
 0x631   :  { %9029 = vst [vmem:[#allocation26_spill] sm:$0xff] %v7206_v40  ;;  %9030 = vst [vmem:[#allocation27_spill] sm:$0xff] %v7212_v35 }
 0x632   :  { %v6923_v48 = vpack.c.bf16 %v2586_v54, %v2586_v54  ;;  %v7218_v54 = vld [vmem:[%s8061_s2 + $0x8c] ss:$16 sps:$4 sm:$0xff]  }
 0x633   :  { %9031 = vst [vmem:[#allocation28_spill] sm:$0xff] %v7218_v54 }
 0x634   :  { %2703 = vmatmul.mubr.bf16.vlgmr.msra.gmra.mrb[76].mxu0 %v6923_v48  ;;  %2744 = vmatmul.mubr.bf16.vlgmr.msra.gmra.mrb[76].mxu1 %v6923_v48 }
 0x635   :  { %2787 = vmatpush1.bf16.msra.mxu0 %v6930_v22  ;;  %2828 = vmatpush1.bf16.msra.mxu1 %v6936_v26 }
 0x636   :  { %2788 = vmatprep.subr.bf16.mxu0 %v6942_v7  ;;  %2829 = vmatprep.subr.bf16.mxu1 %v6948_v21 }
 0x637   :  { %2818 = vmatprep.mubr.bf16.mxu0 %v8564_v60  ;;  %2859 = vmatprep.mubr.bf16.mxu1 %v8564_v60 }
 0x639   :  { %2789 = vmatpush1.bf16.msra.mxu0 %v6956_v41  ;;  %2830 = vmatpush1.bf16.msra.mxu1 %v6962_v56 }
 0x63a   :  { %2790 = vmatprep.subr.bf16.mxu0 %v6968_v47  ;;  %2831 = vmatprep.subr.bf16.mxu1 %v6974_v8 }
 0x63d   :  { %2791 = vmatpush1.bf16.msra.mxu0 %v6980_v0  ;;  %2832 = vmatpush1.bf16.msra.mxu1 %v6986_v50 }
 0x63e   :  { %2792 = vmatprep.subr.bf16.mxu0 %v6992_v57  ;;  %2833 = vmatprep.subr.bf16.mxu1 %v6998_v59 }
 0x641   :  { %2793 = vmatpush1.bf16.msra.mxu0 %v7004_v43  ;;  %2834 = vmatpush1.bf16.msra.mxu1 %v7010_v42 }
 0x642   :  { %2794 = vmatprep.subr.bf16.mxu0 %v7016_v49  ;;  %2835 = vmatprep.subr.bf16.mxu1 %v7022_v45 }
 0x645   :  { %2795 = vmatpush1.bf16.msra.mxu0 %v7028_v10  ;;  %2836 = vmatpush1.bf16.msra.mxu1 %v7034_v53 }
 0x646   :  { %2796 = vmatprep.subr.bf16.mxu0 %v7040_v5  ;;  %2837 = vmatprep.subr.bf16.mxu1 %v7046_v24 }
 0x649   :  { %2797 = vmatpush1.bf16.msra.mxu0 %v7052_v9  ;;  %2838 = vmatpush1.bf16.msra.mxu1 %v7058_v23 }
 0x64a   :  { %2798 = vmatprep.subr.bf16.mxu0 %v7064_v3  ;;  %2839 = vmatprep.subr.bf16.mxu1 %v7070_v16 }
 0x64d   :  { %2799 = vmatpush1.bf16.msra.mxu0 %v7076_v61  ;;  %2840 = vmatpush1.bf16.msra.mxu1 %v7082_v6 }
 0x64e   :  { %2800 = vmatprep.subr.bf16.mxu0 %v7088_v63  ;;  %2841 = vmatprep.subr.bf16.mxu1 %v7094_v4 }
 0x651   :  { %2801 = vmatpush1.bf16.msra.mxu0 %v7100_v14  ;;  %2842 = vmatpush1.bf16.msra.mxu1 %v7106_v58 }
 0x652   :  { %2868 = vmatprep.subr.bf16.mxu0 %v7112_v12  ;;  %2909 = vmatprep.subr.bf16.mxu1 %v7118_v2 }
 0x654   :  { %2819 = vmatmul.mubr.bf16.vlgmr.msra.gmra.mrb[80].mxu0 %v6923_v48  ;;  %2860 = vmatmul.mubr.bf16.vlgmr.msra.gmra.mrb[80].mxu1 %v6923_v48  ;;  %v7224_v48 = vld [vmem:[%s8061_s2 + $0x80] ss:$16 sps:$4 sm:$0xff]  }
 0x655   :  { %2869 = vmatpush1.bf16.msra.mxu0 %v7126_v17  ;;  %2910 = vmatpush1.bf16.msra.mxu1 %v7132_v30  ;;  %9032 = vst [vmem:[#allocation29_spill] sm:$0xff] %v7224_v48 }
 0x656   :  { %2870 = vmatprep.subr.bf16.mxu0 %v7138_v13  ;;  %2911 = vmatprep.subr.bf16.mxu1 %v7144_v29 }
 0x657   :  { %2900 = vmatprep.mubr.bf16.mxu0 %v8564_v60  ;;  %2941 = vmatprep.mubr.bf16.mxu1 %v8564_v60 }
 0x659   :  { %2871 = vmatpush1.bf16.msra.mxu0 %v7152_v31  ;;  %2912 = vmatpush1.bf16.msra.mxu1 %v7158_v52 }
 0x65a   :  { %2872 = vmatprep.subr.bf16.mxu0 %v7164_v32  ;;  %2913 = vmatprep.subr.bf16.mxu1 %v7170_v33 }
 0x65d   :  { %2873 = vmatpush1.bf16.msra.mxu0 %v7176_v34  ;;  %2914 = vmatpush1.bf16.msra.mxu1 %v7182_v37 }
 0x65e   :  { %2874 = vmatprep.subr.bf16.mxu0 %v7188_v38  ;;  %2915 = vmatprep.subr.bf16.mxu1 %v7194_v15 }
 0x661   :  { %2875 = vmatpush1.bf16.msra.mxu0 %v7200_v20  ;;  %2916 = vmatpush1.bf16.msra.mxu1 %v7206_v40  ;;  %v7230_v40 = vld [vmem:[%s8061_s2 + $0x88] ss:$16 sps:$4 sm:$0xff]  }
 0x662   :  { %2876 = vmatprep.subr.bf16.mxu0 %v7212_v35  ;;  %2917 = vmatprep.subr.bf16.mxu1 %v7218_v54  ;;  %9033 = vst [vmem:[#allocation31_spill] sm:$0xff] %v7230_v40  ;;  %v7236_v35 = vld [vmem:[%s8061_s2 + $0xa4] ss:$16 sps:$4 sm:$0xff]   ;;  %v7242_v54 = vld [vmem:[%s8061_s2 + $0xac] ss:$16 sps:$4 sm:$0xff]  }
 0x663   :  { %9034 = vst [vmem:[#allocation30_spill] sm:$0xff] %v7236_v35  ;;  %9035 = vst [vmem:[#allocation32_spill] sm:$0xff] %v7242_v54 }
 0x665   :  { %2877 = vmatpush1.bf16.msra.mxu0 %v7224_v48  ;;  %2918 = vmatpush1.bf16.msra.mxu1 %v7230_v40  ;;  %v7248_v48 = vld [vmem:[%s8061_s2 + $0xa0] ss:$16 sps:$4 sm:$0xff]   ;;  %v7254_v40 = vld [vmem:[%s8061_s2 + $0xa8] ss:$16 sps:$4 sm:$0xff]  }
 0x666   :  { %2878 = vmatprep.subr.bf16.mxu0 %v7236_v35  ;;  %2919 = vmatprep.subr.bf16.mxu1 %v7242_v54  ;;  %9036 = vst [vmem:[#allocation33_spill] sm:$0xff] %v7248_v48  ;;  %9037 = vst [vmem:[#allocation35_spill] sm:$0xff] %v7254_v40  ;;  %v7260_v35 = vld [vmem:[%s8061_s2 + $0xc4] ss:$16 sps:$4 sm:$0xff]   ;;  %v7266_v54 = vld [vmem:[%s8061_s2 + $0xcc] ss:$16 sps:$4 sm:$0xff]  }
 0x667   :  { %9038 = vst [vmem:[#allocation34_spill] sm:$0xff] %v7260_v35  ;;  %9039 = vst [vmem:[#allocation36_spill] sm:$0xff] %v7266_v54 }
 0x669   :  { %2879 = vmatpush1.bf16.msra.mxu0 %v7248_v48  ;;  %2920 = vmatpush1.bf16.msra.mxu1 %v7254_v40  ;;  %v7272_v48 = vld [vmem:[%s8061_s2 + $0xc0] ss:$16 sps:$4 sm:$0xff]   ;;  %v7278_v40 = vld [vmem:[%s8061_s2 + $0xc8] ss:$16 sps:$4 sm:$0xff]  }
 0x66a   :  { %2880 = vmatprep.subr.bf16.mxu0 %v7260_v35  ;;  %2921 = vmatprep.subr.bf16.mxu1 %v7266_v54  ;;  %9040 = vst [vmem:[#allocation37_spill] sm:$0xff] %v7272_v48  ;;  %9041 = vst [vmem:[#allocation39_spill] sm:$0xff] %v7278_v40  ;;  %v7284_v35 = vld [vmem:[%s8061_s2 + $0xe4] ss:$16 sps:$4 sm:$0xff]   ;;  %v7290_v54 = vld [vmem:[%s8061_s2 + $0xec] ss:$16 sps:$4 sm:$0xff]  }
 0x66b   :  { %9042 = vst [vmem:[#allocation38_spill] sm:$0xff] %v7284_v35  ;;  %9043 = vst [vmem:[#allocation41_spill] sm:$0xff] %v7290_v54 }
 0x66d   :  { %2881 = vmatpush1.bf16.msra.mxu0 %v7272_v48  ;;  %2922 = vmatpush1.bf16.msra.mxu1 %v7278_v40  ;;  %v7296_v48 = vld [vmem:[%s8061_s2 + $0xe0] ss:$16 sps:$4 sm:$0xff]   ;;  %v7302_v40 = vld [vmem:[%s8061_s2 + $0xe8] ss:$16 sps:$4 sm:$0xff]  }
 0x66e   :  { %2882 = vmatprep.subr.bf16.mxu0 %v7284_v35  ;;  %2923 = vmatprep.subr.bf16.mxu1 %v7290_v54  ;;  %9044 = vst [vmem:[#allocation40_spill] sm:$0xff] %v7296_v48  ;;  %9045 = vst [vmem:[#allocation42_spill] sm:$0xff] %v7302_v40  ;;  %v4089_v35 = vld [vmem:[%s8062_s0 + $0x14] sm:$0xf] }
 0x66f   :  { %v7311_v54 = vld [vmem:[%s8063_s6 + $0x4] ss:$16 sps:$4 sm:$0xff]  }
 0x670   :  { %9046 = vst [vmem:[#allocation43_spill] sm:$0xff] %v7311_v54 }
 0x671   :  { %2883 = vmatpush1.bf16.msra.mxu0 %v7296_v48  ;;  %2924 = vmatpush1.bf16.msra.mxu1 %v7302_v40  ;;  %v7317_v48 = vld [vmem:[%s8063_s6 + $0xc] ss:$16 sps:$4 sm:$0xff]   ;;  %v7323_v40 = vld [vmem:[%s8063_s6] ss:$16 sps:$4 sm:$0xff]  }
 0x672   :  { %2973 = vmatprep.subr.bf16.mxu0 %v7311_v54  ;;  %9047 = vst [vmem:[#allocation45_spill] sm:$0xff] %v7317_v48  ;;  %3014 = vmatprep.subr.bf16.mxu1 %v7317_v48  ;;  %9048 = vst [vmem:[#allocation44_spill] sm:$0xff] %v7323_v40  ;;  %v7329_v54 = vld [vmem:[%s8063_s6 + $0x8] ss:$16 sps:$4 sm:$0xff]   ;;  %v7335_v48 = vld [vmem:[%s8063_s6 + $0x24] ss:$16 sps:$4 sm:$0xff]  }
 0x673   :  { %9049 = vst [vmem:[#allocation46_spill] sm:$0xff] %v7329_v54  ;;  %9050 = vst [vmem:[#allocation47_spill] sm:$0xff] %v7335_v48 }
 0x674   :  { %2901 = vmatmul.mubr.bf16.vlgmr.msra.gmra.mrb[84].mxu0 %v4089_v35  ;;  %2942 = vmatmul.mubr.bf16.vlgmr.msra.gmra.mrb[84].mxu1 %v4089_v35  ;;  %v7341_v35 = vld [vmem:[%s8063_s6 + $0x2c] ss:$16 sps:$4 sm:$0xff]  }
 0x675   :  { %2974 = vmatpush1.bf16.msra.mxu0 %v7323_v40  ;;  %3015 = vmatpush1.bf16.msra.mxu1 %v7329_v54  ;;  %9051 = vst [vmem:[#allocation48_spill] sm:$0xff] %v7341_v35  ;;  %v7349_v54 = vld [vmem:[%s8063_s6 + $0x20] ss:$16 sps:$4 sm:$0xff]   ;;  %v7367_v40 = vld [vmem:[%s8063_s6 + $0x4c] ss:$16 sps:$4 sm:$0xff]  }
 0x676   :  { %2975 = vmatprep.subr.bf16.mxu0 %v7335_v48  ;;  %3016 = vmatprep.subr.bf16.mxu1 %v7341_v35  ;;  %9052 = vst [vmem:[#allocation49_spill] sm:$0xff] %v7349_v54  ;;  %v7355_v48 = vld [vmem:[%s8063_s6 + $0x28] ss:$16 sps:$4 sm:$0xff]   ;;  %v7361_v35 = vld [vmem:[%s8063_s6 + $0x44] ss:$16 sps:$4 sm:$0xff]   ;;  %9055 = vst [vmem:[#allocation53_spill] sm:$0xff] %v7367_v40 }
 0x677   :  { %3005 = vmatprep.mubr.bf16.mxu0 %v8564_v60  ;;  %3046 = vmatprep.mubr.bf16.mxu1 %v8564_v60  ;;  %9053 = vst [vmem:[#allocation50_spill] sm:$0xff] %v7355_v48  ;;  %9054 = vst [vmem:[#allocation51_spill] sm:$0xff] %v7361_v35 }
 0x679   :  { %2976 = vmatpush1.bf16.msra.mxu0 %v7349_v54  ;;  %3017 = vmatpush1.bf16.msra.mxu1 %v7355_v48  ;;  %v7373_v54 = vld [vmem:[%s8063_s6 + $0x40] ss:$16 sps:$4 sm:$0xff]   ;;  %v7379_v48 = vld [vmem:[%s8063_s6 + $0x48] ss:$16 sps:$4 sm:$0xff]  }
 0x67a   :  { %2977 = vmatprep.subr.bf16.mxu0 %v7361_v35  ;;  %3018 = vmatprep.subr.bf16.mxu1 %v7367_v40  ;;  %9056 = vst [vmem:[#allocation52_spill] sm:$0xff] %v7373_v54  ;;  %9057 = vst [vmem:[#allocation55_spill] sm:$0xff] %v7379_v48  ;;  %v7385_v35 = vld [vmem:[%s8063_s6 + $0x64] ss:$16 sps:$4 sm:$0xff]   ;;  %v7391_v40 = vld [vmem:[%s8063_s6 + $0x6c] ss:$16 sps:$4 sm:$0xff]  }
 0x67b   :  { %9058 = vst [vmem:[#allocation54_spill] sm:$0xff] %v7385_v35  ;;  %9059 = vst [vmem:[#allocation56_spill] sm:$0xff] %v7391_v40 }
 0x67d   :  { %2978 = vmatpush1.bf16.msra.mxu0 %v7373_v54  ;;  %3019 = vmatpush1.bf16.msra.mxu1 %v7379_v48  ;;  %v7397_v54 = vld [vmem:[%s8063_s6 + $0x60] ss:$16 sps:$4 sm:$0xff]   ;;  %v7403_v48 = vld [vmem:[%s8063_s6 + $0x68] ss:$16 sps:$4 sm:$0xff]  }
 0x67e   :  { %2979 = vmatprep.subr.bf16.mxu0 %v7385_v35  ;;  %3020 = vmatprep.subr.bf16.mxu1 %v7391_v40  ;;  %9060 = vst [vmem:[#allocation57_spill] sm:$0xff] %v7397_v54  ;;  %9061 = vst [vmem:[#allocation59_spill] sm:$0xff] %v7403_v48  ;;  %v7409_v35 = vld [vmem:[%s8063_s6 + $0x84] ss:$16 sps:$4 sm:$0xff]   ;;  %v7415_v40 = vld [vmem:[%s8063_s6 + $0x8c] ss:$16 sps:$4 sm:$0xff]  }
 0x67f   :  { %9062 = vst [vmem:[#allocation58_spill] sm:$0xff] %v7409_v35  ;;  %9063 = vst [vmem:[#allocation60_spill] sm:$0xff] %v7415_v40 }
 0x681   :  { %2980 = vmatpush1.bf16.msra.mxu0 %v7397_v54  ;;  %3021 = vmatpush1.bf16.msra.mxu1 %v7403_v48  ;;  %v7421_v54 = vld [vmem:[%s8063_s6 + $0x80] ss:$16 sps:$4 sm:$0xff]   ;;  %v7427_v48 = vld [vmem:[%s8063_s6 + $0x88] ss:$16 sps:$4 sm:$0xff]  }
 0x682   :  { %2981 = vmatprep.subr.bf16.mxu0 %v7409_v35  ;;  %3022 = vmatprep.subr.bf16.mxu1 %v7415_v40  ;;  %9064 = vst [vmem:[#allocation61_spill] sm:$0xff] %v7421_v54  ;;  %9065 = vst [vmem:[#allocation62_spill] sm:$0xff] %v7427_v48  ;;  %v7433_v35 = vld [vmem:[%s8063_s6 + $0xa4] ss:$16 sps:$4 sm:$0xff]   ;;  %v7439_v40 = vld [vmem:[%s8063_s6 + $0xac] ss:$16 sps:$4 sm:$0xff]  }
 0x683   :  { %9066 = vst [vmem:[#allocation93_spill] sm:$0xff] %v7433_v35  ;;  %9067 = vst [vmem:[#allocation63_spill] sm:$0xff] %v7439_v40 }
 0x685   :  { %2982 = vmatpush1.bf16.msra.mxu0 %v7421_v54  ;;  %3023 = vmatpush1.bf16.msra.mxu1 %v7427_v48  ;;  %v7445_v54 = vld [vmem:[%s8063_s6 + $0xa0] ss:$16 sps:$4 sm:$0xff]   ;;  %v7451_v48 = vld [vmem:[%s8063_s6 + $0xa8] ss:$16 sps:$4 sm:$0xff]  }
 0x686   :  { %2983 = vmatprep.subr.bf16.mxu0 %v7433_v35  ;;  %3024 = vmatprep.subr.bf16.mxu1 %v7439_v40  ;;  %9068 = vst [vmem:[#allocation64_spill] sm:$0xff] %v7445_v54  ;;  %9069 = vst [vmem:[#allocation65_spill] sm:$0xff] %v7451_v48  ;;  %v7457_v35 = vld [vmem:[%s8063_s6 + $0xc4] ss:$16 sps:$4 sm:$0xff]   ;;  %v7463_v40 = vld [vmem:[%s8063_s6 + $0xcc] ss:$16 sps:$4 sm:$0xff]  }
 0x687   :  { %9070 = vst [vmem:[#allocation66_spill] sm:$0xff] %v7457_v35  ;;  %9071 = vst [vmem:[#allocation67_spill] sm:$0xff] %v7463_v40 }
 0x689   :  { %2984 = vmatpush1.bf16.msra.mxu0 %v7445_v54  ;;  %3025 = vmatpush1.bf16.msra.mxu1 %v7451_v48  ;;  %v7469_v54 = vld [vmem:[%s8063_s6 + $0xc0] ss:$16 sps:$4 sm:$0xff]   ;;  %v7475_v48 = vld [vmem:[%s8063_s6 + $0xc8] ss:$16 sps:$4 sm:$0xff]  }
 0x68a   :  { %2985 = vmatprep.subr.bf16.mxu0 %v7457_v35  ;;  %3026 = vmatprep.subr.bf16.mxu1 %v7463_v40  ;;  %9072 = vst [vmem:[#allocation68_spill] sm:$0xff] %v7469_v54  ;;  %9073 = vst [vmem:[#allocation69_spill] sm:$0xff] %v7475_v48  ;;  %v7481_v35 = vld [vmem:[%s8063_s6 + $0xe4] ss:$16 sps:$4 sm:$0xff]   ;;  %v7487_v40 = vld [vmem:[%s8063_s6 + $0xec] ss:$16 sps:$4 sm:$0xff]  }
 0x68b   :  { %9074 = vst [vmem:[#allocation70_spill] sm:$0xff] %v7481_v35  ;;  %9075 = vst [vmem:[#allocation71_spill] sm:$0xff] %v7487_v40 }
 0x68d   :  { %2986 = vmatpush1.bf16.msra.mxu0 %v7469_v54  ;;  %3027 = vmatpush1.bf16.msra.mxu1 %v7475_v48  ;;  %v7493_v54 = vld [vmem:[%s8063_s6 + $0xe0] ss:$16 sps:$4 sm:$0xff]   ;;  %v7499_v48 = vld [vmem:[%s8063_s6 + $0xe8] ss:$16 sps:$4 sm:$0xff]  }
 0x68e   :  { %2987 = vmatprep.subr.bf16.mxu0 %v7481_v35  ;;  %3028 = vmatprep.subr.bf16.mxu1 %v7487_v40  ;;  %9076 = vst [vmem:[#allocation72_spill] sm:$0xff] %v7493_v54  ;;  %9077 = vst [vmem:[#allocation73_spill] sm:$0xff] %v7499_v48  ;;  %v7505_v35 = vld [vmem:[%s8064_s5 + $0x4] ss:$16 sps:$4 sm:$0xff]   ;;  %v7511_v40 = vld [vmem:[%s8064_s5 + $0xc] ss:$16 sps:$4 sm:$0xff]  }
 0x68f   :  { %9078 = vst [vmem:[#allocation74_spill] sm:$0xff] %v7505_v35  ;;  %9079 = vst [vmem:[#allocation75_spill] sm:$0xff] %v7511_v40 }
 0x691   :  { %2988 = vmatpush1.bf16.msra.mxu0 %v7493_v54  ;;  %3029 = vmatpush1.bf16.msra.mxu1 %v7499_v48 }
 0x692   :  { %3055 = vmatprep.subr.bf16.mxu0 %v7505_v35  ;;  %3096 = vmatprep.subr.bf16.mxu1 %v7511_v40 }
 0x6c7   :  { %v2622_v54 = vpop.f32.mrb[72].mxu0  ;;  %v2663_v20 = vpop.f32.mrb[72].mxu1 }
 0x6c8   :  { %v2624_v15 = vpop.f32.mrb[73].mxu0  ;;  %v2665_v38 = vpop.f32.mrb[73].mxu1 }
 0x6c9   :  { %v2626_v37 = vpop.f32.mrb[74].mxu0  ;;  %v2667_v48 = vpop.f32.mrb[74].mxu1 }
 0x6ca   :  { %v2627_v34 = vpop.f32.mrb[75].mxu0  ;;  %v2668_v33 = vpop.f32.mrb[75].mxu1 }
 0x707   :  { %v2704_v32 = vpop.f32.mrb[76].mxu0  ;;  %v2745_v52 = vpop.f32.mrb[76].mxu1 }
 0x708   :  { %v2705_v31 = vadd.f32 %v2704_v32, %v2622_v54  ;;  %v2746_v29 = vadd.f32 %v2745_v52, %v2663_v20  ;;  %v2706_v35 = vpop.f32.mrb[77].mxu0  ;;  %v2747_v13 = vpop.f32.mrb[77].mxu1 }
 0x709   :  { %v2707_v30 = vadd.f32 %v2706_v35, %v2624_v15  ;;  %v2748_v17 = vadd.f32 %v2747_v13, %v2665_v38  ;;  %v2708_v2 = vpop.f32.mrb[78].mxu0  ;;  %v2749_v12 = vpop.f32.mrb[78].mxu1 }
 0x70a   :  { %v2752_v40 = vadd.f32 %v2705_v31, %v5698_v19  ;;  %v2709_v58 = vpop.f32.mrb[79].mxu0  ;;  %v2750_v14 = vpop.f32.mrb[79].mxu1  ;;  %v2754_v33 = vadd.f32 %v2746_v29, %v5710_v36 }
 0x70b   :  { %v2753_v4 = vadd.f32 %v2707_v30, %v5702_v25  ;;  %v2755_v52 = vadd.f32 %v2748_v17, %v5716_v18  ;;  %v2780_v15 = vpop.permute.xlu0 %2779 }
 0x70c   :  { %v2756_v37 = vmul.f32 0.5, %v2752_v40  ;;  %vm2781_vm9 = vcmp.eq.s32.totalorder %v2780_v15, 1  ;;  %v7588_v15 = vld [vmem:[%s8064_s5 + $0x40] ss:$16 sps:$4 sm:$0xff]  }
 0x70d   :  { %v2760_v48 = vmul.f32 0.5, %v2753_v4  ;;  %v2765_v32 = vmul.f32 0.5, %v2755_v52  ;;  %9083 = vst [vmem:[#allocation79_spill] sm:$0xff] %v7588_v15 }
 0x70e   :  { %4382 = vtanh.f32 %v2756_v37 }
 0x70f   :  { %4384 = vtanh.f32 %v2760_v48 }
 0x710   :  { %4386 = vtanh.f32 %v2754_v33 }
 0x711   :  { %4388 = vtanh.f32 %v2765_v32 }
 0x718   :  { %v4383_v34 = vpop.eup %4382 }
 0x719   :  { %v4385_v13 = vpop.eup %4384  ;;  %v2758_v2 = vmul.f32 0.5, %v4383_v34 }
 0x71a   :  { %v2762_v12 = vmul.f32 0.5, %v4385_v13  ;;  %v4387_v58 = vpop.eup %4386 }
 0x71b   :  { %v2759_v31 = vadd.f32 0.5, %v2758_v2  ;;  %v4389_v29 = vpop.eup %4388 }
 0x71c   :  { %v2763_v14 = vadd.f32 0.5, %v2762_v12  ;;  %v2767_v20 = vmul.f32 0.5, %v4389_v29  ;;  %v7537_v12 = vld [vmem:[%s8064_s5] ss:$16 sps:$4 sm:$0xff]   ;;  %v7582_v29 = vld [vmem:[%s8064_s5 + $0x4c] ss:$16 sps:$4 sm:$0xff]  }
 0x71d   :  { %v2770_v38 = vmul.f32 %v4387_v58, %v2759_v31  ;;  %v7543_v31 = vld [vmem:[%s8064_s5 + $0x8] ss:$16 sps:$4 sm:$0xff]   ;;  %v7556_v58 = vld [vmem:[%s8064_s5 + $0x2c] ss:$16 sps:$4 sm:$0xff]   ;;  %9082 = vst [vmem:[#allocation78_spill] sm:$0xff] %v7582_v29 }
 0x71e   :  { %v2769_v30 = vmul.f32 %v2763_v14, %v6863_v46  ;;  %v2768_v46 = vadd.f32 0.5, %v2767_v20  ;;  %v7564_v14 = vld [vmem:[%s8064_s5 + $0x20] ss:$16 sps:$4 sm:$0xff]   ;;  %v7594_v20 = vld [vmem:[%s8064_s5 + $0x48] ss:$16 sps:$4 sm:$0xff]  }
 0x71f   :  { %9084 = vst [vmem:[#allocation81_spill] sm:$0xff] %v7594_v20 }
 0x720   :  { %v7519_v4 = vadd.f32 %v2770_v38, %v2769_v30  ;;  %v7570_v38 = vld [vmem:[%s8064_s5 + $0x28] ss:$16 sps:$4 sm:$0xff]   ;;  %v7576_v30 = vld [vmem:[%s8064_s5 + $0x44] ss:$16 sps:$4 sm:$0xff]  }
 0x721   :  { %9080 = vst [vmem:[#allocation76_spill] sm:$0xff] %v7570_v38  ;;  %9081 = vst [vmem:[#allocation77_spill] sm:$0xff] %v7576_v30 }
 0x722   :  { %4390 = vtanh.f32 %v7519_v4 }
 0x727   :  { %v7522_v17 = vpop.f32.mrb[80].mxu0  ;;  %v7524_v40 = vpop.f32.mrb[80].mxu1 }
 0x728   :  { %v7526_v54 = vpop.f32.mrb[81].mxu0  ;;  %v7528_v35 = vpop.f32.mrb[81].mxu1 }
 0x729   :  { %v2824_v37 = vpop.f32.mrb[82].mxu0  ;;  %v2865_v48 = vpop.f32.mrb[82].mxu1 }
 0x72a   :  { %v2825_v33 = vpop.f32.mrb[83].mxu0  ;;  %v2866_v52 = vpop.f32.mrb[83].mxu1  ;;  %v7600_v37 = vld [vmem:[%s8064_s5 + $0x64] ss:$16 sps:$4 sm:$0xff]   ;;  %v7606_v48 = vld [vmem:[%s8064_s5 + $0x6c] ss:$16 sps:$4 sm:$0xff]  }
 0x72b   :  { %9085 = vst [vmem:[#allocation82_spill] sm:$0xff] %v7600_v37  ;;  %9086 = vst [vmem:[#allocation83_spill] sm:$0xff] %v7606_v48  ;;  %v7612_v33 = vld [vmem:[%s8064_s5 + $0x60] ss:$16 sps:$4 sm:$0xff]   ;;  %v7618_v52 = vld [vmem:[%s8064_s5 + $0x68] ss:$16 sps:$4 sm:$0xff]  }
 0x72c   :  { %v4391_v32 = vpop.eup %4390  ;;  %9087 = vst [vmem:[#allocation84_spill] sm:$0xff] %v7612_v33  ;;  %9088 = vst [vmem:[#allocation85_spill] sm:$0xff] %v7618_v52 }
 0x72d   :  { %v2773_v34 = vmul.f32 %v4391_v32, %v2768_v46  ;;  %v7624_v46 = vld [vmem:[%s8064_s5 + $0x84] ss:$16 sps:$4 sm:$0xff]   ;;  %v7630_v32 = vld [vmem:[%s8064_s5 + $0x8c] ss:$16 sps:$4 sm:$0xff]  }
 0x72e   :  { %9089 = vst [vmem:[#allocation86_spill] sm:$0xff] %v7624_v46  ;;  %9090 = vst [vmem:[#allocation87_spill] sm:$0xff] %v7630_v32 }
 0x72f   :  { %v7531_v13 = vsel %vm2781_vm9, %v2773_v34, %v6867_v44  ;;  %v2774_v2 = vpack.c.bf16 %v2773_v34, %v2773_v34  ;;  %v3162_v44 = vsel %vm3161_vm10, 1, %v8564_v60  ;;  %v7636_v34 = vld [vmem:[%s8064_s5 + $0x80] ss:$16 sps:$4 sm:$0xff]  }
 0x730   :  { %3164 = vperm.xlu1 %4099, %v3162_v44   ;;  %9091 = vst [vmem:[#allocation88_spill] sm:$0xff] %v7636_v34  ;;  %v7648_v44 = vld [vmem:[%s8064_s5 + $0xa4] ss:$16 sps:$4 sm:$0xff]  }
 0x731   :  { %3006 = vmatmul.mubr.bf16.vlgmr.msra.gmra.mrb[88].mxu0 %v2774_v2  ;;  %3047 = vmatmul.mubr.bf16.vlgmr.msra.gmra.mrb[88].mxu1 %v2774_v2  ;;  %v7642_v2 = vld [vmem:[%s8064_s5 + $0x88] ss:$16 sps:$4 sm:$0xff]   ;;  %9093 = vst [vmem:[#allocation90_spill] sm:$0xff] %v7648_v44 }
 0x732   :  { %3056 = vmatpush1.bf16.msra.mxu0 %v7537_v12  ;;  %3097 = vmatpush1.bf16.msra.mxu1 %v7543_v31  ;;  %9092 = vst [vmem:[#allocation89_spill] sm:$0xff] %v7642_v2 }
 0x733   :  { %3057 = vmatprep.subr.bf16.mxu0 %v7550_v11  ;;  %3098 = vmatprep.subr.bf16.mxu1 %v7556_v58 }
 0x734   :  { %3087 = vmatprep.mubr.bf16.mxu0 %v8564_v60  ;;  %3128 = vmatprep.mubr.bf16.mxu1 %v8564_v60 }
 0x736   :  { %3058 = vmatpush1.bf16.msra.mxu0 %v7564_v14  ;;  %3099 = vmatpush1.bf16.msra.mxu1 %v7570_v38 }
 0x737   :  { %3059 = vmatprep.subr.bf16.mxu0 %v7576_v30  ;;  %3100 = vmatprep.subr.bf16.mxu1 %v7582_v29 }
 0x73a   :  { %3060 = vmatpush1.bf16.msra.mxu0 %v7588_v15  ;;  %3101 = vmatpush1.bf16.msra.mxu1 %v7594_v20 }
 0x73b   :  { %3061 = vmatprep.subr.bf16.mxu0 %v7600_v37  ;;  %3102 = vmatprep.subr.bf16.mxu1 %v7606_v48 }
 0x73e   :  { %3062 = vmatpush1.bf16.msra.mxu0 %v7612_v33  ;;  %3103 = vmatpush1.bf16.msra.mxu1 %v7618_v52 }
 0x73f   :  { %3063 = vmatprep.subr.bf16.mxu0 %v7624_v46  ;;  %3104 = vmatprep.subr.bf16.mxu1 %v7630_v32  ;;  %v7654_v32 = vld [vmem:[%s8064_s5 + $0xac] ss:$16 sps:$4 sm:$0xff]  }
 0x740   :  { %9094 = vst [vmem:[#allocation91_spill] sm:$0xff] %v7654_v32 }
 0x742   :  { %3064 = vmatpush1.bf16.msra.mxu0 %v7636_v34  ;;  %3105 = vmatpush1.bf16.msra.mxu1 %v7642_v2  ;;  %v7660_v34 = vld [vmem:[%s8064_s5 + $0xa0] ss:$16 sps:$4 sm:$0xff]   ;;  %v7666_v2 = vld [vmem:[%s8064_s5 + $0xa8] ss:$16 sps:$4 sm:$0xff]  }
 0x743   :  { %3065 = vmatprep.subr.bf16.mxu0 %v7648_v44  ;;  %3106 = vmatprep.subr.bf16.mxu1 %v7654_v32  ;;  %9095 = vst [vmem:[#allocation92_spill] sm:$0xff] %v7660_v34  ;;  %9096 = vst [vmem:[#allocation95_spill] sm:$0xff] %v7666_v2  ;;  %v7672_v32 = vld [vmem:[%s8064_s5 + $0xc4] ss:$16 sps:$4 sm:$0xff]  }
 0x744   :  { %9097 = vst [vmem:[#allocation96_spill] sm:$0xff] %v7672_v32 }
 0x746   :  { %3066 = vmatpush1.bf16.msra.mxu0 %v7660_v34  ;;  %3107 = vmatpush1.bf16.msra.mxu1 %v7666_v2  ;;  %v7678_v34 = vld [vmem:[%s8064_s5 + $0xcc] ss:$16 sps:$4 sm:$0xff]  }
 0x747   :  { %v2902_v44 = vpop.f32.mrb[84].mxu0  ;;  %v2943_v46 = vpop.f32.mrb[84].mxu1  ;;  %3067 = vmatprep.subr.bf16.mxu0 %v7672_v32  ;;  %9098 = vst [vmem:[#allocation97_spill] sm:$0xff] %v7678_v34  ;;  %3108 = vmatprep.subr.bf16.mxu1 %v7678_v34  ;;  %v7689_v34 = vld [vmem:[%s8064_s5 + $0xc0] ss:$16 sps:$4 sm:$0xff]  }
 0x748   :  { %v2903_v52 = vadd.f32 %v2902_v44, %v7522_v17  ;;  %v2944_v2 = vadd.f32 %v2943_v46, %v7524_v40  ;;  %v2904_v33 = vpop.f32.mrb[85].mxu0  ;;  %v2945_v48 = vpop.f32.mrb[85].mxu1  ;;  %v7695_v17 = vld [vmem:[%s8064_s5 + $0xc8] ss:$16 sps:$4 sm:$0xff]  }
 0x749   :  { %v2905_v37 = vadd.f32 %v2904_v33, %v7526_v54  ;;  %v2946_v20 = vadd.f32 %v2945_v48, %v7528_v35  ;;  %v2906_v15 = vpop.f32.mrb[86].mxu0  ;;  %v2947_v29 = vpop.f32.mrb[86].mxu1  ;;  %v7702_v54 = vld [vmem:[%s8064_s5 + $0xe4] ss:$16 sps:$4 sm:$0xff]   ;;  %v7708_v35 = vld [vmem:[%s8064_s5 + $0xec] ss:$16 sps:$4 sm:$0xff]  }
 0x74a   :  { %v2950_v32 = vadd.f32 %v2903_v52, %v5559_v55  ;;  %v2907_v30 = vpop.f32.mrb[87].mxu0  ;;  %v2948_v38 = vpop.f32.mrb[87].mxu1  ;;  %3068 = vmatpush1.bf16.msra.mxu0 %v7689_v34  ;;  %3109 = vmatpush1.bf16.msra.mxu1 %v7695_v17  ;;  %v2952_v29 = vadd.f32 %v2944_v2, %v5569_v62  ;;  %v7715_v15 = vld [vmem:[%s8064_s5 + $0xe0] ss:$16 sps:$4 sm:$0xff]  }
 0x74b   :  { %v2951_v40 = vadd.f32 %v2905_v37, %v5564_v1  ;;  %3069 = vmatprep.subr.bf16.mxu0 %v7702_v54  ;;  %3110 = vmatprep.subr.bf16.mxu1 %v7708_v35  ;;  %9099 = vst [vmem:[#allocation99_spill] sm:$0xff] %v7715_v15  ;;  %v7721_v37 = vld [vmem:[%s8064_s5 + $0xe8] ss:$16 sps:$4 sm:$0xff]   ;;  %v2953_v48 = vadd.f32 %v2946_v20, %v9005_v28 }
 0x74c   :  { %v2954_v38 = vmul.f32 0.5, %v2950_v32  ;;  %9100 = vst [vmem:[#allocation102_spill] sm:$0xff] %v7721_v37 }
 0x74d   :  { %v2958_v30 = vmul.f32 0.5, %v2951_v40  ;;  %v2963_v33 = vmul.f32 0.5, %v2953_v48 }
 0x74e   :  { %4392 = vtanh.f32 %v2954_v38  ;;  %3070 = vmatpush1.bf16.msra.mxu0 %v7715_v15  ;;  %3111 = vmatpush1.bf16.msra.mxu1 %v7721_v37 }
 0x74f   :  { %4394 = vtanh.f32 %v2958_v30  ;;  %3171 = vmatprep.subr.bf16.mxu0 %v6909_v51  ;;  %3212 = vmatprep.subr.bf16.mxu1 %v6915_v27 }
 0x750   :  { %4396 = vtanh.f32 %v2952_v29 }
 0x751   :  { %4398 = vtanh.f32 %v2963_v33  ;;  %v9106_v33 = vld [vmem:[#allocation13_spill] sm:$0xff] }
 0x758   :  { %v4393_v52 = vpop.eup %4392 }
 0x759   :  { %v4395_v46 = vpop.eup %4394  ;;  %v2956_v32 = vmul.f32 0.5, %v4393_v52  ;;  %v9107_v52 = vld [vmem:[#allocation14_spill] sm:$0xff] }
 0x75a   :  { %v2960_v2 = vmul.f32 0.5, %v4395_v46  ;;  %v4397_v40 = vpop.eup %4396  ;;  %v9108_v46 = vld [vmem:[#allocation15_spill] sm:$0xff] }
 0x75b   :  { %v2957_v44 = vadd.f32 0.5, %v2956_v32  ;;  %v4399_v27 = vpop.eup %4398  ;;  %v9109_v32 = vld [vmem:[#allocation16_spill] sm:$0xff] }
 0x75c   :  { %v2961_v38 = vadd.f32 0.5, %v2960_v2  ;;  %v2965_v29 = vmul.f32 0.5, %v4399_v27  ;;  %v9102_v27 = vld [vmem:[#allocation9_spill] sm:$0xff] }
 0x75d   :  { %v2968_v15 = vmul.f32 %v4397_v40, %v2957_v44  ;;  %v9110_v2 = vld [vmem:[#allocation17_spill] sm:$0xff]  ;;  %v9111_v44 = vld [vmem:[#allocation18_spill] sm:$0xff]  ;;  %v9112_v40 = vld [vmem:[#allocation19_spill] sm:$0xff] }
 0x75e   :  { %v2967_v37 = vmul.f32 %v2961_v38, %v6920_v39  ;;  %v2966_v51 = vadd.f32 0.5, %v2965_v29  ;;  %v9103_v39 = vld [vmem:[#allocation10_spill] sm:$0xff]  ;;  %v9113_v38 = vld [vmem:[#allocation20_spill] sm:$0xff] }
 0x75f   :  { %v9115_v29 = vld [vmem:[#allocation22_spill] sm:$0xff] }
 0x760   :  { %v7728_v30 = vadd.f32 %v2968_v15, %v2967_v37  ;;  %v9104_v15 = vld [vmem:[#allocation11_spill] sm:$0xff]  ;;  %v9105_v37 = vld [vmem:[#allocation12_spill] sm:$0xff] }
 0x762   :  { %4400 = vtanh.f32 %v7728_v30 }
 0x76c   :  { %v4401_v20 = vpop.eup %4400 }
 0x76d   :  { %v2971_v48 = vmul.f32 %v4401_v20, %v2966_v51  ;;  %v9101_v51 = vld [vmem:[#allocation8_spill] sm:$0xff]  ;;  %v9116_v20 = vld [vmem:[#allocation23_spill] sm:$0xff] }
 0x76f   :  { %v2972_v28 = vpack.c.bf16 %v2971_v48, %v2971_v48  ;;  %v9117_v48 = vld [vmem:[#allocation24_spill] sm:$0xff] }
 0x771   :  { %3088 = vmatmul.mubr.bf16.vlgmr.msra.gmra.mrb[92].mxu0 %v2972_v28  ;;  %3129 = vmatmul.mubr.bf16.vlgmr.msra.gmra.mrb[92].mxu1 %v2972_v28 }
 0x772   :  { %3172 = vmatpush1.bf16.msra.mxu0 %v6930_v22  ;;  %3213 = vmatpush1.bf16.msra.mxu1 %v6936_v26 }
 0x773   :  { %3173 = vmatprep.subr.bf16.mxu0 %v6942_v7  ;;  %3214 = vmatprep.subr.bf16.mxu1 %v6948_v21 }
 0x774   :  { %3203 = vmatprep.mubr.bf16.mxu0 %v8564_v60  ;;  %3244 = vmatprep.mubr.bf16.mxu1 %v8564_v60 }
 0x776   :  { %3174 = vmatpush1.bf16.msra.mxu0 %v6956_v41  ;;  %3215 = vmatpush1.bf16.msra.mxu1 %v6962_v56 }
 0x777   :  { %3175 = vmatprep.subr.bf16.mxu0 %v6968_v47  ;;  %3216 = vmatprep.subr.bf16.mxu1 %v6974_v8 }
 0x77a   :  { %3176 = vmatpush1.bf16.msra.mxu0 %v6980_v0  ;;  %3217 = vmatpush1.bf16.msra.mxu1 %v6986_v50 }
 0x77b   :  { %3177 = vmatprep.subr.bf16.mxu0 %v6992_v57  ;;  %3218 = vmatprep.subr.bf16.mxu1 %v6998_v59 }
 0x77e   :  { %3178 = vmatpush1.bf16.msra.mxu0 %v7004_v43  ;;  %3219 = vmatpush1.bf16.msra.mxu1 %v7010_v42 }
 0x77f   :  { %3179 = vmatprep.subr.bf16.mxu0 %v7016_v49  ;;  %3220 = vmatprep.subr.bf16.mxu1 %v7022_v45 }
 0x782   :  { %3180 = vmatpush1.bf16.msra.mxu0 %v7028_v10  ;;  %3221 = vmatpush1.bf16.msra.mxu1 %v7034_v53 }
 0x783   :  { %3181 = vmatprep.subr.bf16.mxu0 %v7040_v5  ;;  %3222 = vmatprep.subr.bf16.mxu1 %v7046_v24 }
 0x786   :  { %3182 = vmatpush1.bf16.msra.mxu0 %v7052_v9  ;;  %3223 = vmatpush1.bf16.msra.mxu1 %v7058_v23 }
 0x787   :  { %3183 = vmatprep.subr.bf16.mxu0 %v7064_v3  ;;  %3224 = vmatprep.subr.bf16.mxu1 %v7070_v16 }
 0x78a   :  { %3184 = vmatpush1.bf16.msra.mxu0 %v7076_v61  ;;  %3225 = vmatpush1.bf16.msra.mxu1 %v7082_v6 }
 0x78b   :  { %3185 = vmatprep.subr.bf16.mxu0 %v7088_v63  ;;  %3226 = vmatprep.subr.bf16.mxu1 %v9101_v51 }
 0x78e   :  { %3186 = vmatpush1.bf16.msra.mxu0 %v9102_v27  ;;  %3227 = vmatpush1.bf16.msra.mxu1 %v9103_v39 }
 0x78f   :  { %3253 = vmatprep.subr.bf16.mxu0 %v9104_v15  ;;  %3294 = vmatprep.subr.bf16.mxu1 %v9105_v37 }
 0x791   :  { %3204 = vmatmul.mubr.bf16.vlgmr.msra.gmra.mrb[96].mxu0 %v2972_v28  ;;  %3245 = vmatmul.mubr.bf16.vlgmr.msra.gmra.mrb[96].mxu1 %v2972_v28  ;;  %v9114_v28 = vld [vmem:[#allocation21_spill] sm:$0xff] }
 0x792   :  { %3254 = vmatpush1.bf16.msra.mxu0 %v9106_v33  ;;  %3295 = vmatpush1.bf16.msra.mxu1 %v9107_v52  ;;  %v9120_v52 = vld [vmem:[#allocation27_spill] sm:$0xff] }
 0x793   :  { %3255 = vmatprep.subr.bf16.mxu0 %v9108_v46  ;;  %3296 = vmatprep.subr.bf16.mxu1 %v9109_v32  ;;  %v9118_v32 = vld [vmem:[#allocation25_spill] sm:$0xff]  ;;  %v9119_v46 = vld [vmem:[#allocation26_spill] sm:$0xff] }
 0x794   :  { %3285 = vmatprep.mubr.bf16.mxu0 %v8564_v60  ;;  %3326 = vmatprep.mubr.bf16.mxu1 %v8564_v60 }
 0x796   :  { %3256 = vmatpush1.bf16.msra.mxu0 %v9110_v2  ;;  %3297 = vmatpush1.bf16.msra.mxu1 %v9111_v44  ;;  %v9121_v2 = vld [vmem:[#allocation28_spill] sm:$0xff]  ;;  %v9122_v44 = vld [vmem:[#allocation29_spill] sm:$0xff] }
 0x797   :  { %3257 = vmatprep.subr.bf16.mxu0 %v9112_v40  ;;  %3298 = vmatprep.subr.bf16.mxu1 %v9113_v38  ;;  %v9123_v40 = vld [vmem:[#allocation31_spill] sm:$0xff]  ;;  %v9124_v38 = vld [vmem:[#allocation30_spill] sm:$0xff] }
 0x79a   :  { %3258 = vmatpush1.bf16.msra.mxu0 %v9114_v28  ;;  %3299 = vmatpush1.bf16.msra.mxu1 %v9115_v29  ;;  %v9125_v28 = vld [vmem:[#allocation32_spill] sm:$0xff]  ;;  %v9126_v29 = vld [vmem:[#allocation33_spill] sm:$0xff] }
 0x79b   :  { %3259 = vmatprep.subr.bf16.mxu0 %v9116_v20  ;;  %3300 = vmatprep.subr.bf16.mxu1 %v9117_v48  ;;  %v9127_v20 = vld [vmem:[#allocation35_spill] sm:$0xff]  ;;  %v9128_v48 = vld [vmem:[#allocation34_spill] sm:$0xff] }
 0x79e   :  { %3260 = vmatpush1.bf16.msra.mxu0 %v9118_v32  ;;  %3301 = vmatpush1.bf16.msra.mxu1 %v9119_v46  ;;  %v9129_v32 = vld [vmem:[#allocation36_spill] sm:$0xff]  ;;  %v9130_v46 = vld [vmem:[#allocation37_spill] sm:$0xff] }
 0x79f   :  { %3261 = vmatprep.subr.bf16.mxu0 %v9120_v52  ;;  %3302 = vmatprep.subr.bf16.mxu1 %v9121_v2  ;;  %v9131_v52 = vld [vmem:[#allocation39_spill] sm:$0xff]  ;;  %v9132_v2 = vld [vmem:[#allocation38_spill] sm:$0xff] }
 0x7a2   :  { %3262 = vmatpush1.bf16.msra.mxu0 %v9122_v44  ;;  %3303 = vmatpush1.bf16.msra.mxu1 %v9123_v40  ;;  %v9133_v44 = vld [vmem:[#allocation41_spill] sm:$0xff]  ;;  %v9134_v40 = vld [vmem:[#allocation40_spill] sm:$0xff] }
 0x7a3   :  { %3263 = vmatprep.subr.bf16.mxu0 %v9124_v38  ;;  %3304 = vmatprep.subr.bf16.mxu1 %v9125_v28  ;;  %v9135_v38 = vld [vmem:[#allocation42_spill] sm:$0xff] }
 0x7a4   :  { %v9152_v28 = vld [vmem:[#allocation58_spill] sm:$0xff] }
 0x7a6   :  { %3264 = vmatpush1.bf16.msra.mxu0 %v9126_v29  ;;  %3305 = vmatpush1.bf16.msra.mxu1 %v9127_v20  ;;  %v4090_v20 = vld [vmem:[%s8062_s0 + $0x18] sm:$0xf] }
 0x7a7   :  { %3265 = vmatprep.subr.bf16.mxu0 %v9128_v48  ;;  %3306 = vmatprep.subr.bf16.mxu1 %v9129_v32  ;;  %v9136_v29 = vld [vmem:[#allocation43_spill] sm:$0xff]  ;;  %v9137_v48 = vld [vmem:[#allocation45_spill] sm:$0xff] }
 0x7a8   :  { %v9151_v32 = vld [vmem:[#allocation59_spill] sm:$0xff] }
 0x7aa   :  { %3266 = vmatpush1.bf16.msra.mxu0 %v9130_v46  ;;  %3307 = vmatpush1.bf16.msra.mxu1 %v9131_v52  ;;  %v9138_v46 = vld [vmem:[#allocation44_spill] sm:$0xff]  ;;  %v9139_v52 = vld [vmem:[#allocation46_spill] sm:$0xff] }
 0x7ab   :  { %3267 = vmatprep.subr.bf16.mxu0 %v9132_v2  ;;  %3308 = vmatprep.subr.bf16.mxu1 %v9133_v44  ;;  %v9140_v2 = vld [vmem:[#allocation47_spill] sm:$0xff]  ;;  %v9141_v44 = vld [vmem:[#allocation48_spill] sm:$0xff] }
 0x7ae   :  { %3268 = vmatpush1.bf16.msra.mxu0 %v9134_v40  ;;  %3309 = vmatpush1.bf16.msra.mxu1 %v9135_v38  ;;  %v9142_v38 = vld [vmem:[#allocation49_spill] sm:$0xff]  ;;  %v9143_v40 = vld [vmem:[#allocation50_spill] sm:$0xff] }
 0x7af   :  { %3358 = vmatprep.subr.bf16.mxu0 %v9136_v29  ;;  %3399 = vmatprep.subr.bf16.mxu1 %v9137_v48  ;;  %v9144_v29 = vld [vmem:[#allocation51_spill] sm:$0xff]  ;;  %v9145_v48 = vld [vmem:[#allocation53_spill] sm:$0xff] }
 0x7b1   :  { %3286 = vmatmul.mubr.bf16.vlgmr.msra.gmra.mrb[100].mxu0 %v4090_v20  ;;  %3327 = vmatmul.mubr.bf16.vlgmr.msra.gmra.mrb[100].mxu1 %v4090_v20  ;;  %v9146_v20 = vld [vmem:[#allocation52_spill] sm:$0xff] }
 0x7b2   :  { %3359 = vmatpush1.bf16.msra.mxu0 %v9138_v46  ;;  %3400 = vmatpush1.bf16.msra.mxu1 %v9139_v52  ;;  %v9147_v46 = vld [vmem:[#allocation55_spill] sm:$0xff]  ;;  %v9148_v52 = vld [vmem:[#allocation54_spill] sm:$0xff] }
 0x7b3   :  { %3360 = vmatprep.subr.bf16.mxu0 %v9140_v2  ;;  %3401 = vmatprep.subr.bf16.mxu1 %v9141_v44  ;;  %v9149_v2 = vld [vmem:[#allocation56_spill] sm:$0xff]  ;;  %v9150_v44 = vld [vmem:[#allocation57_spill] sm:$0xff] }
 0x7b4   :  { %3390 = vmatprep.mubr.bf16.mxu0 %v8564_v60  ;;  %3431 = vmatprep.mubr.bf16.mxu1 %v8564_v60 }
 0x7b6   :  { %3361 = vmatpush1.bf16.msra.mxu0 %v9142_v38  ;;  %3402 = vmatpush1.bf16.msra.mxu1 %v9143_v40  ;;  %v9153_v38 = vld [vmem:[#allocation60_spill] sm:$0xff]  ;;  %v9154_v40 = vld [vmem:[#allocation61_spill] sm:$0xff] }
 0x7b7   :  { %3362 = vmatprep.subr.bf16.mxu0 %v9144_v29  ;;  %3403 = vmatprep.subr.bf16.mxu1 %v9145_v48  ;;  %v9155_v29 = vld [vmem:[#allocation62_spill] sm:$0xff]  ;;  %v9156_v48 = vld [vmem:[#allocation93_spill] sm:$0xff] }
 0x7ba   :  { %3363 = vmatpush1.bf16.msra.mxu0 %v9146_v20  ;;  %3404 = vmatpush1.bf16.msra.mxu1 %v9147_v46  ;;  %v9157_v20 = vld [vmem:[#allocation63_spill] sm:$0xff]  ;;  %v9158_v46 = vld [vmem:[#allocation64_spill] sm:$0xff] }
 0x7bb   :  { %3364 = vmatprep.subr.bf16.mxu0 %v9148_v52  ;;  %3405 = vmatprep.subr.bf16.mxu1 %v9149_v2  ;;  %v9159_v52 = vld [vmem:[#allocation65_spill] sm:$0xff]  ;;  %v9160_v2 = vld [vmem:[#allocation66_spill] sm:$0xff] }
 0x7be   :  { %3365 = vmatpush1.bf16.msra.mxu0 %v9150_v44  ;;  %3406 = vmatpush1.bf16.msra.mxu1 %v9151_v32  ;;  %v9161_v44 = vld [vmem:[#allocation67_spill] sm:$0xff]  ;;  %v9162_v32 = vld [vmem:[#allocation68_spill] sm:$0xff] }
 0x7bf   :  { %3366 = vmatprep.subr.bf16.mxu0 %v9152_v28  ;;  %3407 = vmatprep.subr.bf16.mxu1 %v9153_v38  ;;  %v9163_v28 = vld [vmem:[#allocation69_spill] sm:$0xff]  ;;  %v9164_v38 = vld [vmem:[#allocation70_spill] sm:$0xff] }
 0x7c2   :  { %3367 = vmatpush1.bf16.msra.mxu0 %v9154_v40  ;;  %3408 = vmatpush1.bf16.msra.mxu1 %v9155_v29  ;;  %v9165_v40 = vld [vmem:[#allocation71_spill] sm:$0xff]  ;;  %v9166_v29 = vld [vmem:[#allocation72_spill] sm:$0xff] }
 0x7c3   :  { %3368 = vmatprep.subr.bf16.mxu0 %v9156_v48  ;;  %3409 = vmatprep.subr.bf16.mxu1 %v9157_v20  ;;  %v9167_v48 = vld [vmem:[#allocation73_spill] sm:$0xff]  ;;  %v9168_v20 = vld [vmem:[#allocation74_spill] sm:$0xff] }
 0x7c6   :  { %3369 = vmatpush1.bf16.msra.mxu0 %v9158_v46  ;;  %3410 = vmatpush1.bf16.msra.mxu1 %v9159_v52  ;;  %v9169_v46 = vld [vmem:[#allocation75_spill] sm:$0xff] }
 0x7c7   :  { %3370 = vmatprep.subr.bf16.mxu0 %v9160_v2  ;;  %3411 = vmatprep.subr.bf16.mxu1 %v9161_v44 }
 0x7ca   :  { %3371 = vmatpush1.bf16.msra.mxu0 %v9162_v32  ;;  %3412 = vmatpush1.bf16.msra.mxu1 %v9163_v28 }
 0x7cb   :  { %3372 = vmatprep.subr.bf16.mxu0 %v9164_v38  ;;  %3413 = vmatprep.subr.bf16.mxu1 %v9165_v40 }
 0x7ce   :  { %3373 = vmatpush1.bf16.msra.mxu0 %v9166_v29  ;;  %3414 = vmatpush1.bf16.msra.mxu1 %v9167_v48 }
 0x7cf   :  { %3440 = vmatprep.subr.bf16.mxu0 %v9168_v20  ;;  %3481 = vmatprep.subr.bf16.mxu1 %v9169_v46 }
 0x804   :  { %v3007_v52 = vpop.f32.mrb[88].mxu0  ;;  %v3048_v2 = vpop.f32.mrb[88].mxu1 }
 0x805   :  { %v3009_v33 = vpop.f32.mrb[89].mxu0  ;;  %v3050_v44 = vpop.f32.mrb[89].mxu1 }
 0x806   :  { %v3011_v37 = vpop.f32.mrb[90].mxu0  ;;  %v3052_v32 = vpop.f32.mrb[90].mxu1 }
 0x807   :  { %v3012_v15 = vpop.f32.mrb[91].mxu0  ;;  %v3053_v28 = vpop.f32.mrb[91].mxu1 }
 0x844   :  { %v3089_v39 = vpop.f32.mrb[92].mxu0  ;;  %v3130_v38 = vpop.f32.mrb[92].mxu1 }
 0x845   :  { %v3090_v27 = vadd.f32 %v3089_v39, %v3007_v52  ;;  %v3131_v40 = vadd.f32 %v3130_v38, %v3048_v2  ;;  %v3091_v51 = vpop.f32.mrb[93].mxu0  ;;  %v3132_v29 = vpop.f32.mrb[93].mxu1 }
 0x846   :  { %v3092_v63 = vadd.f32 %v3091_v51, %v3009_v33  ;;  %v3133_v48 = vadd.f32 %v3132_v29, %v3050_v44  ;;  %v3093_v6 = vpop.f32.mrb[94].mxu0  ;;  %v3134_v20 = vpop.f32.mrb[94].mxu1 }
 0x847   :  { %v3137_v46 = vadd.f32 %v3090_v27, %v5698_v19  ;;  %v3094_v61 = vpop.f32.mrb[95].mxu0  ;;  %v3135_v16 = vpop.f32.mrb[95].mxu1  ;;  %v3139_v15 = vadd.f32 %v3131_v40, %v5710_v36 }
 0x848   :  { %v3138_v3 = vadd.f32 %v3092_v63, %v5702_v25  ;;  %v3140_v39 = vadd.f32 %v3133_v48, %v5716_v18  ;;  %v3165_v40 = vpop.permute.xlu1 %3164 }
 0x849   :  { %v3141_v37 = vmul.f32 0.5, %v3137_v46  ;;  %vm3166_vm11 = vcmp.eq.s32.totalorder %v3165_v40, 1  ;;  %v9176_v40 = vld [vmem:[#allocation83_spill] sm:$0xff] }
 0x84a   :  { %v3145_v32 = vmul.f32 0.5, %v3138_v3  ;;  %v3150_v52 = vmul.f32 0.5, %v3140_v39 }
 0x84b   :  { %4402 = vtanh.f32 %v3141_v37 }
 0x84c   :  { %4404 = vtanh.f32 %v3145_v32 }
 0x84d   :  { %4406 = vtanh.f32 %v3139_v15 }
 0x84e   :  { %4408 = vtanh.f32 %v3150_v52 }
 0x855   :  { %v4403_v51 = vpop.eup %4402 }
 0x856   :  { %v4405_v33 = vpop.eup %4404  ;;  %v3143_v6 = vmul.f32 0.5, %v4403_v51 }
 0x857   :  { %v3147_v2 = vmul.f32 0.5, %v4405_v33  ;;  %v4407_v61 = vpop.eup %4406 }
 0x858   :  { %v3144_v27 = vadd.f32 0.5, %v3143_v6  ;;  %v4409_v46 = vpop.eup %4408 }
 0x859   :  { %v3148_v16 = vadd.f32 0.5, %v3147_v2  ;;  %v3152_v38 = vmul.f32 0.5, %v4409_v46  ;;  %v7850_v2 = vld [vmem:[%s8065_s1] sm:$0xff]  ;;  %v9175_v46 = vld [vmem:[#allocation82_spill] sm:$0xff] }
 0x85a   :  { %v3155_v44 = vmul.f32 %v4407_v61, %v3144_v27  ;;  %vm3546_vm12 = vcmp.eq.s32.totalorder %v7850_v2, 6  ;;  %v9171_v61 = vld [vmem:[#allocation77_spill] sm:$0xff]  ;;  %vm3931_vm13 = vcmp.eq.s32.totalorder %v7850_v2, 7 }
 0x85b   :  { %v3154_v63 = vmul.f32 %v3148_v16, %v7519_v4  ;;  %v3153_v52 = vadd.f32 0.5, %v3152_v38  ;;  %v3547_v27 = vsel %vm3546_vm12, 1, %v8564_v60  ;;  %v9172_v16 = vld [vmem:[#allocation78_spill] sm:$0xff]  ;;  %v9177_v38 = vld [vmem:[#allocation84_spill] sm:$0xff] }
 0x85c   :  { %3549 = vperm.xlu0 %4098, %v3547_v27   ;;  %v9186_v27 = vld [vmem:[#allocation95_spill] sm:$0xff] }
 0x85d   :  { %v7841_v3 = vadd.f32 %v3155_v44, %v3154_v63  ;;  %v9173_v44 = vld [vmem:[#allocation79_spill] sm:$0xff]  ;;  %v9174_v63 = vld [vmem:[#allocation81_spill] sm:$0xff] }
 0x85f   :  { %4410 = vtanh.f32 %v7841_v3 }
 0x864   :  { %v3205_v28 = vpop.f32.mrb[96].mxu0  ;;  %v3246_v29 = vpop.f32.mrb[96].mxu1 }
 0x865   :  { %v3207_v48 = vpop.f32.mrb[97].mxu0  ;;  %v3248_v20 = vpop.f32.mrb[97].mxu1 }
 0x866   :  { %v3209_v37 = vpop.f32.mrb[98].mxu0  ;;  %v3250_v32 = vpop.f32.mrb[98].mxu1 }
 0x867   :  { %v3210_v15 = vpop.f32.mrb[99].mxu0  ;;  %v3251_v39 = vpop.f32.mrb[99].mxu1  ;;  %v9178_v37 = vld [vmem:[#allocation85_spill] sm:$0xff]  ;;  %v9179_v32 = vld [vmem:[#allocation86_spill] sm:$0xff] }
 0x868   :  { %v9180_v15 = vld [vmem:[#allocation87_spill] sm:$0xff]  ;;  %v9181_v39 = vld [vmem:[#allocation88_spill] sm:$0xff] }
 0x869   :  { %v4411_v51 = vpop.eup %4410 }
 0x86a   :  { %v3158_v33 = vmul.f32 %v4411_v51, %v3153_v52  ;;  %v9182_v52 = vld [vmem:[#allocation89_spill] sm:$0xff]  ;;  %v9183_v51 = vld [vmem:[#allocation90_spill] sm:$0xff] }
 0x86c   :  { %v7845_v4 = vsel %vm3166_vm11, %v3158_v33, %v7531_v13  ;;  %v3159_v6 = vpack.c.bf16 %v3158_v33, %v3158_v33  ;;  %v9170_v13 = vld [vmem:[#allocation76_spill] sm:$0xff]  ;;  %v9184_v33 = vld [vmem:[#allocation91_spill] sm:$0xff] }
 0x86e   :  { %3391 = vmatmul.mubr.bf16.vlgmr.msra.gmra.mrb[104].mxu0 %v3159_v6  ;;  %3432 = vmatmul.mubr.bf16.vlgmr.msra.gmra.mrb[104].mxu1 %v3159_v6  ;;  %v9185_v6 = vld [vmem:[#allocation92_spill] sm:$0xff] }
 0x86f   :  { %3441 = vmatpush1.bf16.msra.mxu0 %v7537_v12  ;;  %3482 = vmatpush1.bf16.msra.mxu1 %v7543_v31 }
 0x870   :  { %3442 = vmatprep.subr.bf16.mxu0 %v7550_v11  ;;  %3483 = vmatprep.subr.bf16.mxu1 %v7556_v58 }
 0x871   :  { %3472 = vmatprep.mubr.bf16.mxu0 %v8564_v60  ;;  %3513 = vmatprep.mubr.bf16.mxu1 %v8564_v60 }
 0x873   :  { %3443 = vmatpush1.bf16.msra.mxu0 %v7564_v14  ;;  %3484 = vmatpush1.bf16.msra.mxu1 %v9170_v13 }
 0x874   :  { %3444 = vmatprep.subr.bf16.mxu0 %v9171_v61  ;;  %3485 = vmatprep.subr.bf16.mxu1 %v9172_v16 }
 0x877   :  { %3445 = vmatpush1.bf16.msra.mxu0 %v9173_v44  ;;  %3486 = vmatpush1.bf16.msra.mxu1 %v9174_v63 }
 0x878   :  { %3446 = vmatprep.subr.bf16.mxu0 %v9175_v46  ;;  %3487 = vmatprep.subr.bf16.mxu1 %v9176_v40  ;;  %v9187_v46 = vld [vmem:[#allocation96_spill] sm:$0xff] }
 0x87b   :  { %3447 = vmatpush1.bf16.msra.mxu0 %v9177_v38  ;;  %3488 = vmatpush1.bf16.msra.mxu1 %v9178_v37  ;;  %v9188_v37 = vld [vmem:[#allocation97_spill] sm:$0xff] }
 0x87c   :  { %3448 = vmatprep.subr.bf16.mxu0 %v9179_v32  ;;  %3489 = vmatprep.subr.bf16.mxu1 %v9180_v15 }
 0x87f   :  { %3449 = vmatpush1.bf16.msra.mxu0 %v9181_v39  ;;  %3490 = vmatpush1.bf16.msra.mxu1 %v9182_v52 }
 0x880   :  { %3450 = vmatprep.subr.bf16.mxu0 %v9183_v51  ;;  %3491 = vmatprep.subr.bf16.mxu1 %v9184_v33 }
 0x883   :  { %3451 = vmatpush1.bf16.msra.mxu0 %v9185_v6  ;;  %3492 = vmatpush1.bf16.msra.mxu1 %v9186_v27 }
 0x884   :  { %v3287_v40 = vpop.f32.mrb[100].mxu0  ;;  %v3328_v38 = vpop.f32.mrb[100].mxu1  ;;  %3452 = vmatprep.subr.bf16.mxu0 %v9187_v46  ;;  %3493 = vmatprep.subr.bf16.mxu1 %v9188_v37 }
 0x885   :  { %v3288_v32 = vadd.f32 %v3287_v40, %v3205_v28  ;;  %v3329_v15 = vadd.f32 %v3328_v38, %v3246_v29  ;;  %v3289_v63 = vpop.f32.mrb[101].mxu0  ;;  %v3330_v39 = vpop.f32.mrb[101].mxu1 }
 0x886   :  { %v3290_v44 = vadd.f32 %v3289_v63, %v3207_v48  ;;  %v3331_v52 = vadd.f32 %v3330_v39, %v3248_v20  ;;  %v3291_v16 = vpop.f32.mrb[102].mxu0  ;;  %v3332_v51 = vpop.f32.mrb[102].mxu1  ;;  %v9189_v20 = vld [vmem:[#allocation99_spill] sm:$0xff]  ;;  %v9192_v63 = vld [vmem:[#allocation98_spill] sm:$0xff] }
 0x887   :  { %v3335_v33 = vadd.f32 %v3288_v32, %v5559_v55  ;;  %v3292_v61 = vpop.f32.mrb[103].mxu0  ;;  %v3333_v6 = vpop.f32.mrb[103].mxu1  ;;  %3453 = vmatpush1.bf16.msra.mxu0 %v7689_v34  ;;  %3494 = vmatpush1.bf16.msra.mxu1 %v7695_v17  ;;  %v3337_v48 = vadd.f32 %v3329_v15, %v5569_v62  ;;  %v9190_v16 = vld [vmem:[#allocation102_spill] sm:$0xff] }
 0x888   :  { %v3336_v46 = vadd.f32 %v3290_v44, %v5564_v1  ;;  %3454 = vmatprep.subr.bf16.mxu0 %v7702_v54  ;;  %3495 = vmatprep.subr.bf16.mxu1 %v7708_v35  ;;  %v9191_v61 = vld [vmem:[#allocation80_spill] sm:$0xff]  ;;  %v9193_v44 = vld [vmem:[#allocation94_spill] sm:$0xff] }
 0x889   :  { %v3339_v28 = vmul.f32 0.5, %v3335_v33  ;;  %v3338_v40 = vadd.f32 %v3331_v52, %v9193_v44 }
 0x88a   :  { %v3343_v29 = vmul.f32 0.5, %v3336_v46 }
 0x88b   :  { %4412 = vtanh.f32 %v3339_v28  ;;  %3455 = vmatpush1.bf16.msra.mxu0 %v9189_v20  ;;  %3496 = vmatpush1.bf16.msra.mxu1 %v9190_v16  ;;  %v3348_v38 = vmul.f32 0.5, %v3338_v40 }
 0x88c   :  { %4414 = vtanh.f32 %v3343_v29  ;;  %3556 = vmatprep.subr.bf16.mxu0 %v9191_v61  ;;  %3597 = vmatprep.subr.bf16.mxu1 %v9192_v63 }
 0x88d   :  { %4416 = vtanh.f32 %v3337_v48 }
 0x88e   :  { %4418 = vtanh.f32 %v3348_v38  ;;  %v9219_v38 = vld [vmem:[#allocation28_spill] sm:$0xff] }
 0x895   :  { %v4413_v32 = vpop.eup %4412 }
 0x896   :  { %v4415_v39 = vpop.eup %4414  ;;  %v3341_v51 = vmul.f32 0.5, %v4413_v32  ;;  %v9220_v32 = vld [vmem:[#allocation29_spill] sm:$0xff] }
 0x897   :  { %v3345_v46 = vmul.f32 0.5, %v4415_v39  ;;  %v4417_v15 = vpop.eup %4416  ;;  %v9221_v39 = vld [vmem:[#allocation31_spill] sm:$0xff] }
 0x898   :  { %v3342_v33 = vadd.f32 0.5, %v3341_v51  ;;  %v4419_v61 = vpop.eup %4418  ;;  %v9222_v51 = vld [vmem:[#allocation30_spill] sm:$0xff] }
 0x899   :  { %v3346_v6 = vadd.f32 0.5, %v3345_v46  ;;  %v3350_v48 = vmul.f32 0.5, %v4419_v61  ;;  %v9223_v46 = vld [vmem:[#allocation32_spill] sm:$0xff]  ;;  %v9228_v61 = vld [vmem:[#allocation37_spill] sm:$0xff] }
 0x89a   :  { %v3353_v28 = vmul.f32 %v4417_v15, %v3342_v33  ;;  %v9224_v33 = vld [vmem:[#allocation33_spill] sm:$0xff]  ;;  %v9225_v15 = vld [vmem:[#allocation35_spill] sm:$0xff] }
 0x89b   :  { %v3352_v16 = vmul.f32 %v3346_v6, %v7728_v30  ;;  %v3351_v63 = vadd.f32 0.5, %v3350_v48  ;;  %v9216_v30 = vld [vmem:[#allocation25_spill] sm:$0xff]  ;;  %v9226_v6 = vld [vmem:[#allocation34_spill] sm:$0xff]  ;;  %v9229_v48 = vld [vmem:[#allocation39_spill] sm:$0xff] }
 0x89d   :  { %v7893_v29 = vadd.f32 %v3353_v28, %v3352_v16  ;;  %v9217_v16 = vld [vmem:[#allocation26_spill] sm:$0xff]  ;;  %v9227_v28 = vld [vmem:[#allocation36_spill] sm:$0xff] }
 0x89f   :  { %4420 = vtanh.f32 %v7893_v29 }
 0x8a9   :  { %v4421_v52 = vpop.eup %4420 }
 0x8aa   :  { %v3356_v40 = vmul.f32 %v4421_v52, %v3351_v63  ;;  %v9230_v63 = vld [vmem:[#allocation38_spill] sm:$0xff]  ;;  %v9231_v52 = vld [vmem:[#allocation41_spill] sm:$0xff] }
 0x8ac   :  { %v3357_v44 = vpack.c.bf16 %v3356_v40, %v3356_v40  ;;  %v9232_v40 = vld [vmem:[#allocation40_spill] sm:$0xff] }
 0x8ae   :  { %3473 = vmatmul.mubr.bf16.vlgmr.msra.gmra.mrb[108].mxu0 %v3357_v44  ;;  %3514 = vmatmul.mubr.bf16.vlgmr.msra.gmra.mrb[108].mxu1 %v3357_v44 }
 0x8af   :  { %3557 = vmatpush1.bf16.msra.mxu0 %v6930_v22  ;;  %3598 = vmatpush1.bf16.msra.mxu1 %v6936_v26  ;;  %v9194_v22 = vld [vmem:[#allocation100_spill] sm:$0xff]  ;;  %v9195_v26 = vld [vmem:[#allocation101_spill] sm:$0xff] }
 0x8b0   :  { %3558 = vmatprep.subr.bf16.mxu0 %v6942_v7  ;;  %3599 = vmatprep.subr.bf16.mxu1 %v6948_v21  ;;  %v9196_v7 = vld [vmem:[#allocation5_spill] sm:$0xff]  ;;  %v9197_v21 = vld [vmem:[#allocation6_spill] sm:$0xff] }
 0x8b1   :  { %3588 = vmatprep.mubr.bf16.mxu0 %v8564_v60  ;;  %3629 = vmatprep.mubr.bf16.mxu1 %v8564_v60 }
 0x8b3   :  { %3559 = vmatpush1.bf16.msra.mxu0 %v6956_v41  ;;  %3600 = vmatpush1.bf16.msra.mxu1 %v6962_v56  ;;  %v9198_v41 = vld [vmem:[#allocation7_spill] sm:$0xff]  ;;  %v9199_v56 = vld [vmem:[#allocation8_spill] sm:$0xff] }
 0x8b4   :  { %3560 = vmatprep.subr.bf16.mxu0 %v6968_v47  ;;  %3601 = vmatprep.subr.bf16.mxu1 %v6974_v8  ;;  %v9200_v47 = vld [vmem:[#allocation9_spill] sm:$0xff]  ;;  %v9201_v8 = vld [vmem:[#allocation10_spill] sm:$0xff] }
 0x8b7   :  { %3561 = vmatpush1.bf16.msra.mxu0 %v6980_v0  ;;  %3602 = vmatpush1.bf16.msra.mxu1 %v6986_v50  ;;  %v9202_v0 = vld [vmem:[#allocation11_spill] sm:$0xff]  ;;  %v9203_v50 = vld [vmem:[#allocation12_spill] sm:$0xff] }
 0x8b8   :  { %3562 = vmatprep.subr.bf16.mxu0 %v6992_v57  ;;  %3603 = vmatprep.subr.bf16.mxu1 %v6998_v59  ;;  %v9204_v57 = vld [vmem:[#allocation13_spill] sm:$0xff]  ;;  %v9205_v59 = vld [vmem:[#allocation14_spill] sm:$0xff] }
 0x8bb   :  { %3563 = vmatpush1.bf16.msra.mxu0 %v7004_v43  ;;  %3604 = vmatpush1.bf16.msra.mxu1 %v7010_v42  ;;  %v9206_v43 = vld [vmem:[#allocation15_spill] sm:$0xff]  ;;  %v9207_v42 = vld [vmem:[#allocation16_spill] sm:$0xff] }
 0x8bc   :  { %3564 = vmatprep.subr.bf16.mxu0 %v7016_v49  ;;  %3605 = vmatprep.subr.bf16.mxu1 %v7022_v45  ;;  %v9208_v49 = vld [vmem:[#allocation17_spill] sm:$0xff]  ;;  %v9209_v45 = vld [vmem:[#allocation18_spill] sm:$0xff] }
 0x8bf   :  { %3565 = vmatpush1.bf16.msra.mxu0 %v7028_v10  ;;  %3606 = vmatpush1.bf16.msra.mxu1 %v7034_v53  ;;  %v9210_v10 = vld [vmem:[#allocation19_spill] sm:$0xff]  ;;  %v9211_v53 = vld [vmem:[#allocation20_spill] sm:$0xff] }
 0x8c0   :  { %3566 = vmatprep.subr.bf16.mxu0 %v7040_v5  ;;  %3607 = vmatprep.subr.bf16.mxu1 %v7046_v24  ;;  %v9212_v5 = vld [vmem:[#allocation21_spill] sm:$0xff]  ;;  %v9213_v24 = vld [vmem:[#allocation22_spill] sm:$0xff] }
 0x8c3   :  { %3567 = vmatpush1.bf16.msra.mxu0 %v7052_v9  ;;  %3608 = vmatpush1.bf16.msra.mxu1 %v7058_v23  ;;  %v9214_v9 = vld [vmem:[#allocation23_spill] sm:$0xff]  ;;  %v9215_v23 = vld [vmem:[#allocation24_spill] sm:$0xff] }
 0x8c4   :  { %3568 = vmatprep.subr.bf16.mxu0 %v9194_v22  ;;  %3609 = vmatprep.subr.bf16.mxu1 %v9195_v26  ;;  %v9233_v22 = vld [vmem:[#allocation42_spill] sm:$0xff]  ;;  %v4091_v26 = vld [vmem:[%s8062_s0 + $0x1c] sm:$0xf] }
 0x8c7   :  { %3569 = vmatpush1.bf16.msra.mxu0 %v9196_v7  ;;  %3610 = vmatpush1.bf16.msra.mxu1 %v9197_v21  ;;  %v9234_v7 = vld [vmem:[#allocation43_spill] sm:$0xff]  ;;  %v9235_v21 = vld [vmem:[#allocation45_spill] sm:$0xff] }
 0x8c8   :  { %3570 = vmatprep.subr.bf16.mxu0 %v9198_v41  ;;  %3611 = vmatprep.subr.bf16.mxu1 %v9199_v56  ;;  %v9236_v41 = vld [vmem:[#allocation44_spill] sm:$0xff]  ;;  %v9237_v56 = vld [vmem:[#allocation46_spill] sm:$0xff] }
 0x8cb   :  { %3571 = vmatpush1.bf16.msra.mxu0 %v9200_v47  ;;  %3612 = vmatpush1.bf16.msra.mxu1 %v9201_v8  ;;  %v9238_v47 = vld [vmem:[#allocation47_spill] sm:$0xff]  ;;  %v9239_v8 = vld [vmem:[#allocation48_spill] sm:$0xff] }
 0x8cc   :  { %3638 = vmatprep.subr.bf16.mxu0 %v9202_v0  ;;  %3679 = vmatprep.subr.bf16.mxu1 %v9203_v50  ;;  %v9240_v0 = vld [vmem:[#allocation49_spill] sm:$0xff]  ;;  %v9241_v50 = vld [vmem:[#allocation50_spill] sm:$0xff] }
 0x8ce   :  { %3589 = vmatmul.mubr.bf16.vlgmr.msra.gmra.mrb[112].mxu0 %v3357_v44  ;;  %3630 = vmatmul.mubr.bf16.vlgmr.msra.gmra.mrb[112].mxu1 %v3357_v44  ;;  %v9218_v44 = vld [vmem:[#allocation27_spill] sm:$0xff] }
 0x8cf   :  { %3639 = vmatpush1.bf16.msra.mxu0 %v9204_v57  ;;  %3680 = vmatpush1.bf16.msra.mxu1 %v9205_v59  ;;  %v9242_v57 = vld [vmem:[#allocation51_spill] sm:$0xff]  ;;  %v9243_v59 = vld [vmem:[#allocation53_spill] sm:$0xff] }
 0x8d0   :  { %3640 = vmatprep.subr.bf16.mxu0 %v9206_v43  ;;  %3681 = vmatprep.subr.bf16.mxu1 %v9207_v42  ;;  %v9244_v43 = vld [vmem:[#allocation52_spill] sm:$0xff]  ;;  %v9245_v42 = vld [vmem:[#allocation55_spill] sm:$0xff] }
 0x8d1   :  { %3670 = vmatprep.mubr.bf16.mxu0 %v8564_v60  ;;  %3711 = vmatprep.mubr.bf16.mxu1 %v8564_v60 }
 0x8d3   :  { %3641 = vmatpush1.bf16.msra.mxu0 %v9208_v49  ;;  %3682 = vmatpush1.bf16.msra.mxu1 %v9209_v45  ;;  %v9246_v49 = vld [vmem:[#allocation54_spill] sm:$0xff]  ;;  %v9247_v45 = vld [vmem:[#allocation56_spill] sm:$0xff] }
 0x8d4   :  { %3642 = vmatprep.subr.bf16.mxu0 %v9210_v10  ;;  %3683 = vmatprep.subr.bf16.mxu1 %v9211_v53  ;;  %v9248_v10 = vld [vmem:[#allocation57_spill] sm:$0xff]  ;;  %v9249_v53 = vld [vmem:[#allocation59_spill] sm:$0xff] }
 0x8d7   :  { %3643 = vmatpush1.bf16.msra.mxu0 %v9212_v5  ;;  %3684 = vmatpush1.bf16.msra.mxu1 %v9213_v24  ;;  %v9250_v5 = vld [vmem:[#allocation58_spill] sm:$0xff]  ;;  %v9251_v24 = vld [vmem:[#allocation60_spill] sm:$0xff] }
 0x8d8   :  { %3644 = vmatprep.subr.bf16.mxu0 %v9214_v9  ;;  %3685 = vmatprep.subr.bf16.mxu1 %v9215_v23  ;;  %v9252_v9 = vld [vmem:[#allocation61_spill] sm:$0xff]  ;;  %v9253_v23 = vld [vmem:[#allocation62_spill] sm:$0xff] }
 0x8db   :  { %3645 = vmatpush1.bf16.msra.mxu0 %v9216_v30  ;;  %3686 = vmatpush1.bf16.msra.mxu1 %v9217_v16  ;;  %v9254_v30 = vld [vmem:[#allocation93_spill] sm:$0xff]  ;;  %v9255_v16 = vld [vmem:[#allocation63_spill] sm:$0xff] }
 0x8dc   :  { %3646 = vmatprep.subr.bf16.mxu0 %v9218_v44  ;;  %3687 = vmatprep.subr.bf16.mxu1 %v9219_v38  ;;  %v9256_v44 = vld [vmem:[#allocation64_spill] sm:$0xff]  ;;  %v9257_v38 = vld [vmem:[#allocation65_spill] sm:$0xff] }
 0x8df   :  { %3647 = vmatpush1.bf16.msra.mxu0 %v9220_v32  ;;  %3688 = vmatpush1.bf16.msra.mxu1 %v9221_v39  ;;  %v9258_v32 = vld [vmem:[#allocation66_spill] sm:$0xff]  ;;  %v9259_v39 = vld [vmem:[#allocation67_spill] sm:$0xff] }
 0x8e0   :  { %3648 = vmatprep.subr.bf16.mxu0 %v9222_v51  ;;  %3689 = vmatprep.subr.bf16.mxu1 %v9223_v46  ;;  %v9260_v51 = vld [vmem:[#allocation68_spill] sm:$0xff]  ;;  %v9261_v46 = vld [vmem:[#allocation69_spill] sm:$0xff] }
 0x8e3   :  { %3649 = vmatpush1.bf16.msra.mxu0 %v9224_v33  ;;  %3690 = vmatpush1.bf16.msra.mxu1 %v9225_v15  ;;  %v9262_v33 = vld [vmem:[#allocation70_spill] sm:$0xff]  ;;  %v9263_v15 = vld [vmem:[#allocation71_spill] sm:$0xff] }
 0x8e4   :  { %3650 = vmatprep.subr.bf16.mxu0 %v9226_v6  ;;  %3691 = vmatprep.subr.bf16.mxu1 %v9227_v28  ;;  %v9264_v6 = vld [vmem:[#allocation72_spill] sm:$0xff]  ;;  %v9265_v28 = vld [vmem:[#allocation73_spill] sm:$0xff] }
 0x8e7   :  { %3651 = vmatpush1.bf16.msra.mxu0 %v9228_v61  ;;  %3692 = vmatpush1.bf16.msra.mxu1 %v9229_v48  ;;  %v9266_v61 = vld [vmem:[#allocation74_spill] sm:$0xff]  ;;  %v9267_v48 = vld [vmem:[#allocation75_spill] sm:$0xff] }
 0x8e8   :  { %3652 = vmatprep.subr.bf16.mxu0 %v9230_v63  ;;  %3693 = vmatprep.subr.bf16.mxu1 %v9231_v52 }
 0x8eb   :  { %3653 = vmatpush1.bf16.msra.mxu0 %v9232_v40  ;;  %3694 = vmatpush1.bf16.msra.mxu1 %v9233_v22 }
 0x8ec   :  { %3743 = vmatprep.subr.bf16.mxu0 %v9234_v7  ;;  %3784 = vmatprep.subr.bf16.mxu1 %v9235_v21 }
 0x8ee   :  { %3671 = vmatmul.mubr.bf16.vlgmr.msra.gmra.mrb[116].mxu0 %v4091_v26  ;;  %3712 = vmatmul.mubr.bf16.vlgmr.msra.gmra.mrb[116].mxu1 %v4091_v26 }
 0x8ef   :  { %3744 = vmatpush1.bf16.msra.mxu0 %v9236_v41  ;;  %3785 = vmatpush1.bf16.msra.mxu1 %v9237_v56  ;;  %v3932_v56 = vsel %vm3931_vm13, 1, %v8564_v60 }
 0x8f0   :  { %3745 = vmatprep.subr.bf16.mxu0 %v9238_v47  ;;  %3786 = vmatprep.subr.bf16.mxu1 %v9239_v8 }
 0x8f1   :  { %3775 = vmatprep.mubr.bf16.mxu0 %v8564_v60  ;;  %3816 = vmatprep.mubr.bf16.mxu1 %v8564_v60 }
 0x8f2   :  { %3934 = vperm.xlu1 %4099, %v3932_v56  }
 0x8f3   :  { %3746 = vmatpush1.bf16.msra.mxu0 %v9240_v0  ;;  %3787 = vmatpush1.bf16.msra.mxu1 %v9241_v50 }
 0x8f4   :  { %3747 = vmatprep.subr.bf16.mxu0 %v9242_v57  ;;  %3788 = vmatprep.subr.bf16.mxu1 %v9243_v59 }
 0x8f7   :  { %3748 = vmatpush1.bf16.msra.mxu0 %v9244_v43  ;;  %3789 = vmatpush1.bf16.msra.mxu1 %v9245_v42 }
 0x8f8   :  { %3749 = vmatprep.subr.bf16.mxu0 %v9246_v49  ;;  %3790 = vmatprep.subr.bf16.mxu1 %v9247_v45 }
 0x8fb   :  { %3750 = vmatpush1.bf16.msra.mxu0 %v9248_v10  ;;  %3791 = vmatpush1.bf16.msra.mxu1 %v9249_v53 }
 0x8fc   :  { %3751 = vmatprep.subr.bf16.mxu0 %v9250_v5  ;;  %3792 = vmatprep.subr.bf16.mxu1 %v9251_v24 }
 0x8ff   :  { %3752 = vmatpush1.bf16.msra.mxu0 %v9252_v9  ;;  %3793 = vmatpush1.bf16.msra.mxu1 %v9253_v23 }
 0x900   :  { %3753 = vmatprep.subr.bf16.mxu0 %v9254_v30  ;;  %3794 = vmatprep.subr.bf16.mxu1 %v9255_v16 }
 0x903   :  { %3754 = vmatpush1.bf16.msra.mxu0 %v9256_v44  ;;  %3795 = vmatpush1.bf16.msra.mxu1 %v9257_v38 }
 0x904   :  { %3755 = vmatprep.subr.bf16.mxu0 %v9258_v32  ;;  %3796 = vmatprep.subr.bf16.mxu1 %v9259_v39 }
 0x907   :  { %3756 = vmatpush1.bf16.msra.mxu0 %v9260_v51  ;;  %3797 = vmatpush1.bf16.msra.mxu1 %v9261_v46 }
 0x908   :  { %3757 = vmatprep.subr.bf16.mxu0 %v9262_v33  ;;  %3798 = vmatprep.subr.bf16.mxu1 %v9263_v15 }
 0x90b   :  { %3758 = vmatpush1.bf16.msra.mxu0 %v9264_v6  ;;  %3799 = vmatpush1.bf16.msra.mxu1 %v9265_v28 }
 0x90c   :  { %3825 = vmatprep.subr.bf16.mxu0 %v9266_v61  ;;  %3866 = vmatprep.subr.bf16.mxu1 %v9267_v48  ;;  %v3550_v48 = vpop.permute.xlu0 %3549 }
 0x90d   :  { %vm3551_vm14 = vcmp.eq.s32.totalorder %v3550_v48, 1 }
 0x941   :  { %v3392_v63 = vpop.f32.mrb[104].mxu0  ;;  %v3433_v52 = vpop.f32.mrb[104].mxu1 }
 0x942   :  { %v3394_v40 = vpop.f32.mrb[105].mxu0  ;;  %v3435_v22 = vpop.f32.mrb[105].mxu1 }
 0x943   :  { %v3396_v26 = vpop.f32.mrb[106].mxu0  ;;  %v3437_v7 = vpop.f32.mrb[106].mxu1 }
 0x944   :  { %v3397_v21 = vpop.f32.mrb[107].mxu0  ;;  %v3438_v41 = vpop.f32.mrb[107].mxu1 }
 0x981   :  { %v3474_v47 = vpop.f32.mrb[108].mxu0  ;;  %v3515_v8 = vpop.f32.mrb[108].mxu1 }
 0x982   :  { %v3475_v0 = vadd.f32 %v3474_v47, %v3392_v63  ;;  %v3516_v50 = vadd.f32 %v3515_v8, %v3433_v52  ;;  %v3476_v57 = vpop.f32.mrb[109].mxu0  ;;  %v3517_v59 = vpop.f32.mrb[109].mxu1 }
 0x983   :  { %v3477_v43 = vadd.f32 %v3476_v57, %v3394_v40  ;;  %v3518_v42 = vadd.f32 %v3517_v59, %v3435_v22  ;;  %v3478_v49 = vpop.f32.mrb[110].mxu0  ;;  %v3519_v45 = vpop.f32.mrb[110].mxu1  ;;  %v9269_v57 = vld [vmem:[#allocation78_spill] sm:$0xff]  ;;  %v9270_v59 = vld [vmem:[#allocation79_spill] sm:$0xff] }
 0x984   :  { %v3522_v10 = vadd.f32 %v3475_v0, %v5698_v19  ;;  %v3479_v53 = vpop.f32.mrb[111].mxu0  ;;  %v3520_v5 = vpop.f32.mrb[111].mxu1  ;;  %v3524_v23 = vadd.f32 %v3516_v50, %v5710_v36  ;;  %v9280_v49 = vld [vmem:[#allocation90_spill] sm:$0xff]  ;;  %v9281_v45 = vld [vmem:[#allocation91_spill] sm:$0xff] }
 0x985   :  { %v3523_v24 = vadd.f32 %v3477_v43, %v5702_v25  ;;  %v3525_v30 = vadd.f32 %v3518_v42, %v5716_v18  ;;  %v9275_v43 = vld [vmem:[#allocation85_spill] sm:$0xff] }
 0x986   :  { %v3526_v2 = vmul.f32 0.5, %v3522_v10  ;;  %v9279_v42 = vld [vmem:[#allocation89_spill] sm:$0xff]  ;;  %v9282_v10 = vld [vmem:[#allocation92_spill] sm:$0xff] }
 0x987   :  { %v3530_v9 = vmul.f32 0.5, %v3523_v24  ;;  %v3535_v16 = vmul.f32 0.5, %v3525_v30  ;;  %v9283_v24 = vld [vmem:[#allocation96_spill] sm:$0xff] }
 0x988   :  { %4422 = vtanh.f32 %v3526_v2 }
 0x989   :  { %4424 = vtanh.f32 %v3530_v9 }
 0x98a   :  { %4426 = vtanh.f32 %v3524_v23 }
 0x98b   :  { %4428 = vtanh.f32 %v3535_v16 }
 0x992   :  { %v4423_v44 = vpop.eup %4422 }
 0x993   :  { %v4425_v38 = vpop.eup %4424  ;;  %v3528_v32 = vmul.f32 0.5, %v4423_v44 }
 0x994   :  { %v3532_v39 = vmul.f32 0.5, %v4425_v38  ;;  %v4427_v46 = vpop.eup %4426 }
 0x995   :  { %v3529_v51 = vadd.f32 0.5, %v3528_v32  ;;  %v4429_v61 = vpop.eup %4428 }
 0x996   :  { %v3533_v33 = vadd.f32 0.5, %v3532_v39  ;;  %v3537_v63 = vmul.f32 0.5, %v4429_v61 }
 0x997   :  { %v3540_v15 = vmul.f32 %v4427_v46, %v3529_v51 }
 0x998   :  { %v3539_v6 = vmul.f32 %v3533_v33, %v7841_v3  ;;  %v3538_v47 = vadd.f32 0.5, %v3537_v63 }
 0x99a   :  { %v8008_v28 = vadd.f32 %v3540_v15, %v3539_v6 }
 0x99c   :  { %4430 = vtanh.f32 %v8008_v28 }
 0x9a1   :  { %v3590_v52 = vpop.f32.mrb[112].mxu0  ;;  %v3631_v40 = vpop.f32.mrb[112].mxu1 }
 0x9a2   :  { %v3592_v22 = vpop.f32.mrb[113].mxu0  ;;  %v3633_v26 = vpop.f32.mrb[113].mxu1 }
 0x9a3   :  { %v3594_v7 = vpop.f32.mrb[114].mxu0  ;;  %v3635_v21 = vpop.f32.mrb[114].mxu1 }
 0x9a4   :  { %v3595_v41 = vpop.f32.mrb[115].mxu0  ;;  %v3636_v56 = vpop.f32.mrb[115].mxu1 }
 0x9a6   :  { %v4431_v8 = vpop.eup %4430 }
 0x9a7   :  { %v3543_v0 = vmul.f32 %v4431_v8, %v3538_v47 }
 0x9a9   :  { %v8012_v3 = vsel %vm3551_vm14, %v3543_v0, %v7845_v4  ;;  %v3544_v50 = vpack.c.bf16 %v3543_v0, %v3543_v0  ;;  %v9268_v4 = vld [vmem:[#allocation77_spill] sm:$0xff] }
 0x9ab   :  { %3776 = vmatmul.mubr.bf16.vlgmr.msra.gmra.mrb[120].mxu0 %v3544_v50  ;;  %3817 = vmatmul.mubr.bf16.vlgmr.msra.gmra.mrb[120].mxu1 %v3544_v50 }
 0x9ac   :  { %3826 = vmatpush1.bf16.msra.mxu0 %v7537_v12  ;;  %3867 = vmatpush1.bf16.msra.mxu1 %v7543_v31  ;;  %v9271_v12 = vld [vmem:[#allocation81_spill] sm:$0xff]  ;;  %v9272_v31 = vld [vmem:[#allocation82_spill] sm:$0xff] }
 0x9ad   :  { %3827 = vmatprep.subr.bf16.mxu0 %v7550_v11  ;;  %3868 = vmatprep.subr.bf16.mxu1 %v7556_v58  ;;  %v9273_v11 = vld [vmem:[#allocation83_spill] sm:$0xff]  ;;  %v9274_v58 = vld [vmem:[#allocation84_spill] sm:$0xff] }
 0x9ae   :  { %3857 = vmatprep.mubr.bf16.mxu0 %v8564_v60  ;;  %3898 = vmatprep.mubr.bf16.mxu1 %v8564_v60  ;;  %v9276_v60 = vld [vmem:[#allocation86_spill] sm:$0xff] }
 0x9b0   :  { %3828 = vmatpush1.bf16.msra.mxu0 %v7564_v14  ;;  %3869 = vmatpush1.bf16.msra.mxu1 %v9170_v13  ;;  %v9277_v14 = vld [vmem:[#allocation87_spill] sm:$0xff]  ;;  %v9278_v13 = vld [vmem:[#allocation88_spill] sm:$0xff] }
 0x9b1   :  { %3829 = vmatprep.subr.bf16.mxu0 %v9268_v4  ;;  %3870 = vmatprep.subr.bf16.mxu1 %v9269_v57 }
 0x9b4   :  { %3830 = vmatpush1.bf16.msra.mxu0 %v9270_v59  ;;  %3871 = vmatpush1.bf16.msra.mxu1 %v9271_v12 }
 0x9b5   :  { %3831 = vmatprep.subr.bf16.mxu0 %v9272_v31  ;;  %3872 = vmatprep.subr.bf16.mxu1 %v9273_v11 }
 0x9b8   :  { %3832 = vmatpush1.bf16.msra.mxu0 %v9274_v58  ;;  %3873 = vmatpush1.bf16.msra.mxu1 %v9275_v43 }
 0x9b9   :  { %3833 = vmatprep.subr.bf16.mxu0 %v9276_v60  ;;  %3874 = vmatprep.subr.bf16.mxu1 %v9277_v14 }
 0x9bc   :  { %3834 = vmatpush1.bf16.msra.mxu0 %v9278_v13  ;;  %3875 = vmatpush1.bf16.msra.mxu1 %v9279_v42 }
 0x9bd   :  { %3835 = vmatprep.subr.bf16.mxu0 %v9280_v49  ;;  %3876 = vmatprep.subr.bf16.mxu1 %v9281_v45 }
 0x9c0   :  { %3836 = vmatpush1.bf16.msra.mxu0 %v9282_v10  ;;  %3877 = vmatpush1.bf16.msra.mxu1 %v9186_v27 }
 0x9c1   :  { %v3672_v53 = vpop.f32.mrb[116].mxu0  ;;  %v3713_v5 = vpop.f32.mrb[116].mxu1  ;;  %3837 = vmatprep.subr.bf16.mxu0 %v9283_v24  ;;  %3878 = vmatprep.subr.bf16.mxu1 %v9188_v37 }
 0x9c2   :  { %v3673_v2 = vadd.f32 %v3672_v53, %v3590_v52  ;;  %v3714_v9 = vadd.f32 %v3713_v5, %v3631_v40  ;;  %v3674_v23 = vpop.f32.mrb[117].mxu0  ;;  %v3715_v30 = vpop.f32.mrb[117].mxu1 }
 0x9c3   :  { %v3675_v16 = vadd.f32 %v3674_v23, %v3592_v22  ;;  %v3716_v44 = vadd.f32 %v3715_v30, %v3633_v26  ;;  %v3676_v38 = vpop.f32.mrb[118].mxu0  ;;  %v3717_v32 = vpop.f32.mrb[118].mxu1 }
 0x9c4   :  { %v3720_v39 = vadd.f32 %v3673_v2, %v5559_v55  ;;  %v3677_v51 = vpop.f32.mrb[119].mxu0  ;;  %v3718_v46 = vpop.f32.mrb[119].mxu1  ;;  %3838 = vmatpush1.bf16.msra.mxu0 %v7689_v34  ;;  %3879 = vmatpush1.bf16.msra.mxu1 %v7695_v17  ;;  %v3722_v15 = vadd.f32 %v3714_v9, %v5569_v62  ;;  %v9284_v55 = vld [vmem:[#allocation102_spill] sm:$0xff] }
 0x9c5   :  { %v3721_v27 = vadd.f32 %v3675_v16, %v5564_v1  ;;  %3839 = vmatprep.subr.bf16.mxu0 %v7702_v54  ;;  %3880 = vmatprep.subr.bf16.mxu1 %v7708_v35  ;;  %v9285_v34 = vld [vmem:[#allocation94_spill] sm:$0xff] }
 0x9c6   :  { %v3724_v37 = vmul.f32 0.5, %v3720_v39  ;;  %v3723_v6 = vadd.f32 %v3716_v44, %v9285_v34 }
 0x9c7   :  { %v3728_v33 = vmul.f32 0.5, %v3721_v27 }
 0x9c8   :  { %4432 = vtanh.f32 %v3724_v37  ;;  %3840 = vmatpush1.bf16.msra.mxu0 %v9189_v20  ;;  %3881 = vmatpush1.bf16.msra.mxu1 %v9284_v55  ;;  %v3733_v17 = vmul.f32 0.5, %v3723_v6 }
 0x9c9   :  { %4434 = vtanh.f32 %v3728_v33 }
 0x9ca   :  { %4436 = vtanh.f32 %v3722_v15  ;;  %v3935_v15 = vpop.permute.xlu1 %3934 }
 0x9cb   :  { %4438 = vtanh.f32 %v3733_v17  ;;  %vm3936_vm15 = vcmp.eq.s32.totalorder %v3935_v15, 1 }
 0x9d2   :  { %v4433_v61 = vpop.eup %4432 }
 0x9d3   :  { %v4435_v1 = vpop.eup %4434  ;;  %v3726_v48 = vmul.f32 0.5, %v4433_v61 }
 0x9d4   :  { %v3730_v54 = vmul.f32 0.5, %v4435_v1  ;;  %v4437_v63 = vpop.eup %4436 }
 0x9d5   :  { %v3727_v35 = vadd.f32 0.5, %v3726_v48  ;;  %v4439_v20 = vpop.eup %4438 }
 0x9d6   :  { %v3731_v52 = vadd.f32 0.5, %v3730_v54  ;;  %v3735_v26 = vmul.f32 0.5, %v4439_v20 }
 0x9d7   :  { %v3738_v40 = vmul.f32 %v4437_v63, %v3727_v35 }
 0x9d8   :  { %v3737_v62 = vmul.f32 %v3731_v52, %v7893_v29  ;;  %v3736_v7 = vadd.f32 0.5, %v3735_v26 }
 0x9da   :  { %v3739_v22 = vadd.f32 %v3738_v40, %v3737_v62 }
 0x9dc   :  { %4440 = vtanh.f32 %v3739_v22 }
 0x9e6   :  { %v4441_v21 = vpop.eup %4440 }
 0x9e7   :  { %v3741_v41 = vmul.f32 %v4441_v21, %v3736_v7 }
 0x9e9   :  { %v3742_v56 = vpack.c.bf16 %v3741_v41, %v3741_v41 }
 0x9eb   :  { %3858 = vmatmul.mubr.bf16.vlgmr.msra.gmra.mrb[124].mxu0 %v3742_v56  ;;  %3899 = vmatmul.mubr.bf16.vlgmr.msra.gmra.mrb[124].mxu1 %v3742_v56 }
 0xa7e   :  { %v3777_v47 = vpop.f32.mrb[120].mxu0  ;;  %v3818_v8 = vpop.f32.mrb[120].mxu1 }
 0xa7f   :  { %v3779_v0 = vpop.f32.mrb[121].mxu0  ;;  %v3820_v50 = vpop.f32.mrb[121].mxu1 }
 0xa80   :  { %v3781_v4 = vpop.f32.mrb[122].mxu0  ;;  %v3822_v57 = vpop.f32.mrb[122].mxu1 }
 0xa81   :  { %v3782_v59 = vpop.f32.mrb[123].mxu0  ;;  %v3823_v12 = vpop.f32.mrb[123].mxu1 }
 0xabe   :  { %v3859_v31 = vpop.f32.mrb[124].mxu0  ;;  %v3900_v29 = vpop.f32.mrb[124].mxu1 }
 0xabf   :  { %v3860_v11 = vadd.f32 %v3859_v31, %v3777_v47  ;;  %v3901_v58 = vadd.f32 %v3900_v29, %v3818_v8  ;;  %v3861_v43 = vpop.f32.mrb[125].mxu0  ;;  %v3902_v60 = vpop.f32.mrb[125].mxu1 }
 0xac0   :  { %v3862_v14 = vadd.f32 %v3861_v43, %v3779_v0  ;;  %v3903_v13 = vadd.f32 %v3902_v60, %v3820_v50  ;;  %v3863_v42 = vpop.f32.mrb[126].mxu0  ;;  %v3904_v49 = vpop.f32.mrb[126].mxu1 }
 0xac1   :  { %v3907_v45 = vadd.f32 %v3860_v11, %v5698_v19  ;;  %v3864_v10 = vpop.f32.mrb[127].mxu0  ;;  %v3905_v53 = vpop.f32.mrb[127].mxu1  ;;  %v3909_v9 = vadd.f32 %v3901_v58, %v5710_v36 }
 0xac2   :  { %v3908_v5 = vadd.f32 %v3862_v14, %v5702_v25  ;;  %v3910_v23 = vadd.f32 %v3903_v13, %v5716_v18 }
 0xac3   :  { %v3911_v24 = vmul.f32 0.5, %v3907_v45 }
 0xac4   :  { %v3915_v2 = vmul.f32 0.5, %v3908_v5  ;;  %v3920_v30 = vmul.f32 0.5, %v3910_v23 }
 0xac5   :  { %4442 = vtanh.f32 %v3911_v24 }
 0xac6   :  { %4444 = vtanh.f32 %v3915_v2 }
 0xac7   :  { %4446 = vtanh.f32 %v3909_v9 }
 0xac8   :  { %4448 = vtanh.f32 %v3920_v30 }
 0xacf   :  { %v4443_v16 = vpop.eup %4442 }
 0xad0   :  { %v4445_v44 = vpop.eup %4444  ;;  %v3913_v38 = vmul.f32 0.5, %v4443_v16 }
 0xad1   :  { %v3917_v32 = vmul.f32 0.5, %v4445_v44  ;;  %v4447_v39 = vpop.eup %4446 }
 0xad2   :  { %v3914_v19 = vadd.f32 0.5, %v3913_v38  ;;  %v4449_v37 = vpop.eup %4448 }
 0xad3   :  { %v3918_v51 = vadd.f32 0.5, %v3917_v32  ;;  %v3922_v36 = vmul.f32 0.5, %v4449_v37 }
 0xad4   :  { %v3925_v46 = vmul.f32 %v4447_v39, %v3914_v19 }
 0xad5   :  { %v3924_v25 = vmul.f32 %v3918_v51, %v8008_v28  ;;  %v3923_v33 = vadd.f32 0.5, %v3922_v36 }
 0xad7   :  { %v3926_v27 = vadd.f32 %v3925_v46, %v3924_v25 }
 0xad9   :  { %4450 = vtanh.f32 %v3926_v27 }
 0xae3   :  { %v4451_v55 = vpop.eup %4450 }
 0xae4   :  { %v3928_v18 = vmul.f32 %v4451_v55, %v3923_v33 }
 0xae6   :  { %v3937_v34 = vsel %vm3936_vm15, %v3928_v18, %v8012_v3  ;;  %v4095_v6 = vpack.c.bf16 %v3928_v18, %v3741_v41 }
 0xae7   :  { %v3946_v17 = vmul.f32 %v3937_v34, %v3937_v34 }
 0xae8   :  { %4096 = vst [vmem:[#allocation2] sm:$0xff] %v4095_v6  }
 0xae9   :  { %3947 = vadd.xlane.f32.xlu0 %v3946_v17 }
 0xb76   :  { %v3948_v61 = vpop.xlane.xlu0 %3947 }
 0xb77   :  { %v3949_v1 = vmax.f32 %v3948_v61, 1e-24 }
 0xb79   :  { %4452 = vrsqrt.f32 %v3949_v1 }
 0xb83   :  { %v4453_v48 = vpop.eup %4452 }
 0xb84   :  { %v3951_v28 = vmul.f32 %v4453_v48, %v3937_v34 }
 0xb86   :  { %3952 = vst [vmem:[%s8068_s8] sm:$0xff] %v3951_v28 }

</bundles_post_ra>
